<compile_context>
chip_gen: v6e
topology: v6e:2x2x1
jax: 0.10.0
libtpu: 0.0.40
codegen_flags: <defaults>
</compile_context>

<pallas_src>
import numpy as np

import jax
import jax.numpy as jnp
from jax.experimental import pallas as pl
from jax.experimental.pallas import tpu as pltpu

LATENT = 10
C1, C2, C3 = 16, 8, 4            # mid_dim_3, mid_dim_2, mid_dim_1
H1, H2, H3, H4 = 7, 10, 13, 16   # spatial size after each ConvTranspose2d
BN_EPS = 1e-5

D1 = C1 * H1 * H1    # 784
D2 = C2 * H2 * H2    # 800
D3 = C3 * H3 * H3    # 676
D4 = 1 * H4 * H4     # 256


# ------------------------------ Pallas kernel ----------------------------------

def _bn_train(x, m_ref, mt_ref, g_ref, bcol_ref, hw):
    """Training-mode BatchNorm on channel-major-flattened activations.

    x:    (N, C*HW) f32 value (columns ordered channel-major: c*HW + s)
    m:    (C*HW, C) 0/1 indicator ref  (sums a channel's contiguous columns)
    mt:   (C, C*HW) 0/1 indicator ref  (broadcasts a per-channel value to cols)
    g:    (1, C)    gamma ref
    bcol: (1, C*HW) beta, pre-broadcast to columns in the wrapper
    """
    n = x.shape[0]
    cnt = float(n * hw)

    col_sum = jnp.sum(x, axis=0, keepdims=True)                               # (1, D)
    mean_c = jnp.dot(col_sum, m_ref[...],
                     preferred_element_type=jnp.float32) / cnt                # (1, C)
    mean_col = jnp.dot(mean_c, mt_ref[...],
                       preferred_element_type=jnp.float32)                    # (1, D)
    xc = x - mean_col

    sq_sum = jnp.sum(xc * xc, axis=0, keepdims=True)                          # (1, D)
    var_c = jnp.dot(sq_sum, m_ref[...],
                    preferred_element_type=jnp.float32) / cnt                 # (1, C)
    scale_c = g_ref[...] * jax.lax.rsqrt(var_c + BN_EPS)                      # (1, C)
    scale_col = jnp.dot(scale_c, mt_ref[...],
                        preferred_element_type=jnp.float32)                   # (1, D)
    return xc * scale_col + bcol_ref[...]


def generator_kernel(z_ref,
                     t1_ref, m1_ref, m1t_ref, g1_ref, b1_ref,
                     t2_ref, m2_ref, m2t_ref, g2_ref, b2_ref,
                     t3_ref, m3_ref, m3t_ref, g3_ref, b3_ref,
                     t4_ref,
                     out_ref):
    x = z_ref[...]                                                            # (N, 10)

    # Layer 1: ConvT(10->16, k7) as one matmul, then BN + ReLU.
    x = jnp.dot(x, t1_ref[...], preferred_element_type=jnp.float32)          # (N, 784)
    x = jnp.maximum(_bn_train(x, m1_ref, m1t_ref, g1_ref, b1_ref, H1 * H1), 0.0)

    # Layer 2: ConvT(16->8, k4), BN + ReLU.
    x = jnp.dot(x, t2_ref[...], preferred_element_type=jnp.float32)          # (N, 800)
    x = jnp.maximum(_bn_train(x, m2_ref, m2t_ref, g2_ref, b2_ref, H2 * H2), 0.0)

    # Layer 3: ConvT(8->4, k4), BN (no ReLU here).
    x = jnp.dot(x, t3_ref[...], preferred_element_type=jnp.float32)          # (N, 676)
    x = _bn_train(x, m3_ref, m3t_ref, g3_ref, b3_ref, H3 * H3)

    # Layer 4: ConvT(4->1, k4), then ReLU -> Tanh.
    x = jnp.dot(x, t4_ref[...], preferred_element_type=jnp.float32)          # (N, 256)
    out_ref[...] = jnp.tanh(jnp.maximum(x, 0.0)).astype(out_ref.dtype)


# --------------------------- wrapper-side preprocessing -------------------------

def _toeplitz_indices(cin, cout, k, h, wdt):
    """Static flat scatter indices mapping ConvT weights -> dense Toeplitz."""
    oh, ow = h + k - 1, wdt + k - 1
    dout = cout * oh * ow
    ci, i, j, co, ky, kx = np.indices((cin, h, wdt, cout, k, k))
    rows = (ci * h + i) * wdt + j                       # channel-major input flat idx
    cols = (co * oh + (i + ky)) * ow + (j + kx)         # channel-major output flat idx
    return (rows * dout + cols).reshape(-1)


# Precompute static scatter index tables once at import time.
_T_IDX = {
    1: _toeplitz_indices(LATENT, C1, 7, 1, 1),
    2: _toeplitz_indices(C1, C2, 4, H1, H1),
    3: _toeplitz_indices(C2, C3, 4, H2, H2),
    4: _toeplitz_indices(C3, 1, 4, H3, H3),
}


def _toeplitz(w, h, wdt, idx):
    """PyTorch ConvTranspose2d weight (Cin, Cout, K, K), stride 1, pad 0 ->
    dense (Cin*H*W, Cout*OH*OW) matrix (channel-major flattening both sides).
    Built with a single scatter using static indices (each slot written once)."""
    cin, cout, k, _ = w.shape
    oh, ow = h + k - 1, wdt + k - 1
    din, dout = cin * h * wdt, cout * oh * ow
    vals = jnp.broadcast_to(
        w.astype(jnp.float32)[:, None, None, :, :, :],
        (cin, h, wdt, cout, k, k)).reshape(-1)
    flat = jnp.zeros((din * dout,), jnp.float32).at[idx].set(vals)
    return flat.reshape(din, dout)


def _indicators(c, hw):
    """Returns (M, MT): M (C*HW, C) sums a channel's contiguous columns,
    MT (C, C*HW) broadcasts a per-channel scalar to its columns."""
    mt = np.kron(np.eye(c, dtype=np.float32), np.ones((1, hw), np.float32))
    return jnp.asarray(mt.T), jnp.asarray(mt)


M1, M1T = _indicators(C1, H1 * H1)
M2, M2T = _indicators(C2, H2 * H2)
M3, M3T = _indicators(C3, H3 * H3)


@jax.jit
def generator_forward(z_nchw, params):
    """z_nchw: (N, 10, 1, 1) -> (N, 1, 16, 16), matching the PyTorch module."""
    n = z_nchw.shape[0]
    z2d = z_nchw.reshape(n, LATENT).astype(jnp.float32)

    t1 = _toeplitz(params["w1"], 1, 1, _T_IDX[1])     # (10, 784)
    t2 = _toeplitz(params["w2"], H1, H1, _T_IDX[2])   # (784, 800)
    t3 = _toeplitz(params["w3"], H2, H2, _T_IDX[3])   # (800, 676)
    t4 = _toeplitz(params["w4"], H3, H3, _T_IDX[4])   # (676, 256)

    g1 = params["g1"].reshape(1, C1).astype(jnp.float32)
    g2 = params["g2"].reshape(1, C2).astype(jnp.float32)
    g3 = params["g3"].reshape(1, C3).astype(jnp.float32)
    b1 = jnp.repeat(params["b1"].astype(jnp.float32), H1 * H1).reshape(1, D1)
    b2 = jnp.repeat(params["b2"].astype(jnp.float32), H2 * H2).reshape(1, D2)
    b3 = jnp.repeat(params["b3"].astype(jnp.float32), H3 * H3).reshape(1, D3)

    vmem = pl.BlockSpec(memory_space=pltpu.MemorySpace.VMEM)
    out_flat = pl.pallas_call(
        generator_kernel,
        out_shape=jax.ShapeDtypeStruct((n, D4), jnp.float32),   # lane-dense (256)
        in_specs=[vmem] * 17,
        out_specs=vmem,
    )(z2d,
      t1, M1, M1T, g1, b1,
      t2, M2, M2T, g2, b2,
      t3, M3, M3T, g3, b3,
      t4)

    return out_flat.reshape(n, 1, H4, H4)                       # NCHW


# ---------------- pure-JAX reference (scatter-form conv transpose) --------------

def _ref_conv_t(x, w):
    n, cin, h, wd = x.shape
    _, cout, k, _ = w.shape
    out = jnp.zeros((n, cout, h + k - 1, wd + k - 1), jnp.float32)
    for ky in range(k):
        for kx in range(k):
            out = out.at[:, :, ky:ky + h, kx:kx + wd].add(
                jnp.einsum("nchw,cd->ndhw", x, w[:, :, ky, kx]))
    return out


def _ref_bn(x, g, b):
    mean = jnp.mean(x, axis=(0, 2, 3), keepdims=True)
    var = jnp.mean((x - mean) ** 2, axis=(0, 2, 3), keepdims=True)
    return (x - mean) * jax.lax.rsqrt(var + BN_EPS) * g.reshape(1, -1, 1, 1) \
        + b.reshape(1, -1, 1, 1)


def generator_reference(z, p):
    x = _ref_conv_t(z.astype(jnp.float32), p["w1"])
    x = jnp.maximum(_ref_bn(x, p["g1"], p["b1"]), 0.0)
    x = _ref_conv_t(x, p["w2"])
    x = jnp.maximum(_ref_bn(x, p["g2"], p["b2"]), 0.0)
    x = _ref_conv_t(x, p["w3"])
    x = _ref_bn(x, p["g3"], p["b3"])
    x = _ref_conv_t(x, p["w4"])
    return jnp.tanh(jnp.maximum(x, 0.0))


# ----------------------------------- main ---------------------------------------

if __name__ == "__main__":
    key = jax.random.PRNGKey(0)
    keys = jax.random.split(key, 12)

    params = {
        "w1": 0.02 * jax.random.normal(keys[0], (LATENT, C1, 7, 7), jnp.float32),
        "w2": 0.02 * jax.random.normal(keys[1], (C1, C2, 4, 4), jnp.float32),
        "w3": 0.02 * jax.random.normal(keys[2], (C2, C3, 4, 4), jnp.float32),
        "w4": 0.02 * jax.random.normal(keys[3], (C3, 1, 4, 4), jnp.float32),
        "g1": 1.0 + 0.1 * jax.random.normal(keys[4], (C1,), jnp.float32),
        "b1": 0.1 * jax.random.normal(keys[5], (C1,), jnp.float32),
        "g2": 1.0 + 0.1 * jax.random.normal(keys[6], (C2,), jnp.float32),
        "b2": 0.1 * jax.random.normal(keys[7], (C2,), jnp.float32),
        "g3": 1.0 + 0.1 * jax.random.normal(keys[8], (C3,), jnp.float32),
        "b3": 0.1 * jax.random.normal(keys[9], (C3,), jnp.float32),
    }

    # Standard DCGAN generator input: (N, latent_dim, 1, 1)
    z = jax.random.normal(keys[10], (2, LATENT, 1, 1), jnp.float32)

    out = generator_forward(z, params)
    out = jax.block_until_ready(out)
    assert out.shape == (2, 1, 16, 16), out.shape
    assert bool(jnp.all(jnp.isfinite(out)))

    ref = generator_reference(z, params)
    assert bool(jnp.allclose(out, ref, rtol=1e-3, atol=1e-4)), \
        float(jnp.max(jnp.abs(out - ref)))

    print("KERNEL_OK")
</pallas_src>

<mosaic_0001>
module attributes {stable_mosaic.version = 11 : i64} {
  func.func @generator_kernel(%arg0: memref<2x10xf32, #tpu.memory_space<vmem>>, %arg1: memref<10x784xf32, #tpu.memory_space<vmem>>, %arg2: memref<784x16xf32, #tpu.memory_space<vmem>>, %arg3: memref<16x784xf32, #tpu.memory_space<vmem>>, %arg4: memref<1x16xf32, #tpu.memory_space<vmem>>, %arg5: memref<1x784xf32, #tpu.memory_space<vmem>>, %arg6: memref<784x800xf32, #tpu.memory_space<vmem>>, %arg7: memref<800x8xf32, #tpu.memory_space<vmem>>, %arg8: memref<8x800xf32, #tpu.memory_space<vmem>>, %arg9: memref<1x8xf32, #tpu.memory_space<vmem>>, %arg10: memref<1x800xf32, #tpu.memory_space<vmem>>, %arg11: memref<800x676xf32, #tpu.memory_space<vmem>>, %arg12: memref<676x4xf32, #tpu.memory_space<vmem>>, %arg13: memref<4x676xf32, #tpu.memory_space<vmem>>, %arg14: memref<1x4xf32, #tpu.memory_space<vmem>>, %arg15: memref<1x676xf32, #tpu.memory_space<vmem>>, %arg16: memref<676x256xf32, #tpu.memory_space<vmem>>, %arg17: memref<2x256xf32, #tpu.memory_space<vmem>>) attributes {dimension_semantics = [], scalar_prefetch = 0 : i64, scratch_operands = 0 : i64, tpu.core_type = #tpu.core_type<tc>} {
    %c0 = arith.constant 0 : index
    %c0_0 = arith.constant 0 : index
    %0 = vector.load %arg0[%c0, %c0_0] : memref<2x10xf32, #tpu.memory_space<vmem>>, vector<2x10xf32>
    %c0_1 = arith.constant 0 : index
    %c0_2 = arith.constant 0 : index
    %1 = vector.load %arg1[%c0_1, %c0_2] : memref<10x784xf32, #tpu.memory_space<vmem>>, vector<10x784xf32>
    %cst = arith.constant dense<0.000000e+00> : vector<2x784xf32>
    %2 = tpu.matmul %0, %1, %cst {dimension_numbers = #tpu.dot_dimension_numbers<[1], [0], [0], [1], [0, 0, 1, 1], [], []>} : vector<2x10xf32>, vector<10x784xf32>, vector<2x784xf32> -> vector<2x784xf32>
    %cst_3 = arith.constant dense<0.000000e+00> : vector<784xf32>
    %3 = vector.multi_reduction <add>, %2, %cst_3 [0] : vector<2x784xf32> to vector<784xf32>
    %4 = vector.shape_cast %3 : vector<784xf32> to vector<1x784xf32>
    %c0_4 = arith.constant 0 : index
    %c0_5 = arith.constant 0 : index
    %5 = vector.load %arg2[%c0_4, %c0_5] : memref<784x16xf32, #tpu.memory_space<vmem>>, vector<784x16xf32>
    %cst_6 = arith.constant dense<0.000000e+00> : vector<1x16xf32>
    %6 = tpu.matmul %4, %5, %cst_6 {dimension_numbers = #tpu.dot_dimension_numbers<[1], [0], [0], [1], [0, 0, 1, 1], [], []>} : vector<1x784xf32>, vector<784x16xf32>, vector<1x16xf32> -> vector<1x16xf32>
    %cst_7 = arith.constant 9.800000e+01 : f32
    %7 = vector.broadcast %cst_7 : f32 to vector<1x16xf32>
    %8 = arith.divf %6, %7 : vector<1x16xf32>
    %c0_8 = arith.constant 0 : index
    %c0_9 = arith.constant 0 : index
    %9 = vector.load %arg3[%c0_8, %c0_9] : memref<16x784xf32, #tpu.memory_space<vmem>>, vector<16x784xf32>
    %cst_10 = arith.constant dense<0.000000e+00> : vector<1x784xf32>
    %10 = tpu.matmul %8, %9, %cst_10 {dimension_numbers = #tpu.dot_dimension_numbers<[1], [0], [0], [1], [0, 0, 1, 1], [], []>} : vector<1x16xf32>, vector<16x784xf32>, vector<1x784xf32> -> vector<1x784xf32>
    %11 = vector.broadcast %10 : vector<1x784xf32> to vector<2x784xf32>
    %12 = arith.subf %2, %11 : vector<2x784xf32>
    %13 = arith.mulf %12, %12 : vector<2x784xf32>
    %cst_11 = arith.constant dense<0.000000e+00> : vector<784xf32>
    %14 = vector.multi_reduction <add>, %13, %cst_11 [0] : vector<2x784xf32> to vector<784xf32>
    %15 = vector.shape_cast %14 : vector<784xf32> to vector<1x784xf32>
    %c0_12 = arith.constant 0 : index
    %c0_13 = arith.constant 0 : index
    %16 = vector.load %arg2[%c0_12, %c0_13] : memref<784x16xf32, #tpu.memory_space<vmem>>, vector<784x16xf32>
    %cst_14 = arith.constant dense<0.000000e+00> : vector<1x16xf32>
    %17 = tpu.matmul %15, %16, %cst_14 {dimension_numbers = #tpu.dot_dimension_numbers<[1], [0], [0], [1], [0, 0, 1, 1], [], []>} : vector<1x784xf32>, vector<784x16xf32>, vector<1x16xf32> -> vector<1x16xf32>
    %cst_15 = arith.constant 9.800000e+01 : f32
    %18 = vector.broadcast %cst_15 : f32 to vector<1x16xf32>
    %19 = arith.divf %17, %18 : vector<1x16xf32>
    %c0_16 = arith.constant 0 : index
    %c0_17 = arith.constant 0 : index
    %20 = vector.load %arg4[%c0_16, %c0_17] : memref<1x16xf32, #tpu.memory_space<vmem>>, vector<1x16xf32>
    %cst_18 = arith.constant 9.99999974E-6 : f32
    %21 = vector.broadcast %cst_18 : f32 to vector<1x16xf32>
    %22 = arith.addf %19, %21 : vector<1x16xf32>
    %23 = math.rsqrt %22 : vector<1x16xf32>
    %24 = arith.mulf %20, %23 : vector<1x16xf32>
    %c0_19 = arith.constant 0 : index
    %c0_20 = arith.constant 0 : index
    %25 = vector.load %arg3[%c0_19, %c0_20] : memref<16x784xf32, #tpu.memory_space<vmem>>, vector<16x784xf32>
    %cst_21 = arith.constant dense<0.000000e+00> : vector<1x784xf32>
    %26 = tpu.matmul %24, %25, %cst_21 {dimension_numbers = #tpu.dot_dimension_numbers<[1], [0], [0], [1], [0, 0, 1, 1], [], []>} : vector<1x16xf32>, vector<16x784xf32>, vector<1x784xf32> -> vector<1x784xf32>
    %27 = vector.broadcast %26 : vector<1x784xf32> to vector<2x784xf32>
    %28 = arith.mulf %12, %27 : vector<2x784xf32>
    %c0_22 = arith.constant 0 : index
    %c0_23 = arith.constant 0 : index
    %29 = vector.load %arg5[%c0_22, %c0_23] : memref<1x784xf32, #tpu.memory_space<vmem>>, vector<1x784xf32>
    %30 = vector.broadcast %29 : vector<1x784xf32> to vector<2x784xf32>
    %31 = arith.addf %28, %30 : vector<2x784xf32>
    %cst_24 = arith.constant 0.000000e+00 : f32
    %32 = vector.broadcast %cst_24 : f32 to vector<2x784xf32>
    %33 = arith.maximumf %31, %32 : vector<2x784xf32>
    %c0_25 = arith.constant 0 : index
    %c0_26 = arith.constant 0 : index
    %34 = vector.load %arg6[%c0_25, %c0_26] : memref<784x800xf32, #tpu.memory_space<vmem>>, vector<784x800xf32>
    %cst_27 = arith.constant dense<0.000000e+00> : vector<2x800xf32>
    %35 = tpu.matmul %33, %34, %cst_27 {dimension_numbers = #tpu.dot_dimension_numbers<[1], [0], [0], [1], [0, 0, 1, 1], [], []>} : vector<2x784xf32>, vector<784x800xf32>, vector<2x800xf32> -> vector<2x800xf32>
    %cst_28 = arith.constant dense<0.000000e+00> : vector<800xf32>
    %36 = vector.multi_reduction <add>, %35, %cst_28 [0] : vector<2x800xf32> to vector<800xf32>
    %37 = vector.shape_cast %36 : vector<800xf32> to vector<1x800xf32>
    %c0_29 = arith.constant 0 : index
    %c0_30 = arith.constant 0 : index
    %38 = vector.load %arg7[%c0_29, %c0_30] : memref<800x8xf32, #tpu.memory_space<vmem>>, vector<800x8xf32>
    %cst_31 = arith.constant dense<0.000000e+00> : vector<1x8xf32>
    %39 = tpu.matmul %37, %38, %cst_31 {dimension_numbers = #tpu.dot_dimension_numbers<[1], [0], [0], [1], [0, 0, 1, 1], [], []>} : vector<1x800xf32>, vector<800x8xf32>, vector<1x8xf32> -> vector<1x8xf32>
    %cst_32 = arith.constant 2.000000e+02 : f32
    %40 = vector.broadcast %cst_32 : f32 to vector<1x8xf32>
    %41 = arith.divf %39, %40 : vector<1x8xf32>
    %c0_33 = arith.constant 0 : index
    %c0_34 = arith.constant 0 : index
    %42 = vector.load %arg8[%c0_33, %c0_34] : memref<8x800xf32, #tpu.memory_space<vmem>>, vector<8x800xf32>
    %cst_35 = arith.constant dense<0.000000e+00> : vector<1x800xf32>
    %43 = tpu.matmul %41, %42, %cst_35 {dimension_numbers = #tpu.dot_dimension_numbers<[1], [0], [0], [1], [0, 0, 1, 1], [], []>} : vector<1x8xf32>, vector<8x800xf32>, vector<1x800xf32> -> vector<1x800xf32>
    %44 = vector.broadcast %43 : vector<1x800xf32> to vector<2x800xf32>
    %45 = arith.subf %35, %44 : vector<2x800xf32>
    %46 = arith.mulf %45, %45 : vector<2x800xf32>
    %cst_36 = arith.constant dense<0.000000e+00> : vector<800xf32>
    %47 = vector.multi_reduction <add>, %46, %cst_36 [0] : vector<2x800xf32> to vector<800xf32>
    %48 = vector.shape_cast %47 : vector<800xf32> to vector<1x800xf32>
    %c0_37 = arith.constant 0 : index
    %c0_38 = arith.constant 0 : index
    %49 = vector.load %arg7[%c0_37, %c0_38] : memref<800x8xf32, #tpu.memory_space<vmem>>, vector<800x8xf32>
    %cst_39 = arith.constant dense<0.000000e+00> : vector<1x8xf32>
    %50 = tpu.matmul %48, %49, %cst_39 {dimension_numbers = #tpu.dot_dimension_numbers<[1], [0], [0], [1], [0, 0, 1, 1], [], []>} : vector<1x800xf32>, vector<800x8xf32>, vector<1x8xf32> -> vector<1x8xf32>
    %cst_40 = arith.constant 2.000000e+02 : f32
    %51 = vector.broadcast %cst_40 : f32 to vector<1x8xf32>
    %52 = arith.divf %50, %51 : vector<1x8xf32>
    %c0_41 = arith.constant 0 : index
    %c0_42 = arith.constant 0 : index
    %53 = vector.load %arg9[%c0_41, %c0_42] : memref<1x8xf32, #tpu.memory_space<vmem>>, vector<1x8xf32>
    %cst_43 = arith.constant 9.99999974E-6 : f32
    %54 = vector.broadcast %cst_43 : f32 to vector<1x8xf32>
    %55 = arith.addf %52, %54 : vector<1x8xf32>
    %56 = math.rsqrt %55 : vector<1x8xf32>
    %57 = arith.mulf %53, %56 : vector<1x8xf32>
    %c0_44 = arith.constant 0 : index
    %c0_45 = arith.constant 0 : index
    %58 = vector.load %arg8[%c0_44, %c0_45] : memref<8x800xf32, #tpu.memory_space<vmem>>, vector<8x800xf32>
    %cst_46 = arith.constant dense<0.000000e+00> : vector<1x800xf32>
    %59 = tpu.matmul %57, %58, %cst_46 {dimension_numbers = #tpu.dot_dimension_numbers<[1], [0], [0], [1], [0, 0, 1, 1], [], []>} : vector<1x8xf32>, vector<8x800xf32>, vector<1x800xf32> -> vector<1x800xf32>
    %60 = vector.broadcast %59 : vector<1x800xf32> to vector<2x800xf32>
    %61 = arith.mulf %45, %60 : vector<2x800xf32>
    %c0_47 = arith.constant 0 : index
    %c0_48 = arith.constant 0 : index
    %62 = vector.load %arg10[%c0_47, %c0_48] : memref<1x800xf32, #tpu.memory_space<vmem>>, vector<1x800xf32>
    %63 = vector.broadcast %62 : vector<1x800xf32> to vector<2x800xf32>
    %64 = arith.addf %61, %63 : vector<2x800xf32>
    %cst_49 = arith.constant 0.000000e+00 : f32
    %65 = vector.broadcast %cst_49 : f32 to vector<2x800xf32>
    %66 = arith.maximumf %64, %65 : vector<2x800xf32>
    %c0_50 = arith.constant 0 : index
    %c0_51 = arith.constant 0 : index
    %67 = vector.load %arg11[%c0_50, %c0_51] : memref<800x676xf32, #tpu.memory_space<vmem>>, vector<800x676xf32>
    %cst_52 = arith.constant dense<0.000000e+00> : vector<2x676xf32>
    %68 = tpu.matmul %66, %67, %cst_52 {dimension_numbers = #tpu.dot_dimension_numbers<[1], [0], [0], [1], [0, 0, 1, 1], [], []>} : vector<2x800xf32>, vector<800x676xf32>, vector<2x676xf32> -> vector<2x676xf32>
    %cst_53 = arith.constant dense<0.000000e+00> : vector<676xf32>
    %69 = vector.multi_reduction <add>, %68, %cst_53 [0] : vector<2x676xf32> to vector<676xf32>
    %70 = vector.shape_cast %69 : vector<676xf32> to vector<1x676xf32>
    %c0_54 = arith.constant 0 : index
    %c0_55 = arith.constant 0 : index
    %71 = vector.load %arg12[%c0_54, %c0_55] : memref<676x4xf32, #tpu.memory_space<vmem>>, vector<676x4xf32>
    %cst_56 = arith.constant dense<0.000000e+00> : vector<1x4xf32>
    %72 = tpu.matmul %70, %71, %cst_56 {dimension_numbers = #tpu.dot_dimension_numbers<[1], [0], [0], [1], [0, 0, 1, 1], [], []>} : vector<1x676xf32>, vector<676x4xf32>, vector<1x4xf32> -> vector<1x4xf32>
    %cst_57 = arith.constant 3.380000e+02 : f32
    %73 = vector.broadcast %cst_57 : f32 to vector<1x4xf32>
    %74 = arith.divf %72, %73 : vector<1x4xf32>
    %c0_58 = arith.constant 0 : index
    %c0_59 = arith.constant 0 : index
    %75 = vector.load %arg13[%c0_58, %c0_59] : memref<4x676xf32, #tpu.memory_space<vmem>>, vector<4x676xf32>
    %cst_60 = arith.constant dense<0.000000e+00> : vector<1x676xf32>
    %76 = tpu.matmul %74, %75, %cst_60 {dimension_numbers = #tpu.dot_dimension_numbers<[1], [0], [0], [1], [0, 0, 1, 1], [], []>} : vector<1x4xf32>, vector<4x676xf32>, vector<1x676xf32> -> vector<1x676xf32>
    %77 = vector.broadcast %76 : vector<1x676xf32> to vector<2x676xf32>
    %78 = arith.subf %68, %77 : vector<2x676xf32>
    %79 = arith.mulf %78, %78 : vector<2x676xf32>
    %cst_61 = arith.constant dense<0.000000e+00> : vector<676xf32>
    %80 = vector.multi_reduction <add>, %79, %cst_61 [0] : vector<2x676xf32> to vector<676xf32>
    %81 = vector.shape_cast %80 : vector<676xf32> to vector<1x676xf32>
    %c0_62 = arith.constant 0 : index
    %c0_63 = arith.constant 0 : index
    %82 = vector.load %arg12[%c0_62, %c0_63] : memref<676x4xf32, #tpu.memory_space<vmem>>, vector<676x4xf32>
    %cst_64 = arith.constant dense<0.000000e+00> : vector<1x4xf32>
    %83 = tpu.matmul %81, %82, %cst_64 {dimension_numbers = #tpu.dot_dimension_numbers<[1], [0], [0], [1], [0, 0, 1, 1], [], []>} : vector<1x676xf32>, vector<676x4xf32>, vector<1x4xf32> -> vector<1x4xf32>
    %cst_65 = arith.constant 3.380000e+02 : f32
    %84 = vector.broadcast %cst_65 : f32 to vector<1x4xf32>
    %85 = arith.divf %83, %84 : vector<1x4xf32>
    %c0_66 = arith.constant 0 : index
    %c0_67 = arith.constant 0 : index
    %86 = vector.load %arg14[%c0_66, %c0_67] : memref<1x4xf32, #tpu.memory_space<vmem>>, vector<1x4xf32>
    %cst_68 = arith.constant 9.99999974E-6 : f32
    %87 = vector.broadcast %cst_68 : f32 to vector<1x4xf32>
    %88 = arith.addf %85, %87 : vector<1x4xf32>
    %89 = math.rsqrt %88 : vector<1x4xf32>
    %90 = arith.mulf %86, %89 : vector<1x4xf32>
    %c0_69 = arith.constant 0 : index
    %c0_70 = arith.constant 0 : index
    %91 = vector.load %arg13[%c0_69, %c0_70] : memref<4x676xf32, #tpu.memory_space<vmem>>, vector<4x676xf32>
    %cst_71 = arith.constant dense<0.000000e+00> : vector<1x676xf32>
    %92 = tpu.matmul %90, %91, %cst_71 {dimension_numbers = #tpu.dot_dimension_numbers<[1], [0], [0], [1], [0, 0, 1, 1], [], []>} : vector<1x4xf32>, vector<4x676xf32>, vector<1x676xf32> -> vector<1x676xf32>
    %93 = vector.broadcast %92 : vector<1x676xf32> to vector<2x676xf32>
    %94 = arith.mulf %78, %93 : vector<2x676xf32>
    %c0_72 = arith.constant 0 : index
    %c0_73 = arith.constant 0 : index
    %95 = vector.load %arg15[%c0_72, %c0_73] : memref<1x676xf32, #tpu.memory_space<vmem>>, vector<1x676xf32>
    %96 = vector.broadcast %95 : vector<1x676xf32> to vector<2x676xf32>
    %97 = arith.addf %94, %96 : vector<2x676xf32>
    %c0_74 = arith.constant 0 : index
    %c0_75 = arith.constant 0 : index
    %98 = vector.load %arg16[%c0_74, %c0_75] : memref<676x256xf32, #tpu.memory_space<vmem>>, vector<676x256xf32>
    %cst_76 = arith.constant dense<0.000000e+00> : vector<2x256xf32>
    %99 = tpu.matmul %97, %98, %cst_76 {dimension_numbers = #tpu.dot_dimension_numbers<[1], [0], [0], [1], [0, 0, 1, 1], [], []>} : vector<2x676xf32>, vector<676x256xf32>, vector<2x256xf32> -> vector<2x256xf32>
    %cst_77 = arith.constant 0.000000e+00 : f32
    %100 = vector.broadcast %cst_77 : f32 to vector<2x256xf32>
    %101 = arith.maximumf %99, %100 : vector<2x256xf32>
    %102 = math.tanh %101 : vector<2x256xf32>
    %c0_78 = arith.constant 0 : index
    %c0_79 = arith.constant 0 : index
    %103 = vector.load %arg17[%c0_78, %c0_79] : memref<2x256xf32, #tpu.memory_space<vmem>>, vector<2x256xf32>
    tpu.vector_store %arg17[%c0_78, %c0_79], %102 {strides = array<i32>} : memref<2x256xf32, #tpu.memory_space<vmem>>, vector<2x256xf32>,
    return
  }
}

</mosaic_0001>

<bundles_post_ra>
// kernel: generator_forward.1
= control target key start
LH: loop header
LB: loop body
LE: loop exit
PB: predicated region body
PF: predicated region fallthrough
CT: control target
= control target key end

     0   :  { %vm75_vm0 = vcmask 1041408   ;;  %v16362_v3 = vmov 0.0   ;;  %vm9051_vm1 = vmmov 0   ;;  %vm71_vm2 = vcmask 80896   ;;  %s16343_s1 = inlined_call_operand.vmem [shape: f32[10,784], index: 1, kind: input, shape index: {}]   ;;  %s16344_s0 = inlined_call_operand.vmem [shape: f32[2,10], index: 0, kind: input, shape index: {}]   ;;  %s16345_s2 = inlined_call_operand.vmem [shape: f32[784,16], index: 2, kind: input, shape index: {}]   ;;  %s16346_s3 = inlined_call_operand.vmem [shape: f32[16,784], index: 3, kind: input, shape index: {}]   ;;  %s16347_s6 = inlined_call_operand.vmem [shape: f32[784,800], index: 6, kind: input, shape index: {}]   ;;  %s16348_s4 = inlined_call_operand.vmem [shape: f32[1,16], index: 4, kind: input, shape index: {}]   ;;  %s16349_s5 = inlined_call_operand.vmem [shape: f32[1,784], index: 5, kind: input, shape index: {}]   ;;  %s16350_s7 = inlined_call_operand.vmem [shape: f32[800,8], index: 7, kind: input, shape index: {}]   ;;  %s16351_s8 = inlined_call_operand.vmem [shape: f32[8,800], index: 8, kind: input, shape index: {}]   ;;  %s16352_s11 = inlined_call_operand.vmem [shape: f32[800,676], index: 11, kind: input, shape index: {}]   ;;  %s16353_s9 = inlined_call_operand.vmem [shape: f32[1,8], index: 9, kind: input, shape index: {}]   ;;  %s16354_s10 = inlined_call_operand.vmem [shape: f32[1,800], index: 10, kind: input, shape index: {}]   ;;  %s16355_s12 = inlined_call_operand.vmem [shape: f32[676,4], index: 12, kind: input, shape index: {}]   ;;  %s16356_s13 = inlined_call_operand.vmem [shape: f32[4,676], index: 13, kind: input, shape index: {}]   ;;  %s16357_s16 = inlined_call_operand.vmem [shape: f32[676,256], index: 16, kind: input, shape index: {}]   ;;  %s16358_s14 = inlined_call_operand.vmem [shape: f32[1,4], index: 14, kind: input, shape index: {}]   ;;  %s16359_s15 = inlined_call_operand.vmem [shape: f32[1,676], index: 15, kind: input, shape index: {}]   ;;  %s16360_s17 = inlined_call_operand.vmem [shape: f32[2,256], index: 17, kind: output, shape index: {}]  }
   0x1   :  { %16539 = sst [smem:[#allocation75_spill]] %s16343_s1  ;;  %161 = vmatprep.mubr.f32.mxu0 %v16362_v3  ;;  %8961 = vmatprep.subr.mxu1 %v16362_v3  ;;  %v9206_v16 = vld [vmem:[%s16345_s2 + $0xf8] sm:$0xff]  ;;  %v9222_v19 = vld [vmem:[%s16345_s2 + $0xf0] sm:$0xff]  ;;  %v9245_v23 = vld [vmem:[%s16345_s2 + $0xe8] sm:$0xff]  ;;  %vm422_vm3 = vcmask 123904   ;;  %vm528_vm4 = vcmask 130048  }
   0x2   :  { %16540 = sst [smem:[#allocation76_spill]] %s16344_s0  ;;  %8965 = vmatprep.mubr.msk.f32.mxu1 %vm9051_vm1, %v16362_v3  ;;  %v9211_v17 = vld [vmem:[%s16345_s2 + $0x78] sm:$0xff]  ;;  %v9234_v21 = vld [vmem:[%s16345_s2 + $0x70] sm:$0xff]  ;;  %v9257_v25 = vld [vmem:[%s16345_s2 + $0x68] sm:$0xff]  ;;  %vm3728_vm5 = vcmask 254976   ;;  %vm3836_vm6 = vcmask 261120  }
   0x3   :  { %s16541_s26 = sld [smem:[#allocation75_spill]]  ;;  %v9216_v18 = vld [vmem:[%s16345_s2 + $0x1f8] sm:$0xff]  ;;  %v9239_v22 = vld [vmem:[%s16345_s2 + $0x1f0] sm:$0xff]  ;;  %v9263_v26 = vld [vmem:[%s16345_s2 + $0x1e8] sm:$0xff]  ;;  %vm4129_vm7 = vcmask 64512   ;;  %vm6754_vm8 = vcmask 1043456  }
   0x4   :  { %s16542_s20 = sld [smem:[#allocation76_spill]]  ;;  %v9227_v20 = vld [vmem:[%s16345_s2 + $0x178] sm:$0xff]  ;;  %v9251_v24 = vld [vmem:[%s16345_s2 + $0x170] sm:$0xff]  ;;  %v9269_v27 = vld [vmem:[%s16345_s2 + $0xe0] sm:$0xff]  ;;  %vm6657_vm9 = vcmask 287744   ;;  %vm6750_vm10 = vcmask 293888  }
   0x5   :  { %16543 = vst [vmem:[#allocation2_spill] sm:$0xff] %v9269_v27  ;;  %v9275_v28 = vld [vmem:[%s16345_s2 + $0x168] sm:$0xff]  ;;  %v9281_v29 = vld [vmem:[%s16345_s2 + $0x60] sm:$0xff]  ;;  %v9293_v31 = vld [vmem:[%s16345_s2 + $0xd8] sm:$0xff]  ;;  %vm6979_vm11 = vcmask 31744  }
   0x6   :  { %16544 = vst [vmem:[#allocation3_spill] sm:$0xff] %v9281_v29  ;;  %v9287_v30 = vld [vmem:[%s16345_s2 + $0x1e0] sm:$0xff]  ;;  %16545 = vst [vmem:[#allocation4_spill] sm:$0xff] %v9293_v31  ;;  %v9305_v33 = vld [vmem:[%s16345_s2 + $0x58] sm:$0xff] }
   0x7   :  { %v9299_v32 = vld [vmem:[%s16345_s2 + $0x160] sm:$0xff]  ;;  %16546 = vst [vmem:[#allocation5_spill] sm:$0xff] %v9305_v33  ;;  %v9311_v34 = vld [vmem:[%s16345_s2 + $0x1d8] sm:$0xff]  ;;  %v9317_v35 = vld [vmem:[%s16345_s2 + $0xd0] sm:$0xff] }
   0x8   :  { %16547 = vst [vmem:[#allocation6_spill] sm:$0xff] %v9317_v35  ;;  %v9323_v36 = vld [vmem:[%s16345_s2 + $0x158] sm:$0xff]  ;;  %v9329_v37 = vld [vmem:[%s16345_s2 + $0x50] sm:$0xff]  ;;  %v9341_v39 = vld [vmem:[%s16345_s2 + $0xc8] sm:$0xff] }
   0x9   :  { %v65_v0 = vld [vmem:[%s16541_s26 + $0x40] sm:$0x3]  ;;  %v64_v1 = vld [vmem:[%s16541_s26 + $0x38] sm:$0x3]  ;;  %v58_v2 = vld [vmem:[%s16541_s26 + $0x8] sm:$0xff]  ;;  %16548 = vst [vmem:[#allocation7_spill] sm:$0xff] %v9329_v37 }
   0xa   :  { %8200 = vmatprep.subr.msk.mxu0 %vm75_vm0, %v65_v0  ;;  %v57_v4 = vld [vmem:[%s16541_s26] sm:$0xff]  ;;  %v67_v6 = vld [vmem:[%s16541_s26 + $0x50] sm:$0x3]  ;;  %v66_v7 = vld [vmem:[%s16541_s26 + $0x48] sm:$0x3]  ;;  %16549 = vst [vmem:[#allocation8_spill] sm:$0xff] %v9341_v39 }
   0xb   :  { %8201 = vmatpush1.msk.msra.mxu0 %vm75_vm0, %v64_v1  ;;  %v56_v5 = vld [vmem:[%s16542_s20] sm:$0x3]  ;;  %v60_v8 = vld [vmem:[%s16541_s26 + $0x18] sm:$0xff]  ;;  %v70_v9 = vld [vmem:[%s16541_s26 + $0x68] sm:$0x3] }
   0xc   :  { %127 = vmatprep.subr.mxu0 %v58_v2  ;;  %v59_v10 = vld [vmem:[%s16541_s26 + $0x10] sm:$0xff]  ;;  %v69_v11 = vld [vmem:[%s16541_s26 + $0x60] sm:$0x3]  ;;  %v68_v12 = vld [vmem:[%s16541_s26 + $0x58] sm:$0x3]  ;;  %8962 = vmatpush3.msk.msra.mxu1 %vm75_vm0, %v70_v9 }
   0xd   :  { %128 = vmatpush1.msra.mxu0 %v57_v4  ;;  %v62_v13 = vld [vmem:[%s16541_s26 + $0x28] sm:$0xff]  ;;  %8963 = vmatprep.subr.mxu1 %v16362_v3  ;;  %v63_v14 = vld [vmem:[%s16541_s26 + $0x30] sm:$0xff]  ;;  %v61_v15 = vld [vmem:[%s16541_s26 + $0x20] sm:$0xff] }
   0xe   :  { %8202 = vmatmul.mubr.msk.f32.vlgmr.msra.gmra.mxu0 %vm71_vm2, %v56_v5  ;;  %8203 = vmatprep.subr.msk.mxu0 %vm75_vm0, %v67_v6  ;;  %v9335_v38 = vld [vmem:[%s16345_s2 + $0x1d0] sm:$0xff]  ;;  %v9348_v40 = vld [vmem:[%s16345_s2 + $0x48] sm:$0xff]  ;;  %v9355_v41 = vld [vmem:[%s16345_s2 + $0xc0] sm:$0xff] }
   0xf   :  { %8204 = vmatpush1.msk.msra.mxu0 %vm75_vm0, %v66_v7  ;;  %232 = vmatprep.mubr.f32.mxu0 %v16362_v3  ;;  %16550 = vst [vmem:[#allocation9_spill] sm:$0xff] %v9348_v40  ;;  %16551 = vst [vmem:[#allocation10_spill] sm:$0xff] %v9355_v41  ;;  %v9362_v42 = vld [vmem:[%s16345_s2 + $0x40] sm:$0xff]  ;;  %v9370_v43 = vld [vmem:[%s16345_s2 + $0xb8] sm:$0xff] }
  0x10   :  { %198 = vmatprep.subr.mxu0 %v60_v8  ;;  %8964 = vmatpush3.msra.mxu1 %v63_v14  ;;  %16552 = vst [vmem:[#allocation11_spill] sm:$0xff] %v9362_v42  ;;  %16553 = vst [vmem:[#allocation12_spill] sm:$0xff] %v9370_v43  ;;  %v9375_v44 = vld [vmem:[%s16345_s2 + $0x150] sm:$0xff]  ;;  %v9382_v45 = vld [vmem:[%s16345_s2 + $0x38] sm:$0xff] }
  0x11   :  { %199 = vmatpush1.msra.mxu0 %v59_v10  ;;  %8966 = vmatmul.mubr.msk.f32.vlgmr.msra.gmra.mxu1 %vm71_vm2, %v56_v5  ;;  %16554 = vst [vmem:[#allocation13_spill] sm:$0xff] %v9382_v45  ;;  %v9387_v46 = vld [vmem:[%s16345_s2 + $0x1c8] sm:$0xff]  ;;  %v9394_v47 = vld [vmem:[%s16345_s2 + $0xb0] sm:$0xff]  ;;  %v9411_v50 = vld [vmem:[%s16345_s2 + $0x1c0] sm:$0xff] }
  0x12   :  { %8205 = vmatmul.mubr.msk.f32.vlgmr.msra.gmra.mxu0 %vm71_vm2, %v56_v5  ;;  %8206 = vmatprep.subr.msk.mxu0 %vm75_vm0, %v69_v11  ;;  %16555 = vst [vmem:[#allocation14_spill] sm:$0xff] %v9394_v47  ;;  %v9399_v48 = vld [vmem:[%s16345_s2 + $0x148] sm:$0xff]  ;;  %v9406_v49 = vld [vmem:[%s16345_s2 + $0x30] sm:$0xff]  ;;  %v9423_v52 = vld [vmem:[%s16345_s2 + $0x140] sm:$0xff] }
  0x13   :  { %8207 = vmatpush1.msk.msra.mxu0 %vm75_vm0, %v68_v12  ;;  %303 = vmatprep.mubr.f32.mxu0 %v16362_v3  ;;  %16556 = vst [vmem:[#allocation15_spill] sm:$0xff] %v9406_v49  ;;  %v9418_v51 = vld [vmem:[%s16345_s2 + $0xa8] sm:$0xff]  ;;  %v9435_v54 = vld [vmem:[%s16345_s2 + $0x1b8] sm:$0xff]  ;;  %v9442_v55 = vld [vmem:[%s16345_s2 + $0xa0] sm:$0xff] }
  0x14   :  { %269 = vmatprep.subr.mxu0 %v62_v13  ;;  %8302 = vmatprep.subr.mxu1 %v9216_v18  ;;  %16557 = vst [vmem:[#allocation16_spill] sm:$0xff] %v9418_v51  ;;  %v9430_v53 = vld [vmem:[%s16345_s2 + $0x28] sm:$0xff]  ;;  %16559 = vst [vmem:[#allocation18_spill] sm:$0xff] %v9442_v55  ;;  %v9447_v56 = vld [vmem:[%s16345_s2 + $0x138] sm:$0xff] }
  0x15   :  { %270 = vmatpush1.msra.mxu0 %v61_v15  ;;  %8303 = vmatpush3.msra.mxu1 %v9227_v20  ;;  %16558 = vst [vmem:[#allocation17_spill] sm:$0xff] %v9430_v53  ;;  %v9454_v57 = vld [vmem:[%s16345_s2 + $0x20] sm:$0xff]  ;;  %v9459_v58 = vld [vmem:[%s16345_s2 + $0x1b0] sm:$0xff]  ;;  %v9466_v59 = vld [vmem:[%s16345_s2 + $0x98] sm:$0xff] }
  0x16   :  { %8208 = vmatmul.mubr.msk.f32.vlgmr.msra.gmra.mxu0 %vm71_vm2, %v56_v5  ;;  %8267 = vmatprep.subr.mxu0 %v9206_v16  ;;  %16560 = vst [vmem:[#allocation19_spill] sm:$0xff] %v9454_v57  ;;  %16561 = vst [vmem:[#allocation20_spill] sm:$0xff] %v9466_v59  ;;  %v9471_v60 = vld [vmem:[%s16345_s2 + $0x130] sm:$0xff]  ;;  %v9478_v61 = vld [vmem:[%s16345_s2 + $0x18] sm:$0xff] }
  0x17   :  { %8268 = vmatpush3.msra.mxu0 %v9211_v17  ;;  %8304 = vmatprep.subr.mxu1 %v9239_v22  ;;  %16562 = vst [vmem:[#allocation21_spill] sm:$0xff] %v9478_v61  ;;  %v9483_v62 = vld [vmem:[%s16345_s2 + $0x1a8] sm:$0xff]  ;;  %v9490_v63 = vld [vmem:[%s16345_s2 + $0x90] sm:$0xff]  ;;  %v9507_v2 = vld [vmem:[%s16345_s2 + $0x1a0] sm:$0xff] }
  0x18   :  { %8269 = vmatprep.subr.mxu0 %v9222_v19  ;;  %8305 = vmatpush3.msra.mxu1 %v9251_v24  ;;  %16563 = vst [vmem:[#allocation22_spill] sm:$0xff] %v9490_v63  ;;  %v9495_v0 = vld [vmem:[%s16345_s2 + $0x128] sm:$0xff]  ;;  %v9502_v1 = vld [vmem:[%s16345_s2 + $0x10] sm:$0xff]  ;;  %v9519_v5 = vld [vmem:[%s16345_s2 + $0x120] sm:$0xff] }
  0x19   :  { %8270 = vmatpush3.msra.mxu0 %v9234_v21  ;;  %8306 = vmatprep.subr.mxu1 %v9263_v26  ;;  %16564 = vst [vmem:[#allocation23_spill] sm:$0xff] %v9502_v1  ;;  %v9514_v4 = vld [vmem:[%s16345_s2 + $0x88] sm:$0xff]  ;;  %v9531_v7 = vld [vmem:[%s16345_s2 + $0x198] sm:$0xff]  ;;  %v9538_v8 = vld [vmem:[%s16345_s2 + $0x80] sm:$0xff] }
  0x1a   :  { %8271 = vmatprep.subr.mxu0 %v9245_v23  ;;  %8307 = vmatpush3.msra.mxu1 %v9275_v28  ;;  %16565 = vst [vmem:[#allocation24_spill] sm:$0xff] %v9514_v4  ;;  %v9526_v6 = vld [vmem:[%s16345_s2 + $0x8] sm:$0xff]  ;;  %16567 = vst [vmem:[#allocation26_spill] sm:$0xff] %v9538_v8  ;;  %v9543_v9 = vld [vmem:[%s16345_s2 + $0x118] sm:$0xff] }
  0x1b   :  { %8272 = vmatpush3.msra.mxu0 %v9257_v25  ;;  %8308 = vmatprep.subr.mxu1 %v9287_v30  ;;  %16566 = vst [vmem:[#allocation25_spill] sm:$0xff] %v9526_v6  ;;  %v9550_v10 = vld [vmem:[%s16345_s2] sm:$0xff]  ;;  %v9555_v11 = vld [vmem:[%s16345_s2 + $0x190] sm:$0xff]  ;;  %v9567_v13 = vld [vmem:[%s16345_s2 + $0x2f8] sm:$0xff] }
  0x1c   :  { %8273 = vmatprep.subr.mxu0 %v9269_v27  ;;  %8309 = vmatpush3.msra.mxu1 %v9299_v32  ;;  %16568 = vst [vmem:[#allocation27_spill] sm:$0xff] %v9550_v10  ;;  %v9562_v12 = vld [vmem:[%s16345_s2 + $0x110] sm:$0xff]  ;;  %16569 = vst [vmem:[#allocation28_spill] sm:$0xff] %v9567_v13  ;;  %v9574_v14 = vld [vmem:[%s16345_s2 + $0x188] sm:$0xff] }
  0x1d   :  { %8274 = vmatpush3.msra.mxu0 %v9281_v29  ;;  %8310 = vmatprep.subr.mxu1 %v9311_v34  ;;  %v9580_v15 = vld [vmem:[%s16345_s2 + $0x108] sm:$0xff]  ;;  %v9586_v3 = vld [vmem:[%s16345_s2 + $0x180] sm:$0xff] }
  0x1e   :  { %8275 = vmatprep.subr.mxu0 %v9293_v31  ;;  %8311 = vmatpush3.msra.mxu1 %v9323_v36 }
  0x1f   :  { %8276 = vmatpush3.msra.mxu0 %v9305_v33  ;;  %8312 = vmatprep.subr.mxu1 %v9335_v38 }
  0x20   :  { %8277 = vmatprep.subr.mxu0 %v9317_v35  ;;  %8313 = vmatpush3.msra.mxu1 %v9375_v44 }
  0x21   :  { %8278 = vmatpush3.msra.mxu0 %v9329_v37  ;;  %8314 = vmatprep.subr.mxu1 %v9387_v46 }
  0x22   :  { %8279 = vmatprep.subr.mxu0 %v9341_v39  ;;  %8315 = vmatpush3.msra.mxu1 %v9399_v48 }
  0x23   :  { %8280 = vmatpush3.msra.mxu0 %v9348_v40  ;;  %8316 = vmatprep.subr.mxu1 %v9411_v50 }
  0x24   :  { %8281 = vmatprep.subr.mxu0 %v9355_v41  ;;  %8317 = vmatpush3.msra.mxu1 %v9423_v52 }
  0x25   :  { %8282 = vmatpush3.msra.mxu0 %v9362_v42  ;;  %8318 = vmatprep.subr.mxu1 %v9435_v54 }
  0x26   :  { %8283 = vmatprep.subr.mxu0 %v9370_v43  ;;  %8319 = vmatpush3.msra.mxu1 %v9447_v56 }
  0x27   :  { %8284 = vmatpush3.msra.mxu0 %v9382_v45  ;;  %8320 = vmatprep.subr.mxu1 %v9459_v58 }
  0x28   :  { %8285 = vmatprep.subr.mxu0 %v9394_v47  ;;  %8321 = vmatpush3.msra.mxu1 %v9471_v60 }
  0x29   :  { %8286 = vmatpush3.msra.mxu0 %v9406_v49  ;;  %8322 = vmatprep.subr.mxu1 %v9483_v62 }
  0x2a   :  { %8287 = vmatprep.subr.mxu0 %v9418_v51  ;;  %8323 = vmatpush3.msra.mxu1 %v9495_v0 }
  0x2b   :  { %8288 = vmatpush3.msra.mxu0 %v9430_v53  ;;  %8324 = vmatprep.subr.mxu1 %v9507_v2 }
  0x2c   :  { %8289 = vmatprep.subr.mxu0 %v9442_v55  ;;  %8325 = vmatpush3.msra.mxu1 %v9519_v5 }
  0x2d   :  { %8290 = vmatpush3.msra.mxu0 %v9454_v57  ;;  %8326 = vmatprep.subr.mxu1 %v9531_v7 }
  0x2e   :  { %8291 = vmatprep.subr.mxu0 %v9466_v59  ;;  %8327 = vmatpush3.msra.mxu1 %v9543_v9 }
  0x2f   :  { %8292 = vmatpush3.msra.mxu0 %v9478_v61  ;;  %8328 = vmatprep.subr.mxu1 %v9555_v11 }
  0x30   :  { %8293 = vmatprep.subr.mxu0 %v9490_v63  ;;  %8329 = vmatpush3.msra.mxu1 %v9562_v12 }
  0x31   :  { %8294 = vmatpush3.msra.mxu0 %v9502_v1  ;;  %8330 = vmatprep.subr.mxu1 %v9574_v14 }
  0x32   :  { %8295 = vmatprep.subr.mxu0 %v9514_v4  ;;  %8331 = vmatpush3.msra.mxu1 %v9580_v15 }
  0x33   :  { %8296 = vmatpush3.msra.mxu0 %v9526_v6  ;;  %8332 = vmatprep.subr.mxu1 %v9586_v3 }
  0x34   :  { %8297 = vmatprep.subr.mxu0 %v9538_v8 }
  0x35   :  { %8298 = vmatpush3.msra.mxu0 %v9550_v10  ;;  %v16570_v10 = vmov 0.0  }
  0x36   :  { %8337 = vmatprep.subr.mxu0 %v9567_v13  ;;  %v9592_v13 = vld [vmem:[%s16345_s2 + $0x100] sm:$0xff] }
  0x37   :  { %8333 = vmatpush3.msra.mxu1 %v9592_v13 }
  0x38   :  { %8968 = vmatprep.subr.mxu1 %v16570_v10 }
  0xce   :  { %v9596_v8 = vpop.f32.mrf.mxu0 }
  0xcf   :  { %16571 = vst [vmem:[#allocation29_spill] sm:$0xff] %v9596_v8  ;;  %v380_v6 = vsel %vm75_vm0, %v9596_v8, 0.0 }
  0xd0   :  { %v381_v4 = vrot.slane %v380_v6, 4  ;;  %v9600_v1 = vpop.f32.mrf.mxu0 }
  0xd1   :  { %16572 = vst [vmem:[#allocation30_spill] sm:$0xff] %v9600_v1  ;;  %v387_v63 = vsel %vm75_vm0, %v9600_v1, 0.0  ;;  %v9612_v45 = vpop.f32.mrf.mxu1 }
  0xd2   :  { %v382_v61 = vadd.f32 %v381_v4, %v380_v6  ;;  %v388_v59 = vrot.slane %v387_v63, 4  ;;  %v9604_v57 = vpop.f32.mrf.mxu0  ;;  %16575 = vst [vmem:[#allocation33_spill] sm:$0xff] %v9612_v45 }
  0xd3   :  { %16573 = vst [vmem:[#allocation31_spill] sm:$0xff] %v9604_v57  ;;  %v394_v55 = vsel %vm75_vm0, %v9604_v57, 0.0  ;;  %v423_v57 = vsel %vm422_vm3, %v9612_v45, 0.0  ;;  %v8967_v41 = vpop.f32.mrf.mxu1 }
  0xd4   :  { %v383_v53 = vrot.slane %v382_v61, 2  ;;  %v389_v51 = vadd.f32 %v388_v59, %v387_v63  ;;  %v395_v49 = vrot.slane %v394_v55, 4  ;;  %v9608_v47 = vpop.f32.mrf.mxu0  ;;  %v424_v35 = vrot.slane %v423_v57, 4  ;;  %v9625_v41 = vld [vmem:[%s16345_s2 + $0x278] sm:$0xff] }
  0xd5   :  { %16574 = vst [vmem:[#allocation32_spill] sm:$0xff] %v9608_v47  ;;  %v401_v8 = vsel %vm75_vm0, %v9608_v47, 0.0 }
  0xd6   :  { %v384_v43 = vadd.f32 %v383_v53, %v382_v61  ;;  %v390_v1 = vrot.slane %v389_v51, 2  ;;  %v396_v4 = vadd.f32 %v395_v49, %v394_v55  ;;  %v402_v6 = vrot.slane %v401_v8, 4  ;;  %v9614_v42 = vpop.f32.mrf.mxu0 }
  0xd7   :  { %v425_v33 = vadd.f32 %v424_v35, %v423_v57  ;;  %v9635_v35 = vld [vmem:[%s16345_s2 + $0x270] sm:$0xff]  ;;  %v9664_v57 = vld [vmem:[%s16345_s2 + $0x260] sm:$0xff] }
  0xd8   :  { %v391_v59 = vadd.f32 %v390_v1, %v389_v51  ;;  %v397_v63 = vrot.slane %v396_v4, 2  ;;  %v403_v40 = vadd.f32 %v402_v6, %v401_v8  ;;  %v9618_v39 = vpop.f32.mrf.mxu0  ;;  %v385_v37 = vrot.slane %v384_v43, 1  ;;  %v9630_v8 = vld [vmem:[%s16345_s2 + $0x2f0] sm:$0xff] }
  0xd9   :  { %v415_v47 = vsel %vm75_vm0, %v9618_v39, 0.0  ;;  %v426_v1 = vrot.slane %v425_v33, 2 }
  0xda   :  { %v398_v53 = vadd.f32 %v397_v63, %v396_v4  ;;  %v404_v61 = vrot.slane %v403_v40, 2  ;;  %v392_v49 = vrot.slane %v391_v59, 1  ;;  %v416_v55 = vrot.slane %v415_v47, 4  ;;  %v9669_v63 = vld [vmem:[%s16345_s2 + $0x300] sm:$0xff] }
  0xdb   :  { %v386_v45 = vadd.f32 %v385_v37, %v384_v43 }
  0xdc   :  { %v399_v31 = vrot.slane %v398_v53, 1  ;;  %v405_v29 = vadd.f32 %v404_v61, %v403_v40  ;;  %v393_v27 = vadd.f32 %v392_v49, %v391_v59  ;;  %v417_v51 = vadd.f32 %v416_v55, %v415_v47  ;;  %v9682_v61 = vld [vmem:[%s16345_s2 + $0x258] sm:$0xff] }
  0xdd   :  { %v427_v40 = vadd.f32 %v426_v1, %v425_v33  ;;  %v9652_v33 = vld [vmem:[%s16345_s2 + $0x308] sm:$0xff]  ;;  %v9691_v1 = vld [vmem:[%s16345_s2 + $0x2d0] sm:$0xff] }
  0xde   :  { %596 = vmatprep.mubr.f32.mxu0 %v393_v27  ;;  %v406_v4 = vrot.slane %v405_v29, 1  ;;  %v400_v6 = vadd.f32 %v399_v31, %v398_v53  ;;  %v418_v37 = vrot.slane %v417_v51, 2  ;;  %v9641_v27 = vld [vmem:[%s16345_s2 + $0x2e8] sm:$0xff]  ;;  %v9675_v53 = vld [vmem:[%s16345_s2 + $0x2d8] sm:$0xff] }
  0xdf   :  { %597 = vmatmul.mubr.f32.vlgmr.msra.gmra.mxu0 %v386_v45  ;;  %v9647_v31 = vld [vmem:[%s16345_s2 + $0x268] sm:$0xff]  ;;  %v428_v47 = vrot.slane %v427_v40, 1 }
  0xe0   :  { %8338 = vmatpush3.msra.mxu0 %v9625_v41  ;;  %v407_v43 = vadd.f32 %v406_v4, %v405_v29  ;;  %v419_v45 = vadd.f32 %v418_v37, %v417_v51  ;;  %v9658_v29 = vld [vmem:[%s16345_s2 + $0x2e0] sm:$0xff]  ;;  %v408_v51 = vsel %vm75_vm0, %v9614_v42, 0.0  ;;  %v9698_v4 = vld [vmem:[%s16345_s2 + $0x250] sm:$0xff] }
  0xe1   :  { %8339 = vmatprep.subr.mxu0 %v9630_v8  ;;  %v429_v49 = vadd.f32 %v428_v47, %v427_v40  ;;  %v409_v37 = vrot.slane %v408_v51, 4  ;;  %v9712_v40 = vld [vmem:[%s16345_s2 + $0x248] sm:$0xff]  ;;  %v9732_v47 = vld [vmem:[%s16345_s2 + $0x2b8] sm:$0xff] }
  0xe2   :  { %8340 = vmatpush3.msra.mxu0 %v9635_v35  ;;  %666 = vmatprep.mubr.f32.mxu1 %v407_v43  ;;  %v420_v59 = vrot.slane %v419_v45, 1  ;;  %16576 = vst [vmem:[#allocation34_spill] sm:$0xff] %v9712_v40  ;;  %v9719_v43 = vld [vmem:[%s16345_s2 + $0x2c0] sm:$0xff]  ;;  %16579 = vst [vmem:[#allocation37_spill] sm:$0xff] %v9732_v47 }
  0xe3   :  { %8341 = vmatprep.subr.mxu0 %v9641_v27  ;;  %667 = vmatmul.mubr.f32.vlgmr.msra.gmra.mxu1 %v400_v6  ;;  %v9704_v6 = vld [vmem:[%s16345_s2 + $0x2c8] sm:$0xff]  ;;  %16577 = vst [vmem:[#allocation35_spill] sm:$0xff] %v9719_v43 }
  0xe4   :  { %8342 = vmatpush3.msra.mxu0 %v9647_v31  ;;  %8969 = vmatpush3.msra.mxu1 %v9652_v33  ;;  %v421_v55 = vadd.f32 %v420_v59, %v419_v45  ;;  %v9726_v45 = vld [vmem:[%s16345_s2 + $0x240] sm:$0xff]  ;;  %v410_v59 = vadd.f32 %v409_v37, %v408_v51  ;;  %v9750_v51 = vld [vmem:[%s16345_s2 + $0x230] sm:$0xff]  ;;  %v9756_v37 = vld [vmem:[%s16345_s2 + $0x2a8] sm:$0xff] }
  0xe5   :  { %8343 = vmatprep.subr.mxu0 %v9658_v29  ;;  %8970 = vmatprep.subr.mxu1 %v16570_v10  ;;  %16578 = vst [vmem:[#allocation36_spill] sm:$0xff] %v9726_v45  ;;  %16582 = vst [vmem:[#allocation40_spill] sm:$0xff] %v9750_v51 }
  0xe6   :  { %8344 = vmatpush3.msra.mxu0 %v9664_v57  ;;  %8971 = vmatpush3.msra.mxu1 %v9669_v63  ;;  %16583 = vst [vmem:[#allocation41_spill] sm:$0xff] %v9756_v37 }
  0xe7   :  { %8345 = vmatprep.subr.mxu0 %v9675_v53  ;;  %736 = vmatprep.mubr.f32.mxu0 %v421_v55  ;;  %v9744_v55 = vld [vmem:[%s16345_s2 + $0x2b0] sm:$0xff] }
  0xe8   :  { %8346 = vmatpush3.msra.mxu0 %v9682_v61  ;;  %8972 = vmatprep.mubr.msk.f32.mxu1 %vm9051_vm1, %v16570_v10  ;;  %16581 = vst [vmem:[#allocation39_spill] sm:$0xff] %v9744_v55 }
  0xe9   :  { %8347 = vmatprep.subr.mxu0 %v9691_v1  ;;  %8973 = vmatmul.mubr.msk.f32.vlgmr.msra.gmra.mxu1 %vm528_vm4, %v429_v49  ;;  %v9738_v49 = vld [vmem:[%s16345_s2 + $0x238] sm:$0xff] }
  0xea   :  { %8348 = vmatpush3.msra.mxu0 %v9698_v4  ;;  %895 = vmatprep.mubr.f32.mxu1 %v16570_v10  ;;  %16580 = vst [vmem:[#allocation38_spill] sm:$0xff] %v9738_v49 }
  0xeb   :  { %8349 = vmatprep.subr.mxu0 %v9704_v6 }
  0xec   :  { %8350 = vmatpush3.msra.mxu0 %v9712_v40  ;;  %v9786_v40 = vld [vmem:[%s16345_s2 + $0x218] sm:$0xff] }
  0xed   :  { %8351 = vmatprep.subr.mxu0 %v9719_v43  ;;  %v9762_v43 = vld [vmem:[%s16345_s2 + $0x228] sm:$0xff]  ;;  %16587 = vst [vmem:[#allocation45_spill] sm:$0xff] %v9786_v40 }
  0xee   :  { %8352 = vmatpush3.msra.mxu0 %v9726_v45  ;;  %v411_v45 = vrot.slane %v410_v59, 2 }
  0xef   :  { %8353 = vmatprep.subr.mxu0 %v9732_v47  ;;  %v9768_v47 = vld [vmem:[%s16345_s2 + $0x2a0] sm:$0xff] }
  0xf0   :  { %8354 = vmatpush3.msra.mxu0 %v9738_v49  ;;  %16584 = vst [vmem:[#allocation42_spill] sm:$0xff] %v9768_v47  ;;  %v9774_v49 = vld [vmem:[%s16345_s2 + $0x220] sm:$0xff] }
  0xf1   :  { %8355 = vmatprep.subr.mxu0 %v9744_v55  ;;  %16585 = vst [vmem:[#allocation43_spill] sm:$0xff] %v9774_v49  ;;  %v9780_v55 = vld [vmem:[%s16345_s2 + $0x298] sm:$0xff] }
  0xf2   :  { %8356 = vmatpush3.msra.mxu0 %v9750_v51  ;;  %16586 = vst [vmem:[#allocation44_spill] sm:$0xff] %v9780_v55  ;;  %v412_v51 = vadd.f32 %v411_v45, %v410_v59  ;;  %v9798_v45 = vld [vmem:[%s16345_s2 + $0x210] sm:$0xff]  ;;  %v9804_v59 = vld [vmem:[%s16345_s2 + $0x288] sm:$0xff] }
  0xf3   :  { %8357 = vmatprep.subr.mxu0 %v9756_v37  ;;  %v9792_v37 = vld [vmem:[%s16345_s2 + $0x290] sm:$0xff] }
  0xf4   :  { %8358 = vmatpush3.msra.mxu0 %v9762_v43  ;;  %16588 = vst [vmem:[#allocation46_spill] sm:$0xff] %v9792_v37 }
  0xf5   :  { %8359 = vmatprep.subr.mxu0 %v9768_v47  ;;  %v9810_v47 = vld [vmem:[%s16345_s2 + $0x208] sm:$0xff] }
  0xf6   :  { %8360 = vmatpush3.msra.mxu0 %v9774_v49  ;;  %v413_v49 = vrot.slane %v412_v51, 1 }
  0xf7   :  { %8361 = vmatprep.subr.mxu0 %v9780_v55  ;;  %v9816_v55 = vld [vmem:[%s16345_s2 + $0x280] sm:$0xff] }
  0xf8   :  { %8362 = vmatpush3.msra.mxu0 %v9786_v40  ;;  %v9822_v40 = vld [vmem:[%s16345_s2 + $0x200] sm:$0xff] }
  0xf9   :  { %8363 = vmatprep.subr.mxu0 %v9792_v37  ;;  %v414_v37 = vadd.f32 %v413_v49, %v412_v51  ;;  %v16592_v49 = vld [vmem:[#allocation5_spill] sm:$0xff]  ;;  %v16593_v51 = vld [vmem:[#allocation6_spill] sm:$0xff] }
  0xfa   :  { %8364 = vmatpush3.msra.mxu0 %v9798_v45 }
  0xfb   :  { %8365 = vmatprep.subr.mxu0 %v9804_v59 }
  0xfc   :  { %8366 = vmatpush3.msra.mxu0 %v9810_v47 }
  0xfd   :  { %8367 = vmatprep.subr.mxu0 %v9816_v55 }
  0xfe   :  { %8368 = vmatpush3.msra.mxu0 %v9822_v40 }
  0xff   :  { %737 = vmatmul.mubr.f32.vlgmr.msra.gmra.mxu0 %v414_v37  ;;  %8413 = vmatprep.subr.mxu0 %v9216_v18  ;;  %v9863_v18 = vld [vmem:[%s16346_s3 + $0x40] sm:$0xff]  ;;  %v16600_v37 = vld [vmem:[#allocation13_spill] sm:$0xff] }
 0x100   :  { %8414 = vmatpush3.msra.mxu0 %v9227_v20  ;;  %859 = vmatprep.subr.mxu1 %v9863_v18  ;;  %v9869_v20 = vld [vmem:[%s16346_s3 + $0x38] sm:$0xff] }
 0x101   :  { %8415 = vmatprep.subr.mxu0 %v9239_v22  ;;  %860 = vmatpush1.msra.mxu1 %v9869_v20  ;;  %v9881_v22 = vld [vmem:[%s16346_s3] sm:$0xff] }
 0x102   :  { %8416 = vmatpush3.msra.mxu0 %v9251_v24  ;;  %v9887_v24 = vld [vmem:[%s16346_s3 + $0x50] sm:$0xff] }
 0x103   :  { %8417 = vmatprep.subr.mxu0 %v9263_v26 }
 0x104   :  { %8418 = vmatpush3.msra.mxu0 %v9275_v28 }
 0x105   :  { %8419 = vmatprep.subr.mxu0 %v9287_v30 }
 0x106   :  { %8420 = vmatpush3.msra.mxu0 %v9299_v32 }
 0x107   :  { %8421 = vmatprep.subr.mxu0 %v9311_v34 }
 0x108   :  { %8422 = vmatpush3.msra.mxu0 %v9323_v36 }
 0x109   :  { %8423 = vmatprep.subr.mxu0 %v9335_v38 }
 0x10a   :  { %8424 = vmatpush3.msra.mxu0 %v9375_v44 }
 0x10b   :  { %8425 = vmatprep.subr.mxu0 %v9387_v46 }
 0x10c   :  { %8426 = vmatpush3.msra.mxu0 %v9399_v48 }
 0x10d   :  { %8427 = vmatprep.subr.mxu0 %v9411_v50 }
 0x10e   :  { %8428 = vmatpush3.msra.mxu0 %v9423_v52 }
 0x10f   :  { %8429 = vmatprep.subr.mxu0 %v9435_v54 }
 0x110   :  { %8430 = vmatpush3.msra.mxu0 %v9447_v56 }
 0x111   :  { %8431 = vmatprep.subr.mxu0 %v9459_v58 }
 0x112   :  { %8432 = vmatpush3.msra.mxu0 %v9471_v60  ;;  %v9893_v60 = vld [vmem:[%s16346_s3 + $0x48] sm:$0xff] }
 0x113   :  { %8433 = vmatprep.subr.mxu0 %v9483_v62  ;;  %v9898_v62 = vld [vmem:[%s16346_s3 + $0x18] sm:$0xff] }
 0x114   :  { %8434 = vmatpush3.msra.mxu0 %v9495_v0  ;;  %v9904_v0 = vld [vmem:[%s16346_s3 + $0x10] sm:$0xff] }
 0x115   :  { %8435 = vmatprep.subr.mxu0 %v9507_v2  ;;  %v9911_v2 = vld [vmem:[%s16346_s3 + $0x60] sm:$0xff] }
 0x116   :  { %8436 = vmatpush3.msra.mxu0 %v9519_v5  ;;  %v9917_v5 = vld [vmem:[%s16346_s3 + $0x58] sm:$0xff] }
 0x117   :  { %8437 = vmatprep.subr.mxu0 %v9531_v7  ;;  %v9923_v7 = vld [vmem:[%s16346_s3 + $0x28] sm:$0xff] }
 0x118   :  { %8438 = vmatpush3.msra.mxu0 %v9543_v9  ;;  %v9930_v9 = vld [vmem:[%s16346_s3 + $0x20] sm:$0xff] }
 0x119   :  { %8439 = vmatprep.subr.mxu0 %v9555_v11  ;;  %v9938_v11 = vld [vmem:[%s16346_s3 + $0x68] sm:$0xff] }
 0x11a   :  { %8440 = vmatpush3.msra.mxu0 %v9562_v12  ;;  %v9946_v12 = vld [vmem:[%s16346_s3 + $0x30] sm:$0xff] }
 0x11b   :  { %8441 = vmatprep.subr.mxu0 %v9574_v14  ;;  %v16590_v14 = vld [vmem:[#allocation3_spill] sm:$0xff] }
 0x11c   :  { %8442 = vmatpush3.msra.mxu0 %v9580_v15  ;;  %v16591_v15 = vld [vmem:[#allocation4_spill] sm:$0xff] }
 0x11d   :  { %8443 = vmatprep.subr.mxu0 %v9586_v3  ;;  %v9875_v3 = vld [vmem:[%s16346_s3 + $0x8] sm:$0xff] }
 0x11e   :  { %8444 = vmatpush3.msra.mxu0 %v9592_v13  ;;  %861 = vmatprep.subr.mxu1 %v9875_v3  ;;  %v16589_v13 = vld [vmem:[#allocation2_spill] sm:$0xff] }
 0x11f   :  { %8982 = vmatprep.subr.mxu0 %v16570_v10  ;;  %862 = vmatpush1.msra.mxu1 %v9881_v22 }
 0x120   :  { %930 = vmatprep.subr.mxu1 %v9887_v24 }
 0x19f   :  { %v8299_v34 = vpop.f32.mrf.mxu0 }
 0x1a1   :  { %v8300_v36 = vpop.f32.mrf.mxu0 }
 0x1a2   :  { %v8301_v46 = vadd.f32 %v8300_v36, %v8299_v34  ;;  %v16605_v34 = vld [vmem:[#allocation18_spill] sm:$0xff]  ;;  %v16606_v36 = vld [vmem:[#allocation19_spill] sm:$0xff] }
 0x1a3   :  { %v8334_v26 = vpop.f32.mrf.mxu1 }
 0x1a5   :  { %v8335_v28 = vpop.f32.mrf.mxu1 }
 0x1a6   :  { %v8336_v38 = vadd.f32 %v8335_v28, %v8334_v26  ;;  %v16601_v26 = vld [vmem:[#allocation14_spill] sm:$0xff]  ;;  %v16602_v28 = vld [vmem:[#allocation15_spill] sm:$0xff] }
 0x1a8   :  { %v669_v50 = vadd.f32 %v8336_v38, %v8301_v46  ;;  %v16607_v38 = vld [vmem:[#allocation20_spill] sm:$0xff]  ;;  %v16609_v46 = vld [vmem:[#allocation22_spill] sm:$0xff] }
 0x1a9   :  { %v808_v30 = vpop.f32.mrf.mxu1 }
 0x1ab   :  { %v8974_v32 = vpop.f32.mrf.mxu1 }
 0x1ac   :  { %v16604_v32 = vld [vmem:[#allocation17_spill] sm:$0xff] }
 0x1bf   :  { %v8369_v44 = vpop.f32.mrf.mxu0 }
 0x1c1   :  { %v8370_v48 = vpop.f32.mrf.mxu0 }
 0x1c2   :  { %v8371_v52 = vadd.f32 %v8370_v48, %v8369_v44  ;;  %v16608_v44 = vld [vmem:[#allocation21_spill] sm:$0xff]  ;;  %v16610_v48 = vld [vmem:[#allocation23_spill] sm:$0xff] }
 0x1c4   :  { %v739_v54 = vadd.f32 %v8371_v52, %v669_v50  ;;  %v16611_v50 = vld [vmem:[#allocation24_spill] sm:$0xff]  ;;  %v16612_v52 = vld [vmem:[#allocation25_spill] sm:$0xff] }
 0x1c6   :  { %v809_v56 = vadd.f32 %v808_v30, %v739_v54  ;;  %v16603_v30 = vld [vmem:[#allocation16_spill] sm:$0xff]  ;;  %v16613_v54 = vld [vmem:[#allocation26_spill] sm:$0xff] }
 0x1c8   :  { %v813_v58 = vmul.f32 0.010204081, %v809_v56  ;;  %v16614_v56 = vld [vmem:[#allocation27_spill] sm:$0xff] }
 0x1ca   :  { %8212 = vmatmul.mubr.msk.f32.vlgmr.msra.gmra.mxu1 %vm528_vm4, %v813_v58 }
 0x1cb   :  { %931 = vmatpush1.msra.mxu1 %v9893_v60  ;;  %966 = vmatprep.mubr.f32.mxu1 %v16570_v10 }
 0x1cc   :  { %932 = vmatprep.subr.mxu1 %v9898_v62 }
 0x1cd   :  { %933 = vmatpush1.msra.mxu1 %v9904_v0 }
 0x1ce   :  { %8213 = vmatmul.mubr.msk.f32.vlgmr.msra.gmra.mxu1 %vm528_vm4, %v813_v58  ;;  %1001 = vmatprep.subr.mxu1 %v9911_v2 }
 0x1cf   :  { %1002 = vmatpush1.msra.mxu1 %v9917_v5  ;;  %1037 = vmatprep.mubr.f32.mxu1 %v16570_v10 }
 0x1d0   :  { %1003 = vmatprep.subr.mxu1 %v9923_v7 }
 0x1d1   :  { %1004 = vmatpush1.msra.mxu1 %v9930_v9 }
 0x1d2   :  { %8214 = vmatmul.mubr.msk.f32.vlgmr.msra.gmra.mxu1 %vm528_vm4, %v813_v58  ;;  %8975 = vmatprep.subr.mxu1 %v16570_v10 }
 0x1d3   :  { %8976 = vmatpush3.msra.mxu1 %v9938_v11  ;;  %8979 = vmatprep.mubr.msk.f32.mxu1 %vm9051_vm1, %v16570_v10 }
 0x1d4   :  { %8977 = vmatprep.subr.mxu1 %v16570_v10 }
 0x1d5   :  { %8978 = vmatpush3.msra.mxu1 %v9946_v12 }
 0x1d6   :  { %8980 = vmatmul.mubr.msk.f32.vlgmr.msra.gmra.mxu1 %vm528_vm4, %v813_v58  ;;  %8378 = vmatprep.subr.mxu1 %v9206_v16  ;;  %v16594_v16 = vld [vmem:[#allocation7_spill] sm:$0xff]  ;;  %v16615_v58 = vld [vmem:[#allocation28_spill] sm:$0xff] }
 0x1d7   :  { %8379 = vmatpush3.msra.mxu1 %v9211_v17  ;;  %v16595_v17 = vld [vmem:[#allocation8_spill] sm:$0xff] }
 0x1d8   :  { %8380 = vmatprep.subr.mxu1 %v9222_v19  ;;  %v16596_v19 = vld [vmem:[#allocation9_spill] sm:$0xff] }
 0x1d9   :  { %8381 = vmatpush3.msra.mxu1 %v9234_v21  ;;  %v16597_v21 = vld [vmem:[#allocation10_spill] sm:$0xff] }
 0x1da   :  { %8382 = vmatprep.subr.mxu1 %v9245_v23  ;;  %v16598_v23 = vld [vmem:[#allocation11_spill] sm:$0xff] }
 0x1db   :  { %8383 = vmatpush3.msra.mxu1 %v9257_v25  ;;  %v16599_v25 = vld [vmem:[#allocation12_spill] sm:$0xff] }
 0x1dc   :  { %8384 = vmatprep.subr.mxu1 %v16589_v13  ;;  %v1114_v13 = vlaneseq }
 0x1dd   :  { %8385 = vmatpush3.msra.mxu1 %v16590_v14 }
 0x1de   :  { %8386 = vmatprep.subr.mxu1 %v16591_v15  ;;  %v9987_v14 = vshrl.u32 %v1114_v13, 7 }
 0x1df   :  { %8387 = vmatpush3.msra.mxu1 %v16592_v49 }
 0x1e0   :  { %8388 = vmatprep.subr.mxu1 %v16593_v51  ;;  %16616 = vst [vmem:[#allocation2_spill] sm:$0xff] %v9987_v14  ;;  %v9990_v15 = vsub.s32 0, %v9987_v14 }
 0x1e1   :  { %8389 = vmatpush3.msra.mxu1 %v16594_v16 }
 0x1e2   :  { %8390 = vmatprep.subr.mxu1 %v16595_v17  ;;  %16617 = vst [vmem:[#allocation3_spill] sm:$0xff] %v9990_v15  ;;  %v16618_v17 = vld [vmem:[#allocation29_spill] sm:$0xff] }
 0x1e3   :  { %8391 = vmatpush3.msra.mxu1 %v16596_v19 }
 0x1e4   :  { %8392 = vmatprep.subr.mxu1 %v16597_v21 }
 0x1e5   :  { %8393 = vmatpush3.msra.mxu1 %v16598_v23 }
 0x1e6   :  { %8394 = vmatprep.subr.mxu1 %v16599_v25 }
 0x1e7   :  { %8395 = vmatpush3.msra.mxu1 %v16600_v37  ;;  %v16620_v37 = vld [vmem:[#allocation30_spill] sm:$0xff] }
 0x1e8   :  { %8396 = vmatprep.subr.mxu1 %v16601_v26 }
 0x1e9   :  { %8397 = vmatpush3.msra.mxu1 %v16602_v28 }
 0x1ea   :  { %8398 = vmatprep.subr.mxu1 %v16603_v30 }
 0x1eb   :  { %8399 = vmatpush3.msra.mxu1 %v16604_v32 }
 0x1ec   :  { %8400 = vmatprep.subr.mxu1 %v16605_v34 }
 0x1ed   :  { %8401 = vmatpush3.msra.mxu1 %v16606_v36  ;;  %v16622_v36 = vld [vmem:[#allocation31_spill] sm:$0xff] }
 0x1ee   :  { %8402 = vmatprep.subr.mxu1 %v16607_v38 }
 0x1ef   :  { %8403 = vmatpush3.msra.mxu1 %v16608_v44 }
 0x1f0   :  { %8404 = vmatprep.subr.mxu1 %v16609_v46 }
 0x1f1   :  { %8405 = vmatpush3.msra.mxu1 %v16610_v48 }
 0x1f2   :  { %8406 = vmatprep.subr.mxu1 %v16611_v50 }
 0x1f3   :  { %8407 = vmatpush3.msra.mxu1 %v16612_v52 }
 0x1f4   :  { %8408 = vmatprep.subr.mxu1 %v16613_v54  ;;  %v16624_v54 = vld [vmem:[#allocation32_spill] sm:$0xff] }
 0x1f5   :  { %8409 = vmatpush3.msra.mxu1 %v16614_v56 }
 0x1f6   :  { %8448 = vmatprep.subr.mxu1 %v16615_v58 }
 0x28a   :  { %v897_v49 = vpop.f32.mrf.mxu1 }
 0x28b   :  { %v1117_v51 = vrot.slane %v897_v49, %v9990_v15 }
 0x28c   :  { %v899_v16 = vpop.f32.mrf.mxu1 }
 0x28d   :  { %v9994_v19 = vsub.f32 %v16618_v17, %v1117_v51  ;;  %v1121_v21 = vrot.slane %v899_v16, %v9990_v15 }
 0x28e   :  { %v968_v23 = vpop.f32.mrf.mxu1 }
 0x28f   :  { %16619 = vst [vmem:[#allocation4_spill] sm:$0xff] %v9994_v19  ;;  %v1149_v25 = vmul.f32 %v9994_v19, %v9994_v19  ;;  %v10000_v26 = vsub.f32 %v16620_v37, %v1121_v21  ;;  %v1125_v28 = vrot.slane %v968_v23, %v9990_v15 }
 0x290   :  { %v970_v30 = vpop.f32.mrf.mxu1 }
 0x291   :  { %16621 = vst [vmem:[#allocation5_spill] sm:$0xff] %v10000_v26  ;;  %v1156_v32 = vsel %vm75_vm0, %v1149_v25, 0.0  ;;  %v1150_v34 = vmul.f32 %v10000_v26, %v10000_v26  ;;  %v10007_v38 = vsub.f32 %v16622_v36, %v1125_v28  ;;  %v1129_v44 = vrot.slane %v970_v30, %v9990_v15 }
 0x292   :  { %v1157_v46 = vrot.slane %v1156_v32, 4  ;;  %v1039_v48 = vpop.f32.mrf.mxu1 }
 0x293   :  { %16623 = vst [vmem:[#allocation6_spill] sm:$0xff] %v10007_v38  ;;  %v1163_v50 = vsel %vm75_vm0, %v1150_v34, 0.0  ;;  %v1151_v52 = vmul.f32 %v10007_v38, %v10007_v38  ;;  %v10014_v56 = vsub.f32 %v16624_v54, %v1129_v44 }
 0x294   :  { %v1158_v58 = vadd.f32 %v1157_v46, %v1156_v32  ;;  %v1164_v13 = vrot.slane %v1163_v50, 4  ;;  %v1041_v49 = vpop.f32.mrf.mxu1 }
 0x295   :  { %16625 = vst [vmem:[#allocation7_spill] sm:$0xff] %v10014_v56  ;;  %v1170_v51 = vsel %vm75_vm0, %v1151_v52, 0.0  ;;  %v1152_v16 = vmul.f32 %v10014_v56, %v10014_v56  ;;  %v1137_v17 = vrot.slane %v1041_v49, %v9990_v15  ;;  %v16627_v49 = vld [vmem:[#allocation33_spill] sm:$0xff] }
 0x296   :  { %v1159_v21 = vrot.slane %v1158_v58, 2  ;;  %v1165_v23 = vadd.f32 %v1164_v13, %v1163_v50  ;;  %v1171_v25 = vrot.slane %v1170_v51, 4  ;;  %v1110_v37 = vpop.f32.mrf.mxu1 }
 0x297   :  { %v1177_v28 = vsel %vm75_vm0, %v1152_v16, 0.0  ;;  %v10022_v30 = vsub.f32 %v9618_v39, %v1137_v17  ;;  %v1141_v32 = vrot.slane %v1110_v37, %v9990_v15 }
 0x298   :  { %v1172_v34 = vadd.f32 %v1171_v25, %v1170_v51  ;;  %v1178_v36 = vrot.slane %v1177_v28, 4  ;;  %v8981_v44 = vpop.f32.mrf.mxu1  ;;  %v1166_v46 = vrot.slane %v1165_v23, 2  ;;  %v1160_v52 = vadd.f32 %v1159_v21, %v1158_v58 }
 0x299   :  { %16626 = vst [vmem:[#allocation8_spill] sm:$0xff] %v10022_v30  ;;  %v1154_v54 = vmul.f32 %v10022_v30, %v10022_v30  ;;  %v10028_v56 = vsub.f32 %v16627_v49, %v1141_v32  ;;  %v1133_v51 = vrot.slane %v1039_v48, %v9990_v15 }
 0x29a   :  { %v1173_v50 = vrot.slane %v1172_v34, 2  ;;  %v1179_v13 = vadd.f32 %v1178_v36, %v1177_v28  ;;  %v1167_v38 = vadd.f32 %v1166_v46, %v1165_v23  ;;  %v1161_v17 = vrot.slane %v1160_v52, 1 }
 0x29b   :  { %16628 = vst [vmem:[#allocation9_spill] sm:$0xff] %v10028_v56  ;;  %v1191_v16 = vsel %vm75_vm0, %v1154_v54, 0.0  ;;  %v1155_v39 = vmul.f32 %v10028_v56, %v10028_v56  ;;  %v10036_v23 = vsub.f32 %v9614_v42, %v1133_v51  ;;  %v2160_v51 = vld [vmem:[%s16347_s6 + $0x938] sm:$0xff] }
 0x29c   :  { %v1192_v25 = vrot.slane %v1191_v16, 4  ;;  %v1168_v37 = vrot.slane %v1167_v38, 1  ;;  %v1180_v58 = vrot.slane %v1179_v13, 2  ;;  %v1174_v44 = vadd.f32 %v1173_v50, %v1172_v34 }
 0x29d   :  { %v1198_v21 = vsel %vm422_vm3, %v1155_v39, 0.0  ;;  %v1162_v26 = vadd.f32 %v1161_v17, %v1160_v52  ;;  %v2167_v39 = vld [vmem:[%s16347_s6 + $0x970] sm:$0xff]  ;;  %v2166_v17 = vld [vmem:[%s16347_s6 + $0x968] sm:$0xff] }
 0x29e   :  { %v1193_v30 = vadd.f32 %v1192_v25, %v1191_v16  ;;  %v1199_v32 = vrot.slane %v1198_v21, 4  ;;  %v1169_v49 = vadd.f32 %v1168_v37, %v1167_v38  ;;  %v1181_v28 = vadd.f32 %v1180_v58, %v1179_v13  ;;  %v2194_v13 = vld [vmem:[%s16347_s6 + $0xa48] sm:$0xff]  ;;  %v2173_v16 = vld [vmem:[%s16347_s6 + $0x9a0] sm:$0xff]  ;;  %v2159_v25 = vld [vmem:[%s16347_s6 + $0x930] sm:$0xff] }
 0x29f   :  { %v1175_v46 = vrot.slane %v1174_v44, 1  ;;  %v1153_v38 = vmul.f32 %v10036_v23, %v10036_v23  ;;  %v2153_v37 = vld [vmem:[%s16347_s6 + $0x900] sm:$0xff]  ;;  %v2152_v58 = vld [vmem:[%s16347_s6 + $0x8f8] sm:$0xff] }
 0x2a0   :  { %v1200_v36 = vadd.f32 %v1199_v32, %v1198_v21  ;;  %1272 = vmatprep.mubr.f32.mxu1 %v1169_v49  ;;  %v1194_v54 = vrot.slane %v1193_v30, 2  ;;  %v1182_v48 = vrot.slane %v1181_v28, 1  ;;  %v2146_v21 = vld [vmem:[%s16347_s6 + $0x8c8] sm:$0xff]  ;;  %v2139_v32 = vld [vmem:[%s16347_s6 + $0x890] sm:$0xff] }
 0x2a1   :  { %1273 = vmatmul.mubr.f32.vlgmr.msra.gmra.mxu1 %v1162_v26  ;;  %v1176_v42 = vadd.f32 %v1175_v46, %v1174_v44  ;;  %v2145_v44 = vld [vmem:[%s16347_s6 + $0x8c0] sm:$0xff]  ;;  %v2138_v49 = vld [vmem:[%s16347_s6 + $0x888] sm:$0xff] }
 0x2a2   :  { %v1201_v56 = vrot.slane %v1200_v36, 2  ;;  %8449 = vmatpush3.msra.mxu1 %v9625_v41  ;;  %v1195_v19 = vadd.f32 %v1194_v54, %v1193_v30  ;;  %v1183_v34 = vadd.f32 %v1182_v48, %v1181_v28  ;;  %v2132_v28 = vld [vmem:[%s16347_s6 + $0x858] sm:$0xff]  ;;  %v2125_v46 = vld [vmem:[%s16347_s6 + $0x820] sm:$0xff]  ;;  %v2118_v48 = vld [vmem:[%s16347_s6 + $0x7e8] sm:$0xff] }
 0x2a3   :  { %8450 = vmatprep.subr.mxu1 %v9630_v8  ;;  %v1184_v8 = vsel %vm75_vm0, %v1153_v38, 0.0  ;;  %v2124_v54 = vld [vmem:[%s16347_s6 + $0x818] sm:$0xff]  ;;  %v2111_v38 = vld [vmem:[%s16347_s6 + $0x7b0] sm:$0xff] }
 0x2a4   :  { %v1202_v52 = vadd.f32 %v1201_v56, %v1200_v36  ;;  %8451 = vmatpush3.msra.mxu1 %v9635_v35  ;;  %v1196_v50 = vrot.slane %v1195_v19, 1  ;;  %1342 = vmatprep.mubr.f32.mxu0 %v1183_v34  ;;  %v1185_v35 = vrot.slane %v1184_v8, 4  ;;  %v2195_v56 = vld [vmem:[%s16347_s6 + $0xa50] sm:$0xff]  ;;  %v2117_v34 = vld [vmem:[%s16347_s6 + $0x7e0] sm:$0xff] }
 0x2a5   :  { %8452 = vmatprep.subr.mxu1 %v9641_v27  ;;  %1343 = vmatmul.mubr.f32.vlgmr.msra.gmra.mxu0 %v1176_v42  ;;  %v16629_v27 = vld [vmem:[#allocation34_spill] sm:$0xff]  ;;  %v2131_v36 = vld [vmem:[%s16347_s6 + $0x850] sm:$0xff]  ;;  %v2104_v42 = vld [vmem:[%s16347_s6 + $0x778] sm:$0xff] }
 0x2a6   :  { %v1203_v26 = vrot.slane %v1202_v52, 1  ;;  %8453 = vmatpush3.msra.mxu1 %v9647_v31  ;;  %v1197_v41 = vadd.f32 %v1196_v50, %v1195_v19  ;;  %8983 = vmatpush3.msra.mxu0 %v9652_v33  ;;  %v1186_v31 = vadd.f32 %v1185_v35, %v1184_v8  ;;  %v16630_v33 = vld [vmem:[#allocation35_spill] sm:$0xff]  ;;  %v16641_v19 = vld [vmem:[#allocation46_spill] sm:$0xff]  ;;  %v2103_v50 = vld [vmem:[%s16347_s6 + $0x770] sm:$0xff] }
 0x2a7   :  { %8454 = vmatprep.subr.mxu1 %v9658_v29  ;;  %8984 = vmatprep.subr.mxu0 %v16570_v10  ;;  %v16631_v29 = vld [vmem:[#allocation36_spill] sm:$0xff]  ;;  %v2090_v8 = vld [vmem:[%s16347_s6 + $0x708] sm:$0xff] }
 0x2a8   :  { %v1204_v30 = vadd.f32 %v1203_v26, %v1202_v52  ;;  %8455 = vmatpush3.msra.mxu1 %v9664_v57  ;;  %1412 = vmatprep.mubr.f32.mxu1 %v1197_v41  ;;  %v16632_v57 = vld [vmem:[#allocation37_spill] sm:$0xff]  ;;  %v2110_v52 = vld [vmem:[%s16347_s6 + $0x7a8] sm:$0xff]  ;;  %v2097_v26 = vld [vmem:[%s16347_s6 + $0x740] sm:$0xff] }
 0x2a9   :  { %8456 = vmatprep.subr.mxu1 %v9675_v53  ;;  %8985 = vmatpush3.msra.mxu0 %v9669_v63  ;;  %v16633_v63 = vld [vmem:[#allocation38_spill] sm:$0xff]  ;;  %v1187_v53 = vrot.slane %v1186_v31, 2  ;;  %v2096_v41 = vld [vmem:[%s16347_s6 + $0x738] sm:$0xff]  ;;  %v2307_v35 = vld [vmem:[%s16347_s6 + $0xdd0] sm:$0xff] }
 0x2aa   :  { %8457 = vmatpush3.msra.mxu1 %v9682_v61  ;;  %8986 = vmatprep.mubr.msk.f32.mxu0 %vm9051_vm1, %v16570_v10  ;;  %v16634_v61 = vld [vmem:[#allocation39_spill] sm:$0xff] }
 0x2ab   :  { %8458 = vmatprep.subr.mxu1 %v9691_v1  ;;  %8987 = vmatmul.mubr.msk.f32.vlgmr.msra.gmra.mxu0 %vm528_vm4, %v1204_v30  ;;  %v16635_v1 = vld [vmem:[#allocation40_spill] sm:$0xff]  ;;  %v2089_v30 = vld [vmem:[%s16347_s6 + $0x700] sm:$0xff] }
 0x2ac   :  { %8459 = vmatpush3.msra.mxu1 %v9698_v4  ;;  %1524 = vmatprep.subr.mxu0 %v9863_v18  ;;  %v16636_v4 = vld [vmem:[#allocation41_spill] sm:$0xff]  ;;  %v1188_v18 = vadd.f32 %v1187_v53, %v1186_v31  ;;  %v2285_v53 = vld [vmem:[%s16347_s6 + $0xd20] sm:$0xff] }
 0x2ad   :  { %8460 = vmatprep.subr.mxu1 %v9704_v6  ;;  %1525 = vmatpush1.msra.mxu0 %v9869_v20  ;;  %v16637_v6 = vld [vmem:[#allocation42_spill] sm:$0xff]  ;;  %v16638_v20 = vld [vmem:[#allocation43_spill] sm:$0xff]  ;;  %v2300_v31 = vld [vmem:[%s16347_s6 + $0xd98] sm:$0xff] }
 0x2ae   :  { %8461 = vmatpush3.msra.mxu1 %v16629_v27  ;;  %1526 = vmatprep.subr.mxu0 %v9875_v3  ;;  %v16639_v3 = vld [vmem:[#allocation44_spill] sm:$0xff]  ;;  %v2306_v27 = vld [vmem:[%s16347_s6 + $0xdc8] sm:$0xff] }
 0x2af   :  { %8462 = vmatprep.subr.mxu1 %v16630_v33  ;;  %1527 = vmatpush1.msra.mxu0 %v9881_v22  ;;  %v16640_v22 = vld [vmem:[#allocation45_spill] sm:$0xff]  ;;  %v2299_v33 = vld [vmem:[%s16347_s6 + $0xd90] sm:$0xff] }
 0x2b0   :  { %8463 = vmatpush3.msra.mxu1 %v16631_v29  ;;  %1560 = vmatprep.mubr.f32.mxu0 %v16570_v10  ;;  %v2293_v29 = vld [vmem:[%s16347_s6 + $0xd60] sm:$0xff] }
 0x2b1   :  { %8464 = vmatprep.subr.mxu1 %v16632_v57  ;;  %1595 = vmatprep.subr.mxu0 %v9887_v24  ;;  %v1189_v24 = vrot.slane %v1188_v18, 1  ;;  %v2292_v57 = vld [vmem:[%s16347_s6 + $0xd58] sm:$0xff] }
 0x2b2   :  { %8465 = vmatpush3.msra.mxu1 %v16633_v63  ;;  %v2286_v63 = vld [vmem:[%s16347_s6 + $0xd28] sm:$0xff] }
 0x2b3   :  { %8466 = vmatprep.subr.mxu1 %v16634_v61  ;;  %v2279_v61 = vld [vmem:[%s16347_s6 + $0xcf0] sm:$0xff] }
 0x2b4   :  { %8467 = vmatpush3.msra.mxu1 %v16635_v1  ;;  %v2278_v1 = vld [vmem:[%s16347_s6 + $0xce8] sm:$0xff] }
 0x2b5   :  { %8468 = vmatprep.subr.mxu1 %v16636_v4  ;;  %v2272_v4 = vld [vmem:[%s16347_s6 + $0xcb8] sm:$0xff] }
 0x2b6   :  { %8469 = vmatpush3.msra.mxu1 %v9762_v43  ;;  %v1190_v43 = vadd.f32 %v1189_v24, %v1188_v18  ;;  %v2265_v18 = vld [vmem:[%s16347_s6 + $0xc80] sm:$0xff] }
 0x2b7   :  { %8470 = vmatprep.subr.mxu1 %v16637_v6  ;;  %v2271_v6 = vld [vmem:[%s16347_s6 + $0xcb0] sm:$0xff] }
 0x2b8   :  { %8471 = vmatpush3.msra.mxu1 %v16638_v20  ;;  %v2264_v20 = vld [vmem:[%s16347_s6 + $0xc78] sm:$0xff] }
 0x2b9   :  { %8472 = vmatprep.subr.mxu1 %v16639_v3  ;;  %v2258_v3 = vld [vmem:[%s16347_s6 + $0xc48] sm:$0xff] }
 0x2ba   :  { %8473 = vmatpush3.msra.mxu1 %v16640_v22  ;;  %v2257_v22 = vld [vmem:[%s16347_s6 + $0xc40] sm:$0xff] }
 0x2bb   :  { %8474 = vmatprep.subr.mxu1 %v16641_v19 }
 0x2bc   :  { %8475 = vmatpush3.msra.mxu1 %v9798_v45  ;;  %v2180_v45 = vld [vmem:[%s16347_s6 + $0x9d8] sm:$0xff] }
 0x2bd   :  { %8476 = vmatprep.subr.mxu1 %v9804_v59  ;;  %v2174_v59 = vld [vmem:[%s16347_s6 + $0x9a8] sm:$0xff] }
 0x2be   :  { %8477 = vmatpush3.msra.mxu1 %v9810_v47  ;;  %v2188_v47 = vld [vmem:[%s16347_s6 + $0xa18] sm:$0xff] }
 0x2bf   :  { %8478 = vmatprep.subr.mxu1 %v9816_v55  ;;  %v2181_v55 = vld [vmem:[%s16347_s6 + $0x9e0] sm:$0xff] }
 0x2c0   :  { %8479 = vmatpush3.msra.mxu1 %v9822_v40  ;;  %v2187_v40 = vld [vmem:[%s16347_s6 + $0xa10] sm:$0xff] }
 0x2c1   :  { %1413 = vmatmul.mubr.f32.vlgmr.msra.gmra.mxu1 %v1190_v43  ;;  %2625 = vmatprep.subr.mxu1 %v2195_v56 }
 0x2c2   :  { %2626 = vmatpush1.msra.mxu1 %v2194_v13 }
 0x2c3   :  { %2627 = vmatprep.subr.mxu1 %v2188_v47 }
 0x2c4   :  { %2628 = vmatpush1.msra.mxu1 %v2187_v40 }
 0x2c5   :  { %2629 = vmatprep.subr.mxu1 %v2181_v55 }
 0x2c6   :  { %2630 = vmatpush1.msra.mxu1 %v2180_v45 }
 0x2c7   :  { %2631 = vmatprep.subr.mxu1 %v2174_v59 }
 0x2c8   :  { %2632 = vmatpush1.msra.mxu1 %v2173_v16 }
 0x2c9   :  { %2633 = vmatprep.subr.mxu1 %v2167_v39 }
 0x2ca   :  { %2634 = vmatpush1.msra.mxu1 %v2166_v17 }
 0x2cb   :  { %2635 = vmatprep.subr.mxu1 %v2160_v51 }
 0x2cc   :  { %2636 = vmatpush1.msra.mxu1 %v2159_v25 }
 0x2cd   :  { %2637 = vmatprep.subr.mxu1 %v2153_v37 }
 0x2ce   :  { %2638 = vmatpush1.msra.mxu1 %v2152_v58  ;;  %v1489_v58 = vld [vmem:[%s16348_s4] sm:$0x1] }
 0x2cf   :  { %2639 = vmatprep.subr.mxu1 %v2146_v21 }
 0x2d0   :  { %2640 = vmatpush1.msra.mxu1 %v2145_v44 }
 0x2d1   :  { %2641 = vmatprep.subr.mxu1 %v2139_v32  ;;  %v1942_v32 = vld [vmem:[%s16347_s6 + $0x268] sm:$0xff] }
 0x2d2   :  { %2642 = vmatpush1.msra.mxu1 %v2138_v49  ;;  %v1936_v49 = vld [vmem:[%s16347_s6 + $0x238] sm:$0xff] }
 0x2d3   :  { %2643 = vmatprep.subr.mxu1 %v2132_v28  ;;  %v1935_v28 = vld [vmem:[%s16347_s6 + $0x230] sm:$0xff] }
 0x2d4   :  { %2644 = vmatpush1.msra.mxu1 %v2131_v36  ;;  %v1929_v36 = vld [vmem:[%s16347_s6 + $0x200] sm:$0xff] }
 0x2d5   :  { %2645 = vmatprep.subr.mxu1 %v2125_v46  ;;  %v1928_v46 = vld [vmem:[%s16347_s6 + $0x1f8] sm:$0xff] }
 0x2d6   :  { %2646 = vmatpush1.msra.mxu1 %v2124_v54  ;;  %v1922_v54 = vld [vmem:[%s16347_s6 + $0x1c8] sm:$0xff] }
 0x2d7   :  { %2647 = vmatprep.subr.mxu1 %v2118_v48  ;;  %v1921_v48 = vld [vmem:[%s16347_s6 + $0x1c0] sm:$0xff] }
 0x2d8   :  { %2648 = vmatpush1.msra.mxu1 %v2117_v34  ;;  %v1915_v34 = vld [vmem:[%s16347_s6 + $0x190] sm:$0xff] }
 0x2d9   :  { %2649 = vmatprep.subr.mxu1 %v2111_v38  ;;  %v1914_v38 = vld [vmem:[%s16347_s6 + $0x188] sm:$0xff] }
 0x2da   :  { %2650 = vmatpush1.msra.mxu1 %v2110_v52  ;;  %v1908_v52 = vld [vmem:[%s16347_s6 + $0x158] sm:$0xff] }
 0x2db   :  { %2651 = vmatprep.subr.mxu1 %v2104_v42  ;;  %v1907_v42 = vld [vmem:[%s16347_s6 + $0x150] sm:$0xff] }
 0x2dc   :  { %2652 = vmatpush1.msra.mxu1 %v2103_v50  ;;  %v1901_v50 = vld [vmem:[%s16347_s6 + $0x120] sm:$0xff] }
 0x2dd   :  { %2653 = vmatprep.subr.mxu1 %v2097_v26  ;;  %v1900_v26 = vld [vmem:[%s16347_s6 + $0x118] sm:$0xff] }
 0x2de   :  { %2654 = vmatpush1.msra.mxu1 %v2096_v41  ;;  %v1894_v41 = vld [vmem:[%s16347_s6 + $0xe8] sm:$0xff] }
 0x2df   :  { %2655 = vmatprep.subr.mxu1 %v2090_v8  ;;  %v1893_v8 = vld [vmem:[%s16347_s6 + $0xe0] sm:$0xff] }
 0x2e0   :  { %2656 = vmatpush1.msra.mxu1 %v2089_v30  ;;  %v1887_v30 = vld [vmem:[%s16347_s6 + $0xb0] sm:$0xff] }
 0x2e1   :  { %2657 = vmatprep.subr.mxu1 %v2307_v35  ;;  %v1886_v35 = vld [vmem:[%s16347_s6 + $0xa8] sm:$0xff] }
 0x2e2   :  { %2658 = vmatpush2.msra.mxu1 %v2306_v27  ;;  %v1880_v27 = vld [vmem:[%s16347_s6 + $0x78] sm:$0xff] }
 0x2e3   :  { %2659 = vmatprep.subr.mxu1 %v2300_v31  ;;  %v1879_v31 = vld [vmem:[%s16347_s6 + $0x70] sm:$0xff] }
 0x2e4   :  { %2660 = vmatpush2.msra.mxu1 %v2299_v33  ;;  %v1873_v33 = vld [vmem:[%s16347_s6 + $0x40] sm:$0xff] }
 0x2e5   :  { %2661 = vmatprep.subr.mxu1 %v2293_v29  ;;  %v1872_v29 = vld [vmem:[%s16347_s6 + $0x38] sm:$0xff] }
 0x2e6   :  { %2662 = vmatpush2.msra.mxu1 %v2292_v57  ;;  %v1866_v57 = vld [vmem:[%s16347_s6 + $0x8] sm:$0xff] }
 0x2e7   :  { %2663 = vmatprep.subr.mxu1 %v2286_v63  ;;  %v1865_v63 = vld [vmem:[%s16347_s6] sm:$0xff] }
 0x2e8   :  { %2664 = vmatpush2.msra.mxu1 %v2285_v53  ;;  %v2083_v53 = vld [vmem:[%s16347_s6 + $0x6d0] sm:$0xff] }
 0x2e9   :  { %2665 = vmatprep.subr.mxu1 %v2279_v61  ;;  %v2082_v61 = vld [vmem:[%s16347_s6 + $0x6c8] sm:$0xff] }
 0x2ea   :  { %2666 = vmatpush2.msra.mxu1 %v2278_v1  ;;  %v2076_v1 = vld [vmem:[%s16347_s6 + $0x698] sm:$0xff] }
 0x2eb   :  { %2667 = vmatprep.subr.mxu1 %v2272_v4  ;;  %v2075_v4 = vld [vmem:[%s16347_s6 + $0x690] sm:$0xff] }
 0x2ec   :  { %2668 = vmatpush2.msra.mxu1 %v2271_v6  ;;  %v2069_v6 = vld [vmem:[%s16347_s6 + $0x660] sm:$0xff] }
 0x2ed   :  { %2669 = vmatprep.subr.mxu1 %v2265_v18  ;;  %v2068_v18 = vld [vmem:[%s16347_s6 + $0x658] sm:$0xff] }
 0x2ee   :  { %2670 = vmatpush2.msra.mxu1 %v2264_v20  ;;  %v2062_v20 = vld [vmem:[%s16347_s6 + $0x628] sm:$0xff] }
 0x2ef   :  { %2671 = vmatprep.subr.mxu1 %v2258_v3  ;;  %v2061_v3 = vld [vmem:[%s16347_s6 + $0x620] sm:$0xff] }
 0x2f0   :  { %2672 = vmatpush2.msra.mxu1 %v2257_v22  ;;  %v2055_v22 = vld [vmem:[%s16347_s6 + $0x5f0] sm:$0xff] }
 0x361   :  { %v8410_v13 = vpop.f32.mrf.mxu1 }
 0x363   :  { %v8411_v47 = vpop.f32.mrf.mxu1 }
 0x364   :  { %v8412_v45 = vadd.f32 %v8411_v47, %v8410_v13  ;;  %v2040_v13 = vld [vmem:[%s16347_s6 + $0x578] sm:$0xff]  ;;  %v2034_v47 = vld [vmem:[%s16347_s6 + $0x548] sm:$0xff] }
 0x365   :  { %v8445_v19 = vpop.f32.mrf.mxu0 }
 0x367   :  { %v8446_v24 = vpop.f32.mrf.mxu0 }
 0x368   :  { %v8447_v40 = vadd.f32 %v8446_v24, %v8445_v19  ;;  %v2054_v19 = vld [vmem:[%s16347_s6 + $0x5e8] sm:$0xff]  ;;  %v2048_v24 = vld [vmem:[%s16347_s6 + $0x5b8] sm:$0xff] }
 0x36a   :  { %v1345_v16 = vadd.f32 %v8447_v40, %v8412_v45  ;;  %v2033_v40 = vld [vmem:[%s16347_s6 + $0x540] sm:$0xff]  ;;  %v2026_v45 = vld [vmem:[%s16347_s6 + $0x508] sm:$0xff] }
 0x36b   :  { %v1484_v43 = vpop.f32.mrf.mxu0 }
 0x36d   :  { %v8988_v56 = vpop.f32.mrf.mxu0 }
 0x36e   :  { %v2041_v56 = vld [vmem:[%s16347_s6 + $0x580] sm:$0xff] }
 0x381   :  { %v8480_v55 = vpop.f32.mrf.mxu1 }
 0x383   :  { %v8481_v59 = vpop.f32.mrf.mxu1 }
 0x384   :  { %v8482_v39 = vadd.f32 %v8481_v59, %v8480_v55  ;;  %v2027_v55 = vld [vmem:[%s16347_s6 + $0x510] sm:$0xff]  ;;  %v2020_v59 = vld [vmem:[%s16347_s6 + $0x4d8] sm:$0xff] }
 0x386   :  { %v1415_v17 = vadd.f32 %v8482_v39, %v1345_v16  ;;  %v2019_v16 = vld [vmem:[%s16347_s6 + $0x4d0] sm:$0xff]  ;;  %v2013_v39 = vld [vmem:[%s16347_s6 + $0x4a0] sm:$0xff] }
 0x388   :  { %v1485_v51 = vadd.f32 %v1484_v43, %v1415_v17  ;;  %v2047_v43 = vld [vmem:[%s16347_s6 + $0x5b0] sm:$0xff]  ;;  %v2012_v17 = vld [vmem:[%s16347_s6 + $0x498] sm:$0xff] }
 0x38a   :  { %v1488_v25 = vmul.f32 0.010204081, %v1485_v51  ;;  %v2251_v51 = vld [vmem:[%s16347_s6 + $0xc10] sm:$0xff] }
 0x38b   :  { %2673 = vmatprep.subr.mxu1 %v2251_v51 }
 0x38c   :  { %v1490_v37 = vadd.f32 1e-05, %v1488_v25  ;;  %v2006_v25 = vld [vmem:[%s16347_s6 + $0x468] sm:$0xff] }
 0x38e   :  { %9040 = vrsqrt.f32 %v1490_v37  ;;  %v2250_v37 = vld [vmem:[%s16347_s6 + $0xc08] sm:$0xff] }
 0x38f   :  { %2674 = vmatpush2.msra.mxu1 %v2250_v37 }
 0x39b   :  { %v9041_v21 = vpop.eup %9040 }
 0x39c   :  { %v1492_v44 = vmul.f32 %v9041_v21, %v1489_v58  ;;  %v2005_v58 = vld [vmem:[%s16347_s6 + $0x460] sm:$0xff]  ;;  %v2244_v21 = vld [vmem:[%s16347_s6 + $0xbd8] sm:$0xff] }
 0x39d   :  { %2675 = vmatprep.subr.mxu1 %v2244_v21 }
 0x39e   :  { %8217 = vmatmul.mubr.msk.f32.vlgmr.msra.gmra.mxu0 %vm528_vm4, %v1492_v44 }
 0x39f   :  { %1596 = vmatpush1.msra.mxu0 %v9893_v60  ;;  %1631 = vmatprep.mubr.f32.mxu0 %v16570_v10  ;;  %v1971_v60 = vld [vmem:[%s16347_s6 + $0x350] sm:$0xff] }
 0x3a0   :  { %1597 = vmatprep.subr.mxu0 %v9898_v62  ;;  %v1970_v62 = vld [vmem:[%s16347_s6 + $0x348] sm:$0xff] }
 0x3a1   :  { %1598 = vmatpush1.msra.mxu0 %v9904_v0  ;;  %v1964_v0 = vld [vmem:[%s16347_s6 + $0x318] sm:$0xff] }
 0x3a2   :  { %8218 = vmatmul.mubr.msk.f32.vlgmr.msra.gmra.mxu0 %vm528_vm4, %v1492_v44  ;;  %1666 = vmatprep.subr.mxu0 %v9911_v2  ;;  %v1963_v2 = vld [vmem:[%s16347_s6 + $0x310] sm:$0xff] }
 0x3a3   :  { %1667 = vmatpush1.msra.mxu0 %v9917_v5  ;;  %1702 = vmatprep.mubr.f32.mxu0 %v16570_v10  ;;  %v1957_v5 = vld [vmem:[%s16347_s6 + $0x2e0] sm:$0xff] }
 0x3a4   :  { %1668 = vmatprep.subr.mxu0 %v9923_v7  ;;  %v1956_v7 = vld [vmem:[%s16347_s6 + $0x2d8] sm:$0xff] }
 0x3a5   :  { %1669 = vmatpush1.msra.mxu0 %v9930_v9  ;;  %v1950_v9 = vld [vmem:[%s16347_s6 + $0x2a8] sm:$0xff] }
 0x3a6   :  { %8219 = vmatmul.mubr.msk.f32.vlgmr.msra.gmra.mxu0 %vm528_vm4, %v1492_v44  ;;  %8989 = vmatprep.subr.mxu0 %v16570_v10 }
 0x3a7   :  { %8990 = vmatpush3.msra.mxu0 %v9938_v11  ;;  %8993 = vmatprep.mubr.msk.f32.mxu0 %vm9051_vm1, %v16570_v10  ;;  %v1949_v11 = vld [vmem:[%s16347_s6 + $0x2a0] sm:$0xff] }
 0x3a8   :  { %8991 = vmatprep.subr.mxu0 %v16570_v10 }
 0x3a9   :  { %8992 = vmatpush3.msra.mxu0 %v9946_v12  ;;  %v1943_v12 = vld [vmem:[%s16347_s6 + $0x270] sm:$0xff] }
 0x3aa   :  { %8994 = vmatmul.mubr.msk.f32.vlgmr.msra.gmra.mxu0 %vm528_vm4, %v1492_v44  ;;  %2554 = vmatprep.subr.mxu0 %v1971_v60  ;;  %v1999_v44 = vld [vmem:[%s16347_s6 + $0x430] sm:$0xff] }
 0x3ab   :  { %2555 = vmatpush1.msra.mxu0 %v1970_v62  ;;  %v2243_v60 = vld [vmem:[%s16347_s6 + $0xbd0] sm:$0xff]  ;;  %v1998_v62 = vld [vmem:[%s16347_s6 + $0x428] sm:$0xff] }
 0x3ac   :  { %2556 = vmatprep.subr.mxu0 %v1964_v0  ;;  %2676 = vmatpush2.msra.mxu1 %v2243_v60  ;;  %v2237_v0 = vld [vmem:[%s16347_s6 + $0xba0] sm:$0xff] }
 0x3ad   :  { %2557 = vmatpush1.msra.mxu0 %v1963_v2  ;;  %2677 = vmatprep.subr.mxu1 %v2237_v0  ;;  %v1992_v2 = vld [vmem:[%s16347_s6 + $0x3f8] sm:$0xff] }
 0x3ae   :  { %2558 = vmatprep.subr.mxu0 %v1957_v5  ;;  %v2236_v5 = vld [vmem:[%s16347_s6 + $0xb98] sm:$0xff] }
 0x3af   :  { %2559 = vmatpush1.msra.mxu0 %v1956_v7  ;;  %2678 = vmatpush2.msra.mxu1 %v2236_v5  ;;  %v1991_v7 = vld [vmem:[%s16347_s6 + $0x3f0] sm:$0xff] }
 0x3b0   :  { %2560 = vmatprep.subr.mxu0 %v1950_v9  ;;  %v2230_v9 = vld [vmem:[%s16347_s6 + $0xb68] sm:$0xff] }
 0x3b1   :  { %2561 = vmatpush1.msra.mxu0 %v1949_v11  ;;  %2679 = vmatprep.subr.mxu1 %v2230_v9  ;;  %v1985_v11 = vld [vmem:[%s16347_s6 + $0x3c0] sm:$0xff] }
 0x3b2   :  { %2562 = vmatprep.subr.mxu0 %v1943_v12  ;;  %v2229_v12 = vld [vmem:[%s16347_s6 + $0xb60] sm:$0xff] }
 0x3b3   :  { %2563 = vmatpush1.msra.mxu0 %v1942_v32  ;;  %2680 = vmatpush2.msra.mxu1 %v2229_v12  ;;  %v1984_v32 = vld [vmem:[%s16347_s6 + $0x3b8] sm:$0xff] }
 0x3b4   :  { %2564 = vmatprep.subr.mxu0 %v1936_v49  ;;  %v2223_v49 = vld [vmem:[%s16347_s6 + $0xb30] sm:$0xff] }
 0x3b5   :  { %2565 = vmatpush1.msra.mxu0 %v1935_v28  ;;  %2681 = vmatprep.subr.mxu1 %v2223_v49  ;;  %v1978_v28 = vld [vmem:[%s16347_s6 + $0x388] sm:$0xff]  ;;  %v2404_v49 = vld [vmem:[%s16347_s6 + $0x10d8] sm:$0xff] }
 0x3b6   :  { %2566 = vmatprep.subr.mxu0 %v1929_v36  ;;  %v2222_v36 = vld [vmem:[%s16347_s6 + $0xb28] sm:$0xff] }
 0x3b7   :  { %2567 = vmatpush1.msra.mxu0 %v1928_v46  ;;  %2682 = vmatpush2.msra.mxu1 %v2222_v36  ;;  %v1977_v46 = vld [vmem:[%s16347_s6 + $0x380] sm:$0xff] }
 0x3b8   :  { %2568 = vmatprep.subr.mxu0 %v1922_v54  ;;  %v2216_v54 = vld [vmem:[%s16347_s6 + $0xaf8] sm:$0xff] }
 0x3b9   :  { %2569 = vmatpush1.msra.mxu0 %v1921_v48  ;;  %2683 = vmatprep.subr.mxu1 %v2216_v54  ;;  %v2215_v48 = vld [vmem:[%s16347_s6 + $0xaf0] sm:$0xff] }
 0x3ba   :  { %2570 = vmatprep.subr.mxu0 %v1915_v34  ;;  %v2419_v34 = vld [vmem:[%s16347_s6 + $0x1150] sm:$0xff]  ;;  %2684 = vmatpush2.msra.mxu1 %v2215_v48  ;;  %v2398_v48 = vld [vmem:[%s16347_s6 + $0x10a8] sm:$0xff] }
 0x3bb   :  { %2571 = vmatpush1.msra.mxu0 %v1914_v38  ;;  %v2209_v38 = vld [vmem:[%s16347_s6 + $0xac0] sm:$0xff] }
 0x3bc   :  { %2572 = vmatprep.subr.mxu0 %v1908_v52  ;;  %2685 = vmatprep.subr.mxu1 %v2209_v38  ;;  %v2208_v52 = vld [vmem:[%s16347_s6 + $0xab8] sm:$0xff]  ;;  %v2397_v38 = vld [vmem:[%s16347_s6 + $0x10a0] sm:$0xff] }
 0x3bd   :  { %2573 = vmatpush1.msra.mxu0 %v1907_v42  ;;  %2686 = vmatpush2.msra.mxu1 %v2208_v52  ;;  %v2202_v42 = vld [vmem:[%s16347_s6 + $0xa88] sm:$0xff] }
 0x3be   :  { %2574 = vmatprep.subr.mxu0 %v1901_v50  ;;  %2687 = vmatprep.subr.mxu1 %v2202_v42  ;;  %v2201_v50 = vld [vmem:[%s16347_s6 + $0xa80] sm:$0xff] }
 0x3bf   :  { %2575 = vmatpush1.msra.mxu0 %v1900_v26  ;;  %2688 = vmatpush2.msra.mxu1 %v2201_v50  ;;  %v2545_v26 = vld [vmem:[%s16347_s6 + $0x1540] sm:$0xff]  ;;  %v2391_v50 = vld [vmem:[%s16347_s6 + $0x1070] sm:$0xff] }
 0x3c0   :  { %2576 = vmatprep.subr.mxu0 %v1894_v41  ;;  %2795 = vmatprep.subr.mxu1 %v2545_v26  ;;  %v10499_v41 = vld [vmem:[%s16349_s5] sm:$0x7f] }
 0x3c1   :  { %2577 = vmatpush1.msra.mxu0 %v1893_v8  ;;  %v10502_v8 = vsub.s32 1, %v9987_v14  ;;  %v2537_v26 = vld [vmem:[%s16347_s6 + $0x1500] sm:$0xff] }
 0x3c2   :  { %2578 = vmatprep.subr.mxu0 %v1887_v30 }
 0x3c3   :  { %2579 = vmatpush1.msra.mxu0 %v1886_v35  ;;  %16642 = vst [vmem:[#allocation10_spill] sm:$0xff] %v10502_v8 }
 0x3c4   :  { %2580 = vmatprep.subr.mxu0 %v1880_v27  ;;  %v1819_v27 = vrot.slane %v10499_v41, %v9990_v15 }
 0x3c5   :  { %2581 = vmatpush1.msra.mxu0 %v1879_v31 }
 0x3c6   :  { %2582 = vmatprep.subr.mxu0 %v1873_v33  ;;  %v10508_v33 = vsub.s32 2, %v9987_v14 }
 0x3c7   :  { %2583 = vmatpush1.msra.mxu0 %v1872_v29  ;;  %v10511_v29 = vsub.s32 3, %v9987_v14 }
 0x3c8   :  { %2584 = vmatprep.subr.mxu0 %v1866_v57  ;;  %16643 = vst [vmem:[#allocation11_spill] sm:$0xff] %v10508_v33  ;;  %v16645_v57 = vld [vmem:[#allocation4_spill] sm:$0xff] }
 0x3c9   :  { %2585 = vmatpush1.msra.mxu0 %v1865_v63  ;;  %16644 = vst [vmem:[#allocation12_spill] sm:$0xff] %v10511_v29 }
 0x3ca   :  { %2586 = vmatprep.subr.mxu0 %v2083_v53 }
 0x3cb   :  { %2587 = vmatpush2.msra.mxu0 %v2082_v61  ;;  %v1823_v61 = vrot.slane %v10499_v41, %v10502_v8  ;;  %v12642_v8 = vld [vmem:[%s16350_s7 + $0x2e0] sm:$0xff] }
 0x3cc   :  { %2588 = vmatprep.subr.mxu0 %v2076_v1  ;;  %16673 = vst [vmem:[#allocation35_spill] sm:$0xff] %v12642_v8 }
 0x3cd   :  { %2589 = vmatpush2.msra.mxu0 %v2075_v4  ;;  %v16646_v4 = vld [vmem:[#allocation5_spill] sm:$0xff] }
 0x3ce   :  { %2590 = vmatprep.subr.mxu0 %v2069_v6 }
 0x3cf   :  { %2591 = vmatpush2.msra.mxu0 %v2068_v18 }
 0x3d0   :  { %2592 = vmatprep.subr.mxu0 %v2062_v20 }
 0x3d1   :  { %2593 = vmatpush2.msra.mxu0 %v2061_v3  ;;  %v1827_v3 = vrot.slane %v10499_v41, %v10508_v33  ;;  %v12636_v33 = vld [vmem:[%s16350_s7 + $0x1a8] sm:$0xff] }
 0x3d2   :  { %2594 = vmatprep.subr.mxu0 %v2055_v22  ;;  %16672 = vst [vmem:[#allocation34_spill] sm:$0xff] %v12636_v33 }
 0x3d3   :  { %2595 = vmatpush2.msra.mxu0 %v2054_v19  ;;  %v1831_v19 = vrot.slane %v10499_v41, %v10511_v29  ;;  %v12630_v29 = vld [vmem:[%s16350_s7 + $0x268] sm:$0xff] }
 0x3d4   :  { %2596 = vmatprep.subr.mxu0 %v2048_v24  ;;  %16671 = vst [vmem:[#allocation33_spill] sm:$0xff] %v12630_v29 }
 0x3d5   :  { %2597 = vmatpush2.msra.mxu0 %v2047_v43  ;;  %v16647_v43 = vld [vmem:[#allocation6_spill] sm:$0xff] }
 0x3d6   :  { %2598 = vmatprep.subr.mxu0 %v2041_v56 }
 0x3d7   :  { %2599 = vmatpush2.msra.mxu0 %v2040_v13 }
 0x3d8   :  { %2600 = vmatprep.subr.mxu0 %v2034_v47  ;;  %v10526_v47 = vsub.s32 5, %v9987_v14 }
 0x3d9   :  { %2601 = vmatpush2.msra.mxu0 %v2033_v40 }
 0x3da   :  { %2602 = vmatprep.subr.mxu0 %v2027_v55  ;;  %16648 = vst [vmem:[#allocation13_spill] sm:$0xff] %v10526_v47  ;;  %v1839_v21 = vrot.slane %v10499_v41, %v10526_v47  ;;  %v12624_v47 = vld [vmem:[%s16350_s7 + $0x130] sm:$0xff] }
 0x3db   :  { %2603 = vmatpush2.msra.mxu0 %v2026_v45  ;;  %v16649_v45 = vld [vmem:[#allocation7_spill] sm:$0xff] }
 0x3dc   :  { %2604 = vmatprep.subr.mxu0 %v2020_v59 }
 0x3dd   :  { %2605 = vmatpush2.msra.mxu0 %v2019_v16  ;;  %v16415_v16 = vsub.s32 6, %v9987_v14 }
 0x3de   :  { %2606 = vmatprep.subr.mxu0 %v2013_v39 }
 0x3df   :  { %2607 = vmatpush2.msra.mxu0 %v2012_v17  ;;  %v1843_v9 = vrot.slane %v10499_v41, %v16415_v16  ;;  %v12600_v16 = vld [vmem:[%s16350_s7 + $0x138] sm:$0xff] }
 0x3e0   :  { %2608 = vmatprep.subr.mxu0 %v2006_v25  ;;  %v2418_v25 = vld [vmem:[%s16347_s6 + $0x1148] sm:$0xff] }
 0x3e1   :  { %2609 = vmatpush2.msra.mxu0 %v2005_v58 }
 0x3e2   :  { %2610 = vmatprep.subr.mxu0 %v1999_v44  ;;  %v2412_v44 = vld [vmem:[%s16347_s6 + $0x1118] sm:$0xff] }
 0x3e3   :  { %2611 = vmatpush2.msra.mxu0 %v1998_v62  ;;  %v2411_v62 = vld [vmem:[%s16347_s6 + $0x1110] sm:$0xff] }
 0x3e4   :  { %2612 = vmatprep.subr.mxu0 %v1992_v2  ;;  %v16650_v2 = vld [vmem:[#allocation8_spill] sm:$0xff] }
 0x3e5   :  { %2613 = vmatpush2.msra.mxu0 %v1991_v7 }
 0x3e6   :  { %2614 = vmatprep.subr.mxu0 %v1985_v11  ;;  %v2405_v11 = vld [vmem:[%s16347_s6 + $0x10e0] sm:$0xff] }
 0x3e7   :  { %2615 = vmatpush2.msra.mxu0 %v1984_v32 }
 0x3e8   :  { %2616 = vmatprep.subr.mxu0 %v1978_v28  ;;  %v2544_v28 = vld [vmem:[%s16347_s6 + $0x1538] sm:$0xff] }
 0x3e9   :  { %2617 = vmatpush2.msra.mxu0 %v1977_v46  ;;  %v16651_v46 = vld [vmem:[#allocation9_spill] sm:$0xff] }
 0x3ea   :  { %2696 = vmatprep.subr.mxu0 %v2419_v34  ;;  %v2538_v34 = vld [vmem:[%s16347_s6 + $0x1508] sm:$0xff] }
 0x45e   :  { %v1562_v30 = vpop.f32.mrf.mxu0 }
 0x45f   :  { %v1782_v35 = vrot.slane %v1562_v30, %v9990_v15  ;;  %v2390_v30 = vld [vmem:[%s16347_s6 + $0x1068] sm:$0xff] }
 0x460   :  { %v1564_v31 = vpop.f32.mrf.mxu0 }
 0x461   :  { %v1807_v63 = vmul.f32 %v1782_v35, %v16645_v57  ;;  %v1786_v53 = vrot.slane %v1564_v31, %v9990_v15  ;;  %v2384_v31 = vld [vmem:[%s16347_s6 + $0x1038] sm:$0xff]  ;;  %v2383_v57 = vld [vmem:[%s16347_s6 + $0x1030] sm:$0xff] }
 0x462   :  { %v1633_v1 = vpop.f32.mrf.mxu0 }
 0x463   :  { %v1808_v6 = vmul.f32 %v1786_v53, %v16646_v4  ;;  %v1790_v18 = vrot.slane %v1633_v1, %v9990_v15  ;;  %v1851_v20 = vadd.f32 %v1819_v27, %v1807_v63  ;;  %v1973_v27 = vld [vmem:[%s16347_s6 + $0x360] sm:$0xff]  ;;  %v1972_v63 = vld [vmem:[%s16347_s6 + $0x358] sm:$0xff]  ;;  %v1966_v53 = vld [vmem:[%s16347_s6 + $0x328] sm:$0xff] }
 0x464   :  { %v1635_v22 = vpop.f32.mrf.mxu0  ;;  %v1965_v1 = vld [vmem:[%s16347_s6 + $0x320] sm:$0xff]  ;;  %v2376_v4 = vld [vmem:[%s16347_s6 + $0xff8] sm:$0xff] }
 0x465   :  { %v1852_v24 = vadd.f32 %v1823_v61, %v1808_v6  ;;  %v1809_v56 = vmul.f32 %v1790_v18, %v16647_v43  ;;  %v1794_v13 = vrot.slane %v1635_v22, %v9990_v15  ;;  %v10534_v39 = vmax.f32 %v1851_v20, 0.0  ;;  %v2377_v61 = vld [vmem:[%s16347_s6 + $0x1000] sm:$0xff]  ;;  %v1959_v6 = vld [vmem:[%s16347_s6 + $0x2f0] sm:$0xff]  ;;  %v2370_v18 = vld [vmem:[%s16347_s6 + $0xfc8] sm:$0xff] }
 0x466   :  { %v10528_v40 = vpop.f32.mrf.mxu0  ;;  %v1958_v20 = vld [vmem:[%s16347_s6 + $0x2e8] sm:$0xff]  ;;  %v1952_v22 = vld [vmem:[%s16347_s6 + $0x2b8] sm:$0xff] }
 0x467   :  { %v10530_v55 = vmax.f32 %v1852_v24, 0.0  ;;  %v1810_v59 = vmul.f32 %v1794_v13, %v16649_v45  ;;  %v1853_v17 = vadd.f32 %v1827_v3, %v1809_v56  ;;  %v2369_v3 = vld [vmem:[%s16347_s6 + $0xfc0] sm:$0xff]  ;;  %v1951_v24 = vld [vmem:[%s16347_s6 + $0x2b0] sm:$0xff]  ;;  %v2362_v43 = vld [vmem:[%s16347_s6 + $0xf88] sm:$0xff] }
 0x468   :  { %v1706_v51 = vpop.f32.mrf.mxu0  ;;  %v1945_v56 = vld [vmem:[%s16347_s6 + $0x280] sm:$0xff]  ;;  %v2356_v13 = vld [vmem:[%s16347_s6 + $0xf58] sm:$0xff] }
 0x469   :  { %v1854_v37 = vadd.f32 %v1831_v19, %v1810_v59  ;;  %v1802_v58 = vrot.slane %v1706_v51, %v9990_v15  ;;  %2618 = vmatprep.mubr.f32.mxu0 %v10530_v55  ;;  %v10560_v12 = vmax.f32 %v1853_v17, 0.0  ;;  %v2363_v19 = vld [vmem:[%s16347_s6 + $0xf90] sm:$0xff]  ;;  %v1944_v45 = vld [vmem:[%s16347_s6 + $0x278] sm:$0xff]  ;;  %v1938_v17 = vld [vmem:[%s16347_s6 + $0x248] sm:$0xff] }
 0x46a   :  { %v1775_v60 = vpop.f32.mrf.mxu0  ;;  %2619 = vmatmul.mubr.f32.vlgmr.msra.gmra.mxu0 %v10534_v39  ;;  %v2355_v59 = vld [vmem:[%s16347_s6 + $0xf50] sm:$0xff]  ;;  %v2349_v51 = vld [vmem:[%s16347_s6 + $0xf20] sm:$0xff] }
 0x46b   :  { %v10550_v0 = vmax.f32 %v1854_v37, 0.0  ;;  %v1812_v5 = vmul.f32 %v1802_v58, %v16650_v2  ;;  %v1806_v7 = vrot.slane %v1775_v60, %v9990_v15  ;;  %2697 = vmatpush1.msra.mxu0 %v2418_v25  ;;  %v1937_v25 = vld [vmem:[%s16347_s6 + $0x240] sm:$0xff]  ;;  %v2348_v37 = vld [vmem:[%s16347_s6 + $0xf18] sm:$0xff]  ;;  %v1931_v58 = vld [vmem:[%s16347_s6 + $0x210] sm:$0xff] }
 0x46c   :  { %2698 = vmatprep.subr.mxu0 %v2412_v44  ;;  %v8995_v32 = vpop.f32.mrf.mxu0  ;;  %v1930_v44 = vld [vmem:[%s16347_s6 + $0x208] sm:$0xff]  ;;  %v2341_v60 = vld [vmem:[%s16347_s6 + $0xee0] sm:$0xff]  ;;  %v2335_v2 = vld [vmem:[%s16347_s6 + $0xeb0] sm:$0xff] }
 0x46d   :  { %v1856_v36 = vadd.f32 %v1839_v21, %v1812_v5  ;;  %v1813_v54 = vmul.f32 %v1806_v7, %v16651_v46  ;;  %2699 = vmatpush1.msra.mxu0 %v2411_v62  ;;  %2689 = vmatprep.mubr.f32.mxu1 %v10550_v0  ;;  %v2342_v21 = vld [vmem:[%s16347_s6 + $0xee8] sm:$0xff]  ;;  %v1924_v62 = vld [vmem:[%s16347_s6 + $0x1d8] sm:$0xff]  ;;  %v1923_v5 = vld [vmem:[%s16347_s6 + $0x1d0] sm:$0xff] }
 0x46e   :  { %2700 = vmatprep.subr.mxu0 %v2405_v11  ;;  %2690 = vmatmul.mubr.f32.vlgmr.msra.gmra.mxu1 %v10560_v12  ;;  %v2334_v7 = vld [vmem:[%s16347_s6 + $0xea8] sm:$0xff]  ;;  %v2328_v11 = vld [vmem:[%s16347_s6 + $0xe78] sm:$0xff]  ;;  %v1909_v46 = vld [vmem:[%s16347_s6 + $0x160] sm:$0xff] }
 0x46f   :  { %v10580_v52 = vmax.f32 %v1856_v36, 0.0  ;;  %v1857_v42 = vadd.f32 %v1843_v9, %v1813_v54  ;;  %2701 = vmatpush1.msra.mxu0 %v2404_v49  ;;  %2796 = vmatpush1.msra.mxu1 %v2544_v28  ;;  %v1917_v9 = vld [vmem:[%s16347_s6 + $0x1a0] sm:$0xff]  ;;  %v1916_v32 = vld [vmem:[%s16347_s6 + $0x198] sm:$0xff]  ;;  %v2327_v49 = vld [vmem:[%s16347_s6 + $0xe70] sm:$0xff] }
 0x470   :  { %2702 = vmatprep.subr.mxu0 %v2398_v48  ;;  %2797 = vmatprep.subr.mxu1 %v2538_v34  ;;  %v1910_v28 = vld [vmem:[%s16347_s6 + $0x168] sm:$0xff]  ;;  %v2321_v36 = vld [vmem:[%s16347_s6 + $0xe40] sm:$0xff]  ;;  %v2320_v54 = vld [vmem:[%s16347_s6 + $0xe38] sm:$0xff] }
 0x471   :  { %v10591_v35 = vmax.f32 %v1857_v42, 0.0  ;;  %2703 = vmatpush1.msra.mxu0 %v2397_v38  ;;  %2760 = vmatprep.mubr.f32.mxu0 %v10580_v52  ;;  %v1903_v48 = vld [vmem:[%s16347_s6 + $0x130] sm:$0xff]  ;;  %v2314_v34 = vld [vmem:[%s16347_s6 + $0xe08] sm:$0xff]  ;;  %v2313_v42 = vld [vmem:[%s16347_s6 + $0xe00] sm:$0xff] }
 0x472   :  { %2704 = vmatprep.subr.mxu0 %v2391_v50  ;;  %2798 = vmatpush1.msra.mxu1 %v2537_v26  ;;  %v1902_v38 = vld [vmem:[%s16347_s6 + $0x128] sm:$0xff]  ;;  %v1896_v50 = vld [vmem:[%s16347_s6 + $0xf8] sm:$0xff]  ;;  %v2531_v26 = vld [vmem:[%s16347_s6 + $0x14d0] sm:$0xff] }
 0x473   :  { %2705 = vmatpush1.msra.mxu0 %v2390_v30  ;;  %2831 = vmatprep.mubr.f32.mxu1 %v16570_v10  ;;  %v1895_v30 = vld [vmem:[%s16347_s6 + $0xf0] sm:$0xff] }
 0x474   :  { %2838 = vmatprep.subr.mxu1 %v1973_v27  ;;  %2706 = vmatprep.subr.mxu0 %v2384_v31  ;;  %v2530_v27 = vld [vmem:[%s16347_s6 + $0x14c8] sm:$0xff]  ;;  %v1889_v31 = vld [vmem:[%s16347_s6 + $0xc0] sm:$0xff] }
 0x475   :  { %8221 = vmatmul.mubr.msk.f32.vlgmr.msra.gmra.mxu1 %vm528_vm4, %v10591_v35  ;;  %2707 = vmatpush1.msra.mxu0 %v2383_v57  ;;  %v2524_v57 = vld [vmem:[%s16347_s6 + $0x1498] sm:$0xff] }
 0x476   :  { %2839 = vmatpush1.msra.mxu1 %v1972_v63  ;;  %2902 = vmatprep.mubr.f32.mxu1 %v10530_v55  ;;  %v1888_v63 = vld [vmem:[%s16347_s6 + $0xb8] sm:$0xff] }
 0x477   :  { %2840 = vmatprep.subr.mxu1 %v1966_v53  ;;  %2708 = vmatprep.subr.mxu0 %v2377_v61  ;;  %v2523_v53 = vld [vmem:[%s16347_s6 + $0x1490] sm:$0xff]  ;;  %v1882_v61 = vld [vmem:[%s16347_s6 + $0x88] sm:$0xff] }
 0x478   :  { %2841 = vmatpush1.msra.mxu1 %v1965_v1  ;;  %2709 = vmatpush1.msra.mxu0 %v2376_v4  ;;  %v2517_v1 = vld [vmem:[%s16347_s6 + $0x1460] sm:$0xff] }
 0x479   :  { %2842 = vmatprep.subr.mxu1 %v1959_v6  ;;  %2710 = vmatprep.subr.mxu0 %v2370_v18  ;;  %v1881_v4 = vld [vmem:[%s16347_s6 + $0x80] sm:$0xff]  ;;  %v2516_v6 = vld [vmem:[%s16347_s6 + $0x1458] sm:$0xff]  ;;  %v1875_v18 = vld [vmem:[%s16347_s6 + $0x50] sm:$0xff] }
 0x47a   :  { %2843 = vmatpush1.msra.mxu1 %v1958_v20  ;;  %2711 = vmatpush1.msra.mxu0 %v2369_v3  ;;  %v2510_v20 = vld [vmem:[%s16347_s6 + $0x1428] sm:$0xff] }
 0x47b   :  { %2844 = vmatprep.subr.mxu1 %v1952_v22  ;;  %2712 = vmatprep.subr.mxu0 %v2363_v19  ;;  %v1874_v3 = vld [vmem:[%s16347_s6 + $0x48] sm:$0xff]  ;;  %v2509_v22 = vld [vmem:[%s16347_s6 + $0x1420] sm:$0xff]  ;;  %v1868_v19 = vld [vmem:[%s16347_s6 + $0x18] sm:$0xff] }
 0x47c   :  { %2845 = vmatpush1.msra.mxu1 %v1951_v24  ;;  %2713 = vmatpush1.msra.mxu0 %v2362_v43  ;;  %v2503_v24 = vld [vmem:[%s16347_s6 + $0x13f0] sm:$0xff] }
 0x47d   :  { %2846 = vmatprep.subr.mxu1 %v1945_v56  ;;  %2714 = vmatprep.subr.mxu0 %v2356_v13  ;;  %v1867_v43 = vld [vmem:[%s16347_s6 + $0x10] sm:$0xff]  ;;  %v2502_v56 = vld [vmem:[%s16347_s6 + $0x13e8] sm:$0xff]  ;;  %v2085_v13 = vld [vmem:[%s16347_s6 + $0x6e0] sm:$0xff] }
 0x47e   :  { %2847 = vmatpush1.msra.mxu1 %v1944_v45  ;;  %2715 = vmatpush1.msra.mxu0 %v2355_v59  ;;  %v2496_v45 = vld [vmem:[%s16347_s6 + $0x13b8] sm:$0xff] }
 0x47f   :  { %2848 = vmatprep.subr.mxu1 %v1938_v17  ;;  %2716 = vmatprep.subr.mxu0 %v2349_v51  ;;  %v2084_v59 = vld [vmem:[%s16347_s6 + $0x6d8] sm:$0xff]  ;;  %v2495_v17 = vld [vmem:[%s16347_s6 + $0x13b0] sm:$0xff]  ;;  %v2078_v51 = vld [vmem:[%s16347_s6 + $0x6a8] sm:$0xff] }
 0x480   :  { %2849 = vmatpush1.msra.mxu1 %v1937_v25  ;;  %2717 = vmatpush1.msra.mxu0 %v2348_v37  ;;  %v2489_v25 = vld [vmem:[%s16347_s6 + $0x1380] sm:$0xff] }
 0x481   :  { %2850 = vmatprep.subr.mxu1 %v1931_v58  ;;  %2718 = vmatprep.subr.mxu0 %v2342_v21  ;;  %v2077_v37 = vld [vmem:[%s16347_s6 + $0x6a0] sm:$0xff]  ;;  %v2488_v58 = vld [vmem:[%s16347_s6 + $0x1378] sm:$0xff]  ;;  %v2071_v21 = vld [vmem:[%s16347_s6 + $0x670] sm:$0xff] }
 0x482   :  { %2851 = vmatpush1.msra.mxu1 %v1930_v44  ;;  %2719 = vmatpush1.msra.mxu0 %v2341_v60  ;;  %v2482_v44 = vld [vmem:[%s16347_s6 + $0x1348] sm:$0xff] }
 0x483   :  { %2852 = vmatprep.subr.mxu1 %v1924_v62  ;;  %2720 = vmatprep.subr.mxu0 %v2335_v2  ;;  %v2070_v60 = vld [vmem:[%s16347_s6 + $0x668] sm:$0xff]  ;;  %v2481_v62 = vld [vmem:[%s16347_s6 + $0x1340] sm:$0xff]  ;;  %v2064_v2 = vld [vmem:[%s16347_s6 + $0x638] sm:$0xff] }
 0x484   :  { %2853 = vmatpush1.msra.mxu1 %v1923_v5  ;;  %2721 = vmatpush1.msra.mxu0 %v2334_v7  ;;  %v2475_v5 = vld [vmem:[%s16347_s6 + $0x1310] sm:$0xff] }
 0x485   :  { %2854 = vmatprep.subr.mxu1 %v1917_v9  ;;  %2722 = vmatprep.subr.mxu0 %v2328_v11  ;;  %v2063_v7 = vld [vmem:[%s16347_s6 + $0x630] sm:$0xff]  ;;  %v2474_v9 = vld [vmem:[%s16347_s6 + $0x1308] sm:$0xff]  ;;  %v2057_v11 = vld [vmem:[%s16347_s6 + $0x600] sm:$0xff] }
 0x486   :  { %2855 = vmatpush1.msra.mxu1 %v1916_v32  ;;  %2723 = vmatpush1.msra.mxu0 %v2327_v49  ;;  %v2468_v32 = vld [vmem:[%s16347_s6 + $0x12d8] sm:$0xff] }
 0x487   :  { %2856 = vmatprep.subr.mxu1 %v1910_v28  ;;  %2724 = vmatprep.subr.mxu0 %v2321_v36  ;;  %v2056_v49 = vld [vmem:[%s16347_s6 + $0x5f8] sm:$0xff]  ;;  %v2467_v28 = vld [vmem:[%s16347_s6 + $0x12d0] sm:$0xff]  ;;  %v2050_v36 = vld [vmem:[%s16347_s6 + $0x5c8] sm:$0xff] }
 0x488   :  { %2857 = vmatpush1.msra.mxu1 %v1909_v46  ;;  %2725 = vmatpush1.msra.mxu0 %v2320_v54  ;;  %v2461_v46 = vld [vmem:[%s16347_s6 + $0x12a0] sm:$0xff]  ;;  %v1798_v54 = vrot.slane %v10528_v40, %v9990_v15  ;;  %v2454_v40 = vld [vmem:[%s16347_s6 + $0x1268] sm:$0xff]  ;;  %v12678_v15 = vld [vmem:[%s16350_s7 + $0x258] sm:$0xff] }
 0x489   :  { %2858 = vmatprep.subr.mxu1 %v1903_v48  ;;  %2726 = vmatprep.subr.mxu0 %v2314_v34  ;;  %v10859_v48 = vsub.s32 4, %v9987_v14  ;;  %v2049_v34 = vld [vmem:[%s16347_s6 + $0x5c0] sm:$0xff]  ;;  %v12618_v14 = vld [vmem:[%s16350_s7 + $0x2e8] sm:$0xff]  ;;  %16679 = vst [vmem:[#allocation41_spill] sm:$0xff] %v12678_v15 }
 0x48a   :  { %2859 = vmatpush1.msra.mxu1 %v1902_v38  ;;  %2727 = vmatpush1.msra.mxu0 %v2313_v42  ;;  %v2460_v38 = vld [vmem:[%s16347_s6 + $0x1298] sm:$0xff]  ;;  %v2043_v42 = vld [vmem:[%s16347_s6 + $0x590] sm:$0xff]  ;;  %16670 = vst [vmem:[#allocation32_spill] sm:$0xff] %v12618_v14 }
 0x48b   :  { %2860 = vmatprep.subr.mxu1 %v1896_v50  ;;  %2728 = vmatprep.subr.mxu0 %v2531_v26  ;;  %16652 = vst [vmem:[#allocation14_spill] sm:$0xff] %v10859_v48  ;;  %v2042_v50 = vld [vmem:[%s16347_s6 + $0x588] sm:$0xff]  ;;  %v2453_v26 = vld [vmem:[%s16347_s6 + $0x1260] sm:$0xff] }
 0x48c   :  { %2861 = vmatpush1.msra.mxu1 %v1895_v30  ;;  %2729 = vmatpush2.msra.mxu0 %v2530_v27  ;;  %v2036_v30 = vld [vmem:[%s16347_s6 + $0x558] sm:$0xff]  ;;  %v2447_v27 = vld [vmem:[%s16347_s6 + $0x1230] sm:$0xff] }
 0x48d   :  { %2862 = vmatprep.subr.mxu1 %v1889_v31  ;;  %2730 = vmatprep.subr.mxu0 %v2524_v57  ;;  %v1811_v31 = vmul.f32 %v1798_v54, %v10036_v23  ;;  %v1835_v57 = vrot.slane %v10499_v41, %v10859_v48  ;;  %v2440_v23 = vld [vmem:[%s16347_s6 + $0x11f8] sm:$0xff]  ;;  %v12612_v48 = vld [vmem:[%s16350_s7 + $0x1b0] sm:$0xff] }
 0x48e   :  { %2863 = vmatpush1.msra.mxu1 %v1888_v63  ;;  %2731 = vmatpush2.msra.mxu0 %v2523_v53  ;;  %v2035_v63 = vld [vmem:[%s16347_s6 + $0x550] sm:$0xff]  ;;  %v2446_v53 = vld [vmem:[%s16347_s6 + $0x1228] sm:$0xff]  ;;  %v2028_v41 = vld [vmem:[%s16347_s6 + $0x518] sm:$0xff] }
 0x48f   :  { %2864 = vmatprep.subr.mxu1 %v1882_v61  ;;  %2732 = vmatprep.subr.mxu0 %v2517_v1  ;;  %v2029_v61 = vld [vmem:[%s16347_s6 + $0x520] sm:$0xff]  ;;  %v2439_v1 = vld [vmem:[%s16347_s6 + $0x11f0] sm:$0xff]  ;;  %v2420_v54 = vld [vmem:[%s16347_s6 + $0x1158] sm:$0xff] }
 0x490   :  { %2865 = vmatpush1.msra.mxu1 %v1881_v4  ;;  %2733 = vmatpush2.msra.mxu0 %v2516_v6  ;;  %v2022_v4 = vld [vmem:[%s16347_s6 + $0x4e8] sm:$0xff]  ;;  %v2433_v6 = vld [vmem:[%s16347_s6 + $0x11c0] sm:$0xff] }
 0x491   :  { %2866 = vmatprep.subr.mxu1 %v1875_v18  ;;  %2734 = vmatprep.subr.mxu0 %v2510_v20  ;;  %v1855_v18 = vadd.f32 %v1835_v57, %v1811_v31  ;;  %v2021_v20 = vld [vmem:[%s16347_s6 + $0x4e0] sm:$0xff]  ;;  %v2147_v31 = vld [vmem:[%s16347_s6 + $0x8d0] sm:$0xff]  ;;  %v2400_v57 = vld [vmem:[%s16347_s6 + $0x10b8] sm:$0xff] }
 0x492   :  { %2867 = vmatpush1.msra.mxu1 %v1874_v3  ;;  %2735 = vmatpush2.msra.mxu0 %v2509_v22  ;;  %v2432_v3 = vld [vmem:[%s16347_s6 + $0x11b8] sm:$0xff]  ;;  %v2015_v22 = vld [vmem:[%s16347_s6 + $0x4b0] sm:$0xff] }
 0x493   :  { %2868 = vmatprep.subr.mxu1 %v1868_v19  ;;  %2736 = vmatprep.subr.mxu0 %v2503_v24  ;;  %v2426_v19 = vld [vmem:[%s16347_s6 + $0x1188] sm:$0xff] }
 0x494   :  { %2869 = vmatpush1.msra.mxu1 %v1867_v43  ;;  %2737 = vmatpush2.msra.mxu0 %v2502_v56  ;;  %v2014_v24 = vld [vmem:[%s16347_s6 + $0x4a8] sm:$0xff]  ;;  %v2425_v43 = vld [vmem:[%s16347_s6 + $0x1180] sm:$0xff]  ;;  %v2008_v56 = vld [vmem:[%s16347_s6 + $0x478] sm:$0xff] }
 0x495   :  { %2870 = vmatprep.subr.mxu1 %v2085_v13  ;;  %2738 = vmatprep.subr.mxu0 %v2496_v45  ;;  %v10933_v13 = vmax.f32 %v1855_v18, 0.0  ;;  %v2007_v45 = vld [vmem:[%s16347_s6 + $0x470] sm:$0xff] }
 0x496   :  { %2871 = vmatpush2.msra.mxu1 %v2084_v59  ;;  %2739 = vmatpush2.msra.mxu0 %v2495_v17  ;;  %v2197_v59 = vld [vmem:[%s16347_s6 + $0xa60] sm:$0xff]  ;;  %v2127_v18 = vld [vmem:[%s16347_s6 + $0x830] sm:$0xff] }
 0x497   :  { %2872 = vmatprep.subr.mxu1 %v2078_v51  ;;  %2740 = vmatprep.subr.mxu0 %v2489_v25  ;;  %v2001_v17 = vld [vmem:[%s16347_s6 + $0x440] sm:$0xff]  ;;  %v2196_v51 = vld [vmem:[%s16347_s6 + $0xa58] sm:$0xff] }
 0x498   :  { %2873 = vmatpush2.msra.mxu1 %v2077_v37  ;;  %2741 = vmatpush2.msra.mxu0 %v2488_v58  ;;  %v2000_v25 = vld [vmem:[%s16347_s6 + $0x438] sm:$0xff]  ;;  %v2190_v37 = vld [vmem:[%s16347_s6 + $0xa28] sm:$0xff] }
 0x499   :  { %2874 = vmatprep.subr.mxu1 %v2071_v21  ;;  %2742 = vmatprep.subr.mxu0 %v2482_v44  ;;  %v1994_v58 = vld [vmem:[%s16347_s6 + $0x408] sm:$0xff]  ;;  %v2189_v21 = vld [vmem:[%s16347_s6 + $0xa20] sm:$0xff] }
 0x49a   :  { %2875 = vmatpush2.msra.mxu1 %v2070_v60  ;;  %2743 = vmatpush2.msra.mxu0 %v2481_v62  ;;  %v1993_v44 = vld [vmem:[%s16347_s6 + $0x400] sm:$0xff]  ;;  %v2183_v60 = vld [vmem:[%s16347_s6 + $0x9f0] sm:$0xff] }
 0x49b   :  { %2876 = vmatprep.subr.mxu1 %v2064_v2  ;;  %2744 = vmatprep.subr.mxu0 %v2475_v5  ;;  %v1987_v62 = vld [vmem:[%s16347_s6 + $0x3d0] sm:$0xff]  ;;  %v2182_v2 = vld [vmem:[%s16347_s6 + $0x9e8] sm:$0xff] }
 0x49c   :  { %2877 = vmatpush2.msra.mxu1 %v2063_v7  ;;  %2745 = vmatpush2.msra.mxu0 %v2474_v9  ;;  %v1986_v5 = vld [vmem:[%s16347_s6 + $0x3c8] sm:$0xff]  ;;  %v2176_v7 = vld [vmem:[%s16347_s6 + $0x9b8] sm:$0xff] }
 0x49d   :  { %2878 = vmatprep.subr.mxu1 %v2057_v11  ;;  %2746 = vmatprep.subr.mxu0 %v2468_v32  ;;  %v1980_v9 = vld [vmem:[%s16347_s6 + $0x398] sm:$0xff]  ;;  %v2175_v11 = vld [vmem:[%s16347_s6 + $0x9b0] sm:$0xff] }
 0x49e   :  { %2879 = vmatpush2.msra.mxu1 %v2056_v49  ;;  %2747 = vmatpush2.msra.mxu0 %v2467_v28  ;;  %v1979_v32 = vld [vmem:[%s16347_s6 + $0x390] sm:$0xff]  ;;  %v2169_v49 = vld [vmem:[%s16347_s6 + $0x980] sm:$0xff]  ;;  %v2168_v28 = vld [vmem:[%s16347_s6 + $0x978] sm:$0xff] }
 0x49f   :  { %2880 = vmatprep.subr.mxu1 %v2050_v36  ;;  %2748 = vmatprep.subr.mxu0 %v2461_v46  ;;  %v2421_v36 = vld [vmem:[%s16347_s6 + $0x1160] sm:$0xff]  ;;  %v2162_v46 = vld [vmem:[%s16347_s6 + $0x948] sm:$0xff] }
 0x4a0   :  { %2881 = vmatpush2.msra.mxu1 %v2049_v34  ;;  %2749 = vmatpush2.msra.mxu0 %v2460_v38  ;;  %v2161_v34 = vld [vmem:[%s16347_s6 + $0x940] sm:$0xff]  ;;  %v2414_v38 = vld [vmem:[%s16347_s6 + $0x1128] sm:$0xff] }
 0x4a1   :  { %2882 = vmatprep.subr.mxu1 %v2043_v42  ;;  %2750 = vmatprep.subr.mxu0 %v2454_v40  ;;  %v2155_v42 = vld [vmem:[%s16347_s6 + $0x910] sm:$0xff]  ;;  %v2413_v40 = vld [vmem:[%s16347_s6 + $0x1120] sm:$0xff] }
 0x4a2   :  { %2883 = vmatpush2.msra.mxu1 %v2042_v50  ;;  %2751 = vmatpush2.msra.mxu0 %v2453_v26  ;;  %v2154_v50 = vld [vmem:[%s16347_s6 + $0x908] sm:$0xff]  ;;  %v2407_v26 = vld [vmem:[%s16347_s6 + $0x10f0] sm:$0xff] }
 0x4a3   :  { %2884 = vmatprep.subr.mxu1 %v2036_v30  ;;  %2752 = vmatprep.subr.mxu0 %v2447_v27  ;;  %v2148_v30 = vld [vmem:[%s16347_s6 + $0x8d8] sm:$0xff]  ;;  %v2406_v27 = vld [vmem:[%s16347_s6 + $0x10e8] sm:$0xff] }
 0x4a4   :  { %2885 = vmatpush2.msra.mxu1 %v2035_v63  ;;  %2753 = vmatpush2.msra.mxu0 %v2446_v53  ;;  %v2141_v63 = vld [vmem:[%s16347_s6 + $0x8a0] sm:$0xff]  ;;  %v2399_v53 = vld [vmem:[%s16347_s6 + $0x10b0] sm:$0xff] }
 0x4a5   :  { %2886 = vmatprep.subr.mxu1 %v2029_v61  ;;  %2754 = vmatprep.subr.mxu0 %v2440_v23  ;;  %v2140_v61 = vld [vmem:[%s16347_s6 + $0x898] sm:$0xff]  ;;  %v2393_v23 = vld [vmem:[%s16347_s6 + $0x1080] sm:$0xff] }
 0x4a6   :  { %2887 = vmatpush2.msra.mxu1 %v2028_v41  ;;  %2755 = vmatpush2.msra.mxu0 %v2439_v1  ;;  %v2134_v41 = vld [vmem:[%s16347_s6 + $0x868] sm:$0xff]  ;;  %v2392_v1 = vld [vmem:[%s16347_s6 + $0x1078] sm:$0xff] }
 0x4a7   :  { %2888 = vmatprep.subr.mxu1 %v2022_v4  ;;  %2756 = vmatprep.subr.mxu0 %v2433_v6  ;;  %v2133_v4 = vld [vmem:[%s16347_s6 + $0x860] sm:$0xff]  ;;  %v2386_v6 = vld [vmem:[%s16347_s6 + $0x1048] sm:$0xff] }
 0x4a8   :  { %2889 = vmatpush2.msra.mxu1 %v2021_v20  ;;  %2757 = vmatpush2.msra.mxu0 %v2432_v3  ;;  %v2385_v20 = vld [vmem:[%s16347_s6 + $0x1040] sm:$0xff]  ;;  %v2126_v3 = vld [vmem:[%s16347_s6 + $0x828] sm:$0xff] }
 0x4a9   :  { %2890 = vmatprep.subr.mxu1 %v2015_v22  ;;  %2758 = vmatprep.subr.mxu0 %v2426_v19  ;;  %v2379_v22 = vld [vmem:[%s16347_s6 + $0x1010] sm:$0xff]  ;;  %v2120_v19 = vld [vmem:[%s16347_s6 + $0x7f8] sm:$0xff] }
 0x4aa   :  { %2891 = vmatpush2.msra.mxu1 %v2014_v24  ;;  %2759 = vmatpush2.msra.mxu0 %v2425_v43  ;;  %v2378_v24 = vld [vmem:[%s16347_s6 + $0x1008] sm:$0xff]  ;;  %v2119_v43 = vld [vmem:[%s16347_s6 + $0x7f0] sm:$0xff] }
 0x4ab   :  { %2892 = vmatprep.subr.mxu1 %v2008_v56  ;;  %2761 = vmatmul.mubr.f32.vlgmr.msra.gmra.mxu0 %v10933_v13  ;;  %v2372_v56 = vld [vmem:[%s16347_s6 + $0xfd8] sm:$0xff] }
 0x4ac   :  { %2893 = vmatpush2.msra.mxu1 %v2007_v45  ;;  %2909 = vmatprep.subr.mxu0 %v2197_v59  ;;  %v2113_v45 = vld [vmem:[%s16347_s6 + $0x7c0] sm:$0xff]  ;;  %v2371_v59 = vld [vmem:[%s16347_s6 + $0xfd0] sm:$0xff] }
 0x4ad   :  { %2894 = vmatprep.subr.mxu1 %v2001_v17  ;;  %2910 = vmatpush1.msra.mxu0 %v2196_v51  ;;  %v2112_v17 = vld [vmem:[%s16347_s6 + $0x7b8] sm:$0xff]  ;;  %v2365_v51 = vld [vmem:[%s16347_s6 + $0xfa0] sm:$0xff] }
 0x4ae   :  { %2973 = vmatprep.mubr.f32.mxu0 %v10550_v0  ;;  %2895 = vmatpush2.msra.mxu1 %v2000_v25  ;;  %v2106_v25 = vld [vmem:[%s16347_s6 + $0x788] sm:$0xff] }
 0x4af   :  { %2911 = vmatprep.subr.mxu0 %v2190_v37  ;;  %2896 = vmatprep.subr.mxu1 %v1994_v58  ;;  %v2364_v37 = vld [vmem:[%s16347_s6 + $0xf98] sm:$0xff]  ;;  %v2105_v58 = vld [vmem:[%s16347_s6 + $0x780] sm:$0xff] }
 0x4b0   :  { %2912 = vmatpush1.msra.mxu0 %v2189_v21  ;;  %2897 = vmatpush2.msra.mxu1 %v1993_v44  ;;  %v2358_v21 = vld [vmem:[%s16347_s6 + $0xf68] sm:$0xff]  ;;  %v2099_v44 = vld [vmem:[%s16347_s6 + $0x750] sm:$0xff] }
 0x4b1   :  { %2913 = vmatprep.subr.mxu0 %v2183_v60  ;;  %2898 = vmatprep.subr.mxu1 %v1987_v62  ;;  %v2357_v60 = vld [vmem:[%s16347_s6 + $0xf60] sm:$0xff]  ;;  %v2098_v62 = vld [vmem:[%s16347_s6 + $0x748] sm:$0xff] }
 0x4b2   :  { %2914 = vmatpush1.msra.mxu0 %v2182_v2  ;;  %2899 = vmatpush2.msra.mxu1 %v1986_v5  ;;  %v2351_v2 = vld [vmem:[%s16347_s6 + $0xf30] sm:$0xff]  ;;  %v2092_v5 = vld [vmem:[%s16347_s6 + $0x718] sm:$0xff] }
 0x4b3   :  { %2915 = vmatprep.subr.mxu0 %v2176_v7  ;;  %2900 = vmatprep.subr.mxu1 %v1980_v9  ;;  %v2350_v7 = vld [vmem:[%s16347_s6 + $0xf28] sm:$0xff]  ;;  %v2091_v9 = vld [vmem:[%s16347_s6 + $0x710] sm:$0xff] }
 0x4b4   :  { %2916 = vmatpush1.msra.mxu0 %v2175_v11  ;;  %2901 = vmatpush2.msra.mxu1 %v1979_v32  ;;  %v2344_v11 = vld [vmem:[%s16347_s6 + $0xef8] sm:$0xff]  ;;  %v2309_v32 = vld [vmem:[%s16347_s6 + $0xde0] sm:$0xff] }
 0x4b5   :  { %2917 = vmatprep.subr.mxu0 %v2169_v49  ;;  %2903 = vmatmul.mubr.f32.vlgmr.msra.gmra.mxu1 %v10534_v39  ;;  %v2343_v49 = vld [vmem:[%s16347_s6 + $0xef0] sm:$0xff] }
 0x4b6   :  { %2918 = vmatpush1.msra.mxu0 %v2168_v28  ;;  %2980 = vmatprep.subr.mxu1 %v2421_v36  ;;  %v2308_v28 = vld [vmem:[%s16347_s6 + $0xdd8] sm:$0xff]  ;;  %v2337_v36 = vld [vmem:[%s16347_s6 + $0xec0] sm:$0xff] }
 0x4b7   :  { %2919 = vmatprep.subr.mxu0 %v2162_v46  ;;  %2981 = vmatpush1.msra.mxu1 %v2420_v54  ;;  %v2302_v46 = vld [vmem:[%s16347_s6 + $0xda8] sm:$0xff]  ;;  %v2336_v54 = vld [vmem:[%s16347_s6 + $0xeb8] sm:$0xff] }
 0x4b8   :  { %3044 = vmatprep.mubr.f32.mxu1 %v10580_v52  ;;  %2920 = vmatpush1.msra.mxu0 %v2161_v34  ;;  %v2301_v34 = vld [vmem:[%s16347_s6 + $0xda0] sm:$0xff] }
 0x4b9   :  { %2982 = vmatprep.subr.mxu1 %v2414_v38  ;;  %2921 = vmatprep.subr.mxu0 %v2155_v42  ;;  %v2330_v38 = vld [vmem:[%s16347_s6 + $0xe88] sm:$0xff]  ;;  %v2295_v42 = vld [vmem:[%s16347_s6 + $0xd70] sm:$0xff] }
 0x4ba   :  { %2983 = vmatpush1.msra.mxu1 %v2413_v40  ;;  %2922 = vmatpush1.msra.mxu0 %v2154_v50  ;;  %v2329_v40 = vld [vmem:[%s16347_s6 + $0xe80] sm:$0xff]  ;;  %v2294_v50 = vld [vmem:[%s16347_s6 + $0xd68] sm:$0xff] }
 0x4bb   :  { %2984 = vmatprep.subr.mxu1 %v2407_v26  ;;  %2923 = vmatprep.subr.mxu0 %v2148_v30  ;;  %v2323_v26 = vld [vmem:[%s16347_s6 + $0xe50] sm:$0xff]  ;;  %v2288_v30 = vld [vmem:[%s16347_s6 + $0xd38] sm:$0xff] }
 0x4bc   :  { %2985 = vmatpush1.msra.mxu1 %v2406_v27  ;;  %2924 = vmatpush1.msra.mxu0 %v2147_v31  ;;  %v2322_v27 = vld [vmem:[%s16347_s6 + $0xe48] sm:$0xff]  ;;  %v2287_v31 = vld [vmem:[%s16347_s6 + $0xd30] sm:$0xff] }
 0x4bd   :  { %2986 = vmatprep.subr.mxu1 %v2400_v57  ;;  %2925 = vmatprep.subr.mxu0 %v2141_v63  ;;  %v2316_v57 = vld [vmem:[%s16347_s6 + $0xe18] sm:$0xff]  ;;  %v2281_v63 = vld [vmem:[%s16347_s6 + $0xd00] sm:$0xff] }
 0x4be   :  { %2987 = vmatpush1.msra.mxu1 %v2399_v53  ;;  %2926 = vmatpush1.msra.mxu0 %v2140_v61  ;;  %v2315_v53 = vld [vmem:[%s16347_s6 + $0xe10] sm:$0xff]  ;;  %v2280_v61 = vld [vmem:[%s16347_s6 + $0xcf8] sm:$0xff] }
 0x4bf   :  { %2988 = vmatprep.subr.mxu1 %v2393_v23  ;;  %2927 = vmatprep.subr.mxu0 %v2134_v41  ;;  %v2533_v23 = vld [vmem:[%s16347_s6 + $0x14e0] sm:$0xff]  ;;  %v2274_v41 = vld [vmem:[%s16347_s6 + $0xcc8] sm:$0xff] }
 0x4c0   :  { %2989 = vmatpush1.msra.mxu1 %v2392_v1  ;;  %2928 = vmatpush1.msra.mxu0 %v2133_v4  ;;  %v2532_v1 = vld [vmem:[%s16347_s6 + $0x14d8] sm:$0xff]  ;;  %v2273_v4 = vld [vmem:[%s16347_s6 + $0xcc0] sm:$0xff] }
 0x4c1   :  { %2990 = vmatprep.subr.mxu1 %v2386_v6  ;;  %2929 = vmatprep.subr.mxu0 %v2127_v18  ;;  %v2526_v6 = vld [vmem:[%s16347_s6 + $0x14a8] sm:$0xff]  ;;  %v2267_v18 = vld [vmem:[%s16347_s6 + $0xc90] sm:$0xff] }
 0x4c2   :  { %2991 = vmatpush1.msra.mxu1 %v2385_v20  ;;  %2930 = vmatpush1.msra.mxu0 %v2126_v3  ;;  %v2525_v20 = vld [vmem:[%s16347_s6 + $0x14a0] sm:$0xff]  ;;  %v2266_v3 = vld [vmem:[%s16347_s6 + $0xc88] sm:$0xff] }
 0x4c3   :  { %2992 = vmatprep.subr.mxu1 %v2379_v22  ;;  %2931 = vmatprep.subr.mxu0 %v2120_v19  ;;  %v2519_v22 = vld [vmem:[%s16347_s6 + $0x1470] sm:$0xff]  ;;  %v2260_v19 = vld [vmem:[%s16347_s6 + $0xc58] sm:$0xff] }
 0x4c4   :  { %2993 = vmatpush1.msra.mxu1 %v2378_v24  ;;  %2932 = vmatpush1.msra.mxu0 %v2119_v43  ;;  %v2518_v24 = vld [vmem:[%s16347_s6 + $0x1468] sm:$0xff]  ;;  %v2259_v43 = vld [vmem:[%s16347_s6 + $0xc50] sm:$0xff] }
 0x4c5   :  { %2994 = vmatprep.subr.mxu1 %v2372_v56  ;;  %2933 = vmatprep.subr.mxu0 %v2113_v45  ;;  %v2512_v56 = vld [vmem:[%s16347_s6 + $0x1438] sm:$0xff]  ;;  %v2253_v45 = vld [vmem:[%s16347_s6 + $0xc20] sm:$0xff] }
 0x4c6   :  { %2995 = vmatpush1.msra.mxu1 %v2371_v59  ;;  %2934 = vmatpush1.msra.mxu0 %v2112_v17  ;;  %v2511_v59 = vld [vmem:[%s16347_s6 + $0x1430] sm:$0xff]  ;;  %v2252_v17 = vld [vmem:[%s16347_s6 + $0xc18] sm:$0xff] }
 0x4c7   :  { %2996 = vmatprep.subr.mxu1 %v2365_v51  ;;  %2935 = vmatprep.subr.mxu0 %v2106_v25  ;;  %v2505_v51 = vld [vmem:[%s16347_s6 + $0x1400] sm:$0xff]  ;;  %v2246_v25 = vld [vmem:[%s16347_s6 + $0xbe8] sm:$0xff] }
 0x4c8   :  { %2997 = vmatpush1.msra.mxu1 %v2364_v37  ;;  %2936 = vmatpush1.msra.mxu0 %v2105_v58  ;;  %v2504_v37 = vld [vmem:[%s16347_s6 + $0x13f8] sm:$0xff]  ;;  %v2245_v58 = vld [vmem:[%s16347_s6 + $0xbe0] sm:$0xff] }
 0x4c9   :  { %2998 = vmatprep.subr.mxu1 %v2358_v21  ;;  %2937 = vmatprep.subr.mxu0 %v2099_v44  ;;  %v2498_v21 = vld [vmem:[%s16347_s6 + $0x13c8] sm:$0xff]  ;;  %v2239_v44 = vld [vmem:[%s16347_s6 + $0xbb0] sm:$0xff] }
 0x4ca   :  { %2999 = vmatpush1.msra.mxu1 %v2357_v60  ;;  %2938 = vmatpush1.msra.mxu0 %v2098_v62  ;;  %v2497_v60 = vld [vmem:[%s16347_s6 + $0x13c0] sm:$0xff]  ;;  %v2238_v62 = vld [vmem:[%s16347_s6 + $0xba8] sm:$0xff] }
 0x4cb   :  { %3000 = vmatprep.subr.mxu1 %v2351_v2  ;;  %2939 = vmatprep.subr.mxu0 %v2092_v5  ;;  %v2491_v2 = vld [vmem:[%s16347_s6 + $0x1390] sm:$0xff]  ;;  %v2232_v5 = vld [vmem:[%s16347_s6 + $0xb78] sm:$0xff] }
 0x4cc   :  { %3001 = vmatpush1.msra.mxu1 %v2350_v7  ;;  %2940 = vmatpush1.msra.mxu0 %v2091_v9  ;;  %v2490_v7 = vld [vmem:[%s16347_s6 + $0x1388] sm:$0xff]  ;;  %v2231_v9 = vld [vmem:[%s16347_s6 + $0xb70] sm:$0xff] }
 0x4cd   :  { %3002 = vmatprep.subr.mxu1 %v2344_v11  ;;  %2941 = vmatprep.subr.mxu0 %v2309_v32  ;;  %v2484_v11 = vld [vmem:[%s16347_s6 + $0x1358] sm:$0xff]  ;;  %v2225_v32 = vld [vmem:[%s16347_s6 + $0xb40] sm:$0xff] }
 0x4ce   :  { %3003 = vmatpush1.msra.mxu1 %v2343_v49  ;;  %2942 = vmatpush2.msra.mxu0 %v2308_v28  ;;  %v2483_v49 = vld [vmem:[%s16347_s6 + $0x1350] sm:$0xff]  ;;  %v2224_v28 = vld [vmem:[%s16347_s6 + $0xb38] sm:$0xff] }
 0x4cf   :  { %3004 = vmatprep.subr.mxu1 %v2337_v36  ;;  %2943 = vmatprep.subr.mxu0 %v2302_v46  ;;  %v2477_v36 = vld [vmem:[%s16347_s6 + $0x1320] sm:$0xff]  ;;  %v2218_v46 = vld [vmem:[%s16347_s6 + $0xb08] sm:$0xff] }
 0x4d0   :  { %3005 = vmatpush1.msra.mxu1 %v2336_v54  ;;  %2944 = vmatpush2.msra.mxu0 %v2301_v34  ;;  %v2476_v54 = vld [vmem:[%s16347_s6 + $0x1318] sm:$0xff]  ;;  %v2217_v34 = vld [vmem:[%s16347_s6 + $0xb00] sm:$0xff] }
 0x4d1   :  { %3006 = vmatprep.subr.mxu1 %v2330_v38  ;;  %2945 = vmatprep.subr.mxu0 %v2295_v42  ;;  %v2470_v38 = vld [vmem:[%s16347_s6 + $0x12e8] sm:$0xff]  ;;  %v2211_v42 = vld [vmem:[%s16347_s6 + $0xad0] sm:$0xff] }
 0x4d2   :  { %3007 = vmatpush1.msra.mxu1 %v2329_v40  ;;  %2946 = vmatpush2.msra.mxu0 %v2294_v50  ;;  %v2469_v40 = vld [vmem:[%s16347_s6 + $0x12e0] sm:$0xff]  ;;  %v2210_v50 = vld [vmem:[%s16347_s6 + $0xac8] sm:$0xff] }
 0x4d3   :  { %3008 = vmatprep.subr.mxu1 %v2323_v26  ;;  %2947 = vmatprep.subr.mxu0 %v2288_v30  ;;  %v2463_v26 = vld [vmem:[%s16347_s6 + $0x12b0] sm:$0xff]  ;;  %v2204_v30 = vld [vmem:[%s16347_s6 + $0xa98] sm:$0xff] }
 0x4d4   :  { %3009 = vmatpush1.msra.mxu1 %v2322_v27  ;;  %2948 = vmatpush2.msra.mxu0 %v2287_v31  ;;  %v2462_v27 = vld [vmem:[%s16347_s6 + $0x12a8] sm:$0xff]  ;;  %v2203_v31 = vld [vmem:[%s16347_s6 + $0xa90] sm:$0xff] }
 0x4d5   :  { %3010 = vmatprep.subr.mxu1 %v2316_v57  ;;  %2949 = vmatprep.subr.mxu0 %v2281_v63  ;;  %v2456_v57 = vld [vmem:[%s16347_s6 + $0x1278] sm:$0xff]  ;;  %v2455_v63 = vld [vmem:[%s16347_s6 + $0x1270] sm:$0xff] }
 0x4d6   :  { %3011 = vmatpush1.msra.mxu1 %v2315_v53  ;;  %2950 = vmatpush2.msra.mxu0 %v2280_v61  ;;  %v2547_v53 = vld [vmem:[%s16347_s6 + $0x1550] sm:$0xff]  ;;  %v2449_v61 = vld [vmem:[%s16347_s6 + $0x1240] sm:$0xff] }
 0x4d7   :  { %3012 = vmatprep.subr.mxu1 %v2533_v23  ;;  %2951 = vmatprep.subr.mxu0 %v2274_v41  ;;  %v2546_v23 = vld [vmem:[%s16347_s6 + $0x1548] sm:$0xff]  ;;  %v2448_v41 = vld [vmem:[%s16347_s6 + $0x1238] sm:$0xff] }
 0x4d8   :  { %3013 = vmatpush2.msra.mxu1 %v2532_v1  ;;  %2952 = vmatpush2.msra.mxu0 %v2273_v4  ;;  %v2540_v1 = vld [vmem:[%s16347_s6 + $0x1518] sm:$0xff]  ;;  %v2442_v4 = vld [vmem:[%s16347_s6 + $0x1208] sm:$0xff] }
 0x4d9   :  { %3014 = vmatprep.subr.mxu1 %v2526_v6  ;;  %2953 = vmatprep.subr.mxu0 %v2267_v18  ;;  %v2539_v6 = vld [vmem:[%s16347_s6 + $0x1510] sm:$0xff]  ;;  %v2441_v18 = vld [vmem:[%s16347_s6 + $0x1200] sm:$0xff] }
 0x4da   :  { %3015 = vmatpush2.msra.mxu1 %v2525_v20  ;;  %2954 = vmatpush2.msra.mxu0 %v2266_v3  ;;  %v1975_v20 = vld [vmem:[%s16347_s6 + $0x370] sm:$0xff] }
 0x4db   :  { %3016 = vmatprep.subr.mxu1 %v2519_v22  ;;  %2955 = vmatprep.subr.mxu0 %v2260_v19  ;;  %v2435_v3 = vld [vmem:[%s16347_s6 + $0x11d0] sm:$0xff]  ;;  %v1974_v22 = vld [vmem:[%s16347_s6 + $0x368] sm:$0xff] }
 0x4dc   :  { %3017 = vmatpush2.msra.mxu1 %v2518_v24  ;;  %2956 = vmatpush2.msra.mxu0 %v2259_v43  ;;  %v2434_v19 = vld [vmem:[%s16347_s6 + $0x11c8] sm:$0xff]  ;;  %v1968_v24 = vld [vmem:[%s16347_s6 + $0x338] sm:$0xff] }
 0x4dd   :  { %3018 = vmatprep.subr.mxu1 %v2512_v56  ;;  %2957 = vmatprep.subr.mxu0 %v2253_v45  ;;  %v2428_v43 = vld [vmem:[%s16347_s6 + $0x1198] sm:$0xff]  ;;  %v1967_v56 = vld [vmem:[%s16347_s6 + $0x330] sm:$0xff] }
 0x4de   :  { %3019 = vmatpush2.msra.mxu1 %v2511_v59  ;;  %2958 = vmatpush2.msra.mxu0 %v2252_v17  ;;  %v2427_v45 = vld [vmem:[%s16347_s6 + $0x1190] sm:$0xff]  ;;  %v1961_v59 = vld [vmem:[%s16347_s6 + $0x300] sm:$0xff]  ;;  %v1960_v17 = vld [vmem:[%s16347_s6 + $0x2f8] sm:$0xff] }
 0x4df   :  { %3020 = vmatprep.subr.mxu1 %v2505_v51  ;;  %2959 = vmatprep.subr.mxu0 %v2246_v25  ;;  %v2199_v51 = vld [vmem:[%s16347_s6 + $0xa70] sm:$0xff]  ;;  %v1954_v25 = vld [vmem:[%s16347_s6 + $0x2c8] sm:$0xff] }
 0x4e0   :  { %3021 = vmatpush2.msra.mxu1 %v2504_v37  ;;  %2960 = vmatpush2.msra.mxu0 %v2245_v58  ;;  %v2198_v37 = vld [vmem:[%s16347_s6 + $0xa68] sm:$0xff]  ;;  %v1953_v58 = vld [vmem:[%s16347_s6 + $0x2c0] sm:$0xff] }
 0x4e1   :  { %3022 = vmatprep.subr.mxu1 %v2498_v21  ;;  %2961 = vmatprep.subr.mxu0 %v2239_v44  ;;  %v2192_v21 = vld [vmem:[%s16347_s6 + $0xa38] sm:$0xff]  ;;  %v1947_v44 = vld [vmem:[%s16347_s6 + $0x290] sm:$0xff] }
 0x4e2   :  { %3023 = vmatpush2.msra.mxu1 %v2497_v60  ;;  %2962 = vmatpush2.msra.mxu0 %v2238_v62  ;;  %v2191_v60 = vld [vmem:[%s16347_s6 + $0xa30] sm:$0xff]  ;;  %v1946_v62 = vld [vmem:[%s16347_s6 + $0x288] sm:$0xff] }
 0x4e3   :  { %3024 = vmatprep.subr.mxu1 %v2491_v2  ;;  %2963 = vmatprep.subr.mxu0 %v2232_v5  ;;  %v2185_v2 = vld [vmem:[%s16347_s6 + $0xa00] sm:$0xff]  ;;  %v1940_v5 = vld [vmem:[%s16347_s6 + $0x258] sm:$0xff] }
 0x4e4   :  { %3025 = vmatpush2.msra.mxu1 %v2490_v7  ;;  %2964 = vmatpush2.msra.mxu0 %v2231_v9  ;;  %v2184_v7 = vld [vmem:[%s16347_s6 + $0x9f8] sm:$0xff]  ;;  %v1939_v9 = vld [vmem:[%s16347_s6 + $0x250] sm:$0xff] }
 0x4e5   :  { %3026 = vmatprep.subr.mxu1 %v2484_v11  ;;  %2965 = vmatprep.subr.mxu0 %v2225_v32  ;;  %v2178_v11 = vld [vmem:[%s16347_s6 + $0x9c8] sm:$0xff]  ;;  %v1933_v32 = vld [vmem:[%s16347_s6 + $0x220] sm:$0xff] }
 0x4e6   :  { %3027 = vmatpush2.msra.mxu1 %v2483_v49  ;;  %2966 = vmatpush2.msra.mxu0 %v2224_v28  ;;  %v2177_v49 = vld [vmem:[%s16347_s6 + $0x9c0] sm:$0xff]  ;;  %v1932_v28 = vld [vmem:[%s16347_s6 + $0x218] sm:$0xff] }
 0x4e7   :  { %3028 = vmatprep.subr.mxu1 %v2477_v36  ;;  %2967 = vmatprep.subr.mxu0 %v2218_v46  ;;  %v2171_v36 = vld [vmem:[%s16347_s6 + $0x990] sm:$0xff]  ;;  %v1926_v46 = vld [vmem:[%s16347_s6 + $0x1e8] sm:$0xff] }
 0x4e8   :  { %3029 = vmatpush2.msra.mxu1 %v2476_v54  ;;  %2968 = vmatpush2.msra.mxu0 %v2217_v34  ;;  %v2170_v54 = vld [vmem:[%s16347_s6 + $0x988] sm:$0xff]  ;;  %v1925_v34 = vld [vmem:[%s16347_s6 + $0x1e0] sm:$0xff] }
 0x4e9   :  { %3030 = vmatprep.subr.mxu1 %v2470_v38  ;;  %2969 = vmatprep.subr.mxu0 %v2211_v42  ;;  %v2164_v38 = vld [vmem:[%s16347_s6 + $0x958] sm:$0xff]  ;;  %v1919_v42 = vld [vmem:[%s16347_s6 + $0x1b0] sm:$0xff] }
 0x4ea   :  { %3031 = vmatpush2.msra.mxu1 %v2469_v40  ;;  %2970 = vmatpush2.msra.mxu0 %v2210_v50  ;;  %v2163_v40 = vld [vmem:[%s16347_s6 + $0x950] sm:$0xff]  ;;  %v1918_v50 = vld [vmem:[%s16347_s6 + $0x1a8] sm:$0xff] }
 0x4eb   :  { %3032 = vmatprep.subr.mxu1 %v2463_v26  ;;  %2971 = vmatprep.subr.mxu0 %v2204_v30  ;;  %v2157_v26 = vld [vmem:[%s16347_s6 + $0x920] sm:$0xff]  ;;  %v1912_v30 = vld [vmem:[%s16347_s6 + $0x178] sm:$0xff] }
 0x4ec   :  { %3033 = vmatpush2.msra.mxu1 %v2462_v27  ;;  %2972 = vmatpush2.msra.mxu0 %v2203_v31  ;;  %v2156_v27 = vld [vmem:[%s16347_s6 + $0x918] sm:$0xff]  ;;  %v1911_v31 = vld [vmem:[%s16347_s6 + $0x170] sm:$0xff] }
 0x4ed   :  { %3034 = vmatprep.subr.mxu1 %v2456_v57  ;;  %2974 = vmatmul.mubr.f32.vlgmr.msra.gmra.mxu0 %v10560_v12  ;;  %v2150_v57 = vld [vmem:[%s16347_s6 + $0x8e8] sm:$0xff] }
 0x4ee   :  { %3035 = vmatpush2.msra.mxu1 %v2455_v63  ;;  %3079 = vmatprep.subr.mxu0 %v2547_v53  ;;  %v1905_v63 = vld [vmem:[%s16347_s6 + $0x140] sm:$0xff] }
 0x4ef   :  { %3036 = vmatprep.subr.mxu1 %v2449_v61  ;;  %3080 = vmatpush1.msra.mxu0 %v2546_v23  ;;  %v2149_v53 = vld [vmem:[%s16347_s6 + $0x8e0] sm:$0xff]  ;;  %v1904_v61 = vld [vmem:[%s16347_s6 + $0x138] sm:$0xff]  ;;  %v2143_v23 = vld [vmem:[%s16347_s6 + $0x8b0] sm:$0xff] }
 0x4f0   :  { %3037 = vmatpush2.msra.mxu1 %v2448_v41  ;;  %3081 = vmatprep.subr.mxu0 %v2540_v1  ;;  %v1898_v41 = vld [vmem:[%s16347_s6 + $0x108] sm:$0xff] }
 0x4f1   :  { %3038 = vmatprep.subr.mxu1 %v2442_v4  ;;  %3082 = vmatpush1.msra.mxu0 %v2539_v6  ;;  %v2142_v1 = vld [vmem:[%s16347_s6 + $0x8a8] sm:$0xff]  ;;  %v1897_v4 = vld [vmem:[%s16347_s6 + $0x100] sm:$0xff]  ;;  %v2136_v6 = vld [vmem:[%s16347_s6 + $0x878] sm:$0xff] }
 0x4f2   :  { %3115 = vmatprep.mubr.f32.mxu0 %v16570_v10  ;;  %3039 = vmatpush2.msra.mxu1 %v2441_v18  ;;  %v1891_v18 = vld [vmem:[%s16347_s6 + $0xd0] sm:$0xff] }
 0x4f3   :  { %8222 = vmatmul.mubr.msk.f32.vlgmr.msra.gmra.mxu0 %vm528_vm4, %v10591_v35  ;;  %3122 = vmatprep.subr.mxu0 %v1975_v20  ;;  %v2135_v20 = vld [vmem:[%s16347_s6 + $0x870] sm:$0xff] }
 0x4f4   :  { %3040 = vmatprep.subr.mxu1 %v2435_v3  ;;  %3123 = vmatpush1.msra.mxu0 %v1974_v22  ;;  %v1890_v3 = vld [vmem:[%s16347_s6 + $0xc8] sm:$0xff]  ;;  %v2129_v22 = vld [vmem:[%s16347_s6 + $0x840] sm:$0xff] }
 0x4f5   :  { %3186 = vmatprep.mubr.f32.mxu0 %v10530_v55  ;;  %3041 = vmatpush2.msra.mxu1 %v2434_v19  ;;  %v1884_v19 = vld [vmem:[%s16347_s6 + $0x98] sm:$0xff] }
 0x4f6   :  { %3124 = vmatprep.subr.mxu0 %v1968_v24  ;;  %3042 = vmatprep.subr.mxu1 %v2428_v43  ;;  %v2128_v24 = vld [vmem:[%s16347_s6 + $0x838] sm:$0xff]  ;;  %v1883_v43 = vld [vmem:[%s16347_s6 + $0x90] sm:$0xff] }
 0x4f7   :  { %3125 = vmatpush1.msra.mxu0 %v1967_v56  ;;  %3043 = vmatpush2.msra.mxu1 %v2427_v45  ;;  %v2122_v56 = vld [vmem:[%s16347_s6 + $0x808] sm:$0xff]  ;;  %v1877_v45 = vld [vmem:[%s16347_s6 + $0x60] sm:$0xff] }
 0x4f8   :  { %3126 = vmatprep.subr.mxu0 %v1961_v59  ;;  %3045 = vmatmul.mubr.f32.vlgmr.msra.gmra.mxu1 %v10933_v13  ;;  %v2121_v59 = vld [vmem:[%s16347_s6 + $0x800] sm:$0xff] }
 0x4f9   :  { %3127 = vmatpush1.msra.mxu0 %v1960_v17  ;;  %3193 = vmatprep.subr.mxu1 %v2199_v51  ;;  %v1876_v17 = vld [vmem:[%s16347_s6 + $0x58] sm:$0xff]  ;;  %v2115_v51 = vld [vmem:[%s16347_s6 + $0x7d0] sm:$0xff] }
 0x4fa   :  { %3128 = vmatprep.subr.mxu0 %v1954_v25  ;;  %3194 = vmatpush1.msra.mxu1 %v2198_v37  ;;  %v1870_v25 = vld [vmem:[%s16347_s6 + $0x28] sm:$0xff] }
 0x4fb   :  { %3257 = vmatprep.mubr.f32.mxu1 %v10550_v0  ;;  %3129 = vmatpush1.msra.mxu0 %v1953_v58  ;;  %v2114_v37 = vld [vmem:[%s16347_s6 + $0x7c8] sm:$0xff]  ;;  %v1869_v58 = vld [vmem:[%s16347_s6 + $0x20] sm:$0xff] }
 0x4fc   :  { %3195 = vmatprep.subr.mxu1 %v2192_v21  ;;  %3130 = vmatprep.subr.mxu0 %v1947_v44  ;;  %v2108_v21 = vld [vmem:[%s16347_s6 + $0x798] sm:$0xff]  ;;  %v2087_v44 = vld [vmem:[%s16347_s6 + $0x6f0] sm:$0xff] }
 0x4fd   :  { %3196 = vmatpush1.msra.mxu1 %v2191_v60  ;;  %3131 = vmatpush1.msra.mxu0 %v1946_v62  ;;  %v2107_v60 = vld [vmem:[%s16347_s6 + $0x790] sm:$0xff]  ;;  %v2086_v62 = vld [vmem:[%s16347_s6 + $0x6e8] sm:$0xff] }
 0x4fe   :  { %3197 = vmatprep.subr.mxu1 %v2185_v2  ;;  %3132 = vmatprep.subr.mxu0 %v1940_v5  ;;  %v2101_v2 = vld [vmem:[%s16347_s6 + $0x760] sm:$0xff]  ;;  %v2080_v5 = vld [vmem:[%s16347_s6 + $0x6b8] sm:$0xff] }
 0x4ff   :  { %3198 = vmatpush1.msra.mxu1 %v2184_v7  ;;  %3133 = vmatpush1.msra.mxu0 %v1939_v9  ;;  %v2100_v7 = vld [vmem:[%s16347_s6 + $0x758] sm:$0xff]  ;;  %v2079_v9 = vld [vmem:[%s16347_s6 + $0x6b0] sm:$0xff] }
 0x500   :  { %3199 = vmatprep.subr.mxu1 %v2178_v11  ;;  %3134 = vmatprep.subr.mxu0 %v1933_v32  ;;  %v2094_v11 = vld [vmem:[%s16347_s6 + $0x728] sm:$0xff]  ;;  %v2073_v32 = vld [vmem:[%s16347_s6 + $0x680] sm:$0xff] }
 0x501   :  { %3200 = vmatpush1.msra.mxu1 %v2177_v49  ;;  %3135 = vmatpush1.msra.mxu0 %v1932_v28  ;;  %v2093_v49 = vld [vmem:[%s16347_s6 + $0x720] sm:$0xff]  ;;  %v2072_v28 = vld [vmem:[%s16347_s6 + $0x678] sm:$0xff] }
 0x502   :  { %3201 = vmatprep.subr.mxu1 %v2171_v36  ;;  %3136 = vmatprep.subr.mxu0 %v1926_v46  ;;  %v2311_v36 = vld [vmem:[%s16347_s6 + $0xdf0] sm:$0xff]  ;;  %v2066_v46 = vld [vmem:[%s16347_s6 + $0x648] sm:$0xff] }
 0x503   :  { %3202 = vmatpush1.msra.mxu1 %v2170_v54  ;;  %3137 = vmatpush1.msra.mxu0 %v1925_v34  ;;  %v2310_v54 = vld [vmem:[%s16347_s6 + $0xde8] sm:$0xff]  ;;  %v2065_v34 = vld [vmem:[%s16347_s6 + $0x640] sm:$0xff] }
 0x504   :  { %3203 = vmatprep.subr.mxu1 %v2164_v38  ;;  %3138 = vmatprep.subr.mxu0 %v1919_v42  ;;  %v2304_v38 = vld [vmem:[%s16347_s6 + $0xdb8] sm:$0xff]  ;;  %v2059_v42 = vld [vmem:[%s16347_s6 + $0x610] sm:$0xff] }
 0x505   :  { %3204 = vmatpush1.msra.mxu1 %v2163_v40  ;;  %3139 = vmatpush1.msra.mxu0 %v1918_v50  ;;  %v2303_v40 = vld [vmem:[%s16347_s6 + $0xdb0] sm:$0xff]  ;;  %v2058_v50 = vld [vmem:[%s16347_s6 + $0x608] sm:$0xff] }
 0x506   :  { %3205 = vmatprep.subr.mxu1 %v2157_v26  ;;  %3140 = vmatprep.subr.mxu0 %v1912_v30  ;;  %v2297_v26 = vld [vmem:[%s16347_s6 + $0xd80] sm:$0xff]  ;;  %v2052_v30 = vld [vmem:[%s16347_s6 + $0x5d8] sm:$0xff] }
 0x507   :  { %3206 = vmatpush1.msra.mxu1 %v2156_v27  ;;  %3141 = vmatpush1.msra.mxu0 %v1911_v31  ;;  %v2296_v27 = vld [vmem:[%s16347_s6 + $0xd78] sm:$0xff]  ;;  %v2051_v31 = vld [vmem:[%s16347_s6 + $0x5d0] sm:$0xff] }
 0x508   :  { %3207 = vmatprep.subr.mxu1 %v2150_v57  ;;  %3142 = vmatprep.subr.mxu0 %v1905_v63  ;;  %v2290_v57 = vld [vmem:[%s16347_s6 + $0xd48] sm:$0xff]  ;;  %v2045_v63 = vld [vmem:[%s16347_s6 + $0x5a0] sm:$0xff] }
 0x509   :  { %3208 = vmatpush1.msra.mxu1 %v2149_v53  ;;  %3143 = vmatpush1.msra.mxu0 %v1904_v61  ;;  %v2289_v53 = vld [vmem:[%s16347_s6 + $0xd40] sm:$0xff]  ;;  %v2044_v61 = vld [vmem:[%s16347_s6 + $0x598] sm:$0xff] }
 0x50a   :  { %3209 = vmatprep.subr.mxu1 %v2143_v23  ;;  %3144 = vmatprep.subr.mxu0 %v1898_v41  ;;  %v2283_v23 = vld [vmem:[%s16347_s6 + $0xd10] sm:$0xff]  ;;  %v2038_v41 = vld [vmem:[%s16347_s6 + $0x568] sm:$0xff] }
 0x50b   :  { %3210 = vmatpush1.msra.mxu1 %v2142_v1  ;;  %3145 = vmatpush1.msra.mxu0 %v1897_v4  ;;  %v2282_v1 = vld [vmem:[%s16347_s6 + $0xd08] sm:$0xff]  ;;  %v2037_v4 = vld [vmem:[%s16347_s6 + $0x560] sm:$0xff] }
 0x50c   :  { %3211 = vmatprep.subr.mxu1 %v2136_v6  ;;  %3146 = vmatprep.subr.mxu0 %v1891_v18  ;;  %v2276_v6 = vld [vmem:[%s16347_s6 + $0xcd8] sm:$0xff]  ;;  %v2031_v18 = vld [vmem:[%s16347_s6 + $0x530] sm:$0xff] }
 0x50d   :  { %3212 = vmatpush1.msra.mxu1 %v2135_v20  ;;  %3147 = vmatpush1.msra.mxu0 %v1890_v3  ;;  %v2275_v20 = vld [vmem:[%s16347_s6 + $0xcd0] sm:$0xff]  ;;  %v2030_v3 = vld [vmem:[%s16347_s6 + $0x528] sm:$0xff] }
 0x50e   :  { %3213 = vmatprep.subr.mxu1 %v2129_v22  ;;  %3148 = vmatprep.subr.mxu0 %v1884_v19  ;;  %v2269_v22 = vld [vmem:[%s16347_s6 + $0xca0] sm:$0xff]  ;;  %v2024_v19 = vld [vmem:[%s16347_s6 + $0x4f8] sm:$0xff] }
 0x50f   :  { %3214 = vmatpush1.msra.mxu1 %v2128_v24  ;;  %3149 = vmatpush1.msra.mxu0 %v1883_v43  ;;  %v2268_v24 = vld [vmem:[%s16347_s6 + $0xc98] sm:$0xff]  ;;  %v2023_v43 = vld [vmem:[%s16347_s6 + $0x4f0] sm:$0xff] }
 0x510   :  { %3215 = vmatprep.subr.mxu1 %v2122_v56  ;;  %3150 = vmatprep.subr.mxu0 %v1877_v45  ;;  %v2262_v56 = vld [vmem:[%s16347_s6 + $0xc68] sm:$0xff]  ;;  %v2017_v45 = vld [vmem:[%s16347_s6 + $0x4c0] sm:$0xff] }
 0x511   :  { %3216 = vmatpush1.msra.mxu1 %v2121_v59  ;;  %3151 = vmatpush1.msra.mxu0 %v1876_v17  ;;  %v2261_v59 = vld [vmem:[%s16347_s6 + $0xc60] sm:$0xff]  ;;  %v2016_v17 = vld [vmem:[%s16347_s6 + $0x4b8] sm:$0xff] }
 0x512   :  { %3217 = vmatprep.subr.mxu1 %v2115_v51  ;;  %3152 = vmatprep.subr.mxu0 %v1870_v25  ;;  %v2255_v51 = vld [vmem:[%s16347_s6 + $0xc30] sm:$0xff]  ;;  %v2010_v25 = vld [vmem:[%s16347_s6 + $0x488] sm:$0xff] }
 0x513   :  { %3218 = vmatpush1.msra.mxu1 %v2114_v37  ;;  %3153 = vmatpush1.msra.mxu0 %v1869_v58  ;;  %v2254_v37 = vld [vmem:[%s16347_s6 + $0xc28] sm:$0xff]  ;;  %v2009_v58 = vld [vmem:[%s16347_s6 + $0x480] sm:$0xff] }
 0x514   :  { %3219 = vmatprep.subr.mxu1 %v2108_v21  ;;  %3154 = vmatprep.subr.mxu0 %v2087_v44  ;;  %v2248_v21 = vld [vmem:[%s16347_s6 + $0xbf8] sm:$0xff]  ;;  %v2003_v44 = vld [vmem:[%s16347_s6 + $0x450] sm:$0xff] }
 0x515   :  { %3220 = vmatpush1.msra.mxu1 %v2107_v60  ;;  %3155 = vmatpush2.msra.mxu0 %v2086_v62  ;;  %v2247_v60 = vld [vmem:[%s16347_s6 + $0xbf0] sm:$0xff]  ;;  %v2002_v62 = vld [vmem:[%s16347_s6 + $0x448] sm:$0xff] }
 0x516   :  { %3221 = vmatprep.subr.mxu1 %v2101_v2  ;;  %3156 = vmatprep.subr.mxu0 %v2080_v5  ;;  %v2241_v2 = vld [vmem:[%s16347_s6 + $0xbc0] sm:$0xff]  ;;  %v1996_v5 = vld [vmem:[%s16347_s6 + $0x418] sm:$0xff] }
 0x517   :  { %3222 = vmatpush1.msra.mxu1 %v2100_v7  ;;  %3157 = vmatpush2.msra.mxu0 %v2079_v9  ;;  %v2240_v7 = vld [vmem:[%s16347_s6 + $0xbb8] sm:$0xff]  ;;  %v1995_v9 = vld [vmem:[%s16347_s6 + $0x410] sm:$0xff] }
 0x518   :  { %3223 = vmatprep.subr.mxu1 %v2094_v11  ;;  %3158 = vmatprep.subr.mxu0 %v2073_v32  ;;  %v2234_v11 = vld [vmem:[%s16347_s6 + $0xb88] sm:$0xff]  ;;  %v1989_v32 = vld [vmem:[%s16347_s6 + $0x3e0] sm:$0xff] }
 0x519   :  { %3224 = vmatpush1.msra.mxu1 %v2093_v49  ;;  %3159 = vmatpush2.msra.mxu0 %v2072_v28  ;;  %v2233_v49 = vld [vmem:[%s16347_s6 + $0xb80] sm:$0xff]  ;;  %v1988_v28 = vld [vmem:[%s16347_s6 + $0x3d8] sm:$0xff] }
 0x51a   :  { %3225 = vmatprep.subr.mxu1 %v2311_v36  ;;  %3160 = vmatprep.subr.mxu0 %v2066_v46  ;;  %v2227_v36 = vld [vmem:[%s16347_s6 + $0xb50] sm:$0xff]  ;;  %v1982_v46 = vld [vmem:[%s16347_s6 + $0x3a8] sm:$0xff] }
 0x51b   :  { %3226 = vmatpush2.msra.mxu1 %v2310_v54  ;;  %3161 = vmatpush2.msra.mxu0 %v2065_v34  ;;  %v2226_v54 = vld [vmem:[%s16347_s6 + $0xb48] sm:$0xff]  ;;  %v1981_v34 = vld [vmem:[%s16347_s6 + $0x3a0] sm:$0xff] }
 0x51c   :  { %3227 = vmatprep.subr.mxu1 %v2304_v38  ;;  %3162 = vmatprep.subr.mxu0 %v2059_v42  ;;  %v2220_v38 = vld [vmem:[%s16347_s6 + $0xb18] sm:$0xff]  ;;  %v2219_v42 = vld [vmem:[%s16347_s6 + $0xb10] sm:$0xff] }
 0x51d   :  { %3228 = vmatpush2.msra.mxu1 %v2303_v40  ;;  %3163 = vmatpush2.msra.mxu0 %v2058_v50  ;;  %v2423_v40 = vld [vmem:[%s16347_s6 + $0x1170] sm:$0xff]  ;;  %v2213_v50 = vld [vmem:[%s16347_s6 + $0xae0] sm:$0xff] }
 0x51e   :  { %3229 = vmatprep.subr.mxu1 %v2297_v26  ;;  %3164 = vmatprep.subr.mxu0 %v2052_v30  ;;  %v2422_v26 = vld [vmem:[%s16347_s6 + $0x1168] sm:$0xff]  ;;  %v2212_v30 = vld [vmem:[%s16347_s6 + $0xad8] sm:$0xff] }
 0x51f   :  { %3230 = vmatpush2.msra.mxu1 %v2296_v27  ;;  %3165 = vmatpush2.msra.mxu0 %v2051_v31  ;;  %v2416_v27 = vld [vmem:[%s16347_s6 + $0x1138] sm:$0xff]  ;;  %v2206_v31 = vld [vmem:[%s16347_s6 + $0xaa8] sm:$0xff] }
 0x520   :  { %3231 = vmatprep.subr.mxu1 %v2290_v57  ;;  %3166 = vmatprep.subr.mxu0 %v2045_v63  ;;  %v2415_v57 = vld [vmem:[%s16347_s6 + $0x1130] sm:$0xff]  ;;  %v2205_v63 = vld [vmem:[%s16347_s6 + $0xaa0] sm:$0xff] }
 0x521   :  { %3232 = vmatpush2.msra.mxu1 %v2289_v53  ;;  %3167 = vmatpush2.msra.mxu0 %v2044_v61  ;;  %v2409_v53 = vld [vmem:[%s16347_s6 + $0x1100] sm:$0xff]  ;;  %v2408_v61 = vld [vmem:[%s16347_s6 + $0x10f8] sm:$0xff] }
 0x522   :  { %3233 = vmatprep.subr.mxu1 %v2283_v23  ;;  %3168 = vmatprep.subr.mxu0 %v2038_v41  ;;  %v2549_v23 = vld [vmem:[%s16347_s6 + $0x1560] sm:$0xff]  ;;  %v2402_v41 = vld [vmem:[%s16347_s6 + $0x10c8] sm:$0xff] }
 0x523   :  { %3234 = vmatpush2.msra.mxu1 %v2282_v1  ;;  %3169 = vmatpush2.msra.mxu0 %v2037_v4  ;;  %v2548_v1 = vld [vmem:[%s16347_s6 + $0x1558] sm:$0xff]  ;;  %v2401_v4 = vld [vmem:[%s16347_s6 + $0x10c0] sm:$0xff] }
 0x524   :  { %3235 = vmatprep.subr.mxu1 %v2276_v6  ;;  %3170 = vmatprep.subr.mxu0 %v2031_v18  ;;  %v2542_v6 = vld [vmem:[%s16347_s6 + $0x1528] sm:$0xff]  ;;  %v2395_v18 = vld [vmem:[%s16347_s6 + $0x1090] sm:$0xff] }
 0x525   :  { %3236 = vmatpush2.msra.mxu1 %v2275_v20  ;;  %3171 = vmatpush2.msra.mxu0 %v2030_v3  ;;  %v2541_v20 = vld [vmem:[%s16347_s6 + $0x1520] sm:$0xff]  ;;  %v2394_v3 = vld [vmem:[%s16347_s6 + $0x1088] sm:$0xff] }
 0x526   :  { %3237 = vmatprep.subr.mxu1 %v2269_v22  ;;  %3172 = vmatprep.subr.mxu0 %v2024_v19  ;;  %v2088_v22 = vld [vmem:[%s16347_s6 + $0x6f8] sm:$0xff] }
 0x527   :  { %3238 = vmatpush2.msra.mxu1 %v2268_v24  ;;  %3173 = vmatpush2.msra.mxu0 %v2023_v43  ;;  %v2388_v19 = vld [vmem:[%s16347_s6 + $0x1058] sm:$0xff]  ;;  %v2387_v43 = vld [vmem:[%s16347_s6 + $0x1050] sm:$0xff] }
 0x528   :  { %3239 = vmatprep.subr.mxu1 %v2262_v56  ;;  %3174 = vmatprep.subr.mxu0 %v2017_v45  ;;  %v1976_v24 = vld [vmem:[%s16347_s6 + $0x378] sm:$0xff]  ;;  %v2081_v56 = vld [vmem:[%s16347_s6 + $0x6c0] sm:$0xff] }
 0x529   :  { %3240 = vmatpush2.msra.mxu1 %v2261_v59  ;;  %3175 = vmatpush2.msra.mxu0 %v2016_v17  ;;  %v2381_v45 = vld [vmem:[%s16347_s6 + $0x1020] sm:$0xff]  ;;  %v2380_v17 = vld [vmem:[%s16347_s6 + $0x1018] sm:$0xff] }
 0x52a   :  { %3241 = vmatprep.subr.mxu1 %v2255_v51  ;;  %3176 = vmatprep.subr.mxu0 %v2010_v25  ;;  %v1969_v59 = vld [vmem:[%s16347_s6 + $0x340] sm:$0xff]  ;;  %v2074_v51 = vld [vmem:[%s16347_s6 + $0x688] sm:$0xff] }
 0x52b   :  { %3242 = vmatpush2.msra.mxu1 %v2254_v37  ;;  %3177 = vmatpush2.msra.mxu0 %v2009_v58  ;;  %v2374_v25 = vld [vmem:[%s16347_s6 + $0xfe8] sm:$0xff]  ;;  %v2373_v58 = vld [vmem:[%s16347_s6 + $0xfe0] sm:$0xff] }
 0x52c   :  { %3243 = vmatprep.subr.mxu1 %v2248_v21  ;;  %3178 = vmatprep.subr.mxu0 %v2003_v44  ;;  %v1962_v37 = vld [vmem:[%s16347_s6 + $0x308] sm:$0xff]  ;;  %v2367_v21 = vld [vmem:[%s16347_s6 + $0xfb0] sm:$0xff] }
 0x52d   :  { %3244 = vmatpush2.msra.mxu1 %v2247_v60  ;;  %3179 = vmatpush2.msra.mxu0 %v2002_v62  ;;  %v1955_v44 = vld [vmem:[%s16347_s6 + $0x2d0] sm:$0xff]  ;;  %v2366_v60 = vld [vmem:[%s16347_s6 + $0xfa8] sm:$0xff]  ;;  %v2060_v62 = vld [vmem:[%s16347_s6 + $0x618] sm:$0xff] }
 0x52e   :  { %3245 = vmatprep.subr.mxu1 %v2241_v2  ;;  %3180 = vmatprep.subr.mxu0 %v1996_v5  ;;  %v2360_v2 = vld [vmem:[%s16347_s6 + $0xf78] sm:$0xff] }
 0x52f   :  { %3246 = vmatpush2.msra.mxu1 %v2240_v7  ;;  %3181 = vmatpush2.msra.mxu0 %v1995_v9  ;;  %v1948_v5 = vld [vmem:[%s16347_s6 + $0x298] sm:$0xff]  ;;  %v2359_v7 = vld [vmem:[%s16347_s6 + $0xf70] sm:$0xff]  ;;  %v2053_v9 = vld [vmem:[%s16347_s6 + $0x5e0] sm:$0xff] }
 0x530   :  { %3247 = vmatprep.subr.mxu1 %v2234_v11  ;;  %3182 = vmatprep.subr.mxu0 %v1989_v32  ;;  %v2353_v11 = vld [vmem:[%s16347_s6 + $0xf40] sm:$0xff] }
 0x531   :  { %3248 = vmatpush2.msra.mxu1 %v2233_v49  ;;  %3183 = vmatpush2.msra.mxu0 %v1988_v28  ;;  %v1941_v32 = vld [vmem:[%s16347_s6 + $0x260] sm:$0xff]  ;;  %v2352_v49 = vld [vmem:[%s16347_s6 + $0xf38] sm:$0xff]  ;;  %v2046_v28 = vld [vmem:[%s16347_s6 + $0x5a8] sm:$0xff] }
 0x532   :  { %3249 = vmatprep.subr.mxu1 %v2227_v36  ;;  %3184 = vmatprep.subr.mxu0 %v1982_v46  ;;  %v2346_v36 = vld [vmem:[%s16347_s6 + $0xf08] sm:$0xff] }
 0x533   :  { %3250 = vmatpush2.msra.mxu1 %v2226_v54  ;;  %3185 = vmatpush2.msra.mxu0 %v1981_v34  ;;  %v1934_v46 = vld [vmem:[%s16347_s6 + $0x228] sm:$0xff]  ;;  %v2345_v54 = vld [vmem:[%s16347_s6 + $0xf00] sm:$0xff]  ;;  %v2039_v34 = vld [vmem:[%s16347_s6 + $0x570] sm:$0xff] }
 0x534   :  { %3251 = vmatprep.subr.mxu1 %v2220_v38  ;;  %3187 = vmatmul.mubr.f32.vlgmr.msra.gmra.mxu0 %v10534_v39  ;;  %v2339_v38 = vld [vmem:[%s16347_s6 + $0xed0] sm:$0xff] }
 0x535   :  { %3252 = vmatpush2.msra.mxu1 %v2219_v42  ;;  %3264 = vmatprep.subr.mxu0 %v2423_v40  ;;  %v1927_v42 = vld [vmem:[%s16347_s6 + $0x1f0] sm:$0xff]  ;;  %v2338_v40 = vld [vmem:[%s16347_s6 + $0xec8] sm:$0xff] }
 0x536   :  { %3253 = vmatprep.subr.mxu1 %v2213_v50  ;;  %3265 = vmatpush1.msra.mxu0 %v2422_v26  ;;  %v2032_v50 = vld [vmem:[%s16347_s6 + $0x538] sm:$0xff] }
 0x537   :  { %3328 = vmatprep.mubr.f32.mxu0 %v10580_v52  ;;  %3254 = vmatpush2.msra.mxu1 %v2212_v30  ;;  %v2332_v26 = vld [vmem:[%s16347_s6 + $0xe98] sm:$0xff] }
 0x538   :  { %3266 = vmatprep.subr.mxu0 %v2416_v27  ;;  %3255 = vmatprep.subr.mxu1 %v2206_v31  ;;  %v1920_v30 = vld [vmem:[%s16347_s6 + $0x1b8] sm:$0xff]  ;;  %v2331_v27 = vld [vmem:[%s16347_s6 + $0xe90] sm:$0xff]  ;;  %v2025_v31 = vld [vmem:[%s16347_s6 + $0x500] sm:$0xff] }
 0x539   :  { %3267 = vmatpush1.msra.mxu0 %v2415_v57  ;;  %3256 = vmatpush2.msra.mxu1 %v2205_v63  ;;  %v2325_v57 = vld [vmem:[%s16347_s6 + $0xe60] sm:$0xff] }
 0x53a   :  { %3268 = vmatprep.subr.mxu0 %v2409_v53  ;;  %3258 = vmatmul.mubr.f32.vlgmr.msra.gmra.mxu1 %v10560_v12  ;;  %v1913_v63 = vld [vmem:[%s16347_s6 + $0x180] sm:$0xff]  ;;  %v2324_v53 = vld [vmem:[%s16347_s6 + $0xe58] sm:$0xff] }
 0x53b   :  { %3269 = vmatpush1.msra.mxu0 %v2408_v61  ;;  %3363 = vmatprep.subr.mxu1 %v2549_v23  ;;  %v2018_v61 = vld [vmem:[%s16347_s6 + $0x4c8] sm:$0xff] }
 0x53c   :  { %3270 = vmatprep.subr.mxu0 %v2402_v41  ;;  %3364 = vmatpush1.msra.mxu1 %v2548_v1  ;;  %v2318_v23 = vld [vmem:[%s16347_s6 + $0xe28] sm:$0xff]  ;;  %v2317_v1 = vld [vmem:[%s16347_s6 + $0xe20] sm:$0xff] }
 0x53d   :  { %3271 = vmatpush1.msra.mxu0 %v2401_v4  ;;  %3365 = vmatprep.subr.mxu1 %v2542_v6  ;;  %v1906_v41 = vld [vmem:[%s16347_s6 + $0x148] sm:$0xff]  ;;  %v2011_v4 = vld [vmem:[%s16347_s6 + $0x490] sm:$0xff] }
 0x53e   :  { %3272 = vmatprep.subr.mxu0 %v2395_v18  ;;  %3366 = vmatpush1.msra.mxu1 %v2541_v20  ;;  %v2535_v6 = vld [vmem:[%s16347_s6 + $0x14f0] sm:$0xff]  ;;  %v2534_v20 = vld [vmem:[%s16347_s6 + $0x14e8] sm:$0xff] }
 0x53f   :  { %3399 = vmatprep.mubr.f32.mxu1 %v16570_v10  ;;  %3273 = vmatpush1.msra.mxu0 %v2394_v3  ;;  %v1899_v18 = vld [vmem:[%s16347_s6 + $0x110] sm:$0xff]  ;;  %v2004_v3 = vld [vmem:[%s16347_s6 + $0x458] sm:$0xff] }
 0x540   :  { %8223 = vmatmul.mubr.msk.f32.vlgmr.msra.gmra.mxu1 %vm528_vm4, %v10591_v35  ;;  %8489 = vmatprep.subr.mxu1 %v2088_v22  ;;  %v2528_v22 = vld [vmem:[%s16347_s6 + $0x14b8] sm:$0xff] }
 0x541   :  { %3274 = vmatprep.subr.mxu0 %v2388_v19  ;;  %8490 = vmatpush3.msra.mxu1 %v1976_v24  ;;  %v1892_v19 = vld [vmem:[%s16347_s6 + $0xd8] sm:$0xff]  ;;  %v2527_v24 = vld [vmem:[%s16347_s6 + $0x14b0] sm:$0xff] }
 0x542   :  { %3470 = vmatprep.mubr.f32.mxu1 %v10530_v55  ;;  %3275 = vmatpush1.msra.mxu0 %v2387_v43  ;;  %v2067_v55 = vld [vmem:[%s16347_s6 + $0x650] sm:$0xff]  ;;  %v1997_v43 = vld [vmem:[%s16347_s6 + $0x420] sm:$0xff] }
 0x543   :  { %8491 = vmatprep.subr.mxu1 %v2081_v56  ;;  %3276 = vmatprep.subr.mxu0 %v2381_v45  ;;  %v2521_v56 = vld [vmem:[%s16347_s6 + $0x1480] sm:$0xff] }
 0x544   :  { %8492 = vmatpush3.msra.mxu1 %v1969_v59  ;;  %3277 = vmatpush1.msra.mxu0 %v2380_v17  ;;  %v1885_v45 = vld [vmem:[%s16347_s6 + $0xa0] sm:$0xff]  ;;  %v2520_v59 = vld [vmem:[%s16347_s6 + $0x1478] sm:$0xff]  ;;  %v1990_v17 = vld [vmem:[%s16347_s6 + $0x3e8] sm:$0xff] }
 0x545   :  { %8493 = vmatprep.subr.mxu1 %v2074_v51  ;;  %3278 = vmatprep.subr.mxu0 %v2374_v25  ;;  %v2514_v51 = vld [vmem:[%s16347_s6 + $0x1448] sm:$0xff] }
 0x546   :  { %8494 = vmatpush3.msra.mxu1 %v1962_v37  ;;  %3279 = vmatpush1.msra.mxu0 %v2373_v58  ;;  %v1878_v25 = vld [vmem:[%s16347_s6 + $0x68] sm:$0xff]  ;;  %v2513_v37 = vld [vmem:[%s16347_s6 + $0x1440] sm:$0xff]  ;;  %v1983_v58 = vld [vmem:[%s16347_s6 + $0x3b0] sm:$0xff] }
 0x547   :  { %8495 = vmatprep.subr.mxu1 %v2067_v55  ;;  %3280 = vmatprep.subr.mxu0 %v2367_v21  ;;  %v2507_v55 = vld [vmem:[%s16347_s6 + $0x1410] sm:$0xff] }
 0x548   :  { %8496 = vmatpush3.msra.mxu1 %v1955_v44  ;;  %3281 = vmatpush1.msra.mxu0 %v2366_v60  ;;  %v1871_v21 = vld [vmem:[%s16347_s6 + $0x30] sm:$0xff]  ;;  %v2506_v44 = vld [vmem:[%s16347_s6 + $0x1408] sm:$0xff]  ;;  %v2312_v60 = vld [vmem:[%s16347_s6 + $0xdf8] sm:$0xff] }
 0x549   :  { %8497 = vmatprep.subr.mxu1 %v2060_v62  ;;  %3282 = vmatprep.subr.mxu0 %v2360_v2  ;;  %v2500_v62 = vld [vmem:[%s16347_s6 + $0x13d8] sm:$0xff] }
 0x54a   :  { %8498 = vmatpush3.msra.mxu1 %v1948_v5  ;;  %3283 = vmatpush1.msra.mxu0 %v2359_v7  ;;  %v2200_v2 = vld [vmem:[%s16347_s6 + $0xa78] sm:$0xff]  ;;  %v2499_v5 = vld [vmem:[%s16347_s6 + $0x13d0] sm:$0xff]  ;;  %v2305_v7 = vld [vmem:[%s16347_s6 + $0xdc0] sm:$0xff] }
 0x54b   :  { %8499 = vmatprep.subr.mxu1 %v2053_v9  ;;  %3284 = vmatprep.subr.mxu0 %v2353_v11  ;;  %v2493_v9 = vld [vmem:[%s16347_s6 + $0x13a0] sm:$0xff] }
 0x54c   :  { %8500 = vmatpush3.msra.mxu1 %v1941_v32  ;;  %3285 = vmatpush1.msra.mxu0 %v2352_v49  ;;  %v2193_v11 = vld [vmem:[%s16347_s6 + $0xa40] sm:$0xff]  ;;  %v2492_v32 = vld [vmem:[%s16347_s6 + $0x1398] sm:$0xff]  ;;  %v2298_v49 = vld [vmem:[%s16347_s6 + $0xd88] sm:$0xff] }
 0x54d   :  { %8501 = vmatprep.subr.mxu1 %v2046_v28  ;;  %3286 = vmatprep.subr.mxu0 %v2346_v36  ;;  %v2486_v28 = vld [vmem:[%s16347_s6 + $0x1368] sm:$0xff] }
 0x54e   :  { %8502 = vmatpush3.msra.mxu1 %v1934_v46  ;;  %3287 = vmatpush1.msra.mxu0 %v2345_v54  ;;  %v2186_v36 = vld [vmem:[%s16347_s6 + $0xa08] sm:$0xff]  ;;  %v2485_v46 = vld [vmem:[%s16347_s6 + $0x1360] sm:$0xff]  ;;  %v2291_v54 = vld [vmem:[%s16347_s6 + $0xd50] sm:$0xff] }
 0x54f   :  { %8503 = vmatprep.subr.mxu1 %v2039_v34  ;;  %3288 = vmatprep.subr.mxu0 %v2339_v38  ;;  %v2479_v34 = vld [vmem:[%s16347_s6 + $0x1330] sm:$0xff] }
 0x550   :  { %8504 = vmatpush3.msra.mxu1 %v1927_v42  ;;  %3289 = vmatpush1.msra.mxu0 %v2338_v40  ;;  %v2179_v38 = vld [vmem:[%s16347_s6 + $0x9d0] sm:$0xff]  ;;  %v2478_v42 = vld [vmem:[%s16347_s6 + $0x1328] sm:$0xff] }
 0x551   :  { %8505 = vmatprep.subr.mxu1 %v2032_v50  ;;  %3290 = vmatprep.subr.mxu0 %v2332_v26  ;;  %v2284_v50 = vld [vmem:[%s16347_s6 + $0xd18] sm:$0xff] }
 0x552   :  { %8506 = vmatpush3.msra.mxu1 %v1920_v30  ;;  %3291 = vmatpush1.msra.mxu0 %v2331_v27  ;;  %v2472_v26 = vld [vmem:[%s16347_s6 + $0x12f8] sm:$0xff]  ;;  %v2471_v27 = vld [vmem:[%s16347_s6 + $0x12f0] sm:$0xff] }
 0x553   :  { %8507 = vmatprep.subr.mxu1 %v2025_v31  ;;  %3292 = vmatprep.subr.mxu0 %v2325_v57  ;;  %v2172_v30 = vld [vmem:[%s16347_s6 + $0x998] sm:$0xff]  ;;  %v2277_v57 = vld [vmem:[%s16347_s6 + $0xce0] sm:$0xff] }
 0x554   :  { %8508 = vmatpush3.msra.mxu1 %v1913_v63  ;;  %3293 = vmatpush1.msra.mxu0 %v2324_v53  ;;  %v2465_v63 = vld [vmem:[%s16347_s6 + $0x12c0] sm:$0xff] }
 0x555   :  { %8509 = vmatprep.subr.mxu1 %v2018_v61  ;;  %3294 = vmatprep.subr.mxu0 %v2318_v23  ;;  %v2165_v53 = vld [vmem:[%s16347_s6 + $0x960] sm:$0xff]  ;;  %v2464_v61 = vld [vmem:[%s16347_s6 + $0x12b8] sm:$0xff] }
 0x556   :  { %8510 = vmatpush3.msra.mxu1 %v1906_v41  ;;  %3295 = vmatpush1.msra.mxu0 %v2317_v1  ;;  %v2270_v41 = vld [vmem:[%s16347_s6 + $0xca8] sm:$0xff] }
 0x557   :  { %8511 = vmatprep.subr.mxu1 %v2011_v4  ;;  %3296 = vmatprep.subr.mxu0 %v2535_v6  ;;  %v2458_v1 = vld [vmem:[%s16347_s6 + $0x1288] sm:$0xff] }
 0x558   :  { %8512 = vmatpush3.msra.mxu1 %v1899_v18  ;;  %3297 = vmatpush2.msra.mxu0 %v2534_v20  ;;  %v2158_v18 = vld [vmem:[%s16347_s6 + $0x928] sm:$0xff]  ;;  %v2457_v20 = vld [vmem:[%s16347_s6 + $0x1280] sm:$0xff] }
 0x559   :  { %8513 = vmatprep.subr.mxu1 %v2004_v3  ;;  %3298 = vmatprep.subr.mxu0 %v2528_v22  ;;  %v2263_v3 = vld [vmem:[%s16347_s6 + $0xc70] sm:$0xff] }
 0x55a   :  { %8514 = vmatpush3.msra.mxu1 %v1892_v19  ;;  %3299 = vmatpush2.msra.mxu0 %v2527_v24  ;;  %v2451_v22 = vld [vmem:[%s16347_s6 + $0x1250] sm:$0xff] }
 0x55b   :  { %8515 = vmatprep.subr.mxu1 %v1997_v43  ;;  %3300 = vmatprep.subr.mxu0 %v2521_v56  ;;  %v2151_v24 = vld [vmem:[%s16347_s6 + $0x8f0] sm:$0xff]  ;;  %v2450_v43 = vld [vmem:[%s16347_s6 + $0x1248] sm:$0xff] }
 0x55c   :  { %8516 = vmatpush3.msra.mxu1 %v1885_v45  ;;  %3301 = vmatpush2.msra.mxu0 %v2520_v59  ;;  %v2256_v59 = vld [vmem:[%s16347_s6 + $0xc38] sm:$0xff] }
 0x55d   :  { %8517 = vmatprep.subr.mxu1 %v1990_v17  ;;  %3302 = vmatprep.subr.mxu0 %v2514_v51  ;;  %v2444_v17 = vld [vmem:[%s16347_s6 + $0x1218] sm:$0xff] }
 0x55e   :  { %8518 = vmatpush3.msra.mxu1 %v1878_v25  ;;  %3303 = vmatpush2.msra.mxu0 %v2513_v37  ;;  %v2144_v51 = vld [vmem:[%s16347_s6 + $0x8b8] sm:$0xff]  ;;  %v2443_v25 = vld [vmem:[%s16347_s6 + $0x1210] sm:$0xff] }
 0x55f   :  { %8519 = vmatprep.subr.mxu1 %v1983_v58  ;;  %3304 = vmatprep.subr.mxu0 %v2507_v55  ;;  %v2249_v58 = vld [vmem:[%s16347_s6 + $0xc00] sm:$0xff] }
 0x560   :  { %8520 = vmatpush3.msra.mxu1 %v1871_v21  ;;  %3305 = vmatpush2.msra.mxu0 %v2506_v44  ;;  %v2437_v55 = vld [vmem:[%s16347_s6 + $0x11e0] sm:$0xff]  ;;  %v2436_v44 = vld [vmem:[%s16347_s6 + $0x11d8] sm:$0xff] }
 0x561   :  { %3471 = vmatmul.mubr.f32.vlgmr.msra.gmra.mxu1 %v10534_v39  ;;  %8524 = vmatprep.subr.mxu1 %v2312_v60  ;;  %v12019_v39 = vpop.f32.mrf.mxu1  ;;  %v2137_v21 = vld [vmem:[%s16347_s6 + $0x880] sm:$0xff] }
 0x562   :  { %3306 = vmatprep.subr.mxu0 %v2500_v62  ;;  %8525 = vmatpush3.msra.mxu1 %v2200_v2  ;;  %v2242_v62 = vld [vmem:[%s16347_s6 + $0xbc8] sm:$0xff] }
 0x563   :  { %3540 = vmatprep.mubr.f32.mxu1 %v10550_v0  ;;  %3307 = vmatpush2.msra.mxu0 %v2499_v5  ;;  %v12034_v0 = vpop.f32.mrf.mxu0  ;;  %v2693_v40 = vpop.f32.mrf.mxu1  ;;  %v2430_v2 = vld [vmem:[%s16347_s6 + $0x11a8] sm:$0xff] }
 0x564   :  { %8526 = vmatprep.subr.mxu1 %v2305_v7  ;;  %3308 = vmatprep.subr.mxu0 %v2493_v9  ;;  %v2130_v7 = vld [vmem:[%s16347_s6 + $0x848] sm:$0xff]  ;;  %v2429_v9 = vld [vmem:[%s16347_s6 + $0x11a0] sm:$0xff] }
 0x565   :  { %8527 = vmatpush3.msra.mxu1 %v2193_v11  ;;  %3309 = vmatpush2.msra.mxu0 %v2492_v32  ;;  %v2622_v31 = vpop.f32.mrf.mxu0  ;;  %v12072_v23 = vpop.f32.mrf.mxu1  ;;  %v2235_v11 = vld [vmem:[%s16347_s6 + $0xb90] sm:$0xff] }
 0x566   :  { %8528 = vmatprep.subr.mxu1 %v2298_v49  ;;  %3310 = vmatprep.subr.mxu0 %v2486_v28  ;;  %v2694_v6 = vadd.f32 %v2693_v40, %v2622_v31  ;;  %v2123_v32 = vld [vmem:[%s16347_s6 + $0x810] sm:$0xff]  ;;  %v2536_v49 = vld [vmem:[%s16347_s6 + $0x14f8] sm:$0xff]  ;;  %v2109_v40 = vld [vmem:[%s16347_s6 + $0x7a0] sm:$0xff] }
 0x567   :  { %8529 = vmatpush3.msra.mxu1 %v2186_v36  ;;  %3311 = vmatpush2.msra.mxu0 %v2485_v46  ;;  %v2835_v45 = vpop.f32.mrf.mxu1  ;;  %v2228_v28 = vld [vmem:[%s16347_s6 + $0xb58] sm:$0xff]  ;;  %v2515_v31 = vld [vmem:[%s16347_s6 + $0x1450] sm:$0xff] }
 0x568   :  { %8530 = vmatprep.subr.mxu1 %v2291_v54  ;;  %3312 = vmatprep.subr.mxu0 %v2479_v34  ;;  %v2424_v36 = vld [vmem:[%s16347_s6 + $0x1178] sm:$0xff]  ;;  %v2529_v34 = vld [vmem:[%s16347_s6 + $0x14c0] sm:$0xff] }
 0x569   :  { %8531 = vmatpush3.msra.mxu1 %v2179_v38  ;;  %3313 = vmatpush2.msra.mxu0 %v2478_v42  ;;  %v2116_v54 = vld [vmem:[%s16347_s6 + $0x7d8] sm:$0xff]  ;;  %v2221_v38 = vld [vmem:[%s16347_s6 + $0xb20] sm:$0xff] }
 0x56a   :  { %8532 = vmatprep.subr.mxu1 %v2284_v50  ;;  %3314 = vmatprep.subr.mxu0 %v2472_v26  ;;  %v2417_v42 = vld [vmem:[%s16347_s6 + $0x1140] sm:$0xff]  ;;  %v2522_v50 = vld [vmem:[%s16347_s6 + $0x1488] sm:$0xff] }
 0x56b   :  { %8533 = vmatpush3.msra.mxu1 %v2172_v30  ;;  %3315 = vmatpush2.msra.mxu0 %v2471_v27  ;;  %v12080_v4 = vpop.f32.mrf.mxu0  ;;  %v2214_v26 = vld [vmem:[%s16347_s6 + $0xae8] sm:$0xff] }
 0x56c   :  { %8534 = vmatprep.subr.mxu1 %v2277_v57  ;;  %3316 = vmatprep.subr.mxu0 %v2465_v63  ;;  %v2410_v27 = vld [vmem:[%s16347_s6 + $0x1108] sm:$0xff]  ;;  %v2207_v57 = vld [vmem:[%s16347_s6 + $0xab0] sm:$0xff] }
 0x56d   :  { %8535 = vmatpush3.msra.mxu1 %v2165_v53  ;;  %3317 = vmatpush2.msra.mxu0 %v2464_v61  ;;  %v2764_v19 = vpop.f32.mrf.mxu0  ;;  %v2403_v63 = vld [vmem:[%s16347_s6 + $0x10d0] sm:$0xff]  ;;  %v2508_v61 = vld [vmem:[%s16347_s6 + $0x1418] sm:$0xff] }
 0x56e   :  { %8536 = vmatprep.subr.mxu1 %v2270_v41  ;;  %3318 = vmatprep.subr.mxu0 %v2458_v1  ;;  %v2765_v56 = vadd.f32 %v2764_v19, %v2694_v6  ;;  %v2095_v53 = vld [vmem:[%s16347_s6 + $0x730] sm:$0xff]  ;;  %v2396_v41 = vld [vmem:[%s16347_s6 + $0x1098] sm:$0xff]  ;;  %v2501_v6 = vld [vmem:[%s16347_s6 + $0x13e0] sm:$0xff] }
 0x56f   :  { %8537 = vmatpush3.msra.mxu1 %v2158_v18  ;;  %3319 = vmatpush2.msra.mxu0 %v2457_v20  ;;  %v2550_v18 = vld [vmem:[%s16347_s6 + $0x1568] sm:$0xff]  ;;  %v2389_v20 = vld [vmem:[%s16347_s6 + $0x1060] sm:$0xff] }
 0x570   :  { %8538 = vmatprep.subr.mxu1 %v2263_v3  ;;  %3320 = vmatprep.subr.mxu0 %v2451_v22  ;;  %v12112_v37 = vadd.f32 %v2835_v45, %v2765_v56  ;;  %v2494_v3 = vld [vmem:[%s16347_s6 + $0x13a8] sm:$0xff]  ;;  %v2543_v22 = vld [vmem:[%s16347_s6 + $0x1530] sm:$0xff]  ;;  %v12236_v45 = vld [vmem:[%s16350_s7 + $0x78] sm:$0xff] }
 0x571   :  { %8539 = vmatpush3.msra.mxu1 %v2151_v24  ;;  %3321 = vmatpush2.msra.mxu0 %v2450_v43  ;;  %v12226_v24 = vld [vmem:[%s16350_s7 + $0xf8] sm:$0xff]  ;;  %v2692_v43 = vadd.f32 %v12019_v39, %v12034_v0  ;;  %v2487_v56 = vld [vmem:[%s16347_s6 + $0x1370] sm:$0xff] }
 0x572   :  { %16653 = vst [vmem:[#allocation15_spill] sm:$0xff] %v12112_v37  ;;  %8540 = vmatprep.subr.mxu1 %v2256_v59  ;;  %3322 = vmatprep.subr.mxu0 %v2444_v17  ;;  %v3693_v60 = vsel %vm75_vm0, %v12112_v37, 0.0  ;;  %v2375_v59 = vld [vmem:[%s16347_s6 + $0xff0] sm:$0xff]  ;;  %v2480_v17 = vld [vmem:[%s16347_s6 + $0x1338] sm:$0xff] }
 0x573   :  { %8541 = vmatpush3.msra.mxu1 %v2144_v51  ;;  %3323 = vmatpush2.msra.mxu0 %v2443_v25  ;;  %v3694_v5 = vrot.slane %v3693_v60, 4  ;;  %v12246_v39 = vld [vmem:[%s16350_s7 + $0xf0] sm:$0xff]  ;;  %v2763_v0 = vadd.f32 %v12080_v4, %v2692_v43  ;;  %v2368_v4 = vld [vmem:[%s16347_s6 + $0xfb8] sm:$0xff]  ;;  %v12456_v43 = vld [vmem:[%s16350_s7 + $0x1e8] sm:$0xff] }
 0x574   :  { %8542 = vmatprep.subr.mxu1 %v2249_v58  ;;  %3324 = vmatprep.subr.mxu0 %v2437_v55  ;;  %v12258_v51 = vld [vmem:[%s16350_s7 + $0x70] sm:$0xff]  ;;  %v2473_v58 = vld [vmem:[%s16347_s6 + $0x1300] sm:$0xff]  ;;  %v12277_v55 = vld [vmem:[%s16350_s7 + $0x68] sm:$0xff] }
 0x575   :  { %8543 = vmatpush3.msra.mxu1 %v2137_v21  ;;  %3325 = vmatpush2.msra.mxu0 %v2436_v44  ;;  %v3695_v46 = vadd.f32 %v3694_v5, %v3693_v60  ;;  %v2361_v21 = vld [vmem:[%s16347_s6 + $0xf80] sm:$0xff]  ;;  %v12283_v44 = vadd.f32 %v12072_v23, %v2763_v0  ;;  %v2354_v23 = vld [vmem:[%s16347_s6 + $0xf48] sm:$0xff]  ;;  %v12306_v5 = vld [vmem:[%s16350_s7 + $0xd8] sm:$0xff] }
 0x576   :  { %8544 = vmatprep.subr.mxu1 %v2242_v62  ;;  %3326 = vmatprep.subr.mxu0 %v2430_v2  ;;  %v12288_v60 = vld [vmem:[%s16350_s7 + $0xe0] sm:$0xff]  ;;  %v2466_v62 = vld [vmem:[%s16347_s6 + $0x12c8] sm:$0xff]  ;;  %v12666_v37 = vld [vmem:[%s16350_s7 + $0x2d8] sm:$0xff] }
 0x577   :  { %8545 = vmatpush3.msra.mxu1 %v2130_v7  ;;  %3327 = vmatpush2.msra.mxu0 %v2429_v9  ;;  %v3696_v30 = vrot.slane %v3695_v46, 2  ;;  %16654 = vst [vmem:[#allocation16_spill] sm:$0xff] %v12283_v44  ;;  %v12297_v2 = vld [vmem:[%s16350_s7 + $0x60] sm:$0xff]  ;;  %v2459_v7 = vld [vmem:[%s16347_s6 + $0x1290] sm:$0xff]  ;;  %v12315_v9 = vld [vmem:[%s16350_s7 + $0x58] sm:$0xff] }
 0x578   :  { %8546 = vmatprep.subr.mxu1 %v2235_v11  ;;  %3329 = vmatmul.mubr.f32.vlgmr.msra.gmra.mxu0 %v10933_v13  ;;  %v2347_v11 = vld [vmem:[%s16347_s6 + $0xf10] sm:$0xff]  ;;  %16677 = vst [vmem:[#allocation39_spill] sm:$0xff] %v12666_v37 }
 0x579   :  { %8547 = vmatpush3.msra.mxu1 %v2123_v32  ;;  %8559 = vmatprep.subr.mxu0 %v2536_v49  ;;  %v3697_v1 = vadd.f32 %v3696_v30, %v3695_v46  ;;  %v3686_v32 = vsel %vm75_vm0, %v12283_v44, 0.0  ;;  %v12326_v49 = vld [vmem:[%s16350_s7 + $0xd0] sm:$0xff]  ;;  %v2340_v46 = vld [vmem:[%s16347_s6 + $0xed8] sm:$0xff]  ;;  %v12371_v30 = vld [vmem:[%s16350_s7 + $0x40] sm:$0xff] }
 0x57a   :  { %8548 = vmatprep.subr.mxu1 %v2228_v28  ;;  %8560 = vmatpush3.msra.mxu0 %v2424_v36  ;;  %v2452_v28 = vld [vmem:[%s16347_s6 + $0x1258] sm:$0xff]  ;;  %v12335_v36 = vld [vmem:[%s16350_s7 + $0x50] sm:$0xff]  ;;  %v12672_v44 = vld [vmem:[%s16350_s7 + $0x120] sm:$0xff] }
 0x57b   :  { %3610 = vmatprep.mubr.f32.mxu0 %v10580_v52  ;;  %8549 = vmatpush3.msra.mxu1 %v2116_v54  ;;  %v2102_v52 = vld [vmem:[%s16347_s6 + $0x768] sm:$0xff]  ;;  %v3698_v19 = vrot.slane %v3697_v1, 1  ;;  %16678 = vst [vmem:[#allocation40_spill] sm:$0xff] %v12672_v44 }
 0x57c   :  { %8561 = vmatprep.subr.mxu0 %v2529_v34  ;;  %8550 = vmatprep.subr.mxu1 %v2221_v38  ;;  %v12344_v54 = vld [vmem:[%s16350_s7 + $0xc8] sm:$0xff]  ;;  %v2445_v34 = vld [vmem:[%s16347_s6 + $0x1220] sm:$0xff]  ;;  %v3687_v38 = vrot.slane %v3686_v32, 4 }
 0x57d   :  { %8562 = vmatpush3.msra.mxu0 %v2417_v42  ;;  %8551 = vmatpush3.msra.mxu1 %v2109_v40  ;;  %v3699_v25 = vadd.f32 %v3698_v19, %v3697_v1  ;;  %v12353_v42 = vld [vmem:[%s16350_s7 + $0x48] sm:$0xff]  ;;  %v2333_v40 = vld [vmem:[%s16347_s6 + $0xea0] sm:$0xff]  ;;  %v12409_v1 = vld [vmem:[%s16350_s7 + $0x1f8] sm:$0xff] }
 0x57e   :  { %8563 = vmatprep.subr.mxu0 %v2522_v50  ;;  %8552 = vmatprep.subr.mxu1 %v2214_v26  ;;  %v12362_v50 = vld [vmem:[%s16350_s7 + $0xc0] sm:$0xff]  ;;  %v2438_v26 = vld [vmem:[%s16347_s6 + $0x11e8] sm:$0xff] }
 0x57f   :  { %8564 = vmatpush3.msra.mxu0 %v2410_v27  ;;  %8553 = vmatpush3.msra.mxu1 %v2102_v52  ;;  %v2326_v27 = vld [vmem:[%s16347_s6 + $0xe68] sm:$0xff]  ;;  %v12380_v52 = vld [vmem:[%s16350_s7 + $0xb8] sm:$0xff]  ;;  %v12450_v19 = vld [vmem:[%s16350_s7 + $0x20] sm:$0xff] }
 0x580   :  { %8565 = vmatprep.subr.mxu0 %v2515_v31  ;;  %8554 = vmatprep.subr.mxu1 %v2207_v57  ;;  %v2431_v31 = vld [vmem:[%s16347_s6 + $0x11b0] sm:$0xff]  ;;  %v3688_v57 = vadd.f32 %v3687_v38, %v3686_v32  ;;  %16657 = vst [vmem:[#allocation19_spill] sm:$0xff] %v12450_v19  ;;  %v12546_v38 = vld [vmem:[%s16350_s7] sm:$0xff] }
 0x581   :  { %8566 = vmatpush3.msra.mxu0 %v2403_v63  ;;  %8555 = vmatpush3.msra.mxu1 %v2095_v53  ;;  %v12389_v63 = vld [vmem:[%s16350_s7 + $0x38] sm:$0xff]  ;;  %v2319_v53 = vld [vmem:[%s16347_s6 + $0xe30] sm:$0xff]  ;;  %16665 = vst [vmem:[#allocation27_spill] sm:$0xff] %v12546_v38 }
 0x582   :  { %8567 = vmatprep.subr.mxu0 %v2508_v61  ;;  %3541 = vmatmul.mubr.f32.vlgmr.msra.gmra.mxu1 %v10560_v12  ;;  %v2382_v12 = vld [vmem:[%s16347_s6 + $0x1028] sm:$0xff]  ;;  %v12398_v61 = vld [vmem:[%s16350_s7 + $0xb0] sm:$0xff] }
 0x583   :  { %8568 = vmatpush3.msra.mxu0 %v2396_v41  ;;  %8996 = vmatprep.subr.mxu1 %v16570_v10  ;;  %v12404_v41 = vld [vmem:[%s16350_s7 + $0x30] sm:$0xff] }
 0x584   :  { %8569 = vmatprep.subr.mxu0 %v2501_v6  ;;  %8997 = vmatpush3.msra.mxu1 %v2550_v18  ;;  %v12415_v6 = vld [vmem:[%s16350_s7 + $0xa8] sm:$0xff]  ;;  %v12420_v18 = vld [vmem:[%s16350_s7 + $0x178] sm:$0xff] }
 0x585   :  { %8570 = vmatpush3.msra.mxu0 %v2389_v20  ;;  %8998 = vmatprep.subr.mxu1 %v16570_v10  ;;  %v3689_v20 = vrot.slane %v3688_v57, 2 }
 0x586   :  { %8571 = vmatprep.subr.mxu0 %v2494_v3  ;;  %8999 = vmatpush3.msra.mxu1 %v2543_v22  ;;  %v12427_v3 = vld [vmem:[%s16350_s7 + $0x28] sm:$0xff]  ;;  %v12432_v22 = vld [vmem:[%s16350_s7 + $0x1f0] sm:$0xff] }
 0x587   :  { %9000 = vmatprep.mubr.msk.f32.mxu1 %vm9051_vm1, %v16570_v10  ;;  %8572 = vmatpush3.msra.mxu0 %v2382_v12  ;;  %16655 = vst [vmem:[#allocation17_spill] sm:$0xff] %v12427_v3  ;;  %v12438_v12 = vld [vmem:[%s16350_s7 + $0xa0] sm:$0xff]  ;;  %v3690_v0 = vadd.f32 %v3689_v20, %v3688_v57  ;;  %v12571_v57 = vld [vmem:[%s16350_s7 + $0x2f8] sm:$0xff] }
 0x588   :  { %9001 = vmatmul.mubr.msk.f32.vlgmr.msra.gmra.mxu1 %vm528_vm4, %v10591_v35  ;;  %8597 = vmatprep.subr.mxu1 %v12226_v24  ;;  %v12268_v35 = vld [vmem:[%s16350_s7 + $0xe8] sm:$0xff]  ;;  %16656 = vst [vmem:[#allocation18_spill] sm:$0xff] %v12438_v12  ;;  %16666 = vst [vmem:[#allocation28_spill] sm:$0xff] %v12571_v57  ;;  %v12583_v20 = vld [vmem:[%s16350_s7 + $0x278] sm:$0xff] }
 0x589   :  { %8573 = vmatprep.subr.mxu0 %v2487_v56  ;;  %8598 = vmatpush3.msra.mxu1 %v12236_v45  ;;  %v12462_v56 = vld [vmem:[%s16350_s7 + $0x98] sm:$0xff]  ;;  %v3691_v32 = vrot.slane %v3690_v0, 1  ;;  %16667 = vst [vmem:[#allocation29_spill] sm:$0xff] %v12583_v20 }
 0x58a   :  { %8574 = vmatpush3.msra.mxu0 %v2375_v59  ;;  %8599 = vmatprep.subr.mxu1 %v12246_v39  ;;  %16658 = vst [vmem:[#allocation20_spill] sm:$0xff] %v12462_v56  ;;  %v12468_v59 = vld [vmem:[%s16350_s7 + $0x168] sm:$0xff] }
 0x58b   :  { %8575 = vmatprep.subr.mxu0 %v2480_v17  ;;  %8600 = vmatpush3.msra.mxu1 %v12258_v51  ;;  %v12474_v17 = vld [vmem:[%s16350_s7 + $0x18] sm:$0xff] }
 0x58c   :  { %3904 = vmatprep.mubr.f32.mxu1 %v3699_v25  ;;  %8576 = vmatpush3.msra.mxu0 %v2368_v4  ;;  %16659 = vst [vmem:[#allocation21_spill] sm:$0xff] %v12474_v17  ;;  %v12480_v25 = vld [vmem:[%s16350_s7 + $0x1e0] sm:$0xff]  ;;  %v12486_v4 = vld [vmem:[%s16350_s7 + $0x90] sm:$0xff] }
 0x58d   :  { %8601 = vmatprep.subr.mxu1 %v12268_v35  ;;  %8577 = vmatprep.subr.mxu0 %v2473_v58  ;;  %16660 = vst [vmem:[#allocation22_spill] sm:$0xff] %v12486_v4  ;;  %v12492_v58 = vld [vmem:[%s16350_s7 + $0x160] sm:$0xff] }
 0x58e   :  { %8602 = vmatpush3.msra.mxu1 %v12277_v55  ;;  %8578 = vmatpush3.msra.mxu0 %v2361_v21  ;;  %v12498_v21 = vld [vmem:[%s16350_s7 + $0x10] sm:$0xff] }
 0x58f   :  { %8603 = vmatprep.subr.mxu1 %v12288_v60  ;;  %8579 = vmatprep.subr.mxu0 %v2466_v62  ;;  %16661 = vst [vmem:[#allocation23_spill] sm:$0xff] %v12498_v21  ;;  %v12504_v62 = vld [vmem:[%s16350_s7 + $0x1d8] sm:$0xff] }
 0x590   :  { %8604 = vmatpush3.msra.mxu1 %v12297_v2  ;;  %8580 = vmatpush3.msra.mxu0 %v2354_v23  ;;  %v12510_v23 = vld [vmem:[%s16350_s7 + $0x88] sm:$0xff] }
 0x591   :  { %8605 = vmatprep.subr.mxu1 %v12306_v5  ;;  %8581 = vmatprep.subr.mxu0 %v2459_v7  ;;  %16662 = vst [vmem:[#allocation24_spill] sm:$0xff] %v12510_v23  ;;  %v12516_v7 = vld [vmem:[%s16350_s7 + $0x158] sm:$0xff] }
 0x592   :  { %8606 = vmatpush3.msra.mxu1 %v12315_v9  ;;  %8582 = vmatpush3.msra.mxu0 %v2347_v11  ;;  %v12522_v11 = vld [vmem:[%s16350_s7 + $0x8] sm:$0xff] }
 0x593   :  { %8607 = vmatprep.subr.mxu1 %v12326_v49  ;;  %8583 = vmatprep.subr.mxu0 %v2452_v28  ;;  %16663 = vst [vmem:[#allocation25_spill] sm:$0xff] %v12522_v11  ;;  %v12528_v28 = vld [vmem:[%s16350_s7 + $0x1d0] sm:$0xff] }
 0x594   :  { %8608 = vmatpush3.msra.mxu1 %v12335_v36  ;;  %8584 = vmatpush3.msra.mxu0 %v2340_v46  ;;  %v12534_v46 = vld [vmem:[%s16350_s7 + $0x80] sm:$0xff] }
 0x595   :  { %8609 = vmatprep.subr.mxu1 %v12344_v54  ;;  %8585 = vmatprep.subr.mxu0 %v2445_v34  ;;  %16664 = vst [vmem:[#allocation26_spill] sm:$0xff] %v12534_v46  ;;  %v12540_v34 = vld [vmem:[%s16350_s7 + $0x150] sm:$0xff] }
 0x596   :  { %8610 = vmatpush3.msra.mxu1 %v12353_v42  ;;  %8586 = vmatpush3.msra.mxu0 %v2333_v40  ;;  %v12552_v40 = vld [vmem:[%s16350_s7 + $0x1c8] sm:$0xff] }
 0x597   :  { %8611 = vmatprep.subr.mxu1 %v12362_v50  ;;  %8587 = vmatprep.subr.mxu0 %v2438_v26  ;;  %v12559_v26 = vld [vmem:[%s16350_s7 + $0x148] sm:$0xff] }
 0x598   :  { %8612 = vmatpush3.msra.mxu1 %v12371_v30  ;;  %8588 = vmatpush3.msra.mxu0 %v2326_v27  ;;  %v3692_v27 = vadd.f32 %v3691_v32, %v3690_v0  ;;  %v12589_v0 = vld [vmem:[%s16350_s7 + $0x1b8] sm:$0xff]  ;;  %v12594_v32 = vld [vmem:[%s16350_s7 + $0x2f0] sm:$0xff] }
 0x599   :  { %8613 = vmatprep.subr.mxu1 %v12380_v52  ;;  %8589 = vmatprep.subr.mxu0 %v2431_v31  ;;  %v12566_v31 = vld [vmem:[%s16350_s7 + $0x1c0] sm:$0xff]  ;;  %16668 = vst [vmem:[#allocation30_spill] sm:$0xff] %v12594_v32 }
 0x59a   :  { %8614 = vmatpush3.msra.mxu1 %v12389_v63  ;;  %8590 = vmatpush3.msra.mxu0 %v2319_v53  ;;  %v12578_v53 = vld [vmem:[%s16350_s7 + $0x140] sm:$0xff] }
 0x59b   :  { %8615 = vmatprep.subr.mxu1 %v12398_v61  ;;  %3611 = vmatmul.mubr.f32.vlgmr.msra.gmra.mxu0 %v10933_v13  ;;  %v12444_v13 = vld [vmem:[%s16350_s7 + $0x170] sm:$0xff] }
 0x59c   :  { %8616 = vmatpush3.msra.mxu1 %v12404_v41  ;;  %8632 = vmatprep.subr.mxu0 %v12409_v1 }
 0x59d   :  { %8617 = vmatprep.subr.mxu1 %v12415_v6  ;;  %8633 = vmatpush3.msra.mxu0 %v12420_v18 }
 0x59e   :  { %8618 = vmatpush3.msra.mxu1 %v12427_v3  ;;  %8634 = vmatprep.subr.mxu0 %v12432_v22 }
 0x59f   :  { %8619 = vmatprep.subr.mxu1 %v12438_v12  ;;  %8635 = vmatpush3.msra.mxu0 %v12444_v13 }
 0x5a0   :  { %8620 = vmatpush3.msra.mxu1 %v12450_v19  ;;  %8636 = vmatprep.subr.mxu0 %v12456_v43 }
 0x5a1   :  { %8621 = vmatprep.subr.mxu1 %v12462_v56  ;;  %8637 = vmatpush3.msra.mxu0 %v12468_v59 }
 0x5a2   :  { %8622 = vmatpush3.msra.mxu1 %v12474_v17  ;;  %8638 = vmatprep.subr.mxu0 %v12480_v25 }
 0x5a3   :  { %8623 = vmatprep.subr.mxu1 %v12486_v4  ;;  %8639 = vmatpush3.msra.mxu0 %v12492_v58 }
 0x5a4   :  { %8624 = vmatpush3.msra.mxu1 %v12498_v21  ;;  %8640 = vmatprep.subr.mxu0 %v12504_v62 }
 0x5a5   :  { %8625 = vmatprep.subr.mxu1 %v12510_v23  ;;  %8641 = vmatpush3.msra.mxu0 %v12516_v7 }
 0x5a6   :  { %8626 = vmatpush3.msra.mxu1 %v12522_v11  ;;  %8642 = vmatprep.subr.mxu0 %v12528_v28  ;;  %v12710_v11 = vld [vmem:[%s16350_s7 + $0x110] sm:$0xff] }
 0x5a7   :  { %8627 = vmatprep.subr.mxu1 %v12534_v46  ;;  %8643 = vmatpush3.msra.mxu0 %v12540_v34  ;;  %16684 = vst [vmem:[#allocation46_spill] sm:$0xff] %v12710_v11 }
 0x5a8   :  { %8628 = vmatpush3.msra.mxu1 %v12546_v38  ;;  %8644 = vmatprep.subr.mxu0 %v12552_v40  ;;  %v12696_v38 = vld [vmem:[%s16350_s7 + $0x118] sm:$0xff] }
 0x5a9   :  { %3905 = vmatmul.mubr.f32.vlgmr.msra.gmra.mxu1 %v3692_v27  ;;  %8645 = vmatpush3.msra.mxu0 %v12559_v26  ;;  %v12606_v27 = vld [vmem:[%s16350_s7 + $0x270] sm:$0xff]  ;;  %16682 = vst [vmem:[#allocation44_spill] sm:$0xff] %v12696_v38 }
 0x5aa   :  { %8646 = vmatprep.subr.mxu0 %v12566_v31  ;;  %8667 = vmatprep.subr.mxu1 %v12571_v57  ;;  %16669 = vst [vmem:[#allocation31_spill] sm:$0xff] %v12606_v27  ;;  %v12690_v57 = vld [vmem:[%s16350_s7 + $0x2d0] sm:$0xff] }
 0x5ab   :  { %8647 = vmatpush3.msra.mxu0 %v12578_v53  ;;  %8668 = vmatpush3.msra.mxu1 %v12583_v20  ;;  %v12654_v20 = vld [vmem:[%s16350_s7 + $0x260] sm:$0xff]  ;;  %16681 = vst [vmem:[#allocation43_spill] sm:$0xff] %v12690_v57 }
 0x5ac   :  { %8648 = vmatprep.subr.mxu0 %v12589_v0  ;;  %8669 = vmatprep.subr.mxu1 %v12594_v32  ;;  %v12648_v32 = vld [vmem:[%s16350_s7 + $0x128] sm:$0xff]  ;;  %16675 = vst [vmem:[#allocation37_spill] sm:$0xff] %v12654_v20 }
 0x5ad   :  { %8649 = vmatpush3.msra.mxu0 %v12600_v16  ;;  %8670 = vmatpush3.msra.mxu1 %v12606_v27  ;;  %16674 = vst [vmem:[#allocation36_spill] sm:$0xff] %v12648_v32  ;;  %v12660_v27 = vld [vmem:[%s16350_s7 + $0x1a0] sm:$0xff] }
 0x5ae   :  { %8650 = vmatprep.subr.mxu0 %v12612_v48  ;;  %8671 = vmatprep.subr.mxu1 %v12618_v14  ;;  %16676 = vst [vmem:[#allocation38_spill] sm:$0xff] %v12660_v27  ;;  %v2975_v14 = vpop.f32.mrf.mxu0 }
 0x5af   :  { %8651 = vmatpush3.msra.mxu0 %v12624_v47  ;;  %8672 = vmatpush3.msra.mxu1 %v12630_v29  ;;  %v12684_v29 = vld [vmem:[%s16350_s7 + $0x198] sm:$0xff] }
 0x5b0   :  { %8652 = vmatprep.subr.mxu0 %v12636_v33  ;;  %8673 = vmatprep.subr.mxu1 %v12642_v8  ;;  %16680 = vst [vmem:[#allocation42_spill] sm:$0xff] %v12684_v29  ;;  %v2904_v8 = vpop.f32.mrf.mxu1  ;;  %v2977_v46 = vpop.f32.mrf.mxu0 }
 0x5b1   :  { %8653 = vmatpush3.msra.mxu0 %v12648_v32  ;;  %8674 = vmatpush3.msra.mxu1 %v12654_v20  ;;  %v12703_v20 = vld [vmem:[%s16350_s7 + $0x190] sm:$0xff]  ;;  %v2976_v21 = vadd.f32 %v2975_v14, %v2904_v8 }
 0x5b2   :  { %8654 = vmatprep.subr.mxu0 %v12660_v27  ;;  %8675 = vmatprep.subr.mxu1 %v12666_v37  ;;  %16683 = vst [vmem:[#allocation45_spill] sm:$0xff] %v12703_v20  ;;  %v12717_v37 = vld [vmem:[%s16350_s7 + $0x188] sm:$0xff]  ;;  %v2906_v23 = vpop.f32.mrf.mxu1 }
 0x5b3   :  { %8655 = vmatpush3.msra.mxu0 %v12672_v44  ;;  %8676 = vmatpush3.msra.mxu1 %v12678_v15  ;;  %16685 = vst [vmem:[#allocation4_spill] sm:$0xff] %v12717_v37  ;;  %v12723_v15 = vld [vmem:[%s16350_s7 + $0x108] sm:$0xff]  ;;  %v3117_v4 = vpop.f32.mrf.mxu0  ;;  %v2978_v17 = vadd.f32 %v2977_v46, %v2906_v23  ;;  %v12768_v46 = vld [vmem:[%s16350_s7 + $0x2c0] sm:$0xff] }
 0x5b4   :  { %8656 = vmatprep.subr.mxu0 %v12684_v29  ;;  %8677 = vmatprep.subr.mxu1 %v12690_v57  ;;  %16686 = vst [vmem:[#allocation5_spill] sm:$0xff] %v12723_v15  ;;  %v12729_v57 = vld [vmem:[%s16350_s7 + $0x180] sm:$0xff]  ;;  %16694 = vst [vmem:[#allocation50_spill] sm:$0xff] %v12768_v46 }
 0x5b5   :  { %8657 = vmatpush3.msra.mxu0 %v12696_v38  ;;  %16687 = vst [vmem:[#allocation6_spill] sm:$0xff] %v12729_v57  ;;  %v3119_v56 = vpop.f32.mrf.mxu0 }
 0x5b6   :  { %8658 = vmatprep.subr.mxu0 %v12703_v20  ;;  %v12735_v20 = vld [vmem:[%s16350_s7 + $0x100] sm:$0xff] }
 0x5b7   :  { %8659 = vmatpush3.msra.mxu0 %v12710_v11  ;;  %16688 = vst [vmem:[#allocation7_spill] sm:$0xff] %v12735_v20 }
 0x5b8   :  { %v3046_v38 = vpop.f32.mrf.mxu1  ;;  %8660 = vmatprep.subr.mxu0 %v12717_v37  ;;  %v12745_v37 = vld [vmem:[%s16350_s7 + $0x250] sm:$0xff] }
 0x5b9   :  { %v3047_v29 = vadd.f32 %v3046_v38, %v2976_v21  ;;  %8661 = vmatpush3.msra.mxu0 %v12723_v15  ;;  %16690 = vst [vmem:[#allocation9_spill] sm:$0xff] %v12745_v37  ;;  %8678 = vmatpush3.msra.mxu1 %v12745_v37  ;;  %v12751_v21 = vld [vmem:[%s16350_s7 + $0x2c8] sm:$0xff] }
 0x5ba   :  { %v3048_v14 = vpop.f32.mrf.mxu1  ;;  %8662 = vmatprep.subr.mxu0 %v12729_v57  ;;  %16691 = vst [vmem:[#allocation47_spill] sm:$0xff] %v12751_v21  ;;  %8679 = vmatprep.subr.mxu1 %v12751_v21 }
 0x5bb   :  { %v12739_v8 = vadd.f32 %v3117_v4, %v3047_v29  ;;  %v3049_v11 = vadd.f32 %v3048_v14, %v2978_v17  ;;  %8663 = vmatpush3.msra.mxu0 %v12735_v20  ;;  %v12762_v4 = vld [vmem:[%s16350_s7 + $0x248] sm:$0xff] }
 0x5bc   :  { %9003 = vmatprep.subr.mxu0 %v16570_v10  ;;  %16693 = vst [vmem:[#allocation49_spill] sm:$0xff] %v12762_v4  ;;  %8680 = vmatpush3.msra.mxu1 %v12762_v4  ;;  %v12782_v4 = vld [vmem:[%s16350_s7 + $0x2b8] sm:$0xff] }
 0x5bd   :  { %16689 = vst [vmem:[#allocation8_spill] sm:$0xff] %v12739_v8  ;;  %v3700_v29 = vsel %vm75_vm0, %v12739_v8, 0.0  ;;  %v12756_v17 = vadd.f32 %v3119_v56, %v3049_v11  ;;  %8681 = vmatprep.subr.mxu1 %v12768_v46  ;;  %v12776_v56 = vld [vmem:[%s16350_s7 + $0x240] sm:$0xff]  ;;  %16696 = vst [vmem:[#allocation52_spill] sm:$0xff] %v12782_v4  ;;  %v12788_v46 = vld [vmem:[%s16350_s7 + $0x238] sm:$0xff] }
 0x5be   :  { %v3701_v23 = vrot.slane %v3700_v29, 4  ;;  %16695 = vst [vmem:[#allocation51_spill] sm:$0xff] %v12776_v56  ;;  %8682 = vmatpush3.msra.mxu1 %v12776_v56  ;;  %16697 = vst [vmem:[#allocation53_spill] sm:$0xff] %v12788_v46 }
 0x5bf   :  { %16692 = vst [vmem:[#allocation48_spill] sm:$0xff] %v12756_v17  ;;  %v3707_v38 = vsel %vm75_vm0, %v12756_v17, 0.0  ;;  %8683 = vmatprep.subr.mxu1 %v12782_v4 }
 0x5c0   :  { %v3702_v11 = vadd.f32 %v3701_v23, %v3700_v29  ;;  %v3708_v14 = vrot.slane %v3707_v38, 4  ;;  %8684 = vmatpush3.msra.mxu1 %v12788_v46  ;;  %v12794_v29 = vld [vmem:[%s16350_s7 + $0x2b0] sm:$0xff] }
 0x5c1   :  { %16698 = vst [vmem:[#allocation54_spill] sm:$0xff] %v12794_v29  ;;  %8685 = vmatprep.subr.mxu1 %v12794_v29  ;;  %v12800_v23 = vld [vmem:[%s16350_s7 + $0x230] sm:$0xff] }
 0x5c2   :  { %v3703_v21 = vrot.slane %v3702_v11, 2  ;;  %v3709_v37 = vadd.f32 %v3708_v14, %v3707_v38  ;;  %16699 = vst [vmem:[#allocation55_spill] sm:$0xff] %v12800_v23  ;;  %8686 = vmatpush3.msra.mxu1 %v12800_v23  ;;  %v12806_v38 = vld [vmem:[%s16350_s7 + $0x2a8] sm:$0xff]  ;;  %v12824_v23 = vld [vmem:[%s16350_s7 + $0x220] sm:$0xff] }
 0x5c3   :  { %16700 = vst [vmem:[#allocation56_spill] sm:$0xff] %v12806_v38  ;;  %v12811_v14 = vld [vmem:[%s16350_s7 + $0x228] sm:$0xff]  ;;  %8687 = vmatprep.subr.mxu1 %v12806_v38  ;;  %16703 = vst [vmem:[#allocation59_spill] sm:$0xff] %v12824_v23 }
 0x5c4   :  { %v3704_v4 = vadd.f32 %v3703_v21, %v3702_v11  ;;  %v3710_v56 = vrot.slane %v3709_v37, 2  ;;  %16701 = vst [vmem:[#allocation57_spill] sm:$0xff] %v12811_v14  ;;  %8688 = vmatpush3.msra.mxu1 %v12811_v14  ;;  %v12818_v21 = vld [vmem:[%s16350_s7 + $0x2a0] sm:$0xff]  ;;  %v12842_v14 = vld [vmem:[%s16350_s7 + $0x290] sm:$0xff]  ;;  %v12852_v38 = vld [vmem:[%s16350_s7 + $0x288] sm:$0xff] }
 0x5c5   :  { %16702 = vst [vmem:[#allocation58_spill] sm:$0xff] %v12818_v21  ;;  %8689 = vmatprep.subr.mxu1 %v12818_v21  ;;  %16706 = vst [vmem:[#allocation62_spill] sm:$0xff] %v12842_v14 }
 0x5c6   :  { %v3711_v29 = vadd.f32 %v3710_v56, %v3709_v37  ;;  %v3705_v11 = vrot.slane %v3704_v4, 1  ;;  %8690 = vmatpush3.msra.mxu1 %v12824_v23  ;;  %v12830_v37 = vld [vmem:[%s16350_s7 + $0x298] sm:$0xff]  ;;  %v12847_v23 = vld [vmem:[%s16350_s7 + $0x210] sm:$0xff]  ;;  %16708 = vst [vmem:[#allocation64_spill] sm:$0xff] %v12852_v38 }
 0x5c7   :  { %16704 = vst [vmem:[#allocation60_spill] sm:$0xff] %v12830_v37  ;;  %v12835_v56 = vld [vmem:[%s16350_s7 + $0x218] sm:$0xff]  ;;  %8691 = vmatprep.subr.mxu1 %v12830_v37  ;;  %16707 = vst [vmem:[#allocation63_spill] sm:$0xff] %v12847_v23 }
 0x5c8   :  { %v3712_v46 = vrot.slane %v3711_v29, 1  ;;  %16705 = vst [vmem:[#allocation61_spill] sm:$0xff] %v12835_v56  ;;  %8692 = vmatpush3.msra.mxu1 %v12835_v56  ;;  %v3706_v17 = vadd.f32 %v3705_v11, %v3704_v4  ;;  %v12870_v4 = vld [vmem:[%s16350_s7 + $0x200] sm:$0xff]  ;;  %v12894_v11 = vld [vmem:[%s16350_s7 + $0x308] sm:$0xff] }
 0x5c9   :  { %8693 = vmatprep.subr.mxu1 %v12842_v14  ;;  %16711 = vst [vmem:[#allocation67_spill] sm:$0xff] %v12870_v4  ;;  %16714 = vst [vmem:[#allocation70_spill] sm:$0xff] %v12894_v11 }
 0x5ca   :  { %v3713_v21 = vadd.f32 %v3712_v46, %v3711_v29  ;;  %v12858_v46 = vld [vmem:[%s16350_s7 + $0x208] sm:$0xff]  ;;  %8694 = vmatpush3.msra.mxu1 %v12847_v23  ;;  %v12864_v29 = vld [vmem:[%s16350_s7 + $0x280] sm:$0xff] }
 0x5cb   :  { %16709 = vst [vmem:[#allocation65_spill] sm:$0xff] %v12858_v46  ;;  %16710 = vst [vmem:[#allocation66_spill] sm:$0xff] %v12864_v29  ;;  %8695 = vmatprep.subr.mxu1 %v12852_v38 }
 0x5cc   :  { %3974 = vmatprep.mubr.f32.mxu0 %v3713_v21  ;;  %8696 = vmatpush3.msra.mxu1 %v12858_v46  ;;  %v12887_v21 = vld [vmem:[%s16350_s7 + $0x310] sm:$0xff] }
 0x5cd   :  { %3975 = vmatmul.mubr.f32.vlgmr.msra.gmra.mxu0 %v3706_v17  ;;  %8697 = vmatprep.subr.mxu1 %v12864_v29  ;;  %v12880_v17 = vld [vmem:[%s16350_s7 + $0x318] sm:$0xff]  ;;  %16713 = vst [vmem:[#allocation69_spill] sm:$0xff] %v12887_v21 }
 0x5ce   :  { %9011 = vmatprep.mubr.msk.f32.mxu0 %vm9051_vm1, %v16570_v10  ;;  %8698 = vmatpush3.msra.mxu1 %v12870_v4  ;;  %16712 = vst [vmem:[#allocation68_spill] sm:$0xff] %v12880_v17 }
 0x5cf   :  { %9004 = vmatpush3.msra.mxu0 %v12880_v17  ;;  %v12900_v17 = vld [vmem:[%s16350_s7 + $0x300] sm:$0xff] }
 0x5d0   :  { %9005 = vmatprep.subr.mxu0 %v16570_v10  ;;  %16715 = vst [vmem:[#allocation71_spill] sm:$0xff] %v12900_v17 }
 0x5d1   :  { %9006 = vmatpush3.msra.mxu0 %v12887_v21 }
 0x5d2   :  { %9007 = vmatprep.subr.mxu0 %v16570_v10 }
 0x5d3   :  { %9008 = vmatpush3.msra.mxu0 %v12894_v11 }
 0x5d4   :  { %9009 = vmatprep.subr.mxu0 %v16570_v10 }
 0x5d5   :  { %9010 = vmatpush3.msra.mxu0 %v12900_v17 }
 0x5f4   :  { %v3188_v21 = vpop.f32.mrf.mxu0 }
 0x5f6   :  { %v3190_v46 = vpop.f32.mrf.mxu0 }
 0x5fa   :  { %v3259_v4 = vpop.f32.mrf.mxu1 }
 0x5fb   :  { %v3260_v23 = vadd.f32 %v3259_v4, %v3188_v21 }
 0x5fc   :  { %v3261_v29 = vpop.f32.mrf.mxu1 }
 0x5fd   :  { %v3262_v56 = vadd.f32 %v3261_v29, %v3190_v46 }
 0x600   :  { %v3401_v38 = vpop.f32.mrf.mxu1 }
 0x602   :  { %v3403_v8 = vpop.f32.mrf.mxu1 }
 0x621   :  { %v8521_v15 = vpop.f32.mrf.mxu1 }
 0x623   :  { %v8522_v12 = vpop.f32.mrf.mxu1 }
 0x638   :  { %v3330_v14 = vpop.f32.mrf.mxu0 }
 0x639   :  { %v3331_v37 = vadd.f32 %v3330_v14, %v3260_v23 }
 0x63a   :  { %v3332_v11 = vpop.f32.mrf.mxu0 }
 0x63b   :  { %v12904_v20 = vadd.f32 %v3401_v38, %v3331_v37  ;;  %v3333_v57 = vadd.f32 %v3332_v11, %v3262_v56 }
 0x63d   :  { %16716 = vst [vmem:[#allocation72_spill] sm:$0xff] %v12904_v20  ;;  %v3714_v44 = vsel %vm75_vm0, %v12904_v20, 0.0  ;;  %v12908_v19 = vadd.f32 %v3403_v8, %v3333_v57 }
 0x63e   :  { %v3715_v17 = vrot.slane %v3714_v44, 4 }
 0x63f   :  { %16717 = vst [vmem:[#allocation73_spill] sm:$0xff] %v12908_v19  ;;  %v3721_v27 = vsel %vm75_vm0, %v12908_v19, 0.0 }
 0x640   :  { %v3716_v4 = vadd.f32 %v3715_v17, %v3714_v44  ;;  %v3722_v21 = vrot.slane %v3721_v27, 4  ;;  %v8523_v17 = vadd.f32 %v8522_v12, %v8521_v15  ;;  %v12922_v15 = vld [vmem:[%s16351_s8 + $0x8] sm:$0xff]  ;;  %v12932_v12 = vld [vmem:[%s16351_s8 + $0x18] sm:$0xff] }
 0x641   :  { %4163 = vmatprep.subr.mxu0 %v12922_v15  ;;  %4234 = vmatprep.subr.mxu1 %v12932_v12 }
 0x642   :  { %v3717_v46 = vrot.slane %v3716_v4, 2  ;;  %v3723_v23 = vadd.f32 %v3722_v21, %v3721_v27  ;;  %v8556_v14 = vpop.f32.mrf.mxu1 }
 0x644   :  { %v3718_v29 = vadd.f32 %v3717_v46, %v3716_v4  ;;  %v3724_v38 = vrot.slane %v3723_v23, 2  ;;  %v8557_v37 = vpop.f32.mrf.mxu1 }
 0x645   :  { %v8558_v19 = vadd.f32 %v8557_v37, %v8556_v14 }
 0x646   :  { %v3725_v56 = vadd.f32 %v3724_v38, %v3723_v23  ;;  %v3719_v11 = vrot.slane %v3718_v29, 1 }
 0x647   :  { %v3543_v27 = vadd.f32 %v8558_v19, %v8523_v17  ;;  %v12939_v19 = vld [vmem:[%s16351_s8 + $0x10] sm:$0xff] }
 0x648   :  { %v3682_v32 = vpop.f32.mrf.mxu1  ;;  %v3726_v3 = vrot.slane %v3725_v56, 1  ;;  %v3720_v8 = vadd.f32 %v3719_v11, %v3718_v29 }
 0x64a   :  { %v9002_v20 = vpop.f32.mrf.mxu1  ;;  %v3727_v57 = vadd.f32 %v3726_v3, %v3725_v56 }
 0x64c   :  { %4044 = vmatprep.mubr.f32.mxu1 %v3727_v57 }
 0x64d   :  { %4045 = vmatmul.mubr.f32.vlgmr.msra.gmra.mxu1 %v3720_v8 }
 0x64e   :  { %4268 = vmatprep.mubr.f32.mxu1 %v16570_v10  ;;  %4235 = vmatpush1.msra.mxu1 %v12939_v19 }
 0x64f   :  { %9014 = vmatprep.subr.mxu1 %v16570_v10 }
 0x65b   :  { %v8591_v44 = vpop.f32.mrf.mxu0 }
 0x65d   :  { %v8592_v33 = vpop.f32.mrf.mxu0 }
 0x65e   :  { %v8593_v21 = vadd.f32 %v8592_v33, %v8591_v44  ;;  %v12927_v33 = vld [vmem:[%s16351_s8] sm:$0xff] }
 0x660   :  { %v3613_v4 = vadd.f32 %v8593_v21, %v3543_v27 }
 0x662   :  { %v12913_v46 = vadd.f32 %v3682_v32, %v3613_v4  ;;  %v12946_v32 = vld [vmem:[%s16351_s8 + $0x28] sm:$0xff] }
 0x663   :  { %16718 = vst [vmem:[#allocation74_spill] sm:$0xff] %v12946_v32 }
 0x664   :  { %v3729_v23 = vsel %vm3728_vm5, %v12913_v46, 0.0 }
 0x665   :  { %v3730_v20 = vrot.slane %v3729_v23, 4 }
 0x667   :  { %v3731_v3 = vadd.f32 %v3730_v20, %v3729_v23 }
 0x669   :  { %v3732_v29 = vrot.slane %v3731_v3, 2  ;;  %v8629_v14 = vpop.f32.mrf.mxu1 }
 0x66b   :  { %v3733_v38 = vadd.f32 %v3732_v29, %v3731_v3  ;;  %v8630_v37 = vpop.f32.mrf.mxu1 }
 0x66c   :  { %v8631_v21 = vadd.f32 %v8630_v37, %v8629_v14  ;;  %v16747_v37 = vld [vmem:[#allocation48_spill] sm:$0xff] }
 0x66d   :  { %v3734_v56 = vrot.slane %v3733_v38, 1 }
 0x66f   :  { %v3735_v11 = vadd.f32 %v3734_v56, %v3733_v38 }
 0x671   :  { %9012 = vmatmul.mubr.msk.f32.vlgmr.msra.gmra.mxu0 %vm3836_vm6, %v3735_v11  ;;  %v12953_v11 = vld [vmem:[%s16351_s8 + $0x20] sm:$0xff] }
 0x672   :  { %4197 = vmatprep.mubr.f32.mxu0 %v16570_v10  ;;  %4164 = vmatpush1.msra.mxu0 %v12927_v33 }
 0x673   :  { %4305 = vmatprep.subr.mxu0 %v12946_v32  ;;  %v12958_v32 = vld [vmem:[%s16351_s8 + $0x30] sm:$0xff] }
 0x68d   :  { %v8664_v57 = vpop.f32.mrf.mxu0 }
 0x68f   :  { %v8665_v44 = vpop.f32.mrf.mxu0 }
 0x690   :  { %v8666_v27 = vadd.f32 %v8665_v44, %v8664_v57 }
 0x692   :  { %v3977_v23 = vadd.f32 %v8666_v27, %v8631_v21 }
 0x70d   :  { %v8699_v8 = vpop.f32.mrf.mxu1 }
 0x70f   :  { %v8700_v17 = vpop.f32.mrf.mxu1 }
 0x710   :  { %v8701_v4 = vadd.f32 %v8700_v17, %v8699_v8 }
 0x712   :  { %v4047_v20 = vadd.f32 %v8701_v4, %v3977_v23 }
 0x731   :  { %v4116_v3 = vpop.f32.mrf.mxu0 }
 0x732   :  { %v4117_v29 = vadd.f32 %v4116_v3, %v4047_v20 }
 0x733   :  { %v9013_v38 = vpop.f32.mrf.mxu0 }
 0x734   :  { %v4121_v56 = vmul.f32 0.005, %v4117_v29 }
 0x736   :  { %8226 = vmatmul.mubr.msk.f32.vlgmr.msra.gmra.mxu0 %vm4129_vm7, %v4121_v56  ;;  %8227 = vmatmul.mubr.msk.f32.vlgmr.msra.gmra.mxu1 %vm4129_vm7, %v4121_v56 }
 0x737   :  { %4306 = vmatpush1.msra.mxu0 %v12953_v11  ;;  %4339 = vmatprep.mubr.f32.mxu0 %v16570_v10 }
 0x738   :  { %9015 = vmatpush3.msra.mxu1 %v12958_v32  ;;  %9016 = vmatprep.mubr.msk.f32.mxu1 %vm9051_vm1, %v16570_v10 }
 0x739   :  { %8709 = vmatprep.subr.mxu0 %v12226_v24  ;;  %8744 = vmatprep.subr.mxu1 %v12409_v1  ;;  %v16719_v24 = vld [vmem:[#allocation34_spill] sm:$0xff]  ;;  %v16742_v1 = vld [vmem:[#allocation28_spill] sm:$0xff] }
 0x73a   :  { %8228 = vmatmul.mubr.msk.f32.vlgmr.msra.gmra.mxu0 %vm4129_vm7, %v4121_v56  ;;  %9017 = vmatmul.mubr.msk.f32.vlgmr.msra.gmra.mxu1 %vm4129_vm7, %v4121_v56 }
 0x73b   :  { %8710 = vmatpush3.msra.mxu0 %v12236_v45  ;;  %8745 = vmatpush3.msra.mxu1 %v12420_v18  ;;  %v16720_v45 = vld [vmem:[#allocation17_spill] sm:$0xff] }
 0x73c   :  { %8711 = vmatprep.subr.mxu0 %v12246_v39  ;;  %8746 = vmatprep.subr.mxu1 %v12432_v22  ;;  %v16721_v39 = vld [vmem:[#allocation36_spill] sm:$0xff]  ;;  %v16743_v22 = vld [vmem:[#allocation3_spill] sm:$0xff] }
 0x73d   :  { %8712 = vmatpush3.msra.mxu0 %v12258_v51  ;;  %8747 = vmatpush3.msra.mxu1 %v12444_v13  ;;  %v16722_v51 = vld [vmem:[#allocation18_spill] sm:$0xff] }
 0x73e   :  { %8713 = vmatprep.subr.mxu0 %v12268_v35  ;;  %8748 = vmatprep.subr.mxu1 %v12456_v43  ;;  %v16723_v35 = vld [vmem:[#allocation38_spill] sm:$0xff] }
 0x73f   :  { %8714 = vmatpush3.msra.mxu0 %v12277_v55  ;;  %8749 = vmatpush3.msra.mxu1 %v12468_v59  ;;  %v16725_v55 = vld [vmem:[#allocation40_spill] sm:$0xff] }
 0x740   :  { %8715 = vmatprep.subr.mxu0 %v12288_v60  ;;  %8750 = vmatprep.subr.mxu1 %v12480_v25  ;;  %v16727_v60 = vld [vmem:[#allocation42_spill] sm:$0xff] }
 0x741   :  { %8716 = vmatpush3.msra.mxu0 %v12297_v2  ;;  %8751 = vmatpush3.msra.mxu1 %v12492_v58  ;;  %v16729_v2 = vld [vmem:[#allocation44_spill] sm:$0xff] }
 0x742   :  { %8717 = vmatprep.subr.mxu0 %v12306_v5  ;;  %8752 = vmatprep.subr.mxu1 %v12504_v62  ;;  %v16730_v5 = vld [vmem:[#allocation22_spill] sm:$0xff]  ;;  %v16744_v58 = vld [vmem:[#allocation16_spill] sm:$0xff] }
 0x743   :  { %8718 = vmatpush3.msra.mxu0 %v12315_v9  ;;  %8753 = vmatpush3.msra.mxu1 %v12516_v7  ;;  %v16731_v9 = vld [vmem:[#allocation45_spill] sm:$0xff]  ;;  %v16745_v7 = vld [vmem:[#allocation8_spill] sm:$0xff] }
 0x744   :  { %8719 = vmatprep.subr.mxu0 %v12326_v49  ;;  %8754 = vmatprep.subr.mxu1 %v12528_v28  ;;  %v16732_v49 = vld [vmem:[#allocation23_spill] sm:$0xff] }
 0x745   :  { %8720 = vmatpush3.msra.mxu0 %v12335_v36  ;;  %8755 = vmatpush3.msra.mxu1 %v12540_v34  ;;  %v16733_v36 = vld [vmem:[#allocation46_spill] sm:$0xff] }
 0x746   :  { %8721 = vmatprep.subr.mxu0 %v12344_v54  ;;  %8756 = vmatprep.subr.mxu1 %v12552_v40  ;;  %v16734_v54 = vld [vmem:[#allocation24_spill] sm:$0xff] }
 0x747   :  { %8722 = vmatpush3.msra.mxu0 %v12353_v42  ;;  %8757 = vmatpush3.msra.mxu1 %v12559_v26  ;;  %v16735_v42 = vld [vmem:[#allocation4_spill] sm:$0xff] }
 0x748   :  { %8723 = vmatprep.subr.mxu0 %v12362_v50  ;;  %8758 = vmatprep.subr.mxu1 %v12566_v31  ;;  %v16736_v50 = vld [vmem:[#allocation25_spill] sm:$0xff] }
 0x749   :  { %8724 = vmatpush3.msra.mxu0 %v12371_v30  ;;  %8759 = vmatpush3.msra.mxu1 %v12578_v53  ;;  %v16737_v30 = vld [vmem:[#allocation5_spill] sm:$0xff] }
 0x74a   :  { %8725 = vmatprep.subr.mxu0 %v12380_v52  ;;  %8760 = vmatprep.subr.mxu1 %v12589_v0  ;;  %v16738_v52 = vld [vmem:[#allocation26_spill] sm:$0xff] }
 0x74b   :  { %8726 = vmatpush3.msra.mxu0 %v12389_v63  ;;  %8761 = vmatpush3.msra.mxu1 %v12600_v16  ;;  %v16724_v16 = vld [vmem:[#allocation19_spill] sm:$0xff]  ;;  %v16739_v63 = vld [vmem:[#allocation6_spill] sm:$0xff] }
 0x74c   :  { %8727 = vmatprep.subr.mxu0 %v12398_v61  ;;  %8762 = vmatprep.subr.mxu1 %v12612_v48  ;;  %v16726_v48 = vld [vmem:[#allocation20_spill] sm:$0xff]  ;;  %v16740_v61 = vld [vmem:[#allocation27_spill] sm:$0xff] }
 0x74d   :  { %8728 = vmatpush3.msra.mxu0 %v12404_v41  ;;  %8763 = vmatpush3.msra.mxu1 %v12624_v47  ;;  %v16728_v47 = vld [vmem:[#allocation21_spill] sm:$0xff]  ;;  %v16741_v41 = vld [vmem:[#allocation7_spill] sm:$0xff] }
 0x74e   :  { %8729 = vmatprep.subr.mxu0 %v12415_v6  ;;  %8764 = vmatprep.subr.mxu1 %v16719_v24 }
 0x74f   :  { %8730 = vmatpush3.msra.mxu0 %v16720_v45  ;;  %8765 = vmatpush3.msra.mxu1 %v16721_v39 }
 0x750   :  { %8731 = vmatprep.subr.mxu0 %v16722_v51  ;;  %8766 = vmatprep.subr.mxu1 %v16723_v35  ;;  %v16748_v51 = vld [vmem:[#allocation73_spill] sm:$0xff] }
 0x751   :  { %8732 = vmatpush3.msra.mxu0 %v16724_v16  ;;  %8767 = vmatpush3.msra.mxu1 %v16725_v55 }
 0x752   :  { %8733 = vmatprep.subr.mxu0 %v16726_v48  ;;  %8768 = vmatprep.subr.mxu1 %v16727_v60 }
 0x753   :  { %8734 = vmatpush3.msra.mxu0 %v16728_v47  ;;  %8769 = vmatpush3.msra.mxu1 %v16729_v2 }
 0x754   :  { %8735 = vmatprep.subr.mxu0 %v16730_v5  ;;  %8770 = vmatprep.subr.mxu1 %v16731_v9 }
 0x755   :  { %8736 = vmatpush3.msra.mxu0 %v16732_v49  ;;  %8771 = vmatpush3.msra.mxu1 %v16733_v36 }
 0x756   :  { %8737 = vmatprep.subr.mxu0 %v16734_v54  ;;  %8772 = vmatprep.subr.mxu1 %v16735_v42 }
 0x757   :  { %8738 = vmatpush3.msra.mxu0 %v16736_v50  ;;  %8773 = vmatpush3.msra.mxu1 %v16737_v30 }
 0x758   :  { %8739 = vmatprep.subr.mxu0 %v16738_v52  ;;  %8774 = vmatprep.subr.mxu1 %v16739_v63 }
 0x759   :  { %8740 = vmatpush3.msra.mxu0 %v16740_v61  ;;  %8775 = vmatpush3.msra.mxu1 %v16741_v41 }
 0x75a   :  { %8779 = vmatprep.subr.mxu0 %v16742_v1  ;;  %4828 = vmatprep.subr.mxu1 %v12922_v15  ;;  %v16746_v15 = vld [vmem:[#allocation15_spill] sm:$0xff] }
 0x7f6   :  { %v4199_v6 = vpop.f32.mrf.mxu0  ;;  %v4270_v18 = vpop.f32.mrf.mxu1 }
 0x7f7   :  { %v4419_v13 = vrot.slane %v4199_v6, %v16743_v22  ;;  %v4427_v43 = vrot.slane %v4270_v18, %v16743_v22 }
 0x7f8   :  { %v4201_v59 = vpop.f32.mrf.mxu0  ;;  %v4272_v25 = vpop.f32.mrf.mxu1 }
 0x7f9   :  { %v13038_v62 = vsub.f32 %v16744_v58, %v4419_v13  ;;  %v13041_v28 = vsub.f32 %v16745_v7, %v4427_v43  ;;  %v4423_v34 = vrot.slane %v4201_v59, %v16743_v22  ;;  %v4431_v40 = vrot.slane %v4272_v25, %v16743_v22  ;;  %v16749_v59 = vld [vmem:[#allocation72_spill] sm:$0xff] }
 0x7fa   :  { %v4341_v26 = vpop.f32.mrf.mxu0  ;;  %v13045_v31 = vpop.f32.mrf.mxu1 }
 0x7fb   :  { %v4451_v53 = vmul.f32 %v13038_v62, %v13038_v62  ;;  %v4453_v0 = vmul.f32 %v13041_v28, %v13041_v28  ;;  %v13052_v14 = vsub.f32 %v16746_v15, %v4423_v34  ;;  %v13055_v57 = vsub.f32 %v16747_v37, %v4431_v40  ;;  %v16750_v34 = vld [vmem:[#allocation29_spill] sm:$0xff]  ;;  %v16752_v15 = vld [vmem:[#allocation31_spill] sm:$0xff] }
 0x7fc   :  { %v4343_v8 = vpop.f32.mrf.mxu0  ;;  %v9018_v44 = vpop.f32.mrf.mxu1  ;;  %v4435_v52 = vrot.slane %v4341_v26, %v16743_v22  ;;  %v16751_v26 = vld [vmem:[#allocation30_spill] sm:$0xff] }
 0x7fd   :  { %v4458_v17 = vsel %vm75_vm0, %v4451_v53, 0.0  ;;  %v4472_v27 = vsel %vm75_vm0, %v4453_v0, 0.0  ;;  %v4452_v21 = vmul.f32 %v13052_v14, %v13052_v14  ;;  %v4454_v4 = vmul.f32 %v13055_v57, %v13055_v57  ;;  %v16754_v44 = vld [vmem:[#allocation33_spill] sm:$0xff] }
 0x7fe   :  { %v4459_v23 = vrot.slane %v4458_v17, 4  ;;  %v4473_v20 = vrot.slane %v4472_v27, 4  ;;  %v4439_v38 = vrot.slane %v4343_v8, %v16743_v22  ;;  %v13074_v25 = vsub.f32 %v16749_v59, %v4435_v52  ;;  %v16753_v8 = vld [vmem:[#allocation32_spill] sm:$0xff] }
 0x7ff   :  { %v4465_v3 = vsel %vm75_vm0, %v4452_v21, 0.0  ;;  %v4479_v29 = vsel %vm75_vm0, %v4454_v4, 0.0  ;;  %v4443_v0 = vrot.slane %v13045_v31, %v16743_v22  ;;  %v16756_v31 = vld [vmem:[#allocation37_spill] sm:$0xff]  ;;  %v16757_v21 = vld [vmem:[#allocation39_spill] sm:$0xff] }
 0x800   :  { %v4460_v56 = vadd.f32 %v4459_v23, %v4458_v17  ;;  %v4474_v24 = vadd.f32 %v4473_v20, %v4472_v27  ;;  %v4466_v45 = vrot.slane %v4465_v3, 4  ;;  %v4480_v39 = vrot.slane %v4479_v29, 4  ;;  %v16755_v17 = vld [vmem:[#allocation35_spill] sm:$0xff]  ;;  %v16758_v4 = vld [vmem:[#allocation41_spill] sm:$0xff] }
 0x801   :  { %v13067_v35 = vsub.f32 %v16748_v51, %v4439_v38  ;;  %v4455_v53 = vmul.f32 %v13074_v25, %v13074_v25  ;;  %v13091_v27 = vsub.f32 %v12913_v46, %v4443_v0  ;;  %v16759_v20 = vld [vmem:[#allocation43_spill] sm:$0xff]  ;;  %v16762_v38 = vld [vmem:[#allocation49_spill] sm:$0xff] }
 0x802   :  { %v4461_v16 = vrot.slane %v4460_v56, 2  ;;  %v4475_v55 = vrot.slane %v4474_v24, 2  ;;  %v4467_v48 = vadd.f32 %v4466_v45, %v4465_v3  ;;  %v4481_v60 = vadd.f32 %v4480_v39, %v4479_v29  ;;  %v16760_v3 = vld [vmem:[#allocation9_spill] sm:$0xff]  ;;  %v16761_v29 = vld [vmem:[#allocation47_spill] sm:$0xff]  ;;  %v16765_v39 = vld [vmem:[#allocation52_spill] sm:$0xff] }
 0x803   :  { %v4456_v47 = vmul.f32 %v13067_v35, %v13067_v35  ;;  %v16764_v45 = vld [vmem:[#allocation51_spill] sm:$0xff]  ;;  %v16766_v51 = vld [vmem:[#allocation53_spill] sm:$0xff] }
 0x804   :  { %v4468_v2 = vrot.slane %v4467_v48, 2  ;;  %v4482_v5 = vrot.slane %v4481_v60, 2  ;;  %v4462_v49 = vadd.f32 %v4461_v16, %v4460_v56  ;;  %v4476_v36 = vadd.f32 %v4475_v55, %v4474_v24  ;;  %v16763_v56 = vld [vmem:[#allocation50_spill] sm:$0xff]  ;;  %v5444_v0 = vld [vmem:[%s16352_s11 + $0x8a8] sm:$0xff] }
 0x805   :  { %v4493_v9 = vsel %vm75_vm0, %v4456_v47, 0.0  ;;  %v16769_v47 = vld [vmem:[#allocation56_spill] sm:$0xff] }
 0x806   :  { %v4494_v54 = vrot.slane %v4493_v9, 4  ;;  %v4469_v42 = vadd.f32 %v4468_v2, %v4467_v48  ;;  %v4483_v50 = vadd.f32 %v4482_v5, %v4481_v60  ;;  %v4463_v30 = vrot.slane %v4462_v49, 1  ;;  %v16767_v48 = vld [vmem:[#allocation54_spill] sm:$0xff]  ;;  %v16768_v60 = vld [vmem:[#allocation55_spill] sm:$0xff]  ;;  %v16770_v2 = vld [vmem:[#allocation57_spill] sm:$0xff] }
 0x807   :  { %v4477_v41 = vrot.slane %v4476_v36, 1 }
 0x808   :  { %v4495_v63 = vadd.f32 %v4494_v54, %v4493_v9  ;;  %v4470_v61 = vrot.slane %v4469_v42, 1  ;;  %v4484_v1 = vrot.slane %v4483_v50, 1  ;;  %v4464_v43 = vadd.f32 %v4463_v30, %v4462_v49  ;;  %v16771_v9 = vld [vmem:[#allocation58_spill] sm:$0xff]  ;;  %v16773_v54 = vld [vmem:[#allocation60_spill] sm:$0xff] }
 0x809   :  { %v4478_v58 = vadd.f32 %v4477_v41, %v4476_v36  ;;  %v16772_v36 = vld [vmem:[#allocation59_spill] sm:$0xff]  ;;  %v16775_v30 = vld [vmem:[#allocation62_spill] sm:$0xff]  ;;  %v16778_v41 = vld [vmem:[#allocation65_spill] sm:$0xff] }
 0x80a   :  { %v4471_v6 = vadd.f32 %v4470_v61, %v4469_v42  ;;  %v4496_v18 = vrot.slane %v4495_v63, 2  ;;  %v4485_v13 = vadd.f32 %v4484_v1, %v4483_v50  ;;  %v16774_v42 = vld [vmem:[#allocation61_spill] sm:$0xff]  ;;  %v16777_v61 = vld [vmem:[#allocation64_spill] sm:$0xff] }
 0x80c   :  { %4574 = vmatprep.mubr.f32.mxu0 %v4471_v6  ;;  %v4497_v7 = vadd.f32 %v4496_v18, %v4495_v63  ;;  %4644 = vmatprep.mubr.f32.mxu1 %v4485_v13  ;;  %v16776_v63 = vld [vmem:[#allocation63_spill] sm:$0xff]  ;;  %v16779_v6 = vld [vmem:[#allocation66_spill] sm:$0xff] }
 0x80d   :  { %4575 = vmatmul.mubr.f32.vlgmr.msra.gmra.mxu0 %v4464_v43  ;;  %4645 = vmatmul.mubr.f32.vlgmr.msra.gmra.mxu1 %v4478_v58  ;;  %v16780_v13 = vld [vmem:[#allocation67_spill] sm:$0xff]  ;;  %v16781_v43 = vld [vmem:[#allocation68_spill] sm:$0xff]  ;;  %v16782_v58 = vld [vmem:[#allocation69_spill] sm:$0xff] }
 0x80e   :  { %8780 = vmatpush3.msra.mxu0 %v16750_v34  ;;  %v4498_v40 = vrot.slane %v4497_v7, 1  ;;  %4829 = vmatpush1.msra.mxu1 %v12927_v33  ;;  %v4486_v33 = vsel %vm75_vm0, %v4455_v53, 0.0  ;;  %v5449_v53 = vld [vmem:[%s16352_s11 + $0x8d0] sm:$0xff] }
 0x80f   :  { %8781 = vmatprep.subr.mxu0 %v16751_v26  ;;  %4862 = vmatprep.mubr.f32.mxu1 %v16570_v10  ;;  %v4487_v23 = vrot.slane %v4486_v33, 4  ;;  %v5450_v26 = vld [vmem:[%s16352_s11 + $0x8d8] sm:$0xff] }
 0x810   :  { %8782 = vmatpush3.msra.mxu0 %v16752_v15  ;;  %v4499_v37 = vadd.f32 %v4498_v40, %v4497_v7  ;;  %4899 = vmatprep.subr.mxu1 %v12932_v12  ;;  %v4457_v12 = vmul.f32 %v13091_v27, %v13091_v27  ;;  %v16783_v7 = vld [vmem:[#allocation70_spill] sm:$0xff]  ;;  %v16784_v40 = vld [vmem:[#allocation71_spill] sm:$0xff] }
 0x811   :  { %8783 = vmatprep.subr.mxu0 %v16753_v8  ;;  %v4488_v46 = vadd.f32 %v4487_v23, %v4486_v33  ;;  %v5443_v15 = vld [vmem:[%s16352_s11 + $0x8a0] sm:$0xff]  ;;  %v5437_v8 = vld [vmem:[%s16352_s11 + $0x870] sm:$0xff]  ;;  %v5426_v33 = vld [vmem:[%s16352_s11 + $0x818] sm:$0xff] }
 0x812   :  { %4714 = vmatprep.mubr.f32.mxu0 %v4499_v37  ;;  %8784 = vmatpush3.msra.mxu0 %v16754_v44  ;;  %v4500_v24 = vsel %vm3728_vm5, %v4457_v12, 0.0  ;;  %v5438_v37 = vld [vmem:[%s16352_s11 + $0x878] sm:$0xff]  ;;  %v5432_v44 = vld [vmem:[%s16352_s11 + $0x848] sm:$0xff] }
 0x813   :  { %8785 = vmatprep.subr.mxu0 %v16755_v17  ;;  %v4489_v16 = vrot.slane %v4488_v46, 2  ;;  %v4501_v55 = vrot.slane %v4500_v24, 4  ;;  %v5431_v17 = vld [vmem:[%s16352_s11 + $0x840] sm:$0xff]  ;;  %v5414_v23 = vld [vmem:[%s16352_s11 + $0x7b8] sm:$0xff]  ;;  %v5408_v12 = vld [vmem:[%s16352_s11 + $0x788] sm:$0xff] }
 0x814   :  { %8786 = vmatpush3.msra.mxu0 %v16756_v31  ;;  %v5425_v31 = vld [vmem:[%s16352_s11 + $0x810] sm:$0xff] }
 0x815   :  { %8787 = vmatprep.subr.mxu0 %v16757_v21  ;;  %v4502_v5 = vadd.f32 %v4501_v55, %v4500_v24  ;;  %v4490_v49 = vadd.f32 %v4489_v16, %v4488_v46  ;;  %v5420_v21 = vld [vmem:[%s16352_s11 + $0x7e8] sm:$0xff]  ;;  %v5390_v24 = vld [vmem:[%s16352_s11 + $0x6f8] sm:$0xff]  ;;  %v5377_v55 = vld [vmem:[%s16352_s11 + $0x690] sm:$0xff] }
 0x816   :  { %8788 = vmatpush3.msra.mxu0 %v16758_v4  ;;  %v5419_v4 = vld [vmem:[%s16352_s11 + $0x7e0] sm:$0xff]  ;;  %v5396_v46 = vld [vmem:[%s16352_s11 + $0x728] sm:$0xff]  ;;  %v5378_v16 = vld [vmem:[%s16352_s11 + $0x698] sm:$0xff] }
 0x817   :  { %8789 = vmatprep.subr.mxu0 %v16759_v20  ;;  %v4503_v50 = vrot.slane %v4502_v5, 2  ;;  %v4491_v52 = vrot.slane %v4490_v49, 1  ;;  %v5413_v20 = vld [vmem:[%s16352_s11 + $0x7b0] sm:$0xff] }
 0x818   :  { %8790 = vmatpush3.msra.mxu0 %v16760_v3  ;;  %v5407_v3 = vld [vmem:[%s16352_s11 + $0x780] sm:$0xff] }
 0x819   :  { %8791 = vmatprep.subr.mxu0 %v16761_v29  ;;  %v4504_v1 = vadd.f32 %v4503_v50, %v4502_v5  ;;  %v4492_v18 = vadd.f32 %v4491_v52, %v4490_v49  ;;  %v5402_v29 = vld [vmem:[%s16352_s11 + $0x758] sm:$0xff]  ;;  %v5360_v5 = vld [vmem:[%s16352_s11 + $0x608] sm:$0xff] }
 0x81a   :  { %8792 = vmatpush3.msra.mxu0 %v16762_v38  ;;  %v5401_v38 = vld [vmem:[%s16352_s11 + $0x750] sm:$0xff]  ;;  %v5546_v49 = vld [vmem:[%s16352_s11 + $0xbd8] sm:$0xff]  ;;  %v5528_v52 = vld [vmem:[%s16352_s11 + $0xb48] sm:$0xff] }
 0x81b   :  { %8793 = vmatprep.subr.mxu0 %v16763_v56  ;;  %v4505_v59 = vrot.slane %v4504_v1, 1  ;;  %v5395_v56 = vld [vmem:[%s16352_s11 + $0x720] sm:$0xff]  ;;  %v5534_v50 = vld [vmem:[%s16352_s11 + $0xb78] sm:$0xff] }
 0x81c   :  { %8794 = vmatpush3.msra.mxu0 %v16764_v45  ;;  %v5389_v45 = vld [vmem:[%s16352_s11 + $0x6f0] sm:$0xff] }
 0x81d   :  { %8795 = vmatprep.subr.mxu0 %v16765_v39  ;;  %v4506_v34 = vadd.f32 %v4505_v59, %v4504_v1  ;;  %v5384_v39 = vld [vmem:[%s16352_s11 + $0x6c8] sm:$0xff]  ;;  %v5503_v59 = vld [vmem:[%s16352_s11 + $0xa80] sm:$0xff] }
 0x81e   :  { %8796 = vmatpush3.msra.mxu0 %v16766_v51  ;;  %v5383_v51 = vld [vmem:[%s16352_s11 + $0x6c0] sm:$0xff]  ;;  %v5516_v1 = vld [vmem:[%s16352_s11 + $0xae8] sm:$0xff] }
 0x81f   :  { %8797 = vmatprep.subr.mxu0 %v16767_v48  ;;  %v5372_v48 = vld [vmem:[%s16352_s11 + $0x668] sm:$0xff] }
 0x820   :  { %8798 = vmatpush3.msra.mxu0 %v16768_v60  ;;  %v5371_v60 = vld [vmem:[%s16352_s11 + $0x660] sm:$0xff] }
 0x821   :  { %8799 = vmatprep.subr.mxu0 %v16769_v47  ;;  %v5366_v47 = vld [vmem:[%s16352_s11 + $0x638] sm:$0xff] }
 0x822   :  { %8800 = vmatpush3.msra.mxu0 %v16770_v2  ;;  %v5365_v2 = vld [vmem:[%s16352_s11 + $0x630] sm:$0xff] }
 0x823   :  { %8801 = vmatprep.subr.mxu0 %v16771_v9  ;;  %v5359_v9 = vld [vmem:[%s16352_s11 + $0x600] sm:$0xff] }
 0x824   :  { %8802 = vmatpush3.msra.mxu0 %v16772_v36  ;;  %v5545_v36 = vld [vmem:[%s16352_s11 + $0xbd0] sm:$0xff] }
 0x825   :  { %8803 = vmatprep.subr.mxu0 %v16773_v54  ;;  %v5540_v54 = vld [vmem:[%s16352_s11 + $0xba8] sm:$0xff] }
 0x826   :  { %8804 = vmatpush3.msra.mxu0 %v16774_v42  ;;  %v5539_v42 = vld [vmem:[%s16352_s11 + $0xba0] sm:$0xff] }
 0x827   :  { %8805 = vmatprep.subr.mxu0 %v16775_v30  ;;  %v5533_v30 = vld [vmem:[%s16352_s11 + $0xb70] sm:$0xff] }
 0x828   :  { %8806 = vmatpush3.msra.mxu0 %v16776_v63  ;;  %v5527_v63 = vld [vmem:[%s16352_s11 + $0xb40] sm:$0xff] }
 0x829   :  { %8807 = vmatprep.subr.mxu0 %v16777_v61  ;;  %v5522_v61 = vld [vmem:[%s16352_s11 + $0xb18] sm:$0xff] }
 0x82a   :  { %8808 = vmatpush3.msra.mxu0 %v16778_v41  ;;  %v5521_v41 = vld [vmem:[%s16352_s11 + $0xb10] sm:$0xff] }
 0x82b   :  { %8809 = vmatprep.subr.mxu0 %v16779_v6  ;;  %v5515_v6 = vld [vmem:[%s16352_s11 + $0xae0] sm:$0xff] }
 0x82c   :  { %8810 = vmatpush3.msra.mxu0 %v16780_v13  ;;  %v5509_v13 = vld [vmem:[%s16352_s11 + $0xab0] sm:$0xff] }
 0x82d   :  { %4715 = vmatmul.mubr.f32.vlgmr.msra.gmra.mxu0 %v4492_v18  ;;  %9019 = vmatprep.subr.mxu0 %v16570_v10  ;;  %v5510_v18 = vld [vmem:[%s16352_s11 + $0xab8] sm:$0xff] }
 0x82e   :  { %9020 = vmatpush3.msra.mxu0 %v16781_v43  ;;  %9027 = vmatprep.mubr.msk.f32.mxu0 %vm9051_vm1, %v16570_v10  ;;  %v5504_v43 = vld [vmem:[%s16352_s11 + $0xa88] sm:$0xff] }
 0x82f   :  { %9021 = vmatprep.subr.mxu0 %v16570_v10 }
 0x830   :  { %9022 = vmatpush3.msra.mxu0 %v16782_v58  ;;  %v5498_v58 = vld [vmem:[%s16352_s11 + $0xa58] sm:$0xff] }
 0x831   :  { %9023 = vmatprep.subr.mxu0 %v16570_v10 }
 0x832   :  { %9024 = vmatpush3.msra.mxu0 %v16783_v7 }
 0x833   :  { %9025 = vmatprep.subr.mxu0 %v16570_v10 }
 0x834   :  { %9026 = vmatpush3.msra.mxu0 %v16784_v40 }
 0x835   :  { %9028 = vmatmul.mubr.msk.f32.vlgmr.msra.gmra.mxu0 %vm3836_vm6, %v4506_v34  ;;  %5841 = vmatprep.subr.mxu0 %v5450_v26 }
 0x836   :  { %5842 = vmatpush1.msra.mxu0 %v5449_v53 }
 0x837   :  { %5843 = vmatprep.subr.mxu0 %v5444_v0 }
 0x838   :  { %5844 = vmatpush1.msra.mxu0 %v5443_v15 }
 0x839   :  { %5845 = vmatprep.subr.mxu0 %v5438_v37 }
 0x83a   :  { %5846 = vmatpush1.msra.mxu0 %v5437_v8 }
 0x83b   :  { %5847 = vmatprep.subr.mxu0 %v5432_v44 }
 0x83c   :  { %5848 = vmatpush1.msra.mxu0 %v5431_v17 }
 0x83d   :  { %5849 = vmatprep.subr.mxu0 %v5426_v33 }
 0x83e   :  { %5850 = vmatpush1.msra.mxu0 %v5425_v31 }
 0x83f   :  { %5851 = vmatprep.subr.mxu0 %v5420_v21 }
 0x840   :  { %5852 = vmatpush1.msra.mxu0 %v5419_v4 }
 0x841   :  { %5853 = vmatprep.subr.mxu0 %v5414_v23 }
 0x842   :  { %5854 = vmatpush1.msra.mxu0 %v5413_v20  ;;  %v4791_v20 = vld [vmem:[%s16353_s9] sm:$0x1] }
 0x843   :  { %5855 = vmatprep.subr.mxu0 %v5408_v12 }
 0x844   :  { %5856 = vmatpush1.msra.mxu0 %v5407_v3 }
 0x845   :  { %5857 = vmatprep.subr.mxu0 %v5402_v29  ;;  %v16785_v29 = vld [vmem:[#allocation74_spill] sm:$0xff] }
 0x846   :  { %5858 = vmatpush1.msra.mxu0 %v5401_v38  ;;  %v5258_v38 = vld [vmem:[%s16352_s11 + $0x2d8] sm:$0xff] }
 0x847   :  { %5859 = vmatprep.subr.mxu0 %v5396_v46  ;;  %v5251_v46 = vld [vmem:[%s16352_s11 + $0x2a0] sm:$0xff] }
 0x848   :  { %5860 = vmatpush1.msra.mxu0 %v5395_v56  ;;  %v5245_v56 = vld [vmem:[%s16352_s11 + $0x270] sm:$0xff] }
 0x849   :  { %5861 = vmatprep.subr.mxu0 %v5390_v24  ;;  %v5240_v24 = vld [vmem:[%s16352_s11 + $0x248] sm:$0xff] }
 0x84a   :  { %5862 = vmatpush1.msra.mxu0 %v5389_v45  ;;  %v5239_v45 = vld [vmem:[%s16352_s11 + $0x240] sm:$0xff] }
 0x84b   :  { %5863 = vmatprep.subr.mxu0 %v5384_v39  ;;  %v5234_v39 = vld [vmem:[%s16352_s11 + $0x218] sm:$0xff] }
 0x84c   :  { %5864 = vmatpush1.msra.mxu0 %v5383_v51  ;;  %v5233_v51 = vld [vmem:[%s16352_s11 + $0x210] sm:$0xff] }
 0x84d   :  { %5865 = vmatprep.subr.mxu0 %v5378_v16  ;;  %v5228_v16 = vld [vmem:[%s16352_s11 + $0x1e8] sm:$0xff] }
 0x84e   :  { %5866 = vmatpush1.msra.mxu0 %v5377_v55  ;;  %v5227_v55 = vld [vmem:[%s16352_s11 + $0x1e0] sm:$0xff] }
 0x84f   :  { %5867 = vmatprep.subr.mxu0 %v5372_v48  ;;  %v5222_v48 = vld [vmem:[%s16352_s11 + $0x1b8] sm:$0xff] }
 0x850   :  { %5868 = vmatpush1.msra.mxu0 %v5371_v60  ;;  %v5221_v60 = vld [vmem:[%s16352_s11 + $0x1b0] sm:$0xff] }
 0x851   :  { %5869 = vmatprep.subr.mxu0 %v5366_v47  ;;  %v5216_v47 = vld [vmem:[%s16352_s11 + $0x188] sm:$0xff] }
 0x852   :  { %5870 = vmatpush1.msra.mxu0 %v5365_v2  ;;  %v5215_v2 = vld [vmem:[%s16352_s11 + $0x180] sm:$0xff] }
 0x853   :  { %5871 = vmatprep.subr.mxu0 %v5360_v5  ;;  %v5210_v5 = vld [vmem:[%s16352_s11 + $0x158] sm:$0xff] }
 0x854   :  { %5872 = vmatpush1.msra.mxu0 %v5359_v9  ;;  %v5209_v9 = vld [vmem:[%s16352_s11 + $0x150] sm:$0xff] }
 0x855   :  { %5873 = vmatprep.subr.mxu0 %v5546_v49  ;;  %v5204_v49 = vld [vmem:[%s16352_s11 + $0x128] sm:$0xff] }
 0x856   :  { %5874 = vmatpush2.msra.mxu0 %v5545_v36  ;;  %v5203_v36 = vld [vmem:[%s16352_s11 + $0x120] sm:$0xff] }
 0x857   :  { %5875 = vmatprep.subr.mxu0 %v5540_v54  ;;  %v5198_v54 = vld [vmem:[%s16352_s11 + $0xf8] sm:$0xff] }
 0x858   :  { %5876 = vmatpush2.msra.mxu0 %v5539_v42  ;;  %v5197_v42 = vld [vmem:[%s16352_s11 + $0xf0] sm:$0xff] }
 0x859   :  { %5877 = vmatprep.subr.mxu0 %v5534_v50  ;;  %v5192_v50 = vld [vmem:[%s16352_s11 + $0xc8] sm:$0xff] }
 0x85a   :  { %5878 = vmatpush2.msra.mxu0 %v5533_v30  ;;  %v5191_v30 = vld [vmem:[%s16352_s11 + $0xc0] sm:$0xff] }
 0x85b   :  { %5879 = vmatprep.subr.mxu0 %v5528_v52  ;;  %v5186_v52 = vld [vmem:[%s16352_s11 + $0x98] sm:$0xff] }
 0x85c   :  { %5880 = vmatpush2.msra.mxu0 %v5527_v63  ;;  %v5185_v63 = vld [vmem:[%s16352_s11 + $0x90] sm:$0xff] }
 0x85d   :  { %5881 = vmatprep.subr.mxu0 %v5522_v61  ;;  %v5180_v61 = vld [vmem:[%s16352_s11 + $0x68] sm:$0xff] }
 0x85e   :  { %5882 = vmatpush2.msra.mxu0 %v5521_v41  ;;  %v5179_v41 = vld [vmem:[%s16352_s11 + $0x60] sm:$0xff] }
 0x85f   :  { %5883 = vmatprep.subr.mxu0 %v5516_v1  ;;  %v5174_v1 = vld [vmem:[%s16352_s11 + $0x38] sm:$0xff] }
 0x860   :  { %5884 = vmatpush2.msra.mxu0 %v5515_v6  ;;  %v5173_v6 = vld [vmem:[%s16352_s11 + $0x30] sm:$0xff] }
 0x861   :  { %5885 = vmatprep.subr.mxu0 %v5510_v18  ;;  %v5168_v18 = vld [vmem:[%s16352_s11 + $0x8] sm:$0xff] }
 0x862   :  { %5886 = vmatpush2.msra.mxu0 %v5509_v13  ;;  %v5167_v13 = vld [vmem:[%s16352_s11] sm:$0xff] }
 0x863   :  { %5887 = vmatprep.subr.mxu0 %v5504_v43  ;;  %v5354_v43 = vld [vmem:[%s16352_s11 + $0x5d8] sm:$0xff] }
 0x864   :  { %5888 = vmatpush2.msra.mxu0 %v5503_v59  ;;  %v5353_v59 = vld [vmem:[%s16352_s11 + $0x5d0] sm:$0xff] }
 0x865   :  { %5889 = vmatprep.subr.mxu0 %v5498_v58  ;;  %v5348_v58 = vld [vmem:[%s16352_s11 + $0x5a8] sm:$0xff] }
 0x8cd   :  { %v8741_v7 = vpop.f32.mrf.mxu0  ;;  %v8776_v34 = vpop.f32.mrf.mxu1 }
 0x8cf   :  { %v8742_v40 = vpop.f32.mrf.mxu0  ;;  %v8777_v26 = vpop.f32.mrf.mxu1 }
 0x8d0   :  { %v8743_v0 = vadd.f32 %v8742_v40, %v8741_v7  ;;  %v8778_v15 = vadd.f32 %v8777_v26, %v8776_v34  ;;  %v5347_v7 = vld [vmem:[%s16352_s11 + $0x5a0] sm:$0xff]  ;;  %v5342_v34 = vld [vmem:[%s16352_s11 + $0x578] sm:$0xff]  ;;  %v5341_v40 = vld [vmem:[%s16352_s11 + $0x570] sm:$0xff] }
 0x8d1   :  { %v5336_v26 = vld [vmem:[%s16352_s11 + $0x548] sm:$0xff] }
 0x8d2   :  { %v4647_v44 = vadd.f32 %v8778_v15, %v8743_v0  ;;  %v5330_v0 = vld [vmem:[%s16352_s11 + $0x518] sm:$0xff]  ;;  %v5329_v15 = vld [vmem:[%s16352_s11 + $0x510] sm:$0xff] }
 0x8ed   :  { %v8811_v53 = vpop.f32.mrf.mxu0 }
 0x8ef   :  { %v8812_v37 = vpop.f32.mrf.mxu0 }
 0x8f0   :  { %v8813_v8 = vadd.f32 %v8812_v37, %v8811_v53  ;;  %v5335_v53 = vld [vmem:[%s16352_s11 + $0x540] sm:$0xff]  ;;  %v5324_v37 = vld [vmem:[%s16352_s11 + $0x4e8] sm:$0xff] }
 0x8f2   :  { %v4717_v17 = vadd.f32 %v8813_v8, %v4647_v44  ;;  %v5323_v8 = vld [vmem:[%s16352_s11 + $0x4e0] sm:$0xff]  ;;  %v5318_v44 = vld [vmem:[%s16352_s11 + $0x4b8] sm:$0xff] }
 0x8f5   :  { %v4786_v33 = vpop.f32.mrf.mxu0 }
 0x8f6   :  { %v4787_v31 = vadd.f32 %v4786_v33, %v4717_v17  ;;  %v5317_v17 = vld [vmem:[%s16352_s11 + $0x4b0] sm:$0xff]  ;;  %v5312_v33 = vld [vmem:[%s16352_s11 + $0x488] sm:$0xff] }
 0x8f7   :  { %v9029_v21 = vpop.f32.mrf.mxu0 }
 0x8f8   :  { %v4790_v4 = vmul.f32 0.005, %v4787_v31  ;;  %v5311_v31 = vld [vmem:[%s16352_s11 + $0x480] sm:$0xff]  ;;  %v5306_v21 = vld [vmem:[%s16352_s11 + $0x458] sm:$0xff] }
 0x8fa   :  { %v4792_v23 = vadd.f32 1e-05, %v4790_v4  ;;  %v5305_v4 = vld [vmem:[%s16352_s11 + $0x450] sm:$0xff] }
 0x8fc   :  { %9042 = vrsqrt.f32 %v4792_v23  ;;  %v5300_v23 = vld [vmem:[%s16352_s11 + $0x428] sm:$0xff] }
 0x909   :  { %v9043_v12 = vpop.eup %9042 }
 0x90a   :  { %v4794_v3 = vmul.f32 %v9043_v12, %v4791_v20  ;;  %v5299_v20 = vld [vmem:[%s16352_s11 + $0x420] sm:$0xff]  ;;  %v5294_v12 = vld [vmem:[%s16352_s11 + $0x3f8] sm:$0xff] }
 0x90c   :  { %8231 = vmatmul.mubr.msk.f32.vlgmr.msra.gmra.mxu1 %vm4129_vm7, %v4794_v3 }
 0x90d   :  { %4900 = vmatpush1.msra.mxu1 %v12939_v19  ;;  %4933 = vmatprep.mubr.f32.mxu1 %v16570_v10  ;;  %v5257_v19 = vld [vmem:[%s16352_s11 + $0x2d0] sm:$0xff] }
 0x90e   :  { %4970 = vmatprep.subr.mxu1 %v16785_v29  ;;  %v5497_v29 = vld [vmem:[%s16352_s11 + $0xa50] sm:$0xff] }
 0x90f   :  { %5890 = vmatpush2.msra.mxu0 %v5497_v29 }
 0x910   :  { %8232 = vmatmul.mubr.msk.f32.vlgmr.msra.gmra.mxu1 %vm4129_vm7, %v4794_v3 }
 0x911   :  { %4971 = vmatpush1.msra.mxu1 %v12953_v11  ;;  %5004 = vmatprep.mubr.f32.mxu1 %v16570_v10  ;;  %v5252_v11 = vld [vmem:[%s16352_s11 + $0x2a8] sm:$0xff] }
 0x912   :  { %9030 = vmatprep.subr.mxu1 %v16570_v10 }
 0x914   :  { %8233 = vmatmul.mubr.msk.f32.vlgmr.msra.gmra.mxu1 %vm4129_vm7, %v4794_v3 }
 0x915   :  { %9031 = vmatpush3.msra.mxu1 %v12958_v32  ;;  %9032 = vmatprep.mubr.msk.f32.mxu1 %vm9051_vm1, %v16570_v10  ;;  %v5246_v32 = vld [vmem:[%s16352_s11 + $0x278] sm:$0xff] }
 0x916   :  { %5770 = vmatprep.subr.mxu1 %v5258_v38  ;;  %v5288_v38 = vld [vmem:[%s16352_s11 + $0x3c8] sm:$0xff] }
 0x918   :  { %9033 = vmatmul.mubr.msk.f32.vlgmr.msra.gmra.mxu1 %vm4129_vm7, %v4794_v3  ;;  %v5293_v3 = vld [vmem:[%s16352_s11 + $0x3f0] sm:$0xff] }
 0x919   :  { %5771 = vmatpush1.msra.mxu1 %v5257_v19  ;;  %v5492_v19 = vld [vmem:[%s16352_s11 + $0xa28] sm:$0xff] }
 0x91a   :  { %5772 = vmatprep.subr.mxu1 %v5252_v11  ;;  %5891 = vmatprep.subr.mxu0 %v5492_v19  ;;  %v5287_v11 = vld [vmem:[%s16352_s11 + $0x3c0] sm:$0xff] }
 0x91b   :  { %5773 = vmatpush1.msra.mxu1 %v5251_v46  ;;  %v5491_v46 = vld [vmem:[%s16352_s11 + $0xa20] sm:$0xff] }
 0x91c   :  { %5774 = vmatprep.subr.mxu1 %v5246_v32  ;;  %5892 = vmatpush2.msra.mxu0 %v5491_v46  ;;  %v5282_v32 = vld [vmem:[%s16352_s11 + $0x398] sm:$0xff]  ;;  %v5635_v19 = vld [vmem:[%s16352_s11 + $0xea0] sm:$0xff] }
 0x91d   :  { %5775 = vmatpush1.msra.mxu1 %v5245_v56  ;;  %v5486_v56 = vld [vmem:[%s16352_s11 + $0x9f8] sm:$0xff] }
 0x91e   :  { %5776 = vmatprep.subr.mxu1 %v5240_v24  ;;  %5893 = vmatprep.subr.mxu0 %v5486_v56  ;;  %v5281_v24 = vld [vmem:[%s16352_s11 + $0x390] sm:$0xff]  ;;  %v5630_v56 = vld [vmem:[%s16352_s11 + $0xe78] sm:$0xff] }
 0x91f   :  { %5777 = vmatpush1.msra.mxu1 %v5239_v45  ;;  %v5485_v45 = vld [vmem:[%s16352_s11 + $0x9f0] sm:$0xff] }
 0x920   :  { %5778 = vmatprep.subr.mxu1 %v5234_v39  ;;  %5894 = vmatpush2.msra.mxu0 %v5485_v45  ;;  %v5276_v39 = vld [vmem:[%s16352_s11 + $0x368] sm:$0xff] }
 0x921   :  { %5779 = vmatpush1.msra.mxu1 %v5233_v51  ;;  %v5480_v51 = vld [vmem:[%s16352_s11 + $0x9c8] sm:$0xff] }
 0x922   :  { %5780 = vmatprep.subr.mxu1 %v5228_v16  ;;  %5895 = vmatprep.subr.mxu0 %v5480_v51  ;;  %v5275_v16 = vld [vmem:[%s16352_s11 + $0x360] sm:$0xff] }
 0x923   :  { %5781 = vmatpush1.msra.mxu1 %v5227_v55  ;;  %v5479_v55 = vld [vmem:[%s16352_s11 + $0x9c0] sm:$0xff] }
 0x924   :  { %5782 = vmatprep.subr.mxu1 %v5222_v48  ;;  %5896 = vmatpush2.msra.mxu0 %v5479_v55  ;;  %v5270_v48 = vld [vmem:[%s16352_s11 + $0x338] sm:$0xff] }
 0x925   :  { %5783 = vmatpush1.msra.mxu1 %v5221_v60  ;;  %v5474_v60 = vld [vmem:[%s16352_s11 + $0x998] sm:$0xff] }
 0x926   :  { %5784 = vmatprep.subr.mxu1 %v5216_v47  ;;  %5897 = vmatprep.subr.mxu0 %v5474_v60  ;;  %v5269_v47 = vld [vmem:[%s16352_s11 + $0x330] sm:$0xff]  ;;  %v5624_v60 = vld [vmem:[%s16352_s11 + $0xe48] sm:$0xff] }
 0x927   :  { %5785 = vmatpush1.msra.mxu1 %v5215_v2  ;;  %v5473_v2 = vld [vmem:[%s16352_s11 + $0x990] sm:$0xff] }
 0x928   :  { %5786 = vmatprep.subr.mxu1 %v5210_v5  ;;  %5898 = vmatpush2.msra.mxu0 %v5473_v2  ;;  %v5264_v5 = vld [vmem:[%s16352_s11 + $0x308] sm:$0xff] }
 0x929   :  { %5787 = vmatpush1.msra.mxu1 %v5209_v9  ;;  %v5468_v9 = vld [vmem:[%s16352_s11 + $0x968] sm:$0xff] }
 0x92a   :  { %5788 = vmatprep.subr.mxu1 %v5204_v49  ;;  %5899 = vmatprep.subr.mxu0 %v5468_v9  ;;  %v5263_v49 = vld [vmem:[%s16352_s11 + $0x300] sm:$0xff]  ;;  %v5618_v9 = vld [vmem:[%s16352_s11 + $0xe18] sm:$0xff] }
 0x92b   :  { %5789 = vmatpush1.msra.mxu1 %v5203_v36  ;;  %v5467_v36 = vld [vmem:[%s16352_s11 + $0x960] sm:$0xff] }
 0x92c   :  { %5790 = vmatprep.subr.mxu1 %v5198_v54  ;;  %5900 = vmatpush2.msra.mxu0 %v5467_v36  ;;  %v5462_v54 = vld [vmem:[%s16352_s11 + $0x938] sm:$0xff] }
 0x92d   :  { %5791 = vmatpush1.msra.mxu1 %v5197_v42  ;;  %v5642_v42 = vld [vmem:[%s16352_s11 + $0xed8] sm:$0xff]  ;;  %5901 = vmatprep.subr.mxu0 %v5462_v54  ;;  %v5617_v54 = vld [vmem:[%s16352_s11 + $0xe10] sm:$0xff] }
 0x92e   :  { %5792 = vmatprep.subr.mxu1 %v5192_v50  ;;  %v5461_v50 = vld [vmem:[%s16352_s11 + $0x930] sm:$0xff]  ;;  %v5750_v36 = vld [vmem:[%s16352_s11 + $0x1238] sm:$0xff] }
 0x92f   :  { %5793 = vmatpush1.msra.mxu1 %v5191_v30  ;;  %5902 = vmatpush2.msra.mxu0 %v5461_v50  ;;  %v5456_v30 = vld [vmem:[%s16352_s11 + $0x908] sm:$0xff]  ;;  %v5749_v50 = vld [vmem:[%s16352_s11 + $0x1230] sm:$0xff] }
 0x930   :  { %5794 = vmatprep.subr.mxu1 %v5186_v52  ;;  %5903 = vmatprep.subr.mxu0 %v5456_v30  ;;  %v5455_v52 = vld [vmem:[%s16352_s11 + $0x900] sm:$0xff]  ;;  %v5612_v30 = vld [vmem:[%s16352_s11 + $0xde8] sm:$0xff] }
 0x931   :  { %5795 = vmatpush1.msra.mxu1 %v5185_v63  ;;  %5904 = vmatpush2.msra.mxu0 %v5455_v52  ;;  %v5762_v63 = vld [vmem:[%s16352_s11 + $0x1298] sm:$0xff]  ;;  %v5744_v52 = vld [vmem:[%s16352_s11 + $0x1208] sm:$0xff] }
 0x932   :  { %5796 = vmatprep.subr.mxu1 %v5180_v61  ;;  %6007 = vmatprep.subr.mxu0 %v5762_v63  ;;  %v13541_v61 = vld [vmem:[%s16354_s10] sm:$0x7f] }
 0x933   :  { %5797 = vmatpush1.msra.mxu1 %v5179_v41  ;;  %v5611_v63 = vld [vmem:[%s16352_s11 + $0xde0] sm:$0xff] }
 0x934   :  { %5798 = vmatprep.subr.mxu1 %v5174_v1 }
 0x935   :  { %5799 = vmatpush1.msra.mxu1 %v5173_v6  ;;  %v5121_v6 = vrot.slane %v13541_v61, %v16743_v22 }
 0x936   :  { %5800 = vmatprep.subr.mxu1 %v5168_v18 }
 0x937   :  { %5801 = vmatpush1.msra.mxu1 %v5167_v13 }
 0x938   :  { %5802 = vmatprep.subr.mxu1 %v5354_v43 }
 0x939   :  { %5803 = vmatpush2.msra.mxu1 %v5353_v59  ;;  %v16786_v59 = vld [vmem:[#allocation10_spill] sm:$0xff] }
 0x93a   :  { %5804 = vmatprep.subr.mxu1 %v5348_v58  ;;  %v5125_v58 = vrot.slane %v13541_v61, %v16786_v59  ;;  %v15393_v59 = vld [vmem:[%s16355_s12 + $0x128] sm:$0xff] }
 0x93b   :  { %5805 = vmatpush2.msra.mxu1 %v5347_v7 }
 0x93c   :  { %5806 = vmatprep.subr.mxu1 %v5342_v34 }
 0x93d   :  { %5807 = vmatpush2.msra.mxu1 %v5341_v40 }
 0x93e   :  { %5808 = vmatprep.subr.mxu1 %v5336_v26 }
 0x93f   :  { %5809 = vmatpush2.msra.mxu1 %v5335_v53  ;;  %v16787_v53 = vld [vmem:[#allocation11_spill] sm:$0xff] }
 0x940   :  { %5810 = vmatprep.subr.mxu1 %v5330_v0  ;;  %v5129_v0 = vrot.slane %v13541_v61, %v16787_v53  ;;  %v15380_v53 = vld [vmem:[%s16355_s12 + $0x250] sm:$0xff] }
 0x941   :  { %5811 = vmatpush2.msra.mxu1 %v5329_v15  ;;  %16818 = vst [vmem:[#allocation8_spill] sm:$0xff] %v15380_v53 }
 0x942   :  { %5812 = vmatprep.subr.mxu1 %v5324_v37 }
 0x943   :  { %5813 = vmatpush2.msra.mxu1 %v5323_v8 }
 0x944   :  { %5814 = vmatprep.subr.mxu1 %v5318_v44  ;;  %v16788_v44 = vld [vmem:[#allocation12_spill] sm:$0xff] }
 0x945   :  { %5815 = vmatpush2.msra.mxu1 %v5317_v17  ;;  %v5133_v17 = vrot.slane %v13541_v61, %v16788_v44  ;;  %v15386_v44 = vld [vmem:[%s16355_s12 + $0x1a8] sm:$0xff] }
 0x946   :  { %5816 = vmatprep.subr.mxu1 %v5312_v33 }
 0x947   :  { %5817 = vmatpush2.msra.mxu1 %v5311_v31 }
 0x948   :  { %5818 = vmatprep.subr.mxu1 %v5306_v21 }
 0x949   :  { %5819 = vmatpush2.msra.mxu1 %v5305_v4 }
 0x94a   :  { %5820 = vmatprep.subr.mxu1 %v5300_v23 }
 0x94b   :  { %5821 = vmatpush2.msra.mxu1 %v5299_v20 }
 0x94c   :  { %5822 = vmatprep.subr.mxu1 %v5294_v12  ;;  %v5636_v12 = vld [vmem:[%s16352_s11 + $0xea8] sm:$0xff] }
 0x94d   :  { %5823 = vmatpush2.msra.mxu1 %v5293_v3 }
 0x94e   :  { %5824 = vmatprep.subr.mxu1 %v5288_v38 }
 0x94f   :  { %5825 = vmatpush2.msra.mxu1 %v5287_v11 }
 0x950   :  { %5826 = vmatprep.subr.mxu1 %v5282_v32 }
 0x951   :  { %5827 = vmatpush2.msra.mxu1 %v5281_v24 }
 0x952   :  { %5828 = vmatprep.subr.mxu1 %v5276_v39  ;;  %v5629_v39 = vld [vmem:[%s16352_s11 + $0xe70] sm:$0xff] }
 0x953   :  { %5829 = vmatpush2.msra.mxu1 %v5275_v16  ;;  %v16790_v16 = vld [vmem:[#allocation2_spill] sm:$0xff] }
 0x954   :  { %5830 = vmatprep.subr.mxu1 %v5270_v48  ;;  %v16791_v55 = vsub.s32 6, %v16790_v16  ;;  %v5558_v16 = vld [vmem:[%s16352_s11 + $0xc38] sm:$0xff] }
 0x955   :  { %5831 = vmatpush2.msra.mxu1 %v5269_v47  ;;  %v5756_v47 = vld [vmem:[%s16352_s11 + $0x1268] sm:$0xff] }
 0x956   :  { %5832 = vmatprep.subr.mxu1 %v5264_v5  ;;  %v5145_v48 = vrot.slane %v13541_v61, %v16791_v55  ;;  %v5755_v5 = vld [vmem:[%s16352_s11 + $0x1260] sm:$0xff]  ;;  %v5212_v55 = vld [vmem:[%s16352_s11 + $0x168] sm:$0xff] }
 0x957   :  { %5833 = vmatpush2.msra.mxu1 %v5263_v49 }
 0x958   :  { %5912 = vmatprep.subr.mxu1 %v5642_v42 }
 0x9cc   :  { %v4864_v41 = vpop.f32.mrf.mxu1 }
 0x9cd   :  { %v5084_v1 = vrot.slane %v4864_v41, %v16743_v22  ;;  %v5743_v41 = vld [vmem:[%s16352_s11 + $0x1200] sm:$0xff] }
 0x9ce   :  { %v4866_v18 = vpop.f32.mrf.mxu1 }
 0x9cf   :  { %v5109_v13 = vmul.f32 %v5084_v1, %v13038_v62  ;;  %v5088_v43 = vrot.slane %v4866_v18, %v16743_v22  ;;  %v5606_v1 = vld [vmem:[%s16352_s11 + $0xdb8] sm:$0xff]  ;;  %v5260_v18 = vld [vmem:[%s16352_s11 + $0x2e8] sm:$0xff] }
 0x9d0   :  { %v4935_v7 = vpop.f32.mrf.mxu1 }
 0x9d1   :  { %v5110_v34 = vmul.f32 %v5088_v43, %v13052_v14  ;;  %v5092_v40 = vrot.slane %v4935_v7, %v16743_v22  ;;  %v5153_v26 = vadd.f32 %v5121_v6, %v5109_v13  ;;  %v5605_v13 = vld [vmem:[%s16352_s11 + $0xdb0] sm:$0xff]  ;;  %v5259_v43 = vld [vmem:[%s16352_s11 + $0x2e0] sm:$0xff]  ;;  %v5254_v7 = vld [vmem:[%s16352_s11 + $0x2b8] sm:$0xff] }
 0x9d2   :  { %v4937_v15 = vpop.f32.mrf.mxu1 }
 0x9d3   :  { %v5111_v37 = vmul.f32 %v5092_v40, %v13041_v28  ;;  %v5096_v8 = vrot.slane %v4937_v15, %v16743_v22  ;;  %v5154_v62 = vadd.f32 %v5125_v58, %v5110_v34  ;;  %v13563_v21 = vmax.f32 %v5153_v26, 0.0  ;;  %v5641_v28 = vld [vmem:[%s16352_s11 + $0xed0] sm:$0xff]  ;;  %v5600_v58 = vld [vmem:[%s16352_s11 + $0xd88] sm:$0xff]  ;;  %v5599_v34 = vld [vmem:[%s16352_s11 + $0xd80] sm:$0xff] }
 0x9d4   :  { %v13558_v33 = vpop.f32.mrf.mxu1  ;;  %v5253_v40 = vld [vmem:[%s16352_s11 + $0x2b0] sm:$0xff]  ;;  %v5594_v26 = vld [vmem:[%s16352_s11 + $0xd58] sm:$0xff] }
 0x9d5   :  { %v5112_v31 = vmul.f32 %v5096_v8, %v13055_v57  ;;  %v13561_v14 = vmax.f32 %v5154_v62, 0.0  ;;  %v5155_v4 = vadd.f32 %v5129_v0, %v5111_v37  ;;  %v16789_v57 = vld [vmem:[#allocation13_spill] sm:$0xff]  ;;  %v5248_v0 = vld [vmem:[%s16352_s11 + $0x288] sm:$0xff]  ;;  %v5593_v15 = vld [vmem:[%s16352_s11 + $0xd50] sm:$0xff] }
 0x9d6   :  { %v5008_v23 = vpop.f32.mrf.mxu1  ;;  %v5141_v29 = vrot.slane %v13541_v61, %v16789_v57  ;;  %v5247_v37 = vld [vmem:[%s16352_s11 + $0x280] sm:$0xff]  ;;  %v5588_v8 = vld [vmem:[%s16352_s11 + $0xd28] sm:$0xff]  ;;  %v5242_v62 = vld [vmem:[%s16352_s11 + $0x258] sm:$0xff] }
 0x9d7   :  { %v5104_v20 = vrot.slane %v5008_v23, %v16743_v22  ;;  %5834 = vmatprep.mubr.f32.mxu1 %v13561_v14  ;;  %v5156_v3 = vadd.f32 %v5133_v17, %v5112_v31  ;;  %v13586_v24 = vmax.f32 %v5155_v4, 0.0  ;;  %v5587_v17 = vld [vmem:[%s16352_s11 + $0xd20] sm:$0xff]  ;;  %v5241_v31 = vld [vmem:[%s16352_s11 + $0x250] sm:$0xff]  ;;  %v5582_v4 = vld [vmem:[%s16352_s11 + $0xcf8] sm:$0xff] }
 0x9d8   :  { %v5077_v38 = vpop.f32.mrf.mxu1  ;;  %5835 = vmatmul.mubr.f32.vlgmr.msra.gmra.mxu1 %v13563_v21  ;;  %v5236_v23 = vld [vmem:[%s16352_s11 + $0x228] sm:$0xff]  ;;  %v15374_v57 = vld [vmem:[%s16355_s12 + $0x130] sm:$0xff] }
 0x9d9   :  { %v5114_v11 = vmul.f32 %v5104_v20, %v13067_v35  ;;  %v5108_v46 = vrot.slane %v5077_v38, %v16743_v22  ;;  %5913 = vmatpush1.msra.mxu1 %v5641_v28  ;;  %v13581_v32 = vmax.f32 %v5156_v3, 0.0  ;;  %v5761_v35 = vld [vmem:[%s16352_s11 + $0x1290] sm:$0xff]  ;;  %v5235_v20 = vld [vmem:[%s16352_s11 + $0x220] sm:$0xff]  ;;  %v5230_v3 = vld [vmem:[%s16352_s11 + $0x1f8] sm:$0xff] }
 0x9da   :  { %5914 = vmatprep.subr.mxu1 %v5636_v12  ;;  %v9034_v45 = vpop.f32.mrf.mxu1  ;;  %v5581_v28 = vld [vmem:[%s16352_s11 + $0xcf0] sm:$0xff]  ;;  %v5576_v12 = vld [vmem:[%s16352_s11 + $0xcc8] sm:$0xff] }
 0x9db   :  { %v5115_v51 = vmul.f32 %v5108_v46, %v13091_v27  ;;  %5915 = vmatpush1.msra.mxu1 %v5635_v19  ;;  %5905 = vmatprep.mubr.f32.mxu0 %v13581_v32  ;;  %v5158_v2 = vadd.f32 %v5141_v29, %v5114_v11  ;;  %v5623_v27 = vld [vmem:[%s16352_s11 + $0xe40] sm:$0xff]  ;;  %v5229_v38 = vld [vmem:[%s16352_s11 + $0x1f0] sm:$0xff]  ;;  %v5570_v19 = vld [vmem:[%s16352_s11 + $0xc98] sm:$0xff] }
 0x9dc   :  { %5916 = vmatprep.subr.mxu1 %v5630_v56  ;;  %5906 = vmatmul.mubr.f32.vlgmr.msra.gmra.mxu0 %v13586_v24  ;;  %v5575_v29 = vld [vmem:[%s16352_s11 + $0xcc0] sm:$0xff]  ;;  %v5224_v11 = vld [vmem:[%s16352_s11 + $0x1c8] sm:$0xff]  ;;  %v5569_v46 = vld [vmem:[%s16352_s11 + $0xc90] sm:$0xff] }
 0x9dd   :  { %5917 = vmatpush1.msra.mxu1 %v5629_v39  ;;  %6008 = vmatpush1.msra.mxu0 %v5761_v35  ;;  %v13615_v49 = vmax.f32 %v5158_v2, 0.0  ;;  %v5159_v42 = vadd.f32 %v5145_v48, %v5115_v51  ;;  %v5223_v56 = vld [vmem:[%s16352_s11 + $0x1c0] sm:$0xff]  ;;  %v5564_v45 = vld [vmem:[%s16352_s11 + $0xc68] sm:$0xff]  ;;  %v5218_v39 = vld [vmem:[%s16352_s11 + $0x198] sm:$0xff] }
 0x9de   :  { %5918 = vmatprep.subr.mxu1 %v5624_v60  ;;  %6009 = vmatprep.subr.mxu0 %v5756_v47  ;;  %v5563_v35 = vld [vmem:[%s16352_s11 + $0xc60] sm:$0xff]  ;;  %v5217_v51 = vld [vmem:[%s16352_s11 + $0x190] sm:$0xff]  ;;  %v5552_v47 = vld [vmem:[%s16352_s11 + $0xc08] sm:$0xff] }
 0x9df   :  { %5919 = vmatpush1.msra.mxu1 %v5623_v27  ;;  %6010 = vmatpush1.msra.mxu0 %v5755_v5  ;;  %v13642_v6 = vmax.f32 %v5159_v42, 0.0  ;;  %v5557_v48 = vld [vmem:[%s16352_s11 + $0xc30] sm:$0xff]  ;;  %v5211_v60 = vld [vmem:[%s16352_s11 + $0x160] sm:$0xff]  ;;  %v5206_v2 = vld [vmem:[%s16352_s11 + $0x138] sm:$0xff] }
 0x9e0   :  { %5920 = vmatprep.subr.mxu1 %v5618_v9  ;;  %5976 = vmatprep.mubr.f32.mxu1 %v13615_v49  ;;  %v5551_v27 = vld [vmem:[%s16352_s11 + $0xc00] sm:$0xff]  ;;  %v5205_v5 = vld [vmem:[%s16352_s11 + $0x130] sm:$0xff]  ;;  %v5738_v9 = vld [vmem:[%s16352_s11 + $0x11d8] sm:$0xff] }
 0x9e1   :  { %6011 = vmatprep.subr.mxu0 %v5750_v36  ;;  %5921 = vmatpush1.msra.mxu1 %v5617_v54  ;;  %v5200_v36 = vld [vmem:[%s16352_s11 + $0x108] sm:$0xff]  ;;  %v5737_v54 = vld [vmem:[%s16352_s11 + $0x11d0] sm:$0xff]  ;;  %v5199_v42 = vld [vmem:[%s16352_s11 + $0x100] sm:$0xff] }
 0x9e2   :  { %6012 = vmatpush1.msra.mxu0 %v5749_v50  ;;  %5922 = vmatprep.subr.mxu1 %v5612_v30  ;;  %v5732_v50 = vld [vmem:[%s16352_s11 + $0x11a8] sm:$0xff]  ;;  %v5194_v30 = vld [vmem:[%s16352_s11 + $0xd8] sm:$0xff] }
 0x9e3   :  { %6013 = vmatprep.subr.mxu0 %v5744_v52  ;;  %5923 = vmatpush1.msra.mxu1 %v5611_v63  ;;  %v5731_v52 = vld [vmem:[%s16352_s11 + $0x11a0] sm:$0xff]  ;;  %v5193_v63 = vld [vmem:[%s16352_s11 + $0xd0] sm:$0xff] }
 0x9e4   :  { %6014 = vmatpush1.msra.mxu0 %v5743_v41  ;;  %6047 = vmatprep.mubr.f32.mxu0 %v16570_v10  ;;  %v5726_v41 = vld [vmem:[%s16352_s11 + $0x1178] sm:$0xff] }
 0x9e5   :  { %5924 = vmatprep.subr.mxu1 %v5606_v1  ;;  %8235 = vmatmul.mubr.msk.f32.vlgmr.msra.gmra.mxu0 %vm3836_vm6, %v13642_v6  ;;  %v5188_v1 = vld [vmem:[%s16352_s11 + $0xa8] sm:$0xff] }
 0x9e6   :  { %6054 = vmatprep.subr.mxu0 %v5260_v18  ;;  %5925 = vmatpush1.msra.mxu1 %v5605_v13  ;;  %v5725_v18 = vld [vmem:[%s16352_s11 + $0x1170] sm:$0xff]  ;;  %v5187_v13 = vld [vmem:[%s16352_s11 + $0xa0] sm:$0xff] }
 0x9e7   :  { %6055 = vmatpush1.msra.mxu0 %v5259_v43  ;;  %6118 = vmatprep.mubr.f32.mxu0 %v13561_v14  ;;  %v5720_v43 = vld [vmem:[%s16352_s11 + $0x1148] sm:$0xff] }
 0x9e8   :  { %5926 = vmatprep.subr.mxu1 %v5600_v58  ;;  %6056 = vmatprep.subr.mxu0 %v5254_v7  ;;  %v5182_v58 = vld [vmem:[%s16352_s11 + $0x78] sm:$0xff]  ;;  %v5719_v7 = vld [vmem:[%s16352_s11 + $0x1140] sm:$0xff] }
 0x9e9   :  { %5927 = vmatpush1.msra.mxu1 %v5599_v34  ;;  %6057 = vmatpush1.msra.mxu0 %v5253_v40  ;;  %v5181_v34 = vld [vmem:[%s16352_s11 + $0x70] sm:$0xff]  ;;  %v5714_v40 = vld [vmem:[%s16352_s11 + $0x1118] sm:$0xff] }
 0x9ea   :  { %5928 = vmatprep.subr.mxu1 %v5594_v26  ;;  %6058 = vmatprep.subr.mxu0 %v5248_v0  ;;  %v5176_v26 = vld [vmem:[%s16352_s11 + $0x48] sm:$0xff]  ;;  %v5713_v0 = vld [vmem:[%s16352_s11 + $0x1110] sm:$0xff] }
 0x9eb   :  { %5929 = vmatpush1.msra.mxu1 %v5593_v15  ;;  %6059 = vmatpush1.msra.mxu0 %v5247_v37  ;;  %v5175_v15 = vld [vmem:[%s16352_s11 + $0x40] sm:$0xff]  ;;  %v5708_v37 = vld [vmem:[%s16352_s11 + $0x10e8] sm:$0xff] }
 0x9ec   :  { %5930 = vmatprep.subr.mxu1 %v5588_v8  ;;  %6060 = vmatprep.subr.mxu0 %v5242_v62  ;;  %v5170_v8 = vld [vmem:[%s16352_s11 + $0x18] sm:$0xff]  ;;  %v5707_v62 = vld [vmem:[%s16352_s11 + $0x10e0] sm:$0xff] }
 0x9ed   :  { %5931 = vmatpush1.msra.mxu1 %v5587_v17  ;;  %6061 = vmatpush1.msra.mxu0 %v5241_v31  ;;  %v5169_v17 = vld [vmem:[%s16352_s11 + $0x10] sm:$0xff]  ;;  %v5702_v31 = vld [vmem:[%s16352_s11 + $0x10b8] sm:$0xff] }
 0x9ee   :  { %5932 = vmatprep.subr.mxu1 %v5582_v4  ;;  %6062 = vmatprep.subr.mxu0 %v5236_v23  ;;  %v5356_v4 = vld [vmem:[%s16352_s11 + $0x5e8] sm:$0xff]  ;;  %v5701_v23 = vld [vmem:[%s16352_s11 + $0x10b0] sm:$0xff] }
 0x9ef   :  { %5933 = vmatpush1.msra.mxu1 %v5581_v28  ;;  %6063 = vmatpush1.msra.mxu0 %v5235_v20  ;;  %v5355_v28 = vld [vmem:[%s16352_s11 + $0x5e0] sm:$0xff]  ;;  %v5696_v20 = vld [vmem:[%s16352_s11 + $0x1088] sm:$0xff] }
 0x9f0   :  { %5934 = vmatprep.subr.mxu1 %v5576_v12  ;;  %6064 = vmatprep.subr.mxu0 %v5230_v3  ;;  %v5350_v12 = vld [vmem:[%s16352_s11 + $0x5b8] sm:$0xff]  ;;  %v5695_v3 = vld [vmem:[%s16352_s11 + $0x1080] sm:$0xff] }
 0x9f1   :  { %5935 = vmatpush1.msra.mxu1 %v5575_v29  ;;  %6065 = vmatpush1.msra.mxu0 %v5229_v38  ;;  %v5349_v29 = vld [vmem:[%s16352_s11 + $0x5b0] sm:$0xff]  ;;  %v5690_v38 = vld [vmem:[%s16352_s11 + $0x1058] sm:$0xff] }
 0x9f2   :  { %5936 = vmatprep.subr.mxu1 %v5570_v19  ;;  %6066 = vmatprep.subr.mxu0 %v5224_v11  ;;  %v5344_v19 = vld [vmem:[%s16352_s11 + $0x588] sm:$0xff]  ;;  %v5689_v11 = vld [vmem:[%s16352_s11 + $0x1050] sm:$0xff] }
 0x9f3   :  { %5937 = vmatpush1.msra.mxu1 %v5569_v46  ;;  %6067 = vmatpush1.msra.mxu0 %v5223_v56  ;;  %v5343_v46 = vld [vmem:[%s16352_s11 + $0x580] sm:$0xff]  ;;  %v5684_v56 = vld [vmem:[%s16352_s11 + $0x1028] sm:$0xff] }
 0x9f4   :  { %5938 = vmatprep.subr.mxu1 %v5564_v45  ;;  %6068 = vmatprep.subr.mxu0 %v5218_v39  ;;  %v5338_v45 = vld [vmem:[%s16352_s11 + $0x558] sm:$0xff]  ;;  %v5683_v39 = vld [vmem:[%s16352_s11 + $0x1020] sm:$0xff] }
 0x9f5   :  { %5939 = vmatpush1.msra.mxu1 %v5563_v35  ;;  %6069 = vmatpush1.msra.mxu0 %v5217_v51  ;;  %v5337_v35 = vld [vmem:[%s16352_s11 + $0x550] sm:$0xff]  ;;  %v5678_v51 = vld [vmem:[%s16352_s11 + $0xff8] sm:$0xff] }
 0x9f6   :  { %5940 = vmatprep.subr.mxu1 %v5558_v16  ;;  %6070 = vmatprep.subr.mxu0 %v5212_v55  ;;  %v5332_v16 = vld [vmem:[%s16352_s11 + $0x528] sm:$0xff]  ;;  %v5100_v55 = vrot.slane %v13558_v33, %v16743_v22  ;;  %v5326_v33 = vld [vmem:[%s16352_s11 + $0x4f8] sm:$0xff]  ;;  %v15456_v22 = vld [vmem:[%s16355_s12 + $0x230] sm:$0xff] }
 0x9f7   :  { %5941 = vmatpush1.msra.mxu1 %v5557_v48  ;;  %6071 = vmatpush1.msra.mxu0 %v5211_v60  ;;  %v5677_v48 = vld [vmem:[%s16352_s11 + $0xff0] sm:$0xff]  ;;  %v5331_v60 = vld [vmem:[%s16352_s11 + $0x520] sm:$0xff]  ;;  %16822 = vst [vmem:[#allocation72_spill] sm:$0xff] %v15456_v22 }
 0x9f8   :  { %5942 = vmatprep.subr.mxu1 %v5552_v47  ;;  %6072 = vmatprep.subr.mxu0 %v5206_v2  ;;  %v5672_v47 = vld [vmem:[%s16352_s11 + $0xfc8] sm:$0xff]  ;;  %v5671_v2 = vld [vmem:[%s16352_s11 + $0xfc0] sm:$0xff] }
 0x9f9   :  { %5943 = vmatpush1.msra.mxu1 %v5551_v27  ;;  %6073 = vmatpush1.msra.mxu0 %v5205_v5  ;;  %v5325_v27 = vld [vmem:[%s16352_s11 + $0x4f0] sm:$0xff]  ;;  %v5666_v5 = vld [vmem:[%s16352_s11 + $0xf98] sm:$0xff] }
 0x9fa   :  { %5944 = vmatprep.subr.mxu1 %v5738_v9  ;;  %6074 = vmatprep.subr.mxu0 %v5200_v36  ;;  %v5320_v9 = vld [vmem:[%s16352_s11 + $0x4c8] sm:$0xff]  ;;  %v5113_v36 = vmul.f32 %v5100_v55, %v13074_v25  ;;  %v5314_v25 = vld [vmem:[%s16352_s11 + $0x498] sm:$0xff] }
 0x9fb   :  { %5945 = vmatpush2.msra.mxu1 %v5737_v54  ;;  %6075 = vmatpush1.msra.mxu0 %v5199_v42  ;;  %v16792_v54 = vld [vmem:[#allocation14_spill] sm:$0xff]  ;;  %v5416_v55 = vld [vmem:[%s16352_s11 + $0x7c8] sm:$0xff] }
 0x9fc   :  { %5946 = vmatprep.subr.mxu1 %v5732_v50  ;;  %6076 = vmatprep.subr.mxu0 %v5194_v30  ;;  %v5137_v42 = vrot.slane %v13541_v61, %v16792_v54  ;;  %v5665_v50 = vld [vmem:[%s16352_s11 + $0xf90] sm:$0xff]  ;;  %v5319_v30 = vld [vmem:[%s16352_s11 + $0x4c0] sm:$0xff] }
 0x9fd   :  { %5947 = vmatpush2.msra.mxu1 %v5731_v52  ;;  %6077 = vmatpush1.msra.mxu0 %v5193_v63  ;;  %v5660_v52 = vld [vmem:[%s16352_s11 + $0xf68] sm:$0xff]  ;;  %v5659_v61 = vld [vmem:[%s16352_s11 + $0xf60] sm:$0xff]  ;;  %v5313_v63 = vld [vmem:[%s16352_s11 + $0x490] sm:$0xff] }
 0x9fe   :  { %5948 = vmatprep.subr.mxu1 %v5726_v41  ;;  %6078 = vmatprep.subr.mxu0 %v5188_v1  ;;  %v5654_v41 = vld [vmem:[%s16352_s11 + $0xf38] sm:$0xff]  ;;  %v5308_v1 = vld [vmem:[%s16352_s11 + $0x468] sm:$0xff]  ;;  %v15367_v54 = vld [vmem:[%s16355_s12 + $0x1b0] sm:$0xff] }
 0x9ff   :  { %5949 = vmatpush2.msra.mxu1 %v5725_v18  ;;  %6079 = vmatpush1.msra.mxu0 %v5187_v13  ;;  %v5157_v18 = vadd.f32 %v5137_v42, %v5113_v36  ;;  %v5653_v13 = vld [vmem:[%s16352_s11 + $0xf30] sm:$0xff]  ;;  %v5632_v36 = vld [vmem:[%s16352_s11 + $0xe88] sm:$0xff]  ;;  %v5403_v42 = vld [vmem:[%s16352_s11 + $0x760] sm:$0xff] }
 0xa00   :  { %5950 = vmatprep.subr.mxu1 %v5720_v43  ;;  %6080 = vmatprep.subr.mxu0 %v5182_v58  ;;  %v5307_v43 = vld [vmem:[%s16352_s11 + $0x460] sm:$0xff]  ;;  %v5648_v58 = vld [vmem:[%s16352_s11 + $0xf08] sm:$0xff] }
 0xa01   :  { %5951 = vmatpush2.msra.mxu1 %v5719_v7  ;;  %6081 = vmatpush1.msra.mxu0 %v5181_v34  ;;  %v5302_v7 = vld [vmem:[%s16352_s11 + $0x438] sm:$0xff]  ;;  %v5647_v34 = vld [vmem:[%s16352_s11 + $0xf00] sm:$0xff] }
 0xa02   :  { %5952 = vmatprep.subr.mxu1 %v5714_v40  ;;  %6082 = vmatprep.subr.mxu0 %v5176_v26  ;;  %v5301_v40 = vld [vmem:[%s16352_s11 + $0x430] sm:$0xff]  ;;  %v5296_v26 = vld [vmem:[%s16352_s11 + $0x408] sm:$0xff] }
 0xa03   :  { %5953 = vmatpush2.msra.mxu1 %v5713_v0  ;;  %6083 = vmatpush1.msra.mxu0 %v5175_v15  ;;  %v13965_v0 = vmax.f32 %v5157_v18, 0.0  ;;  %v5452_v15 = vld [vmem:[%s16352_s11 + $0x8e8] sm:$0xff]  ;;  %v5619_v18 = vld [vmem:[%s16352_s11 + $0xe20] sm:$0xff] }
 0xa04   :  { %5954 = vmatprep.subr.mxu1 %v5708_v37  ;;  %6084 = vmatprep.subr.mxu0 %v5170_v8  ;;  %v5295_v37 = vld [vmem:[%s16352_s11 + $0x400] sm:$0xff] }
 0xa05   :  { %5955 = vmatpush2.msra.mxu1 %v5707_v62  ;;  %6085 = vmatpush1.msra.mxu0 %v5169_v17  ;;  %v5451_v8 = vld [vmem:[%s16352_s11 + $0x8e0] sm:$0xff]  ;;  %v5290_v62 = vld [vmem:[%s16352_s11 + $0x3d8] sm:$0xff] }
 0xa06   :  { %5956 = vmatprep.subr.mxu1 %v5702_v31  ;;  %6086 = vmatprep.subr.mxu0 %v5356_v4  ;;  %v5446_v17 = vld [vmem:[%s16352_s11 + $0x8b8] sm:$0xff]  ;;  %v5289_v31 = vld [vmem:[%s16352_s11 + $0x3d0] sm:$0xff] }
 0xa07   :  { %5957 = vmatpush2.msra.mxu1 %v5701_v23  ;;  %6087 = vmatpush2.msra.mxu0 %v5355_v28  ;;  %v5445_v4 = vld [vmem:[%s16352_s11 + $0x8b0] sm:$0xff]  ;;  %v5284_v23 = vld [vmem:[%s16352_s11 + $0x3a8] sm:$0xff] }
 0xa08   :  { %5958 = vmatprep.subr.mxu1 %v5696_v20  ;;  %6088 = vmatprep.subr.mxu0 %v5350_v12  ;;  %v5440_v28 = vld [vmem:[%s16352_s11 + $0x888] sm:$0xff]  ;;  %v5283_v20 = vld [vmem:[%s16352_s11 + $0x3a0] sm:$0xff] }
 0xa09   :  { %5959 = vmatpush2.msra.mxu1 %v5695_v3  ;;  %6089 = vmatpush2.msra.mxu0 %v5349_v29  ;;  %v5439_v12 = vld [vmem:[%s16352_s11 + $0x880] sm:$0xff]  ;;  %v5278_v3 = vld [vmem:[%s16352_s11 + $0x378] sm:$0xff] }
 0xa0a   :  { %5960 = vmatprep.subr.mxu1 %v5690_v38  ;;  %6090 = vmatprep.subr.mxu0 %v5344_v19  ;;  %v5434_v29 = vld [vmem:[%s16352_s11 + $0x858] sm:$0xff]  ;;  %v5277_v38 = vld [vmem:[%s16352_s11 + $0x370] sm:$0xff] }
 0xa0b   :  { %5961 = vmatpush2.msra.mxu1 %v5689_v11  ;;  %6091 = vmatpush2.msra.mxu0 %v5343_v46  ;;  %v5433_v19 = vld [vmem:[%s16352_s11 + $0x850] sm:$0xff]  ;;  %v5272_v11 = vld [vmem:[%s16352_s11 + $0x348] sm:$0xff] }
 0xa0c   :  { %5962 = vmatprep.subr.mxu1 %v5684_v56  ;;  %6092 = vmatprep.subr.mxu0 %v5338_v45  ;;  %v5428_v46 = vld [vmem:[%s16352_s11 + $0x828] sm:$0xff]  ;;  %v5271_v56 = vld [vmem:[%s16352_s11 + $0x340] sm:$0xff] }
 0xa0d   :  { %5963 = vmatpush2.msra.mxu1 %v5683_v39  ;;  %6093 = vmatpush2.msra.mxu0 %v5337_v35  ;;  %v5427_v45 = vld [vmem:[%s16352_s11 + $0x820] sm:$0xff]  ;;  %v5266_v39 = vld [vmem:[%s16352_s11 + $0x318] sm:$0xff] }
 0xa0e   :  { %5964 = vmatprep.subr.mxu1 %v5678_v51  ;;  %6094 = vmatprep.subr.mxu0 %v5332_v16  ;;  %v5422_v35 = vld [vmem:[%s16352_s11 + $0x7f8] sm:$0xff]  ;;  %v5265_v51 = vld [vmem:[%s16352_s11 + $0x310] sm:$0xff] }
 0xa0f   :  { %5965 = vmatpush2.msra.mxu1 %v5677_v48  ;;  %6095 = vmatpush2.msra.mxu0 %v5331_v60  ;;  %v5421_v16 = vld [vmem:[%s16352_s11 + $0x7f0] sm:$0xff]  ;;  %v5644_v48 = vld [vmem:[%s16352_s11 + $0xee8] sm:$0xff]  ;;  %v5415_v60 = vld [vmem:[%s16352_s11 + $0x7c0] sm:$0xff] }
 0xa10   :  { %5966 = vmatprep.subr.mxu1 %v5672_v47  ;;  %6096 = vmatprep.subr.mxu0 %v5326_v33  ;;  %v5643_v47 = vld [vmem:[%s16352_s11 + $0xee0] sm:$0xff]  ;;  %v5410_v33 = vld [vmem:[%s16352_s11 + $0x798] sm:$0xff] }
 0xa11   :  { %5967 = vmatpush2.msra.mxu1 %v5671_v2  ;;  %6097 = vmatpush2.msra.mxu0 %v5325_v27  ;;  %v5638_v2 = vld [vmem:[%s16352_s11 + $0xeb8] sm:$0xff]  ;;  %v5409_v27 = vld [vmem:[%s16352_s11 + $0x790] sm:$0xff] }
 0xa12   :  { %5968 = vmatprep.subr.mxu1 %v5666_v5  ;;  %6098 = vmatprep.subr.mxu0 %v5320_v9  ;;  %v5637_v5 = vld [vmem:[%s16352_s11 + $0xeb0] sm:$0xff]  ;;  %v5404_v9 = vld [vmem:[%s16352_s11 + $0x768] sm:$0xff] }
 0xa13   :  { %5969 = vmatpush2.msra.mxu1 %v5665_v50  ;;  %6099 = vmatpush2.msra.mxu0 %v5319_v30  ;;  %v5631_v50 = vld [vmem:[%s16352_s11 + $0xe80] sm:$0xff]  ;;  %v5398_v30 = vld [vmem:[%s16352_s11 + $0x738] sm:$0xff] }
 0xa14   :  { %5970 = vmatprep.subr.mxu1 %v5660_v52  ;;  %6100 = vmatprep.subr.mxu0 %v5314_v25  ;;  %v5626_v52 = vld [vmem:[%s16352_s11 + $0xe58] sm:$0xff]  ;;  %v5397_v25 = vld [vmem:[%s16352_s11 + $0x730] sm:$0xff] }
 0xa15   :  { %5971 = vmatpush2.msra.mxu1 %v5659_v61  ;;  %6101 = vmatpush2.msra.mxu0 %v5313_v63  ;;  %v5625_v61 = vld [vmem:[%s16352_s11 + $0xe50] sm:$0xff]  ;;  %v5392_v63 = vld [vmem:[%s16352_s11 + $0x708] sm:$0xff] }
 0xa16   :  { %5972 = vmatprep.subr.mxu1 %v5654_v41  ;;  %6102 = vmatprep.subr.mxu0 %v5308_v1  ;;  %v5620_v41 = vld [vmem:[%s16352_s11 + $0xe28] sm:$0xff]  ;;  %v5391_v1 = vld [vmem:[%s16352_s11 + $0x700] sm:$0xff] }
 0xa17   :  { %5973 = vmatpush2.msra.mxu1 %v5653_v13  ;;  %6103 = vmatpush2.msra.mxu0 %v5307_v43  ;;  %v5386_v13 = vld [vmem:[%s16352_s11 + $0x6d8] sm:$0xff] }
 0xa18   :  { %5974 = vmatprep.subr.mxu1 %v5648_v58  ;;  %6104 = vmatprep.subr.mxu0 %v5302_v7  ;;  %v5614_v43 = vld [vmem:[%s16352_s11 + $0xdf8] sm:$0xff]  ;;  %v5385_v58 = vld [vmem:[%s16352_s11 + $0x6d0] sm:$0xff] }
 0xa19   :  { %5975 = vmatpush2.msra.mxu1 %v5647_v34  ;;  %6105 = vmatpush2.msra.mxu0 %v5301_v40  ;;  %v5613_v7 = vld [vmem:[%s16352_s11 + $0xdf0] sm:$0xff]  ;;  %v5380_v34 = vld [vmem:[%s16352_s11 + $0x6a8] sm:$0xff] }
 0xa1a   :  { %5977 = vmatmul.mubr.f32.vlgmr.msra.gmra.mxu1 %v13965_v0  ;;  %6106 = vmatprep.subr.mxu0 %v5296_v26  ;;  %v5608_v40 = vld [vmem:[%s16352_s11 + $0xdc8] sm:$0xff]  ;;  %v5379_v26 = vld [vmem:[%s16352_s11 + $0x6a0] sm:$0xff] }
 0xa1b   :  { %6125 = vmatprep.subr.mxu1 %v5452_v15  ;;  %6107 = vmatpush2.msra.mxu0 %v5295_v37  ;;  %v5607_v15 = vld [vmem:[%s16352_s11 + $0xdc0] sm:$0xff]  ;;  %v5374_v37 = vld [vmem:[%s16352_s11 + $0x678] sm:$0xff] }
 0xa1c   :  { %6126 = vmatpush1.msra.mxu1 %v5451_v8  ;;  %6189 = vmatprep.mubr.f32.mxu1 %v13581_v32  ;;  %v5602_v8 = vld [vmem:[%s16352_s11 + $0xd98] sm:$0xff] }
 0xa1d   :  { %6108 = vmatprep.subr.mxu0 %v5290_v62  ;;  %6127 = vmatprep.subr.mxu1 %v5446_v17  ;;  %v5373_v62 = vld [vmem:[%s16352_s11 + $0x670] sm:$0xff] }
 0xa1e   :  { %6109 = vmatpush2.msra.mxu0 %v5289_v31  ;;  %6128 = vmatpush1.msra.mxu1 %v5445_v4  ;;  %v5601_v17 = vld [vmem:[%s16352_s11 + $0xd90] sm:$0xff]  ;;  %v5368_v31 = vld [vmem:[%s16352_s11 + $0x648] sm:$0xff] }
 0xa1f   :  { %6110 = vmatprep.subr.mxu0 %v5284_v23  ;;  %6129 = vmatprep.subr.mxu1 %v5440_v28  ;;  %v5596_v4 = vld [vmem:[%s16352_s11 + $0xd68] sm:$0xff]  ;;  %v5367_v23 = vld [vmem:[%s16352_s11 + $0x640] sm:$0xff] }
 0xa20   :  { %6111 = vmatpush2.msra.mxu0 %v5283_v20  ;;  %6130 = vmatpush1.msra.mxu1 %v5439_v12  ;;  %v5595_v28 = vld [vmem:[%s16352_s11 + $0xd60] sm:$0xff]  ;;  %v5362_v20 = vld [vmem:[%s16352_s11 + $0x618] sm:$0xff] }
 0xa21   :  { %6112 = vmatprep.subr.mxu0 %v5278_v3  ;;  %6131 = vmatprep.subr.mxu1 %v5434_v29  ;;  %v5590_v12 = vld [vmem:[%s16352_s11 + $0xd38] sm:$0xff]  ;;  %v5361_v3 = vld [vmem:[%s16352_s11 + $0x610] sm:$0xff] }
 0xa22   :  { %6113 = vmatpush2.msra.mxu0 %v5277_v38  ;;  %6132 = vmatpush1.msra.mxu1 %v5433_v19  ;;  %v5589_v29 = vld [vmem:[%s16352_s11 + $0xd30] sm:$0xff]  ;;  %v5548_v38 = vld [vmem:[%s16352_s11 + $0xbe8] sm:$0xff] }
 0xa23   :  { %6114 = vmatprep.subr.mxu0 %v5272_v11  ;;  %6133 = vmatprep.subr.mxu1 %v5428_v46  ;;  %v5584_v19 = vld [vmem:[%s16352_s11 + $0xd08] sm:$0xff]  ;;  %v5547_v11 = vld [vmem:[%s16352_s11 + $0xbe0] sm:$0xff] }
 0xa24   :  { %6115 = vmatpush2.msra.mxu0 %v5271_v56  ;;  %6134 = vmatpush1.msra.mxu1 %v5427_v45  ;;  %v5583_v46 = vld [vmem:[%s16352_s11 + $0xd00] sm:$0xff]  ;;  %v5542_v56 = vld [vmem:[%s16352_s11 + $0xbb8] sm:$0xff] }
 0xa25   :  { %6116 = vmatprep.subr.mxu0 %v5266_v39  ;;  %6135 = vmatprep.subr.mxu1 %v5422_v35  ;;  %v5578_v45 = vld [vmem:[%s16352_s11 + $0xcd8] sm:$0xff]  ;;  %v5541_v39 = vld [vmem:[%s16352_s11 + $0xbb0] sm:$0xff] }
 0xa26   :  { %6117 = vmatpush2.msra.mxu0 %v5265_v51  ;;  %6136 = vmatpush1.msra.mxu1 %v5421_v16  ;;  %v5577_v35 = vld [vmem:[%s16352_s11 + $0xcd0] sm:$0xff]  ;;  %v5536_v51 = vld [vmem:[%s16352_s11 + $0xb88] sm:$0xff] }
 0xa27   :  { %6119 = vmatmul.mubr.f32.vlgmr.msra.gmra.mxu0 %v13563_v21  ;;  %6137 = vmatprep.subr.mxu1 %v5416_v55  ;;  %v5572_v16 = vld [vmem:[%s16352_s11 + $0xca8] sm:$0xff]  ;;  %v5535_v55 = vld [vmem:[%s16352_s11 + $0xb80] sm:$0xff] }
 0xa28   :  { %6196 = vmatprep.subr.mxu0 %v5644_v48  ;;  %6138 = vmatpush1.msra.mxu1 %v5415_v60  ;;  %v5571_v48 = vld [vmem:[%s16352_s11 + $0xca0] sm:$0xff]  ;;  %v5530_v60 = vld [vmem:[%s16352_s11 + $0xb58] sm:$0xff] }
 0xa29   :  { %6197 = vmatpush1.msra.mxu0 %v5643_v47  ;;  %6260 = vmatprep.mubr.f32.mxu0 %v13615_v49  ;;  %v5566_v47 = vld [vmem:[%s16352_s11 + $0xc78] sm:$0xff] }
 0xa2a   :  { %6139 = vmatprep.subr.mxu1 %v5410_v33  ;;  %6198 = vmatprep.subr.mxu0 %v5638_v2  ;;  %v5529_v33 = vld [vmem:[%s16352_s11 + $0xb50] sm:$0xff] }
 0xa2b   :  { %6140 = vmatpush1.msra.mxu1 %v5409_v27  ;;  %6199 = vmatpush1.msra.mxu0 %v5637_v5  ;;  %v5565_v2 = vld [vmem:[%s16352_s11 + $0xc70] sm:$0xff]  ;;  %v5524_v27 = vld [vmem:[%s16352_s11 + $0xb28] sm:$0xff] }
 0xa2c   :  { %6141 = vmatprep.subr.mxu1 %v5404_v9  ;;  %6200 = vmatprep.subr.mxu0 %v5632_v36  ;;  %v5560_v5 = vld [vmem:[%s16352_s11 + $0xc48] sm:$0xff]  ;;  %v5523_v9 = vld [vmem:[%s16352_s11 + $0xb20] sm:$0xff] }
 0xa2d   :  { %6142 = vmatpush1.msra.mxu1 %v5403_v42  ;;  %6201 = vmatpush1.msra.mxu0 %v5631_v50  ;;  %v5559_v36 = vld [vmem:[%s16352_s11 + $0xc40] sm:$0xff]  ;;  %v5518_v42 = vld [vmem:[%s16352_s11 + $0xaf8] sm:$0xff] }
 0xa2e   :  { %6143 = vmatprep.subr.mxu1 %v5398_v30  ;;  %6202 = vmatprep.subr.mxu0 %v5626_v52  ;;  %v5554_v50 = vld [vmem:[%s16352_s11 + $0xc18] sm:$0xff]  ;;  %v5517_v30 = vld [vmem:[%s16352_s11 + $0xaf0] sm:$0xff] }
 0xa2f   :  { %6144 = vmatpush1.msra.mxu1 %v5397_v25  ;;  %6203 = vmatpush1.msra.mxu0 %v5625_v61  ;;  %v5553_v52 = vld [vmem:[%s16352_s11 + $0xc10] sm:$0xff]  ;;  %v5512_v25 = vld [vmem:[%s16352_s11 + $0xac8] sm:$0xff] }
 0xa30   :  { %6145 = vmatprep.subr.mxu1 %v5392_v63  ;;  %6204 = vmatprep.subr.mxu0 %v5620_v41  ;;  %v5740_v61 = vld [vmem:[%s16352_s11 + $0x11e8] sm:$0xff]  ;;  %v5511_v63 = vld [vmem:[%s16352_s11 + $0xac0] sm:$0xff] }
 0xa31   :  { %6146 = vmatpush1.msra.mxu1 %v5391_v1  ;;  %6205 = vmatpush1.msra.mxu0 %v5619_v18  ;;  %v5739_v41 = vld [vmem:[%s16352_s11 + $0x11e0] sm:$0xff]  ;;  %v5506_v1 = vld [vmem:[%s16352_s11 + $0xa98] sm:$0xff] }
 0xa32   :  { %6147 = vmatprep.subr.mxu1 %v5386_v13  ;;  %6206 = vmatprep.subr.mxu0 %v5614_v43  ;;  %v5734_v18 = vld [vmem:[%s16352_s11 + $0x11b8] sm:$0xff]  ;;  %v5505_v13 = vld [vmem:[%s16352_s11 + $0xa90] sm:$0xff] }
 0xa33   :  { %6148 = vmatpush1.msra.mxu1 %v5385_v58  ;;  %6207 = vmatpush1.msra.mxu0 %v5613_v7  ;;  %v5733_v43 = vld [vmem:[%s16352_s11 + $0x11b0] sm:$0xff]  ;;  %v5500_v58 = vld [vmem:[%s16352_s11 + $0xa68] sm:$0xff] }
 0xa34   :  { %6149 = vmatprep.subr.mxu1 %v5380_v34  ;;  %6208 = vmatprep.subr.mxu0 %v5608_v40  ;;  %v5728_v7 = vld [vmem:[%s16352_s11 + $0x1188] sm:$0xff]  ;;  %v5499_v34 = vld [vmem:[%s16352_s11 + $0xa60] sm:$0xff] }
 0xa35   :  { %6150 = vmatpush1.msra.mxu1 %v5379_v26  ;;  %6209 = vmatpush1.msra.mxu0 %v5607_v15  ;;  %v5727_v40 = vld [vmem:[%s16352_s11 + $0x1180] sm:$0xff]  ;;  %v5494_v26 = vld [vmem:[%s16352_s11 + $0xa38] sm:$0xff] }
 0xa36   :  { %6151 = vmatprep.subr.mxu1 %v5374_v37  ;;  %6210 = vmatprep.subr.mxu0 %v5602_v8  ;;  %v5722_v15 = vld [vmem:[%s16352_s11 + $0x1158] sm:$0xff]  ;;  %v5493_v37 = vld [vmem:[%s16352_s11 + $0xa30] sm:$0xff] }
 0xa37   :  { %6152 = vmatpush1.msra.mxu1 %v5373_v62  ;;  %6211 = vmatpush1.msra.mxu0 %v5601_v17  ;;  %v5721_v8 = vld [vmem:[%s16352_s11 + $0x1150] sm:$0xff]  ;;  %v5488_v62 = vld [vmem:[%s16352_s11 + $0xa08] sm:$0xff] }
 0xa38   :  { %6153 = vmatprep.subr.mxu1 %v5368_v31  ;;  %6212 = vmatprep.subr.mxu0 %v5596_v4  ;;  %v5716_v17 = vld [vmem:[%s16352_s11 + $0x1128] sm:$0xff]  ;;  %v5487_v31 = vld [vmem:[%s16352_s11 + $0xa00] sm:$0xff] }
 0xa39   :  { %6154 = vmatpush1.msra.mxu1 %v5367_v23  ;;  %6213 = vmatpush1.msra.mxu0 %v5595_v28  ;;  %v5715_v4 = vld [vmem:[%s16352_s11 + $0x1120] sm:$0xff]  ;;  %v5482_v23 = vld [vmem:[%s16352_s11 + $0x9d8] sm:$0xff] }
 0xa3a   :  { %6155 = vmatprep.subr.mxu1 %v5362_v20  ;;  %6214 = vmatprep.subr.mxu0 %v5590_v12  ;;  %v5710_v28 = vld [vmem:[%s16352_s11 + $0x10f8] sm:$0xff]  ;;  %v5481_v20 = vld [vmem:[%s16352_s11 + $0x9d0] sm:$0xff] }
 0xa3b   :  { %6156 = vmatpush1.msra.mxu1 %v5361_v3  ;;  %6215 = vmatpush1.msra.mxu0 %v5589_v29  ;;  %v5709_v12 = vld [vmem:[%s16352_s11 + $0x10f0] sm:$0xff]  ;;  %v5476_v3 = vld [vmem:[%s16352_s11 + $0x9a8] sm:$0xff] }
 0xa3c   :  { %6157 = vmatprep.subr.mxu1 %v5548_v38  ;;  %6216 = vmatprep.subr.mxu0 %v5584_v19  ;;  %v5704_v29 = vld [vmem:[%s16352_s11 + $0x10c8] sm:$0xff]  ;;  %v5475_v38 = vld [vmem:[%s16352_s11 + $0x9a0] sm:$0xff] }
 0xa3d   :  { %6158 = vmatpush2.msra.mxu1 %v5547_v11  ;;  %6217 = vmatpush1.msra.mxu0 %v5583_v46  ;;  %v5703_v19 = vld [vmem:[%s16352_s11 + $0x10c0] sm:$0xff]  ;;  %v5470_v11 = vld [vmem:[%s16352_s11 + $0x978] sm:$0xff] }
 0xa3e   :  { %6159 = vmatprep.subr.mxu1 %v5542_v56  ;;  %6218 = vmatprep.subr.mxu0 %v5578_v45  ;;  %v5698_v46 = vld [vmem:[%s16352_s11 + $0x1098] sm:$0xff]  ;;  %v5469_v56 = vld [vmem:[%s16352_s11 + $0x970] sm:$0xff] }
 0xa3f   :  { %6160 = vmatpush2.msra.mxu1 %v5541_v39  ;;  %6219 = vmatpush1.msra.mxu0 %v5577_v35  ;;  %v5697_v45 = vld [vmem:[%s16352_s11 + $0x1090] sm:$0xff]  ;;  %v5464_v39 = vld [vmem:[%s16352_s11 + $0x948] sm:$0xff] }
 0xa40   :  { %6161 = vmatprep.subr.mxu1 %v5536_v51  ;;  %6220 = vmatprep.subr.mxu0 %v5572_v16  ;;  %v5692_v35 = vld [vmem:[%s16352_s11 + $0x1068] sm:$0xff]  ;;  %v5463_v51 = vld [vmem:[%s16352_s11 + $0x940] sm:$0xff] }
 0xa41   :  { %6162 = vmatpush2.msra.mxu1 %v5535_v55  ;;  %6221 = vmatpush1.msra.mxu0 %v5571_v48  ;;  %v5691_v16 = vld [vmem:[%s16352_s11 + $0x1060] sm:$0xff]  ;;  %v5458_v55 = vld [vmem:[%s16352_s11 + $0x918] sm:$0xff] }
 0xa42   :  { %6163 = vmatprep.subr.mxu1 %v5530_v60  ;;  %6222 = vmatprep.subr.mxu0 %v5566_v47  ;;  %v5686_v48 = vld [vmem:[%s16352_s11 + $0x1038] sm:$0xff]  ;;  %v5457_v60 = vld [vmem:[%s16352_s11 + $0x910] sm:$0xff] }
 0xa43   :  { %6164 = vmatpush2.msra.mxu1 %v5529_v33  ;;  %6223 = vmatpush1.msra.mxu0 %v5565_v2  ;;  %v5685_v47 = vld [vmem:[%s16352_s11 + $0x1030] sm:$0xff]  ;;  %v5680_v33 = vld [vmem:[%s16352_s11 + $0x1008] sm:$0xff] }
 0xa44   :  { %6165 = vmatprep.subr.mxu1 %v5524_v27  ;;  %6224 = vmatprep.subr.mxu0 %v5560_v5  ;;  %v5764_v2 = vld [vmem:[%s16352_s11 + $0x12a8] sm:$0xff]  ;;  %v5679_v27 = vld [vmem:[%s16352_s11 + $0x1000] sm:$0xff] }
 0xa45   :  { %6166 = vmatpush2.msra.mxu1 %v5523_v9  ;;  %6225 = vmatpush1.msra.mxu0 %v5559_v36  ;;  %v5763_v5 = vld [vmem:[%s16352_s11 + $0x12a0] sm:$0xff]  ;;  %v5674_v9 = vld [vmem:[%s16352_s11 + $0xfd8] sm:$0xff] }
 0xa46   :  { %6167 = vmatprep.subr.mxu1 %v5518_v42  ;;  %6226 = vmatprep.subr.mxu0 %v5554_v50  ;;  %v5758_v36 = vld [vmem:[%s16352_s11 + $0x1278] sm:$0xff]  ;;  %v5673_v42 = vld [vmem:[%s16352_s11 + $0xfd0] sm:$0xff] }
 0xa47   :  { %6168 = vmatpush2.msra.mxu1 %v5517_v30  ;;  %6227 = vmatpush1.msra.mxu0 %v5553_v52  ;;  %v5757_v50 = vld [vmem:[%s16352_s11 + $0x1270] sm:$0xff]  ;;  %v5668_v30 = vld [vmem:[%s16352_s11 + $0xfa8] sm:$0xff] }
 0xa48   :  { %6169 = vmatprep.subr.mxu1 %v5512_v25  ;;  %6228 = vmatprep.subr.mxu0 %v5740_v61  ;;  %v5752_v52 = vld [vmem:[%s16352_s11 + $0x1248] sm:$0xff]  ;;  %v5667_v25 = vld [vmem:[%s16352_s11 + $0xfa0] sm:$0xff] }
 0xa49   :  { %6170 = vmatpush2.msra.mxu1 %v5511_v63  ;;  %6229 = vmatpush2.msra.mxu0 %v5739_v41  ;;  %v5751_v61 = vld [vmem:[%s16352_s11 + $0x1240] sm:$0xff]  ;;  %v5662_v63 = vld [vmem:[%s16352_s11 + $0xf78] sm:$0xff] }
 0xa4a   :  { %6171 = vmatprep.subr.mxu1 %v5506_v1  ;;  %6230 = vmatprep.subr.mxu0 %v5734_v18  ;;  %v5746_v41 = vld [vmem:[%s16352_s11 + $0x1218] sm:$0xff]  ;;  %v5661_v1 = vld [vmem:[%s16352_s11 + $0xf70] sm:$0xff] }
 0xa4b   :  { %6172 = vmatpush2.msra.mxu1 %v5505_v13  ;;  %6231 = vmatpush2.msra.mxu0 %v5733_v43  ;;  %v5745_v18 = vld [vmem:[%s16352_s11 + $0x1210] sm:$0xff]  ;;  %v5656_v13 = vld [vmem:[%s16352_s11 + $0xf48] sm:$0xff]  ;;  %v5262_v43 = vld [vmem:[%s16352_s11 + $0x2f8] sm:$0xff] }
 0xa4c   :  { %6173 = vmatprep.subr.mxu1 %v5500_v58  ;;  %6232 = vmatprep.subr.mxu0 %v5728_v7  ;;  %v5655_v58 = vld [vmem:[%s16352_s11 + $0xf40] sm:$0xff]  ;;  %v5261_v7 = vld [vmem:[%s16352_s11 + $0x2f0] sm:$0xff] }
 0xa4d   :  { %6174 = vmatpush2.msra.mxu1 %v5499_v34  ;;  %6233 = vmatpush2.msra.mxu0 %v5727_v40  ;;  %v5650_v34 = vld [vmem:[%s16352_s11 + $0xf18] sm:$0xff]  ;;  %v5256_v40 = vld [vmem:[%s16352_s11 + $0x2c8] sm:$0xff] }
 0xa4e   :  { %6175 = vmatprep.subr.mxu1 %v5494_v26  ;;  %6234 = vmatprep.subr.mxu0 %v5722_v15  ;;  %v5649_v26 = vld [vmem:[%s16352_s11 + $0xf10] sm:$0xff]  ;;  %v5255_v15 = vld [vmem:[%s16352_s11 + $0x2c0] sm:$0xff] }
 0xa4f   :  { %6176 = vmatpush2.msra.mxu1 %v5493_v37  ;;  %6235 = vmatpush2.msra.mxu0 %v5721_v8  ;;  %v5250_v37 = vld [vmem:[%s16352_s11 + $0x298] sm:$0xff] }
 0xa50   :  { %6177 = vmatprep.subr.mxu1 %v5488_v62  ;;  %6236 = vmatprep.subr.mxu0 %v5716_v17  ;;  %v5454_v8 = vld [vmem:[%s16352_s11 + $0x8f8] sm:$0xff]  ;;  %v5249_v62 = vld [vmem:[%s16352_s11 + $0x290] sm:$0xff]  ;;  %v5244_v17 = vld [vmem:[%s16352_s11 + $0x268] sm:$0xff] }
 0xa51   :  { %6178 = vmatpush2.msra.mxu1 %v5487_v31  ;;  %6237 = vmatpush2.msra.mxu0 %v5715_v4  ;;  %v5448_v31 = vld [vmem:[%s16352_s11 + $0x8c8] sm:$0xff]  ;;  %v5243_v4 = vld [vmem:[%s16352_s11 + $0x260] sm:$0xff] }
 0xa52   :  { %6179 = vmatprep.subr.mxu1 %v5482_v23  ;;  %6238 = vmatprep.subr.mxu0 %v5710_v28  ;;  %v5447_v23 = vld [vmem:[%s16352_s11 + $0x8c0] sm:$0xff]  ;;  %v5238_v28 = vld [vmem:[%s16352_s11 + $0x238] sm:$0xff] }
 0xa53   :  { %6180 = vmatpush2.msra.mxu1 %v5481_v20  ;;  %6239 = vmatpush2.msra.mxu0 %v5709_v12  ;;  %v5442_v20 = vld [vmem:[%s16352_s11 + $0x898] sm:$0xff]  ;;  %v5237_v12 = vld [vmem:[%s16352_s11 + $0x230] sm:$0xff] }
 0xa54   :  { %6181 = vmatprep.subr.mxu1 %v5476_v3  ;;  %6240 = vmatprep.subr.mxu0 %v5704_v29  ;;  %v5441_v3 = vld [vmem:[%s16352_s11 + $0x890] sm:$0xff]  ;;  %v5436_v29 = vld [vmem:[%s16352_s11 + $0x868] sm:$0xff] }
 0xa55   :  { %6182 = vmatpush2.msra.mxu1 %v5475_v38  ;;  %6241 = vmatpush2.msra.mxu0 %v5703_v19  ;;  %v5231_v38 = vld [vmem:[%s16352_s11 + $0x200] sm:$0xff] }
 0xa56   :  { %6183 = vmatprep.subr.mxu1 %v5470_v11  ;;  %6242 = vmatprep.subr.mxu0 %v5698_v46  ;;  %v5435_v19 = vld [vmem:[%s16352_s11 + $0x860] sm:$0xff]  ;;  %v5226_v11 = vld [vmem:[%s16352_s11 + $0x1d8] sm:$0xff] }
 0xa57   :  { %6184 = vmatpush2.msra.mxu1 %v5469_v56  ;;  %6243 = vmatpush2.msra.mxu0 %v5697_v45  ;;  %v5430_v46 = vld [vmem:[%s16352_s11 + $0x838] sm:$0xff]  ;;  %v5225_v56 = vld [vmem:[%s16352_s11 + $0x1d0] sm:$0xff] }
 0xa58   :  { %6185 = vmatprep.subr.mxu1 %v5464_v39  ;;  %6244 = vmatprep.subr.mxu0 %v5692_v35  ;;  %v5429_v45 = vld [vmem:[%s16352_s11 + $0x830] sm:$0xff]  ;;  %v5220_v39 = vld [vmem:[%s16352_s11 + $0x1a8] sm:$0xff] }
 0xa59   :  { %6186 = vmatpush2.msra.mxu1 %v5463_v51  ;;  %6245 = vmatpush2.msra.mxu0 %v5691_v16  ;;  %v5424_v35 = vld [vmem:[%s16352_s11 + $0x808] sm:$0xff]  ;;  %v5219_v51 = vld [vmem:[%s16352_s11 + $0x1a0] sm:$0xff] }
 0xa5a   :  { %6187 = vmatprep.subr.mxu1 %v5458_v55  ;;  %6246 = vmatprep.subr.mxu0 %v5686_v48  ;;  %v5423_v16 = vld [vmem:[%s16352_s11 + $0x800] sm:$0xff]  ;;  %v5214_v55 = vld [vmem:[%s16352_s11 + $0x178] sm:$0xff] }
 0xa5b   :  { %6188 = vmatpush2.msra.mxu1 %v5457_v60  ;;  %6247 = vmatpush2.msra.mxu0 %v5685_v47  ;;  %v5418_v48 = vld [vmem:[%s16352_s11 + $0x7d8] sm:$0xff]  ;;  %v5213_v60 = vld [vmem:[%s16352_s11 + $0x170] sm:$0xff] }
 0xa5c   :  { %6190 = vmatmul.mubr.f32.vlgmr.msra.gmra.mxu1 %v13586_v24  ;;  %6248 = vmatprep.subr.mxu0 %v5680_v33  ;;  %v5417_v47 = vld [vmem:[%s16352_s11 + $0x7d0] sm:$0xff]  ;;  %v5208_v33 = vld [vmem:[%s16352_s11 + $0x148] sm:$0xff] }
 0xa5d   :  { %6291 = vmatprep.subr.mxu1 %v5764_v2  ;;  %6249 = vmatpush2.msra.mxu0 %v5679_v27  ;;  %v5412_v2 = vld [vmem:[%s16352_s11 + $0x7a8] sm:$0xff]  ;;  %v5207_v27 = vld [vmem:[%s16352_s11 + $0x140] sm:$0xff] }
 0xa5e   :  { %6292 = vmatpush1.msra.mxu1 %v5763_v5  ;;  %6250 = vmatprep.subr.mxu0 %v5674_v9  ;;  %v5411_v5 = vld [vmem:[%s16352_s11 + $0x7a0] sm:$0xff]  ;;  %v5202_v9 = vld [vmem:[%s16352_s11 + $0x118] sm:$0xff] }
 0xa5f   :  { %6293 = vmatprep.subr.mxu1 %v5758_v36  ;;  %6251 = vmatpush2.msra.mxu0 %v5673_v42  ;;  %v5406_v36 = vld [vmem:[%s16352_s11 + $0x778] sm:$0xff]  ;;  %v5201_v42 = vld [vmem:[%s16352_s11 + $0x110] sm:$0xff] }
 0xa60   :  { %6294 = vmatpush1.msra.mxu1 %v5757_v50  ;;  %6252 = vmatprep.subr.mxu0 %v5668_v30  ;;  %v5405_v50 = vld [vmem:[%s16352_s11 + $0x770] sm:$0xff]  ;;  %v5196_v30 = vld [vmem:[%s16352_s11 + $0xe8] sm:$0xff] }
 0xa61   :  { %6295 = vmatprep.subr.mxu1 %v5752_v52  ;;  %6253 = vmatpush2.msra.mxu0 %v5667_v25  ;;  %v5400_v52 = vld [vmem:[%s16352_s11 + $0x748] sm:$0xff]  ;;  %v5195_v25 = vld [vmem:[%s16352_s11 + $0xe0] sm:$0xff] }
 0xa62   :  { %6296 = vmatpush1.msra.mxu1 %v5751_v61  ;;  %6254 = vmatprep.subr.mxu0 %v5662_v63  ;;  %v5399_v61 = vld [vmem:[%s16352_s11 + $0x740] sm:$0xff]  ;;  %v5190_v63 = vld [vmem:[%s16352_s11 + $0xb8] sm:$0xff] }
 0xa63   :  { %6297 = vmatprep.subr.mxu1 %v5746_v41  ;;  %6255 = vmatpush2.msra.mxu0 %v5661_v1  ;;  %v5394_v41 = vld [vmem:[%s16352_s11 + $0x718] sm:$0xff]  ;;  %v5189_v1 = vld [vmem:[%s16352_s11 + $0xb0] sm:$0xff] }
 0xa64   :  { %6298 = vmatpush1.msra.mxu1 %v5745_v18  ;;  %6331 = vmatprep.mubr.f32.mxu1 %v16570_v10  ;;  %v5393_v18 = vld [vmem:[%s16352_s11 + $0x710] sm:$0xff] }
 0xa65   :  { %6256 = vmatprep.subr.mxu0 %v5656_v13  ;;  %8236 = vmatmul.mubr.msk.f32.vlgmr.msra.gmra.mxu1 %vm3836_vm6, %v13642_v6  ;;  %v5184_v13 = vld [vmem:[%s16352_s11 + $0x88] sm:$0xff] }
 0xa66   :  { %6338 = vmatprep.subr.mxu1 %v5262_v43  ;;  %6257 = vmatpush2.msra.mxu0 %v5655_v58  ;;  %v5388_v43 = vld [vmem:[%s16352_s11 + $0x6e8] sm:$0xff]  ;;  %v5183_v58 = vld [vmem:[%s16352_s11 + $0x80] sm:$0xff] }
 0xa67   :  { %6339 = vmatpush1.msra.mxu1 %v5261_v7  ;;  %6402 = vmatprep.mubr.f32.mxu1 %v13561_v14  ;;  %v5453_v14 = vld [vmem:[%s16352_s11 + $0x8f0] sm:$0xff]  ;;  %v5387_v7 = vld [vmem:[%s16352_s11 + $0x6e0] sm:$0xff] }
 0xa68   :  { %6258 = vmatprep.subr.mxu0 %v5650_v34  ;;  %6340 = vmatprep.subr.mxu1 %v5256_v40  ;;  %v5178_v34 = vld [vmem:[%s16352_s11 + $0x58] sm:$0xff] }
 0xa69   :  { %6259 = vmatpush2.msra.mxu0 %v5649_v26  ;;  %6341 = vmatpush1.msra.mxu1 %v5255_v15  ;;  %v5382_v40 = vld [vmem:[%s16352_s11 + $0x6b8] sm:$0xff]  ;;  %v5177_v26 = vld [vmem:[%s16352_s11 + $0x50] sm:$0xff] }
 0xa6a   :  { %6261 = vmatmul.mubr.f32.vlgmr.msra.gmra.mxu0 %v13965_v0  ;;  %6342 = vmatprep.subr.mxu1 %v5250_v37  ;;  %v5381_v15 = vld [vmem:[%s16352_s11 + $0x6b0] sm:$0xff]  ;;  %v5172_v37 = vld [vmem:[%s16352_s11 + $0x28] sm:$0xff] }
 0xa6b   :  { %6409 = vmatprep.subr.mxu0 %v5454_v8  ;;  %6343 = vmatpush1.msra.mxu1 %v5249_v62  ;;  %v5376_v8 = vld [vmem:[%s16352_s11 + $0x688] sm:$0xff]  ;;  %v5171_v62 = vld [vmem:[%s16352_s11 + $0x20] sm:$0xff] }
 0xa6c   :  { %6410 = vmatpush1.msra.mxu0 %v5453_v14  ;;  %6473 = vmatprep.mubr.f32.mxu0 %v13581_v32  ;;  %v5232_v32 = vld [vmem:[%s16352_s11 + $0x208] sm:$0xff]  ;;  %v5375_v14 = vld [vmem:[%s16352_s11 + $0x680] sm:$0xff] }
 0xa6d   :  { %6344 = vmatprep.subr.mxu1 %v5244_v17  ;;  %6411 = vmatprep.subr.mxu0 %v5448_v31  ;;  %v5358_v17 = vld [vmem:[%s16352_s11 + $0x5f8] sm:$0xff] }
 0xa6e   :  { %6345 = vmatpush1.msra.mxu1 %v5243_v4  ;;  %6412 = vmatpush1.msra.mxu0 %v5447_v23  ;;  %v5370_v31 = vld [vmem:[%s16352_s11 + $0x658] sm:$0xff]  ;;  %v5357_v4 = vld [vmem:[%s16352_s11 + $0x5f0] sm:$0xff] }
 0xa6f   :  { %6346 = vmatprep.subr.mxu1 %v5238_v28  ;;  %6413 = vmatprep.subr.mxu0 %v5442_v20  ;;  %v5369_v23 = vld [vmem:[%s16352_s11 + $0x650] sm:$0xff]  ;;  %v5352_v28 = vld [vmem:[%s16352_s11 + $0x5c8] sm:$0xff] }
 0xa70   :  { %6347 = vmatpush1.msra.mxu1 %v5237_v12  ;;  %6414 = vmatpush1.msra.mxu0 %v5441_v3  ;;  %v5364_v20 = vld [vmem:[%s16352_s11 + $0x628] sm:$0xff]  ;;  %v5351_v12 = vld [vmem:[%s16352_s11 + $0x5c0] sm:$0xff] }
 0xa71   :  { %6348 = vmatprep.subr.mxu1 %v5232_v32  ;;  %6415 = vmatprep.subr.mxu0 %v5436_v29  ;;  %v5363_v3 = vld [vmem:[%s16352_s11 + $0x620] sm:$0xff]  ;;  %v5346_v32 = vld [vmem:[%s16352_s11 + $0x598] sm:$0xff] }
 0xa72   :  { %6349 = vmatpush1.msra.mxu1 %v5231_v38  ;;  %6416 = vmatpush1.msra.mxu0 %v5435_v19  ;;  %v5550_v29 = vld [vmem:[%s16352_s11 + $0xbf8] sm:$0xff]  ;;  %v5345_v38 = vld [vmem:[%s16352_s11 + $0x590] sm:$0xff] }
 0xa73   :  { %6350 = vmatprep.subr.mxu1 %v5226_v11  ;;  %6417 = vmatprep.subr.mxu0 %v5430_v46  ;;  %v5549_v19 = vld [vmem:[%s16352_s11 + $0xbf0] sm:$0xff]  ;;  %v5340_v11 = vld [vmem:[%s16352_s11 + $0x568] sm:$0xff] }
 0xa74   :  { %6351 = vmatpush1.msra.mxu1 %v5225_v56  ;;  %6418 = vmatpush1.msra.mxu0 %v5429_v45  ;;  %v5544_v46 = vld [vmem:[%s16352_s11 + $0xbc8] sm:$0xff]  ;;  %v5339_v56 = vld [vmem:[%s16352_s11 + $0x560] sm:$0xff] }
 0xa75   :  { %6352 = vmatprep.subr.mxu1 %v5220_v39  ;;  %6419 = vmatprep.subr.mxu0 %v5424_v35  ;;  %v5543_v45 = vld [vmem:[%s16352_s11 + $0xbc0] sm:$0xff]  ;;  %v5334_v39 = vld [vmem:[%s16352_s11 + $0x538] sm:$0xff] }
 0xa76   :  { %6353 = vmatpush1.msra.mxu1 %v5219_v51  ;;  %6420 = vmatpush1.msra.mxu0 %v5423_v16  ;;  %v5538_v35 = vld [vmem:[%s16352_s11 + $0xb98] sm:$0xff]  ;;  %v5333_v51 = vld [vmem:[%s16352_s11 + $0x530] sm:$0xff] }
 0xa77   :  { %6354 = vmatprep.subr.mxu1 %v5214_v55  ;;  %6421 = vmatprep.subr.mxu0 %v5418_v48  ;;  %v5537_v16 = vld [vmem:[%s16352_s11 + $0xb90] sm:$0xff]  ;;  %v5328_v55 = vld [vmem:[%s16352_s11 + $0x508] sm:$0xff] }
 0xa78   :  { %6355 = vmatpush1.msra.mxu1 %v5213_v60  ;;  %6422 = vmatpush1.msra.mxu0 %v5417_v47  ;;  %v5532_v48 = vld [vmem:[%s16352_s11 + $0xb68] sm:$0xff]  ;;  %v5327_v60 = vld [vmem:[%s16352_s11 + $0x500] sm:$0xff] }
 0xa79   :  { %6356 = vmatprep.subr.mxu1 %v5208_v33  ;;  %6423 = vmatprep.subr.mxu0 %v5412_v2  ;;  %v5531_v47 = vld [vmem:[%s16352_s11 + $0xb60] sm:$0xff]  ;;  %v5322_v33 = vld [vmem:[%s16352_s11 + $0x4d8] sm:$0xff] }
 0xa7a   :  { %6357 = vmatpush1.msra.mxu1 %v5207_v27  ;;  %6424 = vmatpush1.msra.mxu0 %v5411_v5  ;;  %v5526_v2 = vld [vmem:[%s16352_s11 + $0xb38] sm:$0xff]  ;;  %v5321_v27 = vld [vmem:[%s16352_s11 + $0x4d0] sm:$0xff] }
 0xa7b   :  { %6358 = vmatprep.subr.mxu1 %v5202_v9  ;;  %6425 = vmatprep.subr.mxu0 %v5406_v36  ;;  %v5525_v5 = vld [vmem:[%s16352_s11 + $0xb30] sm:$0xff]  ;;  %v5316_v9 = vld [vmem:[%s16352_s11 + $0x4a8] sm:$0xff] }
 0xa7c   :  { %6359 = vmatpush1.msra.mxu1 %v5201_v42  ;;  %6426 = vmatpush1.msra.mxu0 %v5405_v50  ;;  %v5520_v36 = vld [vmem:[%s16352_s11 + $0xb08] sm:$0xff]  ;;  %v5315_v42 = vld [vmem:[%s16352_s11 + $0x4a0] sm:$0xff] }
 0xa7d   :  { %6360 = vmatprep.subr.mxu1 %v5196_v30  ;;  %6427 = vmatprep.subr.mxu0 %v5400_v52  ;;  %v5519_v50 = vld [vmem:[%s16352_s11 + $0xb00] sm:$0xff]  ;;  %v5310_v30 = vld [vmem:[%s16352_s11 + $0x478] sm:$0xff] }
 0xa7e   :  { %6361 = vmatpush1.msra.mxu1 %v5195_v25  ;;  %6428 = vmatpush1.msra.mxu0 %v5399_v61  ;;  %v5514_v52 = vld [vmem:[%s16352_s11 + $0xad8] sm:$0xff]  ;;  %v5309_v25 = vld [vmem:[%s16352_s11 + $0x470] sm:$0xff] }
 0xa7f   :  { %6362 = vmatprep.subr.mxu1 %v5190_v63  ;;  %6429 = vmatprep.subr.mxu0 %v5394_v41  ;;  %v5513_v61 = vld [vmem:[%s16352_s11 + $0xad0] sm:$0xff]  ;;  %v5304_v63 = vld [vmem:[%s16352_s11 + $0x448] sm:$0xff] }
 0xa80   :  { %6363 = vmatpush1.msra.mxu1 %v5189_v1  ;;  %6430 = vmatpush1.msra.mxu0 %v5393_v18  ;;  %v5508_v41 = vld [vmem:[%s16352_s11 + $0xaa8] sm:$0xff]  ;;  %v5303_v1 = vld [vmem:[%s16352_s11 + $0x440] sm:$0xff] }
 0xa81   :  { %6364 = vmatprep.subr.mxu1 %v5184_v13  ;;  %6431 = vmatprep.subr.mxu0 %v5388_v43  ;;  %v5507_v18 = vld [vmem:[%s16352_s11 + $0xaa0] sm:$0xff]  ;;  %v5298_v13 = vld [vmem:[%s16352_s11 + $0x418] sm:$0xff] }
 0xa82   :  { %6365 = vmatpush1.msra.mxu1 %v5183_v58  ;;  %6432 = vmatpush1.msra.mxu0 %v5387_v7  ;;  %v5502_v43 = vld [vmem:[%s16352_s11 + $0xa78] sm:$0xff]  ;;  %v5297_v58 = vld [vmem:[%s16352_s11 + $0x410] sm:$0xff] }
 0xa83   :  { %6366 = vmatprep.subr.mxu1 %v5178_v34  ;;  %6433 = vmatprep.subr.mxu0 %v5382_v40  ;;  %v5501_v7 = vld [vmem:[%s16352_s11 + $0xa70] sm:$0xff]  ;;  %v5292_v34 = vld [vmem:[%s16352_s11 + $0x3e8] sm:$0xff] }
 0xa84   :  { %6367 = vmatpush1.msra.mxu1 %v5177_v26  ;;  %6434 = vmatpush1.msra.mxu0 %v5381_v15  ;;  %v5496_v40 = vld [vmem:[%s16352_s11 + $0xa48] sm:$0xff]  ;;  %v5291_v26 = vld [vmem:[%s16352_s11 + $0x3e0] sm:$0xff] }
 0xa85   :  { %6368 = vmatprep.subr.mxu1 %v5172_v37  ;;  %6435 = vmatprep.subr.mxu0 %v5376_v8  ;;  %v5495_v15 = vld [vmem:[%s16352_s11 + $0xa40] sm:$0xff]  ;;  %v5286_v37 = vld [vmem:[%s16352_s11 + $0x3b8] sm:$0xff] }
 0xa86   :  { %6369 = vmatpush1.msra.mxu1 %v5171_v62  ;;  %6436 = vmatpush1.msra.mxu0 %v5375_v14  ;;  %v5490_v8 = vld [vmem:[%s16352_s11 + $0xa18] sm:$0xff]  ;;  %v5285_v62 = vld [vmem:[%s16352_s11 + $0x3b0] sm:$0xff] }
 0xa87   :  { %6370 = vmatprep.subr.mxu1 %v5358_v17  ;;  %6437 = vmatprep.subr.mxu0 %v5370_v31  ;;  %v5489_v14 = vld [vmem:[%s16352_s11 + $0xa10] sm:$0xff]  ;;  %v5280_v17 = vld [vmem:[%s16352_s11 + $0x388] sm:$0xff] }
 0xa88   :  { %6371 = vmatpush2.msra.mxu1 %v5357_v4  ;;  %6438 = vmatpush1.msra.mxu0 %v5369_v23  ;;  %v5484_v31 = vld [vmem:[%s16352_s11 + $0x9e8] sm:$0xff]  ;;  %v5279_v4 = vld [vmem:[%s16352_s11 + $0x380] sm:$0xff] }
 0xa89   :  { %6372 = vmatprep.subr.mxu1 %v5352_v28  ;;  %6439 = vmatprep.subr.mxu0 %v5364_v20  ;;  %v5483_v23 = vld [vmem:[%s16352_s11 + $0x9e0] sm:$0xff]  ;;  %v5274_v28 = vld [vmem:[%s16352_s11 + $0x358] sm:$0xff] }
 0xa8a   :  { %6373 = vmatpush2.msra.mxu1 %v5351_v12  ;;  %6440 = vmatpush1.msra.mxu0 %v5363_v3  ;;  %v5478_v20 = vld [vmem:[%s16352_s11 + $0x9b8] sm:$0xff]  ;;  %v5273_v12 = vld [vmem:[%s16352_s11 + $0x350] sm:$0xff] }
 0xa8b   :  { %6374 = vmatprep.subr.mxu1 %v5346_v32  ;;  %6441 = vmatprep.subr.mxu0 %v5550_v29  ;;  %v5477_v3 = vld [vmem:[%s16352_s11 + $0x9b0] sm:$0xff]  ;;  %v5268_v32 = vld [vmem:[%s16352_s11 + $0x328] sm:$0xff] }
 0xa8c   :  { %6375 = vmatpush2.msra.mxu1 %v5345_v38  ;;  %6442 = vmatpush2.msra.mxu0 %v5549_v19  ;;  %v5472_v29 = vld [vmem:[%s16352_s11 + $0x988] sm:$0xff]  ;;  %v5267_v38 = vld [vmem:[%s16352_s11 + $0x320] sm:$0xff] }
 0xa8d   :  { %6376 = vmatprep.subr.mxu1 %v5340_v11  ;;  %6443 = vmatprep.subr.mxu0 %v5544_v46  ;;  %v5471_v19 = vld [vmem:[%s16352_s11 + $0x980] sm:$0xff]  ;;  %v5466_v11 = vld [vmem:[%s16352_s11 + $0x958] sm:$0xff] }
 0xa8e   :  { %6377 = vmatpush2.msra.mxu1 %v5339_v56  ;;  %6444 = vmatpush2.msra.mxu0 %v5543_v45  ;;  %v5646_v46 = vld [vmem:[%s16352_s11 + $0xef8] sm:$0xff]  ;;  %v5465_v56 = vld [vmem:[%s16352_s11 + $0x950] sm:$0xff] }
 0xa8f   :  { %6378 = vmatprep.subr.mxu1 %v5334_v39  ;;  %6445 = vmatprep.subr.mxu0 %v5538_v35  ;;  %v5645_v45 = vld [vmem:[%s16352_s11 + $0xef0] sm:$0xff]  ;;  %v5460_v39 = vld [vmem:[%s16352_s11 + $0x928] sm:$0xff] }
 0xa90   :  { %6379 = vmatpush2.msra.mxu1 %v5333_v51  ;;  %6446 = vmatpush2.msra.mxu0 %v5537_v16  ;;  %v5640_v35 = vld [vmem:[%s16352_s11 + $0xec8] sm:$0xff]  ;;  %v5459_v51 = vld [vmem:[%s16352_s11 + $0x920] sm:$0xff] }
 0xa91   :  { %6380 = vmatprep.subr.mxu1 %v5328_v55  ;;  %6447 = vmatprep.subr.mxu0 %v5532_v48  ;;  %v5639_v16 = vld [vmem:[%s16352_s11 + $0xec0] sm:$0xff]  ;;  %v5766_v55 = vld [vmem:[%s16352_s11 + $0x12b8] sm:$0xff]  ;;  %v5633_v48 = vld [vmem:[%s16352_s11 + $0xe90] sm:$0xff] }
 0xa92   :  { %6381 = vmatpush2.msra.mxu1 %v5327_v60  ;;  %6448 = vmatpush2.msra.mxu0 %v5531_v47  ;;  %v5628_v60 = vld [vmem:[%s16352_s11 + $0xe68] sm:$0xff] }
 0xa93   :  { %6382 = vmatprep.subr.mxu1 %v5322_v33  ;;  %6449 = vmatprep.subr.mxu0 %v5526_v2  ;;  %v5760_v47 = vld [vmem:[%s16352_s11 + $0x1288] sm:$0xff]  ;;  %v5627_v33 = vld [vmem:[%s16352_s11 + $0xe60] sm:$0xff] }
 0xa94   :  { %6383 = vmatpush2.msra.mxu1 %v5321_v27  ;;  %6450 = vmatpush2.msra.mxu0 %v5525_v5  ;;  %v5759_v2 = vld [vmem:[%s16352_s11 + $0x1280] sm:$0xff]  ;;  %v5622_v27 = vld [vmem:[%s16352_s11 + $0xe38] sm:$0xff]  ;;  %v5621_v5 = vld [vmem:[%s16352_s11 + $0xe30] sm:$0xff] }
 0xa95   :  { %6384 = vmatprep.subr.mxu1 %v5316_v9  ;;  %6451 = vmatprep.subr.mxu0 %v5520_v36  ;;  %v5753_v9 = vld [vmem:[%s16352_s11 + $0x1250] sm:$0xff]  ;;  %v5616_v36 = vld [vmem:[%s16352_s11 + $0xe08] sm:$0xff] }
 0xa96   :  { %6385 = vmatpush2.msra.mxu1 %v5315_v42  ;;  %6452 = vmatpush2.msra.mxu0 %v5519_v50  ;;  %v5748_v42 = vld [vmem:[%s16352_s11 + $0x1228] sm:$0xff]  ;;  %v5615_v50 = vld [vmem:[%s16352_s11 + $0xe00] sm:$0xff] }
 0xa97   :  { %6386 = vmatprep.subr.mxu1 %v5310_v30  ;;  %6453 = vmatprep.subr.mxu0 %v5514_v52  ;;  %v5747_v30 = vld [vmem:[%s16352_s11 + $0x1220] sm:$0xff]  ;;  %v5610_v52 = vld [vmem:[%s16352_s11 + $0xdd8] sm:$0xff] }
 0xa98   :  { %6387 = vmatpush2.msra.mxu1 %v5309_v25  ;;  %6454 = vmatpush2.msra.mxu0 %v5513_v61  ;;  %v5609_v25 = vld [vmem:[%s16352_s11 + $0xdd0] sm:$0xff]  ;;  %v14875_v61 = vld [vmem:[%s16355_s12 + $0xf8] sm:$0xff] }
 0xa99   :  { %6388 = vmatprep.subr.mxu1 %v5304_v63  ;;  %6455 = vmatprep.subr.mxu0 %v5508_v41  ;;  %v5604_v63 = vld [vmem:[%s16352_s11 + $0xda8] sm:$0xff]  ;;  %v14884_v41 = vld [vmem:[%s16355_s12 + $0x78] sm:$0xff] }
 0xa9a   :  { %6389 = vmatpush2.msra.mxu1 %v5303_v1  ;;  %6456 = vmatpush2.msra.mxu0 %v5507_v18  ;;  %v5603_v1 = vld [vmem:[%s16352_s11 + $0xda0] sm:$0xff]  ;;  %v14894_v18 = vld [vmem:[%s16355_s12 + $0xf0] sm:$0xff] }
 0xa9b   :  { %6390 = vmatprep.subr.mxu1 %v5298_v13  ;;  %6457 = vmatprep.subr.mxu0 %v5502_v43  ;;  %v5598_v13 = vld [vmem:[%s16352_s11 + $0xd78] sm:$0xff]  ;;  %v5597_v43 = vld [vmem:[%s16352_s11 + $0xd70] sm:$0xff] }
 0xa9c   :  { %6391 = vmatpush2.msra.mxu1 %v5297_v58  ;;  %6458 = vmatpush2.msra.mxu0 %v5501_v7  ;;  %v14912_v58 = vld [vmem:[%s16355_s12 + $0xe8] sm:$0xff] }
 0xa9d   :  { %6392 = vmatprep.subr.mxu1 %v5292_v34  ;;  %6459 = vmatprep.subr.mxu0 %v5496_v40  ;;  %v5592_v7 = vld [vmem:[%s16352_s11 + $0xd48] sm:$0xff]  ;;  %v5591_v40 = vld [vmem:[%s16352_s11 + $0xd40] sm:$0xff] }
 0xa9e   :  { %6393 = vmatpush2.msra.mxu1 %v5291_v26  ;;  %6460 = vmatpush2.msra.mxu0 %v5495_v15  ;;  %v14921_v34 = vld [vmem:[%s16355_s12 + $0x68] sm:$0xff]  ;;  %v14930_v26 = vld [vmem:[%s16355_s12 + $0xe0] sm:$0xff]  ;;  %v5586_v15 = vld [vmem:[%s16352_s11 + $0xd18] sm:$0xff] }
 0xa9f   :  { %6394 = vmatprep.subr.mxu1 %v5286_v37  ;;  %6461 = vmatprep.subr.mxu0 %v5490_v8  ;;  %v14939_v37 = vld [vmem:[%s16355_s12 + $0x60] sm:$0xff]  ;;  %v5585_v8 = vld [vmem:[%s16352_s11 + $0xd10] sm:$0xff] }
 0xaa0   :  { %6395 = vmatpush2.msra.mxu1 %v5285_v62  ;;  %6462 = vmatpush2.msra.mxu0 %v5489_v14  ;;  %v14948_v62 = vld [vmem:[%s16355_s12 + $0xd8] sm:$0xff]  ;;  %v5580_v14 = vld [vmem:[%s16352_s11 + $0xce8] sm:$0xff] }
 0xaa1   :  { %6396 = vmatprep.subr.mxu1 %v5280_v17  ;;  %6463 = vmatprep.subr.mxu0 %v5484_v31  ;;  %v14957_v17 = vld [vmem:[%s16355_s12 + $0x58] sm:$0xff]  ;;  %v5579_v31 = vld [vmem:[%s16352_s11 + $0xce0] sm:$0xff] }
 0xaa2   :  { %6397 = vmatpush2.msra.mxu1 %v5279_v4  ;;  %6464 = vmatpush2.msra.mxu0 %v5483_v23  ;;  %v14966_v4 = vld [vmem:[%s16355_s12 + $0xd0] sm:$0xff]  ;;  %v5574_v23 = vld [vmem:[%s16352_s11 + $0xcb8] sm:$0xff] }
 0xaa3   :  { %6398 = vmatprep.subr.mxu1 %v5274_v28  ;;  %6465 = vmatprep.subr.mxu0 %v5478_v20  ;;  %v14975_v28 = vld [vmem:[%s16355_s12 + $0x50] sm:$0xff] }
 0xaa4   :  { %6399 = vmatpush2.msra.mxu1 %v5273_v12  ;;  %6466 = vmatpush2.msra.mxu0 %v5477_v3  ;;  %v5573_v20 = vld [vmem:[%s16352_s11 + $0xcb0] sm:$0xff]  ;;  %v14984_v12 = vld [vmem:[%s16355_s12 + $0xc8] sm:$0xff] }
 0xaa5   :  { %6400 = vmatprep.subr.mxu1 %v5268_v32  ;;  %6467 = vmatprep.subr.mxu0 %v5472_v29  ;;  %v5568_v3 = vld [vmem:[%s16352_s11 + $0xc88] sm:$0xff]  ;;  %v5567_v29 = vld [vmem:[%s16352_s11 + $0xc80] sm:$0xff] }
 0xaa6   :  { %6401 = vmatpush2.msra.mxu1 %v5267_v38  ;;  %6468 = vmatpush2.msra.mxu0 %v5471_v19  ;;  %v14993_v32 = vld [vmem:[%s16355_s12 + $0x48] sm:$0xff]  ;;  %v15002_v38 = vld [vmem:[%s16355_s12 + $0xc0] sm:$0xff]  ;;  %v5562_v19 = vld [vmem:[%s16352_s11 + $0xc58] sm:$0xff] }
 0xaa7   :  { %6403 = vmatmul.mubr.f32.vlgmr.msra.gmra.mxu1 %v13563_v21  ;;  %6469 = vmatprep.subr.mxu0 %v5466_v11  ;;  %v5634_v21 = vld [vmem:[%s16352_s11 + $0xe98] sm:$0xff]  ;;  %16793 = vst [vmem:[#allocation34_spill] sm:$0xff] %v15002_v38  ;;  %v15011_v11 = vld [vmem:[%s16355_s12 + $0x40] sm:$0xff] }
 0xaa8   :  { %6480 = vmatprep.subr.mxu1 %v5646_v46  ;;  %6470 = vmatpush2.msra.mxu0 %v5465_v56  ;;  %16794 = vst [vmem:[#allocation17_spill] sm:$0xff] %v15011_v11  ;;  %v5561_v46 = vld [vmem:[%s16352_s11 + $0xc50] sm:$0xff]  ;;  %v15020_v56 = vld [vmem:[%s16355_s12 + $0xb8] sm:$0xff] }
 0xaa9   :  { %6481 = vmatpush1.msra.mxu1 %v5645_v45  ;;  %6544 = vmatprep.mubr.f32.mxu1 %v13615_v49  ;;  %v5765_v49 = vld [vmem:[%s16352_s11 + $0x12b0] sm:$0xff]  ;;  %16795 = vst [vmem:[#allocation36_spill] sm:$0xff] %v15020_v56  ;;  %v5556_v45 = vld [vmem:[%s16352_s11 + $0xc28] sm:$0xff] }
 0xaaa   :  { %6471 = vmatprep.subr.mxu0 %v5460_v39  ;;  %6482 = vmatprep.subr.mxu1 %v5640_v35  ;;  %v15029_v39 = vld [vmem:[%s16355_s12 + $0x38] sm:$0xff]  ;;  %v5555_v35 = vld [vmem:[%s16352_s11 + $0xc20] sm:$0xff] }
 0xaab   :  { %6472 = vmatpush2.msra.mxu0 %v5459_v51  ;;  %6483 = vmatpush1.msra.mxu1 %v5639_v16  ;;  %16796 = vst [vmem:[#allocation18_spill] sm:$0xff] %v15029_v39  ;;  %v15038_v51 = vld [vmem:[%s16355_s12 + $0xb0] sm:$0xff]  ;;  %v5742_v16 = vld [vmem:[%s16352_s11 + $0x11f8] sm:$0xff] }
 0xaac   :  { %6474 = vmatmul.mubr.f32.vlgmr.msra.gmra.mxu0 %v13586_v24  ;;  %6484 = vmatprep.subr.mxu1 %v5634_v21  ;;  %v5754_v24 = vld [vmem:[%s16352_s11 + $0x1258] sm:$0xff]  ;;  %16797 = vst [vmem:[#allocation38_spill] sm:$0xff] %v15038_v51  ;;  %v15047_v21 = vld [vmem:[%s16355_s12 + $0x30] sm:$0xff] }
 0xaad   :  { %6575 = vmatprep.subr.mxu0 %v5766_v55  ;;  %6485 = vmatpush1.msra.mxu1 %v5633_v48  ;;  %16798 = vst [vmem:[#allocation19_spill] sm:$0xff] %v15047_v21  ;;  %v5741_v55 = vld [vmem:[%s16352_s11 + $0x11f0] sm:$0xff]  ;;  %v15056_v48 = vld [vmem:[%s16355_s12 + $0xa8] sm:$0xff] }
 0xaae   :  { %6576 = vmatpush1.msra.mxu0 %v5765_v49  ;;  %6486 = vmatprep.subr.mxu1 %v5628_v60  ;;  %16799 = vst [vmem:[#allocation40_spill] sm:$0xff] %v15056_v48  ;;  %v5736_v49 = vld [vmem:[%s16352_s11 + $0x11c8] sm:$0xff] }
 0xaaf   :  { %6577 = vmatprep.subr.mxu0 %v5760_v47  ;;  %6487 = vmatpush1.msra.mxu1 %v5627_v33  ;;  %v15065_v60 = vld [vmem:[%s16355_s12 + $0x28] sm:$0xff]  ;;  %v5735_v47 = vld [vmem:[%s16352_s11 + $0x11c0] sm:$0xff] }
 0xab0   :  { %6578 = vmatpush1.msra.mxu0 %v5759_v2  ;;  %6488 = vmatprep.subr.mxu1 %v5622_v27  ;;  %16800 = vst [vmem:[#allocation20_spill] sm:$0xff] %v15065_v60  ;;  %v15074_v33 = vld [vmem:[%s16355_s12 + $0xa0] sm:$0xff]  ;;  %v5730_v2 = vld [vmem:[%s16352_s11 + $0x1198] sm:$0xff] }
 0xab1   :  { %6579 = vmatprep.subr.mxu0 %v5754_v24  ;;  %6489 = vmatpush1.msra.mxu1 %v5621_v5  ;;  %16801 = vst [vmem:[#allocation42_spill] sm:$0xff] %v15074_v33  ;;  %v15083_v27 = vld [vmem:[%s16355_s12 + $0x20] sm:$0xff]  ;;  %v5729_v24 = vld [vmem:[%s16352_s11 + $0x1190] sm:$0xff]  ;;  %v15092_v5 = vld [vmem:[%s16355_s12 + $0x98] sm:$0xff] }
 0xab2   :  { %6580 = vmatpush1.msra.mxu0 %v5753_v9  ;;  %6490 = vmatprep.subr.mxu1 %v5616_v36  ;;  %16802 = vst [vmem:[#allocation21_spill] sm:$0xff] %v15083_v27  ;;  %16803 = vst [vmem:[#allocation44_spill] sm:$0xff] %v15092_v5  ;;  %v5724_v9 = vld [vmem:[%s16352_s11 + $0x1168] sm:$0xff]  ;;  %v15101_v36 = vld [vmem:[%s16355_s12 + $0x18] sm:$0xff] }
 0xab3   :  { %6581 = vmatprep.subr.mxu0 %v5748_v42  ;;  %6491 = vmatpush1.msra.mxu1 %v5615_v50  ;;  %16804 = vst [vmem:[#allocation22_spill] sm:$0xff] %v15101_v36  ;;  %v5723_v42 = vld [vmem:[%s16352_s11 + $0x1160] sm:$0xff]  ;;  %v15110_v50 = vld [vmem:[%s16355_s12 + $0x90] sm:$0xff] }
 0xab4   :  { %6582 = vmatpush1.msra.mxu0 %v5747_v30  ;;  %6615 = vmatprep.mubr.f32.mxu0 %v16570_v10  ;;  %16805 = vst [vmem:[#allocation45_spill] sm:$0xff] %v15110_v50  ;;  %v5718_v30 = vld [vmem:[%s16352_s11 + $0x1138] sm:$0xff] }
 0xab5   :  { %6492 = vmatprep.subr.mxu1 %v5610_v52  ;;  %8237 = vmatmul.mubr.msk.f32.vlgmr.msra.gmra.mxu0 %vm3836_vm6, %v13642_v6  ;;  %v14903_v6 = vld [vmem:[%s16355_s12 + $0x70] sm:$0xff] }
 0xab6   :  { %6493 = vmatpush1.msra.mxu1 %v5609_v25  ;;  %8821 = vmatprep.subr.mxu0 %v14875_v61  ;;  %v15119_v52 = vld [vmem:[%s16355_s12 + $0x10] sm:$0xff] }
 0xab7   :  { %6494 = vmatprep.subr.mxu1 %v5604_v63  ;;  %8822 = vmatpush3.msra.mxu0 %v14884_v41  ;;  %16806 = vst [vmem:[#allocation23_spill] sm:$0xff] %v15119_v52  ;;  %v5717_v25 = vld [vmem:[%s16352_s11 + $0x1130] sm:$0xff]  ;;  %v15128_v63 = vld [vmem:[%s16355_s12 + $0x88] sm:$0xff] }
 0xab8   :  { %6495 = vmatpush1.msra.mxu1 %v5603_v1  ;;  %8823 = vmatprep.subr.mxu0 %v14894_v18  ;;  %16807 = vst [vmem:[#allocation46_spill] sm:$0xff] %v15128_v63  ;;  %v5712_v1 = vld [vmem:[%s16352_s11 + $0x1108] sm:$0xff] }
 0xab9   :  { %6496 = vmatprep.subr.mxu1 %v5598_v13  ;;  %8824 = vmatpush3.msra.mxu0 %v14903_v6  ;;  %v15137_v13 = vld [vmem:[%s16355_s12 + $0x8] sm:$0xff] }
 0xaba   :  { %6497 = vmatpush1.msra.mxu1 %v5597_v43  ;;  %8825 = vmatprep.subr.mxu0 %v14912_v58  ;;  %16808 = vst [vmem:[#allocation24_spill] sm:$0xff] %v15137_v13  ;;  %v5711_v43 = vld [vmem:[%s16352_s11 + $0x1100] sm:$0xff] }
 0xabb   :  { %6498 = vmatprep.subr.mxu1 %v5592_v7  ;;  %8826 = vmatpush3.msra.mxu0 %v14921_v34  ;;  %v15146_v7 = vld [vmem:[%s16355_s12 + $0x80] sm:$0xff] }
 0xabc   :  { %6499 = vmatpush1.msra.mxu1 %v5591_v40  ;;  %8827 = vmatprep.subr.mxu0 %v14930_v26  ;;  %16809 = vst [vmem:[#allocation4_spill] sm:$0xff] %v15146_v7  ;;  %v5706_v40 = vld [vmem:[%s16352_s11 + $0x10d8] sm:$0xff] }
 0xabd   :  { %6500 = vmatprep.subr.mxu1 %v5586_v15  ;;  %8828 = vmatpush3.msra.mxu0 %v14939_v37  ;;  %v15155_v15 = vld [vmem:[%s16355_s12] sm:$0xff] }
 0xabe   :  { %6501 = vmatpush1.msra.mxu1 %v5585_v8  ;;  %8829 = vmatprep.subr.mxu0 %v14948_v62  ;;  %16810 = vst [vmem:[#allocation25_spill] sm:$0xff] %v15155_v15  ;;  %v5705_v8 = vld [vmem:[%s16352_s11 + $0x10d0] sm:$0xff] }
 0xabf   :  { %6502 = vmatprep.subr.mxu1 %v5580_v14  ;;  %8830 = vmatpush3.msra.mxu0 %v14957_v17  ;;  %v15164_v14 = vld [vmem:[%s16355_s12 + $0x1f8] sm:$0xff] }
 0xac0   :  { %6503 = vmatpush1.msra.mxu1 %v5579_v31  ;;  %8831 = vmatprep.subr.mxu0 %v14966_v4  ;;  %v5836_v31 = vpop.f32.mrf.mxu1 }
 0xac1   :  { %6504 = vmatprep.subr.mxu1 %v5574_v23  ;;  %8832 = vmatpush3.msra.mxu0 %v14975_v28  ;;  %v5907_v23 = vpop.f32.mrf.mxu0 }
 0xac2   :  { %6505 = vmatpush1.msra.mxu1 %v5573_v20  ;;  %8833 = vmatprep.subr.mxu0 %v14984_v12  ;;  %v5700_v20 = vld [vmem:[%s16352_s11 + $0x10a8] sm:$0xff] }
 0xac3   :  { %6506 = vmatprep.subr.mxu1 %v5568_v3  ;;  %8834 = vmatpush3.msra.mxu0 %v14993_v32  ;;  %v5699_v3 = vld [vmem:[%s16352_s11 + $0x10a0] sm:$0xff] }
 0xac4   :  { %6507 = vmatpush1.msra.mxu1 %v5567_v29  ;;  %8835 = vmatprep.subr.mxu0 %v15002_v38  ;;  %v5694_v29 = vld [vmem:[%s16352_s11 + $0x1078] sm:$0xff] }
 0xac5   :  { %6508 = vmatprep.subr.mxu1 %v5562_v19  ;;  %8836 = vmatpush3.msra.mxu0 %v15011_v11  ;;  %v5693_v19 = vld [vmem:[%s16352_s11 + $0x1070] sm:$0xff] }
 0xac6   :  { %6509 = vmatpush1.msra.mxu1 %v5561_v46  ;;  %8837 = vmatprep.subr.mxu0 %v15020_v56  ;;  %v5838_v46 = vpop.f32.mrf.mxu1 }
 0xac7   :  { %6510 = vmatprep.subr.mxu1 %v5556_v45  ;;  %8838 = vmatpush3.msra.mxu0 %v15029_v39  ;;  %v5909_v45 = vpop.f32.mrf.mxu0 }
 0xac8   :  { %6511 = vmatpush1.msra.mxu1 %v5555_v35  ;;  %8839 = vmatprep.subr.mxu0 %v15038_v51  ;;  %v5688_v35 = vld [vmem:[%s16352_s11 + $0x1048] sm:$0xff] }
 0xac9   :  { %6512 = vmatprep.subr.mxu1 %v5742_v16  ;;  %8840 = vmatpush3.msra.mxu0 %v15047_v21  ;;  %v5908_v16 = vadd.f32 %v5907_v23, %v5836_v31  ;;  %v5670_v31 = vld [vmem:[%s16352_s11 + $0xfb8] sm:$0xff] }
 0xaca   :  { %6513 = vmatpush2.msra.mxu1 %v5741_v55  ;;  %8841 = vmatprep.subr.mxu0 %v15056_v48  ;;  %v5687_v55 = vld [vmem:[%s16352_s11 + $0x1040] sm:$0xff] }
 0xacb   :  { %6514 = vmatprep.subr.mxu1 %v5736_v49  ;;  %8842 = vmatpush3.msra.mxu0 %v15065_v60  ;;  %v6049_v49 = vpop.f32.mrf.mxu0 }
 0xacc   :  { %6515 = vmatpush2.msra.mxu1 %v5735_v47  ;;  %8843 = vmatprep.subr.mxu0 %v15074_v33  ;;  %v5682_v47 = vld [vmem:[%s16352_s11 + $0x1018] sm:$0xff]  ;;  %v15499_v33 = vld [vmem:[%s16355_s12 + $0x220] sm:$0xff] }
 0xacd   :  { %6516 = vmatprep.subr.mxu1 %v5730_v2  ;;  %8844 = vmatpush3.msra.mxu0 %v15083_v27  ;;  %16824 = vst [vmem:[#allocation30_spill] sm:$0xff] %v15499_v33 }
 0xace   :  { %6517 = vmatpush2.msra.mxu1 %v5729_v24  ;;  %8845 = vmatprep.subr.mxu0 %v15092_v5  ;;  %v5910_v24 = vadd.f32 %v5909_v45, %v5838_v46  ;;  %v5663_v45 = vld [vmem:[%s16352_s11 + $0xf80] sm:$0xff] }
 0xacf   :  { %6518 = vmatprep.subr.mxu1 %v5724_v9  ;;  %8846 = vmatpush3.msra.mxu0 %v15101_v36  ;;  %v5681_v9 = vld [vmem:[%s16352_s11 + $0x1010] sm:$0xff] }
 0xad0   :  { %6519 = vmatpush2.msra.mxu1 %v5723_v42  ;;  %8847 = vmatprep.subr.mxu0 %v15110_v50 }
 0xad1   :  { %6520 = vmatprep.subr.mxu1 %v5718_v30  ;;  %8848 = vmatpush3.msra.mxu0 %v15119_v52  ;;  %v5676_v30 = vld [vmem:[%s16352_s11 + $0xfe8] sm:$0xff] }
 0xad2   :  { %6521 = vmatpush2.msra.mxu1 %v5717_v25  ;;  %8849 = vmatprep.subr.mxu0 %v15128_v63 }
 0xad3   :  { %6522 = vmatprep.subr.mxu1 %v5712_v1  ;;  %8850 = vmatpush3.msra.mxu0 %v15137_v13  ;;  %v5675_v1 = vld [vmem:[%s16352_s11 + $0xfe0] sm:$0xff] }
 0xad4   :  { %6523 = vmatpush2.msra.mxu1 %v5711_v43  ;;  %8851 = vmatprep.subr.mxu0 %v15146_v7  ;;  %v15476_v7 = vld [vmem:[%s16355_s12 + $0x180] sm:$0xff] }
 0xad5   :  { %6524 = vmatprep.subr.mxu1 %v5706_v40  ;;  %8852 = vmatpush3.msra.mxu0 %v15155_v15  ;;  %v15469_v15 = vld [vmem:[%s16355_s12 + $0x108] sm:$0xff] }
 0xad6   :  { %6525 = vmatpush2.msra.mxu1 %v5705_v8  ;;  %8856 = vmatprep.subr.mxu0 %v15164_v14  ;;  %v6051_v8 = vpop.f32.mrf.mxu0 }
 0xad7   :  { %6526 = vmatprep.subr.mxu1 %v5700_v20  ;;  %v5669_v20 = vld [vmem:[%s16352_s11 + $0xfb0] sm:$0xff] }
 0xad8   :  { %6527 = vmatpush2.msra.mxu1 %v5699_v3 }
 0xad9   :  { %6528 = vmatprep.subr.mxu1 %v5694_v29 }
 0xada   :  { %6529 = vmatpush2.msra.mxu1 %v5693_v19  ;;  %v5978_v2 = vpop.f32.mrf.mxu1  ;;  %v5664_v19 = vld [vmem:[%s16352_s11 + $0xf88] sm:$0xff] }
 0xadb   :  { %6530 = vmatprep.subr.mxu1 %v5688_v35  ;;  %v5979_v42 = vadd.f32 %v5978_v2, %v5908_v16 }
 0xadc   :  { %6531 = vmatpush2.msra.mxu1 %v5687_v55  ;;  %v5980_v25 = vpop.f32.mrf.mxu1  ;;  %v5658_v55 = vld [vmem:[%s16352_s11 + $0xf58] sm:$0xff] }
 0xadd   :  { %6532 = vmatprep.subr.mxu1 %v5682_v47  ;;  %v15199_v43 = vadd.f32 %v6049_v49, %v5979_v42  ;;  %v5981_v40 = vadd.f32 %v5980_v25, %v5910_v24  ;;  %v5657_v49 = vld [vmem:[%s16352_s11 + $0xf50] sm:$0xff]  ;;  %v5652_v24 = vld [vmem:[%s16352_s11 + $0xf28] sm:$0xff] }
 0xade   :  { %6533 = vmatpush2.msra.mxu1 %v5681_v9  ;;  %v5651_v9 = vld [vmem:[%s16352_s11 + $0xf20] sm:$0xff] }
 0xadf   :  { %16811 = vst [vmem:[#allocation5_spill] sm:$0xff] %v15199_v43  ;;  %6534 = vmatprep.subr.mxu1 %v5676_v30  ;;  %v6622_v23 = vsel %vm75_vm0, %v15199_v43, 0.0  ;;  %v15209_v3 = vadd.f32 %v6051_v8, %v5981_v40  ;;  %v15450_v43 = vld [vmem:[%s16355_s12 + $0x110] sm:$0xff] }
 0xae0   :  { %6535 = vmatpush2.msra.mxu1 %v5675_v1  ;;  %v6623_v29 = vrot.slane %v6622_v23, 4 }
 0xae1   :  { %16812 = vst [vmem:[#allocation26_spill] sm:$0xff] %v15209_v3  ;;  %6536 = vmatprep.subr.mxu1 %v5670_v31  ;;  %v6629_v46 = vsel %vm75_vm0, %v15209_v3, 0.0  ;;  %v15437_v3 = vld [vmem:[%s16355_s12 + $0x238] sm:$0xff] }
 0xae2   :  { %v6624_v35 = vadd.f32 %v6623_v29, %v6622_v23  ;;  %6537 = vmatpush2.msra.mxu1 %v5669_v20  ;;  %v6630_v16 = vrot.slane %v6629_v46, 4  ;;  %v15236_v23 = vld [vmem:[%s16355_s12 + $0x178] sm:$0xff]  ;;  %v15241_v20 = vld [vmem:[%s16355_s12 + $0x1f0] sm:$0xff]  ;;  %v15252_v29 = vld [vmem:[%s16355_s12 + $0x1e8] sm:$0xff]  ;;  %16821 = vst [vmem:[#allocation73_spill] sm:$0xff] %v15437_v3 }
 0xae3   :  { %6538 = vmatprep.subr.mxu1 %v5664_v19  ;;  %v15258_v19 = vld [vmem:[%s16355_s12 + $0x168] sm:$0xff] }
 0xae4   :  { %v6625_v47 = vrot.slane %v6624_v35, 2  ;;  %v6631_v2 = vadd.f32 %v6630_v16, %v6629_v46  ;;  %6539 = vmatpush2.msra.mxu1 %v5663_v45  ;;  %v15264_v46 = vld [vmem:[%s16355_s12 + $0x1e0] sm:$0xff]  ;;  %v15282_v16 = vld [vmem:[%s16355_s12 + $0x158] sm:$0xff] }
 0xae5   :  { %6540 = vmatprep.subr.mxu1 %v5658_v55  ;;  %v15270_v45 = vld [vmem:[%s16355_s12 + $0x160] sm:$0xff]  ;;  %v15288_v55 = vld [vmem:[%s16355_s12 + $0x1d0] sm:$0xff] }
 0xae6   :  { %v6626_v42 = vadd.f32 %v6625_v47, %v6624_v35  ;;  %v6632_v30 = vrot.slane %v6631_v2, 2  ;;  %6541 = vmatpush2.msra.mxu1 %v5657_v49  ;;  %v15276_v35 = vld [vmem:[%s16355_s12 + $0x1d8] sm:$0xff]  ;;  %v15294_v49 = vld [vmem:[%s16355_s12 + $0x150] sm:$0xff] }
 0xae7   :  { %6542 = vmatprep.subr.mxu1 %v5652_v24  ;;  %v15299_v47 = vld [vmem:[%s16355_s12 + $0x278] sm:$0xff]  ;;  %v15310_v24 = vld [vmem:[%s16355_s12 + $0x1c8] sm:$0xff]  ;;  %v6120_v13 = vpop.f32.mrf.mxu0 }
 0xae8   :  { %6543 = vmatpush2.msra.mxu1 %v5651_v9  ;;  %v6633_v25 = vadd.f32 %v6632_v30, %v6631_v2  ;;  %v6627_v1 = vrot.slane %v6626_v42, 1  ;;  %16813 = vst [vmem:[#allocation6_spill] sm:$0xff] %v15299_v47  ;;  %v15304_v2 = vld [vmem:[%s16355_s12 + $0x270] sm:$0xff]  ;;  %v15317_v9 = vld [vmem:[%s16355_s12 + $0x148] sm:$0xff]  ;;  %v15329_v30 = vld [vmem:[%s16355_s12 + $0x1c0] sm:$0xff] }
 0xae9   :  { %6545 = vmatmul.mubr.f32.vlgmr.msra.gmra.mxu1 %v13965_v0  ;;  %6898 = vmatprep.subr.mxu1 %v16570_v10  ;;  %v15246_v0 = vld [vmem:[%s16355_s12 + $0x170] sm:$0xff]  ;;  %16814 = vst [vmem:[#allocation27_spill] sm:$0xff] %v15304_v2  ;;  %v6122_v52 = vpop.f32.mrf.mxu0 }
 0xaea   :  { %v6634_v40 = vrot.slane %v6633_v25, 1  ;;  %v6628_v31 = vadd.f32 %v6627_v1, %v6626_v42  ;;  %6899 = vmatpush1.msra.mxu1 %v15299_v47  ;;  %v15323_v42 = vld [vmem:[%s16355_s12 + $0x268] sm:$0xff]  ;;  %v15342_v1 = vld [vmem:[%s16355_s12 + $0x260] sm:$0xff]  ;;  %v15431_v47 = vld [vmem:[%s16355_s12 + $0x118] sm:$0xff] }
 0xaeb   :  { %6900 = vmatprep.subr.mxu1 %v16570_v10  ;;  %16815 = vst [vmem:[#allocation7_spill] sm:$0xff] %v15323_v42  ;;  %16816 = vst [vmem:[#allocation28_spill] sm:$0xff] %v15342_v1 }
 0xaec   :  { %v6635_v8 = vadd.f32 %v6634_v40, %v6633_v25  ;;  %6901 = vmatpush1.msra.mxu1 %v15304_v2  ;;  %v15336_v25 = vld [vmem:[%s16355_s12 + $0x140] sm:$0xff]  ;;  %v15348_v40 = vld [vmem:[%s16355_s12 + $0x1b8] sm:$0xff] }
 0xaed   :  { %6902 = vmatprep.subr.mxu1 %v16570_v10  ;;  %v15418_v2 = vld [vmem:[%s16355_s12 + $0x240] sm:$0xff] }
 0xaee   :  { %6822 = vmatprep.mubr.f32.mxu0 %v6635_v8  ;;  %6903 = vmatpush1.msra.mxu1 %v15323_v42  ;;  %v15355_v8 = vld [vmem:[%s16355_s12 + $0x138] sm:$0xff]  ;;  %v15412_v42 = vld [vmem:[%s16355_s12 + $0x120] sm:$0xff]  ;;  %16820 = vst [vmem:[#allocation48_spill] sm:$0xff] %v15418_v2 }
 0xaef   :  { %6823 = vmatmul.mubr.f32.vlgmr.msra.gmra.mxu0 %v6628_v31  ;;  %6904 = vmatprep.subr.mxu1 %v16570_v10  ;;  %v15361_v31 = vld [vmem:[%s16355_s12 + $0x258] sm:$0xff] }
 0xaf0   :  { %8857 = vmatpush3.msra.mxu0 %v15236_v23  ;;  %16817 = vst [vmem:[#allocation16_spill] sm:$0xff] %v15361_v31  ;;  %6905 = vmatpush1.msra.mxu1 %v15342_v1  ;;  %v15399_v1 = vld [vmem:[%s16355_s12 + $0x248] sm:$0xff] }
 0xaf1   :  { %8858 = vmatprep.subr.mxu0 %v15241_v20  ;;  %6906 = vmatprep.subr.mxu1 %v16570_v10  ;;  %16819 = vst [vmem:[#allocation15_spill] sm:$0xff] %v15399_v1 }
 0xaf2   :  { %8859 = vmatpush3.msra.mxu0 %v15246_v0  ;;  %6907 = vmatpush1.msra.mxu1 %v15361_v31  ;;  %v15405_v31 = vld [vmem:[%s16355_s12 + $0x1a0] sm:$0xff] }
 0xaf3   :  { %8860 = vmatprep.subr.mxu0 %v15252_v29  ;;  %6908 = vmatprep.subr.mxu1 %v16570_v10 }
 0xaf4   :  { %8861 = vmatpush3.msra.mxu0 %v15258_v19  ;;  %6909 = vmatpush1.msra.mxu1 %v15380_v53  ;;  %v15424_v53 = vld [vmem:[%s16355_s12 + $0x198] sm:$0xff] }
 0xaf5   :  { %8862 = vmatprep.subr.mxu0 %v15264_v46  ;;  %6910 = vmatprep.subr.mxu1 %v16570_v10 }
 0xaf6   :  { %8863 = vmatpush3.msra.mxu0 %v15270_v45  ;;  %6911 = vmatpush1.msra.mxu1 %v15399_v1  ;;  %v15443_v1 = vld [vmem:[%s16355_s12 + $0x190] sm:$0xff] }
 0xaf7   :  { %8864 = vmatprep.subr.mxu0 %v15276_v35  ;;  %6912 = vmatprep.subr.mxu1 %v16570_v10 }
 0xaf8   :  { %8865 = vmatpush3.msra.mxu0 %v15282_v16  ;;  %6913 = vmatpush1.msra.mxu1 %v15418_v2  ;;  %v15462_v2 = vld [vmem:[%s16355_s12 + $0x188] sm:$0xff] }
 0xaf9   :  { %8866 = vmatprep.subr.mxu0 %v15288_v55  ;;  %6914 = vmatprep.subr.mxu1 %v16570_v10 }
 0xafa   :  { %8867 = vmatpush3.msra.mxu0 %v15294_v49  ;;  %6915 = vmatpush1.msra.mxu1 %v15437_v3  ;;  %v15483_v3 = vld [vmem:[%s16355_s12 + $0x100] sm:$0xff] }
 0xafb   :  { %8868 = vmatprep.subr.mxu0 %v15310_v24  ;;  %6916 = vmatprep.subr.mxu1 %v16570_v10 }
 0xafc   :  { %8869 = vmatpush3.msra.mxu0 %v15317_v9  ;;  %6917 = vmatpush1.msra.mxu1 %v15456_v22  ;;  %v15492_v22 = vld [vmem:[%s16355_s12 + $0x228] sm:$0xff] }
 0xafd   :  { %8870 = vmatprep.subr.mxu0 %v15329_v30  ;;  %6918 = vmatprep.subr.mxu1 %v16570_v10  ;;  %16823 = vst [vmem:[#allocation29_spill] sm:$0xff] %v15492_v22 }
 0xafe   :  { %8871 = vmatpush3.msra.mxu0 %v15336_v25  ;;  %6919 = vmatpush1.msra.mxu1 %v15492_v22 }
 0xaff   :  { %8872 = vmatprep.subr.mxu0 %v15348_v40  ;;  %6920 = vmatprep.subr.mxu1 %v16570_v10 }
 0xb00   :  { %8873 = vmatpush3.msra.mxu0 %v15355_v8  ;;  %6921 = vmatpush1.msra.mxu1 %v15499_v33 }
 0xb01   :  { %8874 = vmatprep.subr.mxu0 %v15367_v54  ;;  %6922 = vmatprep.subr.mxu1 %v16570_v10 }
 0xb02   :  { %8875 = vmatpush3.msra.mxu0 %v15374_v57 }
 0xb03   :  { %8876 = vmatprep.subr.mxu0 %v15386_v44 }
 0xb04   :  { %8877 = vmatpush3.msra.mxu0 %v15393_v59 }
 0xb05   :  { %8878 = vmatprep.subr.mxu0 %v15405_v31 }
 0xb06   :  { %8879 = vmatpush3.msra.mxu0 %v15412_v42 }
 0xb07   :  { %8880 = vmatprep.subr.mxu0 %v15424_v53 }
 0xb08   :  { %8881 = vmatpush3.msra.mxu0 %v15431_v47 }
 0xb09   :  { %8882 = vmatprep.subr.mxu0 %v15443_v1 }
 0xb0a   :  { %8883 = vmatpush3.msra.mxu0 %v15450_v43 }
 0xb0b   :  { %8884 = vmatprep.subr.mxu0 %v15462_v2 }
 0xb0c   :  { %8885 = vmatpush3.msra.mxu0 %v15469_v15 }
 0xb0d   :  { %8886 = vmatprep.subr.mxu0 %v15476_v7 }
 0xb0e   :  { %8887 = vmatpush3.msra.mxu0 %v15483_v3 }
 0xb1c   :  { %v6191_v63 = vpop.f32.mrf.mxu1 }
 0xb1d   :  { %v6192_v36 = vadd.f32 %v6191_v63, %v6120_v13  ;;  %v15506_v63 = vld [vmem:[%s16355_s12 + $0x218] sm:$0xff] }
 0xb1e   :  { %v6193_v50 = vpop.f32.mrf.mxu1  ;;  %16825 = vst [vmem:[#allocation31_spill] sm:$0xff] %v15506_v63  ;;  %6923 = vmatpush1.msra.mxu1 %v15506_v63  ;;  %v15542_v63 = vld [vmem:[%s16355_s12 + $0x2a0] sm:$0xf] }
 0xb1f   :  { %v6194_v60 = vadd.f32 %v6193_v50, %v6122_v52  ;;  %6924 = vmatprep.subr.mxu1 %v16570_v10  ;;  %16831 = vst [vmem:[#allocation41_spill] sm:$0xff] %v15542_v63 }
 0xb25   :  { %v6333_v5 = vpop.f32.mrf.mxu1 }
 0xb27   :  { %v6335_v51 = vpop.f32.mrf.mxu1 }
 0xb2a   :  { %v6262_v27 = vpop.f32.mrf.mxu0 }
 0xb2b   :  { %v6263_v48 = vadd.f32 %v6262_v27, %v6192_v36  ;;  %v15515_v27 = vld [vmem:[%s16355_s12 + $0x210] sm:$0xff] }
 0xb2c   :  { %v6264_v21 = vpop.f32.mrf.mxu0  ;;  %16827 = vst [vmem:[#allocation33_spill] sm:$0xff] %v15515_v27  ;;  %6925 = vmatpush1.msra.mxu1 %v15515_v27 }
 0xb2d   :  { %v15508_v13 = vadd.f32 %v6333_v5, %v6263_v48  ;;  %v6265_v22 = vadd.f32 %v6264_v21, %v6194_v60  ;;  %6926 = vmatprep.subr.mxu1 %v16570_v10  ;;  %v15526_v21 = vld [vmem:[%s16355_s12 + $0x208] sm:$0xff] }
 0xb2e   :  { %16829 = vst [vmem:[#allocation37_spill] sm:$0xff] %v15526_v21  ;;  %6927 = vmatpush1.msra.mxu1 %v15526_v21 }
 0xb2f   :  { %16826 = vst [vmem:[#allocation32_spill] sm:$0xff] %v15508_v13  ;;  %v6636_v36 = vsel %vm75_vm0, %v15508_v13, 0.0  ;;  %v15519_v50 = vadd.f32 %v6335_v51, %v6265_v22  ;;  %6928 = vmatprep.subr.mxu1 %v16570_v10  ;;  %v15535_v22 = vld [vmem:[%s16355_s12 + $0x200] sm:$0xff] }
 0xb30   :  { %v6637_v48 = vrot.slane %v6636_v36, 4  ;;  %16830 = vst [vmem:[#allocation39_spill] sm:$0xff] %v15535_v22  ;;  %6929 = vmatpush1.msra.mxu1 %v15535_v22  ;;  %v15550_v22 = vld [vmem:[%s16355_s12 + $0x298] sm:$0xff] }
 0xb31   :  { %16828 = vst [vmem:[#allocation35_spill] sm:$0xff] %v15519_v50  ;;  %v6643_v60 = vsel %vm75_vm0, %v15519_v50, 0.0  ;;  %6952 = vmatprep.subr.mxu1 %v16570_v10  ;;  %16832 = vst [vmem:[#allocation43_spill] sm:$0xff] %v15550_v22 }
 0xb32   :  { %v6638_v5 = vadd.f32 %v6637_v48, %v6636_v36  ;;  %v6644_v52 = vrot.slane %v6643_v60, 4  ;;  %8238 = vmatpush2.msk.msra.mxu1 %vm6754_vm8, %v15542_v63 }
 0xb33   :  { %6954 = vmatprep.subr.mxu1 %v16570_v10 }
 0xb34   :  { %v6639_v51 = vrot.slane %v6638_v5, 2  ;;  %v6645_v27 = vadd.f32 %v6644_v52, %v6643_v60  ;;  %6955 = vmatpush2.msra.mxu1 %v15550_v22  ;;  %v15556_v60 = vld [vmem:[%s16355_s12 + $0x290] sm:$0xff]  ;;  %v15569_v22 = vld [vmem:[%s16355_s12 + $0x280] sm:$0xff] }
 0xb35   :  { %16833 = vst [vmem:[#allocation9_spill] sm:$0xff] %v15556_v60  ;;  %6956 = vmatprep.subr.mxu1 %v16570_v10  ;;  %16835 = vst [vmem:[#allocation49_spill] sm:$0xff] %v15569_v22 }
 0xb36   :  { %v6640_v36 = vadd.f32 %v6639_v51, %v6638_v5  ;;  %v6646_v48 = vrot.slane %v6645_v27, 2  ;;  %v15562_v5 = vld [vmem:[%s16355_s12 + $0x288] sm:$0xff]  ;;  %6957 = vmatpush2.msra.mxu1 %v15556_v60 }
 0xb37   :  { %16834 = vst [vmem:[#allocation47_spill] sm:$0xff] %v15562_v5  ;;  %6958 = vmatprep.subr.mxu1 %v16570_v10 }
 0xb38   :  { %v6647_v52 = vadd.f32 %v6646_v48, %v6645_v27  ;;  %v6641_v51 = vrot.slane %v6640_v36, 1  ;;  %6959 = vmatpush2.msra.mxu1 %v15562_v5 }
 0xb39   :  { %6960 = vmatprep.subr.mxu1 %v16570_v10 }
 0xb3a   :  { %v6648_v63 = vrot.slane %v6647_v52, 1  ;;  %v6642_v48 = vadd.f32 %v6641_v51, %v6640_v36  ;;  %6961 = vmatpush2.msra.mxu1 %v15569_v22 }
 0xb3b   :  { %8926 = vmatprep.subr.mxu1 %v15164_v14 }
 0xb3c   :  { %v6649_v27 = vadd.f32 %v6648_v63, %v6647_v52 }
 0xb3e   :  { %6892 = vmatprep.mubr.f32.mxu0 %v6649_v27 }
 0xb3f   :  { %6893 = vmatmul.mubr.f32.vlgmr.msra.gmra.mxu0 %v6642_v48 }
 0xb40   :  { %7059 = vmatprep.mubr.f32.mxu0 %v16570_v10 }
 0xb67   :  { %v6404_v60 = vpop.f32.mrf.mxu1 }
 0xb69   :  { %v6406_v33 = vpop.f32.mrf.mxu1 }
 0xb6c   :  { %v6475_v21 = vpop.f32.mrf.mxu0 }
 0xb6d   :  { %v6476_v13 = vadd.f32 %v6475_v21, %v6404_v60 }
 0xb6e   :  { %v6477_v50 = vpop.f32.mrf.mxu0 }
 0xb6f   :  { %v6478_v5 = vadd.f32 %v6477_v50, %v6406_v33 }
 0xb75   :  { %v6617_v39 = vpop.f32.mrf.mxu0 }
 0xb77   :  { %v6619_v51 = vpop.f32.mrf.mxu0 }
 0xba9   :  { %v6546_v56 = vpop.f32.mrf.mxu1 }
 0xbaa   :  { %v6547_v63 = vadd.f32 %v6546_v56, %v6476_v13 }
 0xbab   :  { %v6548_v52 = vpop.f32.mrf.mxu1 }
 0xbac   :  { %v15576_v11 = vadd.f32 %v6617_v39, %v6547_v63  ;;  %v6549_v36 = vadd.f32 %v6548_v52, %v6478_v5 }
 0xbae   :  { %v6650_v14 = vsel %vm75_vm0, %v15576_v11, 0.0  ;;  %v15580_v27 = vadd.f32 %v6619_v51, %v6549_v36 }
 0xbaf   :  { %v6651_v48 = vrot.slane %v6650_v14, 4 }
 0xbb0   :  { %v6658_v22 = vsel %vm6657_vm9, %v15580_v27, 0.0 }
 0xbb1   :  { %v6652_v21 = vadd.f32 %v6651_v48, %v6650_v14  ;;  %v6659_v60 = vrot.slane %v6658_v22, 4  ;;  %v16857_v48 = vld [vmem:[#allocation32_spill] sm:$0xff] }
 0xbb3   :  { %v6653_v38 = vrot.slane %v6652_v21, 2  ;;  %v6660_v33 = vadd.f32 %v6659_v60, %v6658_v22 }
 0xbb5   :  { %v6654_v56 = vadd.f32 %v6653_v38, %v6652_v21  ;;  %v6661_v13 = vrot.slane %v6660_v33, 2 }
 0xbb7   :  { %v6662_v39 = vadd.f32 %v6661_v13, %v6660_v33  ;;  %v6655_v50 = vrot.slane %v6654_v56, 1 }
 0xbb9   :  { %v6663_v5 = vrot.slane %v6662_v39, 1  ;;  %v6656_v52 = vadd.f32 %v6655_v50, %v6654_v56  ;;  %v16858_v50 = vld [vmem:[#allocation35_spill] sm:$0xff] }
 0xbbb   :  { %v6664_v63 = vadd.f32 %v6663_v5, %v6662_v39 }
 0xbbd   :  { %8239 = vmatprep.mubr.msk.f32.mxu1 %vm6750_vm10, %v6664_v63 }
 0xbbe   :  { %6963 = vmatmul.mubr.f32.vlgmr.msra.gmra.mxu1 %v6656_v52 }
 0xbbf   :  { %8927 = vmatpush3.msra.mxu1 %v15236_v23 }
 0xbc0   :  { %8928 = vmatprep.subr.mxu1 %v15241_v20 }
 0xbc1   :  { %8929 = vmatpush3.msra.mxu1 %v15246_v0  ;;  %v15641_v0 = vld [vmem:[%s16356_s13 + $0x10] sm:$0xff] }
 0xbc2   :  { %8930 = vmatprep.subr.mxu1 %v15252_v29 }
 0xbc3   :  { %8931 = vmatpush3.msra.mxu1 %v15258_v19 }
 0xbc4   :  { %8932 = vmatprep.subr.mxu1 %v15264_v46 }
 0xbc5   :  { %8933 = vmatpush3.msra.mxu1 %v15270_v45  ;;  %v15645_v45 = vcombine.high %v15641_v0, %v15641_v0 }
 0xbc6   :  { %8934 = vmatprep.subr.mxu1 %v15276_v35  ;;  %v16850_v35 = vld [vmem:[#allocation46_spill] sm:$0xff] }
 0xbc7   :  { %8935 = vmatpush3.msra.mxu1 %v15282_v16  ;;  %v16851_v16 = vld [vmem:[#allocation24_spill] sm:$0xff] }
 0xbc8   :  { %8936 = vmatprep.subr.mxu1 %v15288_v55  ;;  %v16852_v55 = vld [vmem:[#allocation4_spill] sm:$0xff] }
 0xbc9   :  { %8937 = vmatpush3.msra.mxu1 %v15294_v49  ;;  %v16853_v49 = vld [vmem:[#allocation25_spill] sm:$0xff] }
 0xbca   :  { %8938 = vmatprep.subr.mxu1 %v15310_v24 }
 0xbcb   :  { %8939 = vmatpush3.msra.mxu1 %v15317_v9 }
 0xbcc   :  { %8940 = vmatprep.subr.mxu1 %v15329_v30 }
 0xbcd   :  { %8941 = vmatpush3.msra.mxu1 %v15336_v25 }
 0xbce   :  { %8942 = vmatprep.subr.mxu1 %v15348_v40 }
 0xbcf   :  { %8943 = vmatpush3.msra.mxu1 %v15355_v8  ;;  %v16856_v8 = vld [vmem:[#allocation26_spill] sm:$0xff] }
 0xbd0   :  { %8944 = vmatprep.subr.mxu1 %v15367_v54  ;;  %v8853_v54 = vpop.f32.mrf.mxu0 }
 0xbd1   :  { %8945 = vmatpush3.msra.mxu1 %v15374_v57 }
 0xbd2   :  { %8946 = vmatprep.subr.mxu1 %v15386_v44  ;;  %v15630_v44 = vld [vmem:[%s16356_s13 + $0x8] sm:$0xff]  ;;  %v8854_v38 = vpop.f32.mrf.mxu0 }
 0xbd3   :  { %8947 = vmatpush3.msra.mxu1 %v15393_v59  ;;  %v15619_v59 = vld [vmem:[%s16356_s13] sm:$0xff]  ;;  %v15634_v57 = vcombine.high %v15630_v44, %v15630_v44 }
 0xbd4   :  { %8948 = vmatprep.subr.mxu1 %v15405_v31 }
 0xbd5   :  { %8949 = vmatpush3.msra.mxu1 %v15412_v42  ;;  %v16855_v42 = vld [vmem:[#allocation5_spill] sm:$0xff] }
 0xbd6   :  { %8950 = vmatprep.subr.mxu1 %v15424_v53  ;;  %v6976_v53 = vcombine.high %v15619_v59, %v15619_v59 }
 0xbd7   :  { %8951 = vmatpush3.msra.mxu1 %v15431_v47 }
 0xbd8   :  { %8952 = vmatprep.subr.mxu1 %v15443_v1  ;;  %8240 = vmatprep.subr.msk.mxu0 %vm6754_vm8, %v6976_v53 }
 0xbd9   :  { %8953 = vmatpush3.msra.mxu1 %v15450_v43  ;;  %8241 = vmatpush1.msk.msra.mxu0 %vm6754_vm8, %v15619_v59 }
 0xbda   :  { %8954 = vmatprep.subr.mxu1 %v15462_v2  ;;  %8243 = vmatprep.subr.msk.mxu0 %vm6754_vm8, %v15634_v57  ;;  %v16854_v2 = vld [vmem:[#allocation3_spill] sm:$0xff] }
 0xbdb   :  { %8955 = vmatpush3.msra.mxu1 %v15469_v15 }
 0xbdc   :  { %8956 = vmatprep.subr.mxu1 %v15476_v7 }
 0xbdd   :  { %8957 = vmatpush3.msra.mxu1 %v15483_v3  ;;  %v8855_v3 = vadd.f32 %v8854_v38, %v8853_v54 }
 0xbde   :  { %8251 = vmatprep.subr.msk.mxu1 %vm6754_vm8, %v6976_v53 }
 0xbff   :  { %v8888_v7 = vpop.f32.mrf.mxu0 }
 0xc01   :  { %v8889_v15 = vpop.f32.mrf.mxu0 }
 0xc02   :  { %v8890_v43 = vadd.f32 %v8889_v15, %v8888_v7 }
 0xc04   :  { %v6895_v23 = vadd.f32 %v8890_v43, %v8855_v3 }
 0xc7e   :  { %v6964_v20 = vpop.f32.mrf.mxu1 }
 0xc7f   :  { %v6965_v29 = vadd.f32 %v6964_v20, %v6895_v23 }
 0xc80   :  { %v6966_v19 = vpop.f32.mrf.mxu1 }
 0xc81   :  { %v6969_v46 = vmul.f32 0.00295858, %v6965_v29 }
 0xc83   :  { %8242 = vmatmul.mubr.msk.f32.vlgmr.msra.gmra.mxu0 %vm6979_vm11, %v6969_v46 }
 0xc84   :  { %8244 = vmatpush1.msk.msra.mxu0 %vm6754_vm8, %v15630_v44  ;;  %7130 = vmatprep.mubr.f32.mxu0 %v16570_v10 }
 0xc85   :  { %8246 = vmatprep.subr.msk.mxu0 %vm6754_vm8, %v15645_v45 }
 0xc87   :  { %8245 = vmatmul.mubr.msk.f32.vlgmr.msra.gmra.mxu0 %vm6979_vm11, %v6969_v46 }
 0xc88   :  { %8247 = vmatpush1.msk.msra.mxu0 %vm6754_vm8, %v15641_v0  ;;  %7201 = vmatprep.mubr.f32.mxu0 %v16570_v10 }
 0xc89   :  { %8891 = vmatprep.subr.mxu0 %v14875_v61  ;;  %v16836_v61 = vld [vmem:[#allocation34_spill] sm:$0xff] }
 0xc8b   :  { %8248 = vmatmul.mubr.msk.f32.vlgmr.msra.gmra.mxu0 %vm6979_vm11, %v6969_v46 }
 0xc8c   :  { %8892 = vmatpush3.msra.mxu0 %v14884_v41  ;;  %v16837_v41 = vld [vmem:[#allocation17_spill] sm:$0xff] }
 0xc8d   :  { %8893 = vmatprep.subr.mxu0 %v14894_v18  ;;  %v16838_v18 = vld [vmem:[#allocation36_spill] sm:$0xff] }
 0xc8e   :  { %8894 = vmatpush3.msra.mxu0 %v14903_v6  ;;  %v16839_v6 = vld [vmem:[#allocation18_spill] sm:$0xff] }
 0xc8f   :  { %8895 = vmatprep.subr.mxu0 %v14912_v58  ;;  %v16840_v58 = vld [vmem:[#allocation38_spill] sm:$0xff] }
 0xc90   :  { %8896 = vmatpush3.msra.mxu0 %v14921_v34  ;;  %v16841_v34 = vld [vmem:[#allocation19_spill] sm:$0xff] }
 0xc91   :  { %8897 = vmatprep.subr.mxu0 %v14930_v26  ;;  %v16842_v26 = vld [vmem:[#allocation40_spill] sm:$0xff] }
 0xc92   :  { %8898 = vmatpush3.msra.mxu0 %v14939_v37  ;;  %v16843_v37 = vld [vmem:[#allocation20_spill] sm:$0xff] }
 0xc93   :  { %8899 = vmatprep.subr.mxu0 %v14948_v62  ;;  %v16844_v62 = vld [vmem:[#allocation42_spill] sm:$0xff] }
 0xc94   :  { %8900 = vmatpush3.msra.mxu0 %v14957_v17  ;;  %v16845_v17 = vld [vmem:[#allocation21_spill] sm:$0xff] }
 0xc95   :  { %8901 = vmatprep.subr.mxu0 %v14966_v4  ;;  %v16846_v4 = vld [vmem:[#allocation44_spill] sm:$0xff] }
 0xc96   :  { %8902 = vmatpush3.msra.mxu0 %v14975_v28  ;;  %v16847_v28 = vld [vmem:[#allocation22_spill] sm:$0xff] }
 0xc97   :  { %8903 = vmatprep.subr.mxu0 %v14984_v12  ;;  %v16848_v12 = vld [vmem:[#allocation45_spill] sm:$0xff] }
 0xc98   :  { %8904 = vmatpush3.msra.mxu0 %v14993_v32  ;;  %v16849_v32 = vld [vmem:[#allocation23_spill] sm:$0xff] }
 0xc99   :  { %8905 = vmatprep.subr.mxu0 %v16836_v61 }
 0xc9a   :  { %8906 = vmatpush3.msra.mxu0 %v16837_v41 }
 0xc9b   :  { %8907 = vmatprep.subr.mxu0 %v16838_v18 }
 0xc9c   :  { %8908 = vmatpush3.msra.mxu0 %v16839_v6 }
 0xc9d   :  { %8909 = vmatprep.subr.mxu0 %v16840_v58 }
 0xc9e   :  { %8910 = vmatpush3.msra.mxu0 %v16841_v34 }
 0xc9f   :  { %8911 = vmatprep.subr.mxu0 %v16842_v26 }
 0xca0   :  { %8912 = vmatpush3.msra.mxu0 %v16843_v37 }
 0xca1   :  { %8913 = vmatprep.subr.mxu0 %v16844_v62 }
 0xca2   :  { %8914 = vmatpush3.msra.mxu0 %v16845_v17 }
 0xca3   :  { %8915 = vmatprep.subr.mxu0 %v16846_v4 }
 0xca4   :  { %8916 = vmatpush3.msra.mxu0 %v16847_v28 }
 0xca5   :  { %8917 = vmatprep.subr.mxu0 %v16848_v12 }
 0xca6   :  { %8918 = vmatpush3.msra.mxu0 %v16849_v32 }
 0xca7   :  { %8919 = vmatprep.subr.mxu0 %v16850_v35 }
 0xca8   :  { %8920 = vmatpush3.msra.mxu0 %v16851_v16 }
 0xca9   :  { %8921 = vmatprep.subr.mxu0 %v16852_v55 }
 0xcaa   :  { %8922 = vmatpush3.msra.mxu0 %v16853_v49  ;;  %v16859_v49 = vld [vmem:[#allocation6_spill] sm:$0xff] }
 0xcab   :  { %7429 = vmatprep.subr.mxu0 %v16570_v10 }
 0xd43   :  { %v7061_v47 = vpop.f32.mrf.mxu0 }
 0xd44   :  { %v7211_v24 = vrot.slane %v7061_v47, %v16854_v2 }
 0xd45   :  { %v7063_v9 = vpop.f32.mrf.mxu0 }
 0xd46   :  { %v15693_v30 = vsub.f32 %v16855_v42, %v7211_v24  ;;  %v7215_v25 = vrot.slane %v7063_v9, %v16854_v2  ;;  %v16860_v42 = vld [vmem:[#allocation27_spill] sm:$0xff] }
 0xd47   :  { %v7132_v1 = vpop.f32.mrf.mxu0 }
 0xd48   :  { %v7238_v40 = vmul.f32 %v15693_v30, %v15693_v30  ;;  %v15699_v31 = vsub.f32 %v16856_v8, %v7215_v25  ;;  %v7219_v22 = vrot.slane %v7132_v1, %v16854_v2 }
 0xd49   :  { %v7134_v36 = vpop.f32.mrf.mxu0 }
 0xd4a   :  { %v7244_v51 = vsel %vm75_vm0, %v7238_v40, 0.0  ;;  %v7239_v14 = vmul.f32 %v15699_v31, %v15699_v31  ;;  %v15706_v21 = vsub.f32 %v16857_v48, %v7219_v22  ;;  %v7223_v60 = vrot.slane %v7134_v36, %v16854_v2  ;;  %v16861_v40 = vld [vmem:[#allocation7_spill] sm:$0xff]  ;;  %v16862_v22 = vld [vmem:[#allocation28_spill] sm:$0xff] }
 0xd4b   :  { %v7245_v33 = vrot.slane %v7244_v51, 4  ;;  %v7203_v56 = vpop.f32.mrf.mxu0  ;;  %v16865_v48 = vld [vmem:[#allocation15_spill] sm:$0xff] }
 0xd4c   :  { %v7251_v13 = vsel %vm75_vm0, %v7239_v14, 0.0  ;;  %v7240_v39 = vmul.f32 %v15706_v21, %v15706_v21  ;;  %v15713_v5 = vsub.f32 %v16858_v50, %v7223_v60  ;;  %v7227_v1 = vrot.slane %v7203_v56, %v16854_v2  ;;  %v16866_v60 = vld [vmem:[#allocation48_spill] sm:$0xff] }
 0xd4d   :  { %v7246_v63 = vadd.f32 %v7245_v33, %v7244_v51  ;;  %v7252_v52 = vrot.slane %v7251_v13, 4  ;;  %v7205_v53 = vpop.f32.mrf.mxu0  ;;  %v16863_v51 = vld [vmem:[#allocation16_spill] sm:$0xff] }
 0xd4e   :  { %v7258_v54 = vsel %vm75_vm0, %v7240_v39, 0.0  ;;  %v7241_v38 = vmul.f32 %v15713_v5, %v15713_v5  ;;  %v7231_v7 = vrot.slane %v7205_v53, %v16854_v2  ;;  %v15742_v36 = vsub.f32 %v15576_v11, %v7227_v1  ;;  %v16868_v33 = vld [vmem:[#allocation72_spill] sm:$0xff]  ;;  %v16870_v39 = vld [vmem:[#allocation30_spill] sm:$0xff]  ;;  %v7859_v1 = vld [vmem:[%s16357_s16 + $0x238] sm:$0xff] }
 0xd4f   :  { %v7247_v15 = vrot.slane %v7246_v63, 2  ;;  %v7253_v43 = vadd.f32 %v7252_v52, %v7251_v13  ;;  %v7259_v3 = vrot.slane %v7258_v54, 4  ;;  %v16869_v13 = vld [vmem:[#allocation29_spill] sm:$0xff] }
 0xd50   :  { %v7265_v23 = vsel %vm75_vm0, %v7241_v38, 0.0  ;;  %v15721_v20 = vsub.f32 %v15580_v27, %v7231_v7  ;;  %v7242_v14 = vmul.f32 %v15742_v36, %v15742_v36  ;;  %v16872_v52 = vld [vmem:[#allocation33_spill] sm:$0xff]  ;;  %v16874_v38 = vld [vmem:[#allocation39_spill] sm:$0xff] }
 0xd51   :  { %v7260_v29 = vadd.f32 %v7259_v3, %v7258_v54  ;;  %v7266_v19 = vrot.slane %v7265_v23, 4  ;;  %v7254_v46 = vrot.slane %v7253_v43, 2  ;;  %v7248_v61 = vadd.f32 %v7247_v15, %v7246_v63  ;;  %v16871_v63 = vld [vmem:[#allocation31_spill] sm:$0xff]  ;;  %v16873_v54 = vld [vmem:[#allocation37_spill] sm:$0xff] }
 0xd52   :  { %v7243_v41 = vmul.f32 %v15721_v20, %v15721_v20  ;;  %v7272_v11 = vsel %vm75_vm0, %v7242_v14, 0.0  ;;  %v16875_v15 = vld [vmem:[#allocation41_spill] sm:$0xff]  ;;  %v7853_v14 = vld [vmem:[%s16357_s16 + $0x208] sm:$0xff] }
 0xd53   :  { %v7261_v18 = vrot.slane %v7260_v29, 2  ;;  %v7267_v6 = vadd.f32 %v7266_v19, %v7265_v23  ;;  %v7255_v58 = vadd.f32 %v7254_v46, %v7253_v43  ;;  %v7249_v26 = vrot.slane %v7248_v61, 1  ;;  %v16876_v43 = vld [vmem:[#allocation43_spill] sm:$0xff]  ;;  %v16877_v23 = vld [vmem:[#allocation9_spill] sm:$0xff] }
 0xd54   :  { %v7279_v34 = vsel %vm6657_vm9, %v7243_v41, 0.0  ;;  %v7273_v56 = vrot.slane %v7272_v11, 4  ;;  %v16879_v46 = vld [vmem:[#allocation49_spill] sm:$0xff]  ;;  %v7882_v41 = vld [vmem:[%s16357_s16 + $0x2f0] sm:$0xff] }
 0xd55   :  { %v7280_v37 = vrot.slane %v7279_v34, 4  ;;  %v7256_v62 = vrot.slane %v7255_v58, 1  ;;  %v7268_v17 = vrot.slane %v7267_v6, 2  ;;  %v7262_v4 = vadd.f32 %v7261_v18, %v7260_v29  ;;  %v16878_v29 = vld [vmem:[#allocation47_spill] sm:$0xff] }
 0xd56   :  { %v7250_v32 = vadd.f32 %v7249_v26, %v7248_v61  ;;  %v7274_v50 = vadd.f32 %v7273_v56, %v7272_v11  ;;  %v7883_v61 = vld [vmem:[%s16357_s16 + $0x2f8] sm:$0xff]  ;;  %v7881_v18 = vld [vmem:[%s16357_s16 + $0x2e8] sm:$0xff]  ;;  %v7914_v11 = vld [vmem:[%s16357_s16 + $0x3f0] sm:$0xff] }
 0xd57   :  { %v7281_v28 = vadd.f32 %v7280_v37, %v7279_v34  ;;  %v7257_v27 = vadd.f32 %v7256_v62, %v7255_v58  ;;  %v7269_v12 = vadd.f32 %v7268_v17, %v7267_v6  ;;  %v7263_v35 = vrot.slane %v7262_v4, 1  ;;  %v7880_v6 = vld [vmem:[%s16357_s16 + $0x2e0] sm:$0xff]  ;;  %v7879_v58 = vld [vmem:[%s16357_s16 + $0x2d8] sm:$0xff]  ;;  %v7878_v34 = vld [vmem:[%s16357_s16 + $0x2d0] sm:$0xff] }
 0xd58   :  { %v7275_v53 = vrot.slane %v7274_v50, 2  ;;  %v7877_v26 = vld [vmem:[%s16357_s16 + $0x2c8] sm:$0xff]  ;;  %v7876_v37 = vld [vmem:[%s16357_s16 + $0x2c0] sm:$0xff]  ;;  %v7875_v62 = vld [vmem:[%s16357_s16 + $0x2b8] sm:$0xff] }
 0xd59   :  { %v7282_v16 = vrot.slane %v7281_v28, 2  ;;  %7353 = vmatprep.mubr.f32.mxu0 %v7257_v27  ;;  %v7270_v55 = vrot.slane %v7269_v12, 1  ;;  %v7264_v9 = vadd.f32 %v7263_v35, %v7262_v4  ;;  %v7874_v17 = vld [vmem:[%s16357_s16 + $0x2b0] sm:$0xff]  ;;  %v7873_v4 = vld [vmem:[%s16357_s16 + $0x2a8] sm:$0xff]  ;;  %v7871_v27 = vld [vmem:[%s16357_s16 + $0x298] sm:$0xff] }
 0xd5a   :  { %7354 = vmatmul.mubr.f32.vlgmr.msra.gmra.mxu0 %v7250_v32  ;;  %v7276_v7 = vadd.f32 %v7275_v53, %v7274_v50  ;;  %v7869_v32 = vld [vmem:[%s16357_s16 + $0x288] sm:$0xff]  ;;  %v7868_v35 = vld [vmem:[%s16357_s16 + $0x280] sm:$0xff]  ;;  %v7911_v56 = vld [vmem:[%s16357_s16 + $0x3d8] sm:$0xff] }
 0xd5b   :  { %7430 = vmatpush1.msra.mxu0 %v16859_v49  ;;  %v7271_v47 = vadd.f32 %v7270_v55, %v7269_v12  ;;  %v7283_v24 = vadd.f32 %v7282_v16, %v7281_v28  ;;  %v7872_v28 = vld [vmem:[%s16357_s16 + $0x2a0] sm:$0xff]  ;;  %v7870_v12 = vld [vmem:[%s16357_s16 + $0x290] sm:$0xff]  ;;  %v7867_v16 = vld [vmem:[%s16357_s16 + $0x278] sm:$0xff] }
 0xd5c   :  { %7431 = vmatprep.subr.mxu0 %v16570_v10  ;;  %v7277_v3 = vrot.slane %v7276_v7, 1  ;;  %v7866_v55 = vld [vmem:[%s16357_s16 + $0x270] sm:$0xff]  ;;  %v7865_v49 = vld [vmem:[%s16357_s16 + $0x268] sm:$0xff]  ;;  %v7908_v50 = vld [vmem:[%s16357_s16 + $0x3c0] sm:$0xff] }
 0xd5d   :  { %7432 = vmatpush1.msra.mxu0 %v16860_v42  ;;  %7423 = vmatprep.mubr.f32.mxu1 %v7271_v47  ;;  %v7284_v25 = vrot.slane %v7283_v24, 1  ;;  %v7864_v47 = vld [vmem:[%s16357_s16 + $0x260] sm:$0xff]  ;;  %v7861_v42 = vld [vmem:[%s16357_s16 + $0x248] sm:$0xff] }
 0xd5e   :  { %7433 = vmatprep.subr.mxu0 %v16570_v10  ;;  %7424 = vmatmul.mubr.f32.vlgmr.msra.gmra.mxu1 %v7264_v9  ;;  %v7278_v19 = vadd.f32 %v7277_v3, %v7276_v7  ;;  %v7862_v9 = vld [vmem:[%s16357_s16 + $0x250] sm:$0xff]  ;;  %v7905_v53 = vld [vmem:[%s16357_s16 + $0x3a8] sm:$0xff]  ;;  %v7899_v3 = vld [vmem:[%s16357_s16 + $0x378] sm:$0xff] }
 0xd5f   :  { %7434 = vmatpush1.msra.mxu0 %v16861_v40  ;;  %v7285_v8 = vadd.f32 %v7284_v25, %v7283_v24  ;;  %8252 = vmatpush1.msk.msra.mxu1 %vm6754_vm8, %v15619_v59  ;;  %v16864_v59 = vld [vmem:[#allocation8_spill] sm:$0xff]  ;;  %v7863_v24 = vld [vmem:[%s16357_s16 + $0x258] sm:$0xff]  ;;  %v7860_v25 = vld [vmem:[%s16357_s16 + $0x240] sm:$0xff] }
 0xd60   :  { %7435 = vmatprep.subr.mxu0 %v16570_v10  ;;  %7571 = vmatprep.mubr.f32.mxu1 %v16570_v10  ;;  %v7858_v40 = vld [vmem:[%s16357_s16 + $0x230] sm:$0xff] }
 0xd61   :  { %7436 = vmatpush1.msra.mxu0 %v16862_v22  ;;  %8250 = vmatprep.mubr.msk.f32.mxu0 %vm6750_vm10, %v7285_v8  ;;  %v7857_v8 = vld [vmem:[%s16357_s16 + $0x228] sm:$0xff]  ;;  %v7856_v22 = vld [vmem:[%s16357_s16 + $0x220] sm:$0xff]  ;;  %v7902_v7 = vld [vmem:[%s16357_s16 + $0x390] sm:$0xff] }
 0xd62   :  { %7437 = vmatprep.subr.mxu0 %v16570_v10  ;;  %8254 = vmatprep.subr.msk.mxu1 %vm6754_vm8, %v15634_v57  ;;  %v16867_v57 = vld [vmem:[#allocation73_spill] sm:$0xff] }
 0xd63   :  { %7438 = vmatpush1.msra.mxu0 %v16863_v51  ;;  %v7855_v51 = vld [vmem:[%s16357_s16 + $0x218] sm:$0xff] }
 0xd64   :  { %7439 = vmatprep.subr.mxu0 %v16570_v10 }
 0xd65   :  { %7440 = vmatpush1.msra.mxu0 %v16864_v59  ;;  %v7854_v59 = vld [vmem:[%s16357_s16 + $0x210] sm:$0xff] }
 0xd66   :  { %7441 = vmatprep.subr.mxu0 %v16570_v10 }
 0xd67   :  { %7442 = vmatpush1.msra.mxu0 %v16865_v48  ;;  %v7852_v48 = vld [vmem:[%s16357_s16 + $0x200] sm:$0xff] }
 0xd68   :  { %7443 = vmatprep.subr.mxu0 %v16570_v10 }
 0xd69   :  { %7444 = vmatpush1.msra.mxu0 %v16866_v60  ;;  %v7915_v60 = vld [vmem:[%s16357_s16 + $0x3f8] sm:$0xff] }
 0xd6a   :  { %7445 = vmatprep.subr.mxu0 %v16570_v10 }
 0xd6b   :  { %7446 = vmatpush1.msra.mxu0 %v16867_v57  ;;  %v7913_v57 = vld [vmem:[%s16357_s16 + $0x3e8] sm:$0xff] }
 0xd6c   :  { %7447 = vmatprep.subr.mxu0 %v16570_v10 }
 0xd6d   :  { %7448 = vmatpush1.msra.mxu0 %v16868_v33  ;;  %v7912_v33 = vld [vmem:[%s16357_s16 + $0x3e0] sm:$0xff] }
 0xd6e   :  { %7449 = vmatprep.subr.mxu0 %v16570_v10 }
 0xd6f   :  { %7450 = vmatpush1.msra.mxu0 %v16869_v13  ;;  %v7910_v13 = vld [vmem:[%s16357_s16 + $0x3d0] sm:$0xff] }
 0xd70   :  { %7451 = vmatprep.subr.mxu0 %v16570_v10 }
 0xd71   :  { %7452 = vmatpush1.msra.mxu0 %v16870_v39  ;;  %v7909_v39 = vld [vmem:[%s16357_s16 + $0x3c8] sm:$0xff] }
 0xd72   :  { %7453 = vmatprep.subr.mxu0 %v16570_v10 }
 0xd73   :  { %7454 = vmatpush1.msra.mxu0 %v16871_v63  ;;  %v7907_v63 = vld [vmem:[%s16357_s16 + $0x3b8] sm:$0xff] }
 0xd74   :  { %7455 = vmatprep.subr.mxu0 %v16570_v10 }
 0xd75   :  { %7456 = vmatpush1.msra.mxu0 %v16872_v52  ;;  %v7906_v52 = vld [vmem:[%s16357_s16 + $0x3b0] sm:$0xff] }
 0xd76   :  { %7457 = vmatprep.subr.mxu0 %v16570_v10 }
 0xd77   :  { %7458 = vmatpush1.msra.mxu0 %v16873_v54  ;;  %v7904_v54 = vld [vmem:[%s16357_s16 + $0x3a0] sm:$0xff] }
 0xd78   :  { %7459 = vmatprep.subr.mxu0 %v16570_v10 }
 0xd79   :  { %7460 = vmatpush1.msra.mxu0 %v16874_v38  ;;  %v7903_v38 = vld [vmem:[%s16357_s16 + $0x398] sm:$0xff] }
 0xd7a   :  { %7483 = vmatprep.subr.mxu0 %v16570_v10 }
 0xd7b   :  { %8249 = vmatpush2.msk.msra.mxu0 %vm6754_vm8, %v16875_v15  ;;  %v7901_v15 = vld [vmem:[%s16357_s16 + $0x388] sm:$0xff] }
 0xd7c   :  { %7485 = vmatprep.subr.mxu0 %v16570_v10 }
 0xd7d   :  { %7486 = vmatpush2.msra.mxu0 %v16876_v43  ;;  %v7900_v43 = vld [vmem:[%s16357_s16 + $0x380] sm:$0xff] }
 0xd7e   :  { %7487 = vmatprep.subr.mxu0 %v16570_v10 }
 0xd7f   :  { %7488 = vmatpush2.msra.mxu0 %v16877_v23  ;;  %v7898_v23 = vld [vmem:[%s16357_s16 + $0x370] sm:$0xff] }
 0xd80   :  { %7489 = vmatprep.subr.mxu0 %v16570_v10 }
 0xd81   :  { %7490 = vmatpush2.msra.mxu0 %v16878_v29 }
 0xd82   :  { %7491 = vmatprep.subr.mxu0 %v16570_v10 }
 0xd83   :  { %7492 = vmatpush2.msra.mxu0 %v16879_v46 }
 0xd84   :  { %7494 = vmatmul.mubr.f32.vlgmr.msra.gmra.mxu0 %v7278_v19  ;;  %8038 = vmatprep.subr.mxu0 %v7883_v61 }
 0xd85   :  { %8039 = vmatpush1.msra.mxu0 %v7882_v41 }
 0xd86   :  { %8040 = vmatprep.subr.mxu0 %v7881_v18 }
 0xd87   :  { %8041 = vmatpush1.msra.mxu0 %v7880_v6 }
 0xd88   :  { %8042 = vmatprep.subr.mxu0 %v7879_v58 }
 0xd89   :  { %8043 = vmatpush1.msra.mxu0 %v7878_v34 }
 0xd8a   :  { %8044 = vmatprep.subr.mxu0 %v7877_v26 }
 0xd8b   :  { %8045 = vmatpush1.msra.mxu0 %v7876_v37 }
 0xd8c   :  { %8046 = vmatprep.subr.mxu0 %v7875_v62 }
 0xd8d   :  { %8047 = vmatpush1.msra.mxu0 %v7874_v17  ;;  %v7500_v17 = vld [vmem:[%s16358_s14] sm:$0x1] }
 0xd8e   :  { %8048 = vmatprep.subr.mxu0 %v7873_v4 }
 0xd8f   :  { %8049 = vmatpush1.msra.mxu0 %v7872_v28 }
 0xd90   :  { %8050 = vmatprep.subr.mxu0 %v7871_v27  ;;  %v7819_v27 = vld [vmem:[%s16357_s16 + $0xf8] sm:$0xff] }
 0xd91   :  { %8051 = vmatpush1.msra.mxu0 %v7870_v12  ;;  %v7816_v12 = vld [vmem:[%s16357_s16 + $0xe0] sm:$0xff] }
 0xd92   :  { %8052 = vmatprep.subr.mxu0 %v7869_v32  ;;  %v7813_v32 = vld [vmem:[%s16357_s16 + $0xc8] sm:$0xff] }
 0xd93   :  { %8053 = vmatpush1.msra.mxu0 %v7868_v35  ;;  %v7812_v35 = vld [vmem:[%s16357_s16 + $0xc0] sm:$0xff] }
 0xd94   :  { %8054 = vmatprep.subr.mxu0 %v7867_v16  ;;  %v7811_v16 = vld [vmem:[%s16357_s16 + $0xb8] sm:$0xff] }
 0xd95   :  { %8055 = vmatpush1.msra.mxu0 %v7866_v55  ;;  %v7810_v55 = vld [vmem:[%s16357_s16 + $0xb0] sm:$0xff] }
 0xd96   :  { %8056 = vmatprep.subr.mxu0 %v7865_v49  ;;  %v7809_v49 = vld [vmem:[%s16357_s16 + $0xa8] sm:$0xff] }
 0xd97   :  { %8057 = vmatpush1.msra.mxu0 %v7864_v47  ;;  %v7808_v47 = vld [vmem:[%s16357_s16 + $0xa0] sm:$0xff] }
 0xd98   :  { %8058 = vmatprep.subr.mxu0 %v7863_v24  ;;  %v7807_v24 = vld [vmem:[%s16357_s16 + $0x98] sm:$0xff] }
 0xd99   :  { %8059 = vmatpush1.msra.mxu0 %v7862_v9  ;;  %v7806_v9 = vld [vmem:[%s16357_s16 + $0x90] sm:$0xff] }
 0xd9a   :  { %8060 = vmatprep.subr.mxu0 %v7861_v42  ;;  %v7805_v42 = vld [vmem:[%s16357_s16 + $0x88] sm:$0xff] }
 0xd9b   :  { %8061 = vmatpush1.msra.mxu0 %v7860_v25  ;;  %v7804_v25 = vld [vmem:[%s16357_s16 + $0x80] sm:$0xff] }
 0xd9c   :  { %8062 = vmatprep.subr.mxu0 %v7859_v1  ;;  %v7803_v1 = vld [vmem:[%s16357_s16 + $0x78] sm:$0xff] }
 0xd9d   :  { %8063 = vmatpush1.msra.mxu0 %v7858_v40  ;;  %v7802_v40 = vld [vmem:[%s16357_s16 + $0x70] sm:$0xff] }
 0xd9e   :  { %8064 = vmatprep.subr.mxu0 %v7857_v8  ;;  %v7801_v8 = vld [vmem:[%s16357_s16 + $0x68] sm:$0xff] }
 0xd9f   :  { %8065 = vmatpush1.msra.mxu0 %v7856_v22  ;;  %v7800_v22 = vld [vmem:[%s16357_s16 + $0x60] sm:$0xff] }
 0xda0   :  { %8066 = vmatprep.subr.mxu0 %v7855_v51  ;;  %v7799_v51 = vld [vmem:[%s16357_s16 + $0x58] sm:$0xff] }
 0xda1   :  { %8067 = vmatpush1.msra.mxu0 %v7854_v59  ;;  %v7798_v59 = vld [vmem:[%s16357_s16 + $0x50] sm:$0xff] }
 0xda2   :  { %8068 = vmatprep.subr.mxu0 %v7853_v14  ;;  %v7797_v14 = vld [vmem:[%s16357_s16 + $0x48] sm:$0xff] }
 0xda3   :  { %8069 = vmatpush1.msra.mxu0 %v7852_v48  ;;  %v7796_v48 = vld [vmem:[%s16357_s16 + $0x40] sm:$0xff] }
 0xda4   :  { %8070 = vmatprep.subr.mxu0 %v7915_v60  ;;  %v7795_v60 = vld [vmem:[%s16357_s16 + $0x38] sm:$0xff] }
 0xda5   :  { %8071 = vmatpush2.msra.mxu0 %v7914_v11  ;;  %v7794_v11 = vld [vmem:[%s16357_s16 + $0x30] sm:$0xff] }
 0xda6   :  { %8072 = vmatprep.subr.mxu0 %v7913_v57  ;;  %v7793_v57 = vld [vmem:[%s16357_s16 + $0x28] sm:$0xff] }
 0xda7   :  { %8073 = vmatpush2.msra.mxu0 %v7912_v33  ;;  %v7792_v33 = vld [vmem:[%s16357_s16 + $0x20] sm:$0xff] }
 0xda8   :  { %8074 = vmatprep.subr.mxu0 %v7911_v56  ;;  %v7791_v56 = vld [vmem:[%s16357_s16 + $0x18] sm:$0xff] }
 0xda9   :  { %8075 = vmatpush2.msra.mxu0 %v7910_v13  ;;  %v7790_v13 = vld [vmem:[%s16357_s16 + $0x10] sm:$0xff] }
 0xdaa   :  { %8076 = vmatprep.subr.mxu0 %v7909_v39  ;;  %v7789_v39 = vld [vmem:[%s16357_s16 + $0x8] sm:$0xff] }
 0xdab   :  { %8077 = vmatpush2.msra.mxu0 %v7908_v50  ;;  %v7788_v50 = vld [vmem:[%s16357_s16] sm:$0xff] }
 0xdac   :  { %8078 = vmatprep.subr.mxu0 %v7907_v63  ;;  %v7851_v63 = vld [vmem:[%s16357_s16 + $0x1f8] sm:$0xff] }
 0xdad   :  { %8079 = vmatpush2.msra.mxu0 %v7906_v52  ;;  %v7850_v52 = vld [vmem:[%s16357_s16 + $0x1f0] sm:$0xff] }
 0xdae   :  { %8080 = vmatprep.subr.mxu0 %v7905_v53  ;;  %v7849_v53 = vld [vmem:[%s16357_s16 + $0x1e8] sm:$0xff] }
 0xdaf   :  { %8081 = vmatpush2.msra.mxu0 %v7904_v54  ;;  %v7848_v54 = vld [vmem:[%s16357_s16 + $0x1e0] sm:$0xff] }
 0xdb0   :  { %8082 = vmatprep.subr.mxu0 %v7903_v38  ;;  %v7847_v38 = vld [vmem:[%s16357_s16 + $0x1d8] sm:$0xff] }
 0xdb1   :  { %8083 = vmatpush2.msra.mxu0 %v7902_v7  ;;  %v7846_v7 = vld [vmem:[%s16357_s16 + $0x1d0] sm:$0xff] }
 0xdb2   :  { %8084 = vmatprep.subr.mxu0 %v7901_v15  ;;  %v7845_v15 = vld [vmem:[%s16357_s16 + $0x1c8] sm:$0xff] }
 0xdb3   :  { %8085 = vmatpush2.msra.mxu0 %v7900_v43  ;;  %v7844_v43 = vld [vmem:[%s16357_s16 + $0x1c0] sm:$0xff] }
 0xdb4   :  { %8086 = vmatprep.subr.mxu0 %v7899_v3  ;;  %v7843_v3 = vld [vmem:[%s16357_s16 + $0x1b8] sm:$0xff] }
 0xdb5   :  { %8087 = vmatpush2.msra.mxu0 %v7898_v23  ;;  %v7842_v23 = vld [vmem:[%s16357_s16 + $0x1b0] sm:$0xff] }
 0xe1a   :  { %v8923_v19 = vpop.f32.mrf.mxu0 }
 0xe1c   :  { %v8924_v61 = vpop.f32.mrf.mxu0 }
 0xe1d   :  { %v8925_v18 = vadd.f32 %v8924_v61, %v8923_v19  ;;  %v7840_v19 = vld [vmem:[%s16357_s16 + $0x1a0] sm:$0xff]  ;;  %v7838_v61 = vld [vmem:[%s16357_s16 + $0x190] sm:$0xff] }
 0xe1e   :  { %v8958_v29 = vpop.f32.mrf.mxu1 }
 0xe20   :  { %v8959_v46 = vpop.f32.mrf.mxu1 }
 0xe21   :  { %v8960_v41 = vadd.f32 %v8959_v46, %v8958_v29  ;;  %v7841_v29 = vld [vmem:[%s16357_s16 + $0x1a8] sm:$0xff]  ;;  %v7839_v46 = vld [vmem:[%s16357_s16 + $0x198] sm:$0xff] }
 0xe23   :  { %v7426_v6 = vadd.f32 %v8960_v41, %v8925_v18  ;;  %v7837_v41 = vld [vmem:[%s16357_s16 + $0x188] sm:$0xff]  ;;  %v7836_v18 = vld [vmem:[%s16357_s16 + $0x180] sm:$0xff] }
 0xe44   :  { %v7495_v58 = vpop.f32.mrf.mxu0 }
 0xe45   :  { %v7496_v34 = vadd.f32 %v7495_v58, %v7426_v6  ;;  %v7835_v6 = vld [vmem:[%s16357_s16 + $0x178] sm:$0xff]  ;;  %v7834_v58 = vld [vmem:[%s16357_s16 + $0x170] sm:$0xff] }
 0xe46   :  { %v7497_v26 = vpop.f32.mrf.mxu0 }
 0xe47   :  { %v7499_v37 = vmul.f32 0.00295858, %v7496_v34  ;;  %v7833_v34 = vld [vmem:[%s16357_s16 + $0x168] sm:$0xff]  ;;  %v7832_v26 = vld [vmem:[%s16357_s16 + $0x160] sm:$0xff] }
 0xe49   :  { %v7501_v62 = vadd.f32 1e-05, %v7499_v37  ;;  %v7831_v37 = vld [vmem:[%s16357_s16 + $0x158] sm:$0xff] }
 0xe4b   :  { %9044 = vrsqrt.f32 %v7501_v62  ;;  %v7830_v62 = vld [vmem:[%s16357_s16 + $0x150] sm:$0xff] }
 0xe58   :  { %v9045_v4 = vpop.eup %9044 }
 0xe59   :  { %v7503_v28 = vmul.f32 %v9045_v4, %v7500_v17  ;;  %v7829_v17 = vld [vmem:[%s16357_s16 + $0x148] sm:$0xff]  ;;  %v7828_v4 = vld [vmem:[%s16357_s16 + $0x140] sm:$0xff] }
 0xe5b   :  { %8253 = vmatmul.mubr.msk.f32.vlgmr.msra.gmra.mxu1 %vm6979_vm11, %v7503_v28 }
 0xe5c   :  { %8255 = vmatpush1.msk.msra.mxu1 %vm6754_vm8, %v15630_v44  ;;  %7642 = vmatprep.mubr.f32.mxu1 %v16570_v10  ;;  %v7818_v44 = vld [vmem:[%s16357_s16 + $0xf0] sm:$0xff] }
 0xe5d   :  { %8257 = vmatprep.subr.msk.mxu1 %vm6754_vm8, %v15645_v45  ;;  %v7817_v45 = vld [vmem:[%s16357_s16 + $0xe8] sm:$0xff] }
 0xe5f   :  { %8256 = vmatmul.mubr.msk.f32.vlgmr.msra.gmra.mxu1 %vm6979_vm11, %v7503_v28 }
 0xe60   :  { %8258 = vmatpush1.msk.msra.mxu1 %vm6754_vm8, %v15641_v0  ;;  %7713 = vmatprep.mubr.f32.mxu1 %v16570_v10  ;;  %v7815_v10 = vld [vmem:[%s16357_s16 + $0xd8] sm:$0xff]  ;;  %v7814_v0 = vld [vmem:[%s16357_s16 + $0xd0] sm:$0xff] }
 0xe61   :  { %7967 = vmatprep.subr.mxu1 %v7819_v27  ;;  %v7827_v27 = vld [vmem:[%s16357_s16 + $0x138] sm:$0xff] }
 0xe63   :  { %8259 = vmatmul.mubr.msk.f32.vlgmr.msra.gmra.mxu1 %vm6979_vm11, %v7503_v28  ;;  %v7897_v28 = vld [vmem:[%s16357_s16 + $0x368] sm:$0xff] }
 0xe64   :  { %7968 = vmatpush1.msra.mxu1 %v7818_v44  ;;  %8088 = vmatprep.subr.mxu0 %v7897_v28  ;;  %v7896_v44 = vld [vmem:[%s16357_s16 + $0x360] sm:$0xff]  ;;  %v7939_v28 = vld [vmem:[%s16357_s16 + $0x4b8] sm:$0xff] }
 0xe65   :  { %7969 = vmatprep.subr.mxu1 %v7817_v45  ;;  %8089 = vmatpush2.msra.mxu0 %v7896_v44  ;;  %v7826_v45 = vld [vmem:[%s16357_s16 + $0x130] sm:$0xff]  ;;  %v7936_v44 = vld [vmem:[%s16357_s16 + $0x4a0] sm:$0xff] }
 0xe66   :  { %7970 = vmatpush1.msra.mxu1 %v7816_v12  ;;  %v7895_v12 = vld [vmem:[%s16357_s16 + $0x358] sm:$0xff] }
 0xe67   :  { %7971 = vmatprep.subr.mxu1 %v7815_v10  ;;  %8090 = vmatprep.subr.mxu0 %v7895_v12  ;;  %v7825_v10 = vld [vmem:[%s16357_s16 + $0x128] sm:$0xff]  ;;  %v7934_v12 = vld [vmem:[%s16357_s16 + $0x490] sm:$0xff] }
 0xe68   :  { %7972 = vmatpush1.msra.mxu1 %v7814_v0  ;;  %v7894_v0 = vld [vmem:[%s16357_s16 + $0x350] sm:$0xff] }
 0xe69   :  { %7973 = vmatprep.subr.mxu1 %v7813_v32  ;;  %8091 = vmatpush2.msra.mxu0 %v7894_v0  ;;  %v7824_v32 = vld [vmem:[%s16357_s16 + $0x120] sm:$0xff] }
 0xe6a   :  { %7974 = vmatpush1.msra.mxu1 %v7812_v35  ;;  %v7893_v35 = vld [vmem:[%s16357_s16 + $0x348] sm:$0xff]  ;;  %v7932_v0 = vld [vmem:[%s16357_s16 + $0x480] sm:$0xff] }
 0xe6b   :  { %7975 = vmatprep.subr.mxu1 %v7811_v16  ;;  %8092 = vmatprep.subr.mxu0 %v7893_v35  ;;  %v7823_v16 = vld [vmem:[%s16357_s16 + $0x118] sm:$0xff]  ;;  %v7930_v35 = vld [vmem:[%s16357_s16 + $0x470] sm:$0xff] }
 0xe6c   :  { %7976 = vmatpush1.msra.mxu1 %v7810_v55  ;;  %v7892_v55 = vld [vmem:[%s16357_s16 + $0x340] sm:$0xff] }
 0xe6d   :  { %7977 = vmatprep.subr.mxu1 %v7809_v49  ;;  %8093 = vmatpush2.msra.mxu0 %v7892_v55  ;;  %v7822_v49 = vld [vmem:[%s16357_s16 + $0x110] sm:$0xff]  ;;  %v7928_v55 = vld [vmem:[%s16357_s16 + $0x460] sm:$0xff] }
 0xe6e   :  { %7978 = vmatpush1.msra.mxu1 %v7808_v47  ;;  %v7891_v47 = vld [vmem:[%s16357_s16 + $0x338] sm:$0xff] }
 0xe6f   :  { %7979 = vmatprep.subr.mxu1 %v7807_v24  ;;  %8094 = vmatprep.subr.mxu0 %v7891_v47  ;;  %v7821_v24 = vld [vmem:[%s16357_s16 + $0x108] sm:$0xff]  ;;  %v7926_v47 = vld [vmem:[%s16357_s16 + $0x450] sm:$0xff] }
 0xe70   :  { %7980 = vmatpush1.msra.mxu1 %v7806_v9  ;;  %v7890_v9 = vld [vmem:[%s16357_s16 + $0x330] sm:$0xff] }
 0xe71   :  { %7981 = vmatprep.subr.mxu1 %v7805_v42  ;;  %8095 = vmatpush2.msra.mxu0 %v7890_v9  ;;  %v7820_v42 = vld [vmem:[%s16357_s16 + $0x100] sm:$0xff] }
 0xe72   :  { %7982 = vmatpush1.msra.mxu1 %v7804_v25  ;;  %v7889_v25 = vld [vmem:[%s16357_s16 + $0x328] sm:$0xff]  ;;  %v7924_v9 = vld [vmem:[%s16357_s16 + $0x440] sm:$0xff] }
 0xe73   :  { %7983 = vmatprep.subr.mxu1 %v7803_v1  ;;  %8096 = vmatprep.subr.mxu0 %v7889_v25  ;;  %v7888_v1 = vld [vmem:[%s16357_s16 + $0x320] sm:$0xff]  ;;  %v7922_v25 = vld [vmem:[%s16357_s16 + $0x430] sm:$0xff] }
 0xe74   :  { %7984 = vmatpush1.msra.mxu1 %v7802_v40  ;;  %v7947_v40 = vld [vmem:[%s16357_s16 + $0x4f8] sm:$0xff]  ;;  %8097 = vmatpush2.msra.mxu0 %v7888_v1  ;;  %v7921_v1 = vld [vmem:[%s16357_s16 + $0x428] sm:$0xff] }
 0xe75   :  { %7985 = vmatprep.subr.mxu1 %v7801_v8  ;;  %v7887_v8 = vld [vmem:[%s16357_s16 + $0x318] sm:$0xff] }
 0xe76   :  { %7986 = vmatpush1.msra.mxu1 %v7800_v22  ;;  %8098 = vmatprep.subr.mxu0 %v7887_v8  ;;  %v7886_v22 = vld [vmem:[%s16357_s16 + $0x310] sm:$0xff]  ;;  %v7919_v8 = vld [vmem:[%s16357_s16 + $0x418] sm:$0xff] }
 0xe77   :  { %7987 = vmatprep.subr.mxu1 %v7799_v51  ;;  %8099 = vmatpush2.msra.mxu0 %v7886_v22  ;;  %v7885_v51 = vld [vmem:[%s16357_s16 + $0x308] sm:$0xff]  ;;  %v7918_v22 = vld [vmem:[%s16357_s16 + $0x410] sm:$0xff] }
 0xe78   :  { %7988 = vmatpush1.msra.mxu1 %v7798_v59  ;;  %8100 = vmatprep.subr.mxu0 %v7885_v51  ;;  %v7884_v59 = vld [vmem:[%s16357_s16 + $0x300] sm:$0xff]  ;;  %v7917_v51 = vld [vmem:[%s16357_s16 + $0x408] sm:$0xff] }
 0xe79   :  { %7989 = vmatprep.subr.mxu1 %v7797_v14  ;;  %8101 = vmatpush2.msra.mxu0 %v7884_v59  ;;  %v7916_v59 = vld [vmem:[%s16357_s16 + $0x400] sm:$0xff] }
 0xe7a   :  { %7990 = vmatpush1.msra.mxu1 %v7796_v48 }
 0xe7b   :  { %7991 = vmatprep.subr.mxu1 %v7795_v60  ;;  %v16186_v60 = vld [vmem:[%s16359_s15] sm:$0x3f] }
 0xe7c   :  { %7992 = vmatpush1.msra.mxu1 %v7794_v11 }
 0xe7d   :  { %7993 = vmatprep.subr.mxu1 %v7793_v57 }
 0xe7e   :  { %7994 = vmatpush1.msra.mxu1 %v7792_v33  ;;  %v16880_v33 = vld [vmem:[#allocation10_spill] sm:$0xff] }
 0xe7f   :  { %7995 = vmatprep.subr.mxu1 %v7791_v56  ;;  %v7759_v56 = vrot.slane %v16186_v60, %v16880_v33  ;;  %v7954_v33 = vld [vmem:[%s16357_s16 + $0x530] sm:$0xff] }
 0xe80   :  { %7996 = vmatpush1.msra.mxu1 %v7790_v13 }
 0xe81   :  { %7997 = vmatprep.subr.mxu1 %v7789_v39  ;;  %v7755_v39 = vrot.slane %v16186_v60, %v16854_v2 }
 0xe82   :  { %7998 = vmatpush1.msra.mxu1 %v7788_v50 }
 0xe83   :  { %7999 = vmatprep.subr.mxu1 %v7851_v63 }
 0xe84   :  { %8000 = vmatpush2.msra.mxu1 %v7850_v52 }
 0xe85   :  { %8001 = vmatprep.subr.mxu1 %v7849_v53 }
 0xe86   :  { %8002 = vmatpush2.msra.mxu1 %v7848_v54 }
 0xe87   :  { %8003 = vmatprep.subr.mxu1 %v7847_v38 }
 0xe88   :  { %8004 = vmatpush2.msra.mxu1 %v7846_v7  ;;  %v16881_v7 = vld [vmem:[#allocation12_spill] sm:$0xff] }
 0xe89   :  { %8005 = vmatprep.subr.mxu1 %v7845_v15  ;;  %v7767_v15 = vrot.slane %v16186_v60, %v16881_v7 }
 0xe8a   :  { %8006 = vmatpush2.msra.mxu1 %v7844_v43 }
 0xe8b   :  { %8007 = vmatprep.subr.mxu1 %v7843_v3 }
 0xe8c   :  { %8008 = vmatpush2.msra.mxu1 %v7842_v23  ;;  %v16882_v23 = vld [vmem:[#allocation11_spill] sm:$0xff] }
 0xe8d   :  { %8009 = vmatprep.subr.mxu1 %v7841_v29 }
 0xe8e   :  { %8010 = vmatpush2.msra.mxu1 %v7840_v19 }
 0xe8f   :  { %8011 = vmatprep.subr.mxu1 %v7839_v46  ;;  %v7945_v46 = vld [vmem:[%s16357_s16 + $0x4e8] sm:$0xff] }
 0xe90   :  { %8012 = vmatpush2.msra.mxu1 %v7838_v61 }
 0xe91   :  { %8013 = vmatprep.subr.mxu1 %v7837_v41 }
 0xe92   :  { %8014 = vmatpush2.msra.mxu1 %v7836_v18  ;;  %v16883_v18 = vld [vmem:[#allocation13_spill] sm:$0xff] }
 0xe93   :  { %8015 = vmatprep.subr.mxu1 %v7835_v6  ;;  %v7775_v6 = vrot.slane %v16186_v60, %v16883_v18 }
 0xe94   :  { %8016 = vmatpush2.msra.mxu1 %v7834_v58 }
 0xe95   :  { %8017 = vmatprep.subr.mxu1 %v7833_v34 }
 0xe96   :  { %8018 = vmatpush2.msra.mxu1 %v7832_v26  ;;  %v7942_v26 = vld [vmem:[%s16357_s16 + $0x4d0] sm:$0xff] }
 0xe97   :  { %8019 = vmatprep.subr.mxu1 %v7831_v37 }
 0xe98   :  { %8020 = vmatpush2.msra.mxu1 %v7830_v62  ;;  %v7941_v62 = vld [vmem:[%s16357_s16 + $0x4c8] sm:$0xff] }
 0xe99   :  { %8021 = vmatprep.subr.mxu1 %v7829_v17  ;;  %v7940_v17 = vld [vmem:[%s16357_s16 + $0x4c0] sm:$0xff] }
 0xe9a   :  { %8022 = vmatpush2.msra.mxu1 %v7828_v4 }
 0xe9b   :  { %8023 = vmatprep.subr.mxu1 %v7827_v27  ;;  %v7937_v27 = vld [vmem:[%s16357_s16 + $0x4a8] sm:$0xff] }
 0xe9c   :  { %8024 = vmatpush2.msra.mxu1 %v7826_v45  ;;  %v7935_v45 = vld [vmem:[%s16357_s16 + $0x498] sm:$0xff] }
 0xe9d   :  { %8025 = vmatprep.subr.mxu1 %v7825_v10  ;;  %v7933_v10 = vld [vmem:[%s16357_s16 + $0x488] sm:$0xff] }
 0xe9e   :  { %8026 = vmatpush2.msra.mxu1 %v7824_v32  ;;  %v7931_v32 = vld [vmem:[%s16357_s16 + $0x478] sm:$0xff] }
 0xe9f   :  { %8027 = vmatprep.subr.mxu1 %v7823_v16  ;;  %v7929_v16 = vld [vmem:[%s16357_s16 + $0x468] sm:$0xff] }
 0xea0   :  { %8028 = vmatpush2.msra.mxu1 %v7822_v49  ;;  %v7927_v49 = vld [vmem:[%s16357_s16 + $0x458] sm:$0xff] }
 0xea1   :  { %8029 = vmatprep.subr.mxu1 %v7821_v24  ;;  %v7925_v24 = vld [vmem:[%s16357_s16 + $0x448] sm:$0xff] }
 0xea2   :  { %8030 = vmatpush2.msra.mxu1 %v7820_v42  ;;  %v7923_v42 = vld [vmem:[%s16357_s16 + $0x438] sm:$0xff] }
 0xea3   :  { %8109 = vmatprep.subr.mxu1 %v7947_v40  ;;  %v7920_v40 = vld [vmem:[%s16357_s16 + $0x420] sm:$0xff] }
 0xf1b   :  { %v7573_v14 = vpop.f32.mrf.mxu1 }
 0xf1c   :  { %v7723_v48 = vrot.slane %v7573_v14, %v16854_v2  ;;  %v7957_v14 = vld [vmem:[%s16357_s16 + $0x548] sm:$0xf] }
 0xf1d   :  { %v7575_v11 = vpop.f32.mrf.mxu1 }
 0xf1e   :  { %v7727_v57 = vrot.slane %v7575_v11, %v16854_v2  ;;  %v7744_v13 = vmul.f32 %v7723_v48, %v15693_v30  ;;  %v7763_v30 = vrot.slane %v16186_v60, %v16882_v23  ;;  %v7956_v48 = vld [vmem:[%s16357_s16 + $0x540] sm:$0xf]  ;;  %v7955_v11 = vld [vmem:[%s16357_s16 + $0x538] sm:$0xff] }
 0xf1f   :  { %v7644_v50 = vpop.f32.mrf.mxu1 }
 0xf20   :  { %v7745_v63 = vmul.f32 %v7727_v57, %v15699_v31  ;;  %v7731_v52 = vrot.slane %v7644_v50, %v16854_v2  ;;  %v7782_v43 = vadd.f32 %v7755_v39, %v7744_v13  ;;  %v7946_v31 = vld [vmem:[%s16357_s16 + $0x4f0] sm:$0xff]  ;;  %v7952_v13 = vld [vmem:[%s16357_s16 + $0x520] sm:$0xff] }
 0xf21   :  { %v7646_v53 = vpop.f32.mrf.mxu1  ;;  %v16884_v50 = vld [vmem:[#allocation14_spill] sm:$0xff] }
 0xf22   :  { %v7735_v54 = vrot.slane %v7646_v53, %v16854_v2  ;;  %v7783_v38 = vadd.f32 %v7759_v56, %v7745_v63  ;;  %v7746_v3 = vmul.f32 %v7731_v52, %v15706_v21  ;;  %v7944_v21 = vld [vmem:[%s16357_s16 + $0x4e0] sm:$0xff]  ;;  %v7953_v56 = vld [vmem:[%s16357_s16 + $0x528] sm:$0xff]  ;;  %v7771_v63 = vrot.slane %v16186_v60, %v16884_v50  ;;  %v7950_v52 = vld [vmem:[%s16357_s16 + $0x510] sm:$0xff] }
 0xf23   :  { %v16202_v29 = vpop.f32.mrf.mxu1  ;;  %v7949_v53 = vld [vmem:[%s16357_s16 + $0x508] sm:$0xff] }
 0xf24   :  { %v7747_v19 = vmul.f32 %v7735_v54, %v15713_v5  ;;  %8031 = vmatprep.mubr.f32.mxu1 %v7783_v38  ;;  %v7943_v5 = vld [vmem:[%s16357_s16 + $0x4d8] sm:$0xff]  ;;  %v7784_v34 = vadd.f32 %v7763_v30, %v7746_v3  ;;  %v7739_v57 = vrot.slane %v16202_v29, %v16854_v2  ;;  %v7948_v54 = vld [vmem:[%s16357_s16 + $0x500] sm:$0xff] }
 0xf25   :  { %v7717_v61 = vpop.f32.mrf.mxu1  ;;  %8032 = vmatmul.mubr.f32.vlgmr.msra.gmra.mxu1 %v7782_v43 }
 0xf26   :  { %v7743_v41 = vrot.slane %v7717_v61, %v16854_v2  ;;  %8110 = vmatpush1.msra.mxu1 %v7946_v31  ;;  %v7785_v58 = vadd.f32 %v7767_v15, %v7747_v19  ;;  %v7951_v2 = vld [vmem:[%s16357_s16 + $0x518] sm:$0xff]  ;;  %v7748_v39 = vmul.f32 %v7739_v57, %v15742_v36 }
 0xf27   :  { %8111 = vmatprep.subr.mxu1 %v7945_v46 }
 0xf28   :  { %v7749_v37 = vmul.f32 %v7743_v41, %v15721_v20  ;;  %8112 = vmatpush1.msra.mxu1 %v7944_v21  ;;  %8102 = vmatprep.mubr.f32.mxu0 %v7785_v58  ;;  %v7938_v20 = vld [vmem:[%s16357_s16 + $0x4b0] sm:$0xff]  ;;  %v7786_v36 = vadd.f32 %v7771_v63, %v7748_v39 }
 0xf29   :  { %8113 = vmatprep.subr.mxu1 %v7943_v5  ;;  %8103 = vmatmul.mubr.f32.vlgmr.msra.gmra.mxu0 %v7784_v34 }
 0xf2a   :  { %v7787_v4 = vadd.f32 %v7775_v6, %v7749_v37  ;;  %8114 = vmatpush1.msra.mxu1 %v7942_v26 }
 0xf2b   :  { %8115 = vmatprep.subr.mxu1 %v7941_v62 }
 0xf2c   :  { %8116 = vmatpush1.msra.mxu1 %v7940_v17  ;;  %8262 = vmatprep.mubr.msk.f32.mxu1 %vm6750_vm10, %v7787_v4 }
 0xf2d   :  { %8117 = vmatprep.subr.mxu1 %v7939_v28 }
 0xf2e   :  { %8118 = vmatpush1.msra.mxu1 %v7938_v20 }
 0xf2f   :  { %8119 = vmatprep.subr.mxu1 %v7937_v27 }
 0xf30   :  { %8120 = vmatpush1.msra.mxu1 %v7936_v44 }
 0xf31   :  { %8121 = vmatprep.subr.mxu1 %v7935_v45 }
 0xf32   :  { %8122 = vmatpush1.msra.mxu1 %v7934_v12 }
 0xf33   :  { %8123 = vmatprep.subr.mxu1 %v7933_v10 }
 0xf34   :  { %8124 = vmatpush1.msra.mxu1 %v7932_v0 }
 0xf35   :  { %8125 = vmatprep.subr.mxu1 %v7931_v32 }
 0xf36   :  { %8126 = vmatpush1.msra.mxu1 %v7930_v35 }
 0xf37   :  { %8127 = vmatprep.subr.mxu1 %v7929_v16 }
 0xf38   :  { %8128 = vmatpush1.msra.mxu1 %v7928_v55 }
 0xf39   :  { %8129 = vmatprep.subr.mxu1 %v7927_v49 }
 0xf3a   :  { %8130 = vmatpush1.msra.mxu1 %v7926_v47 }
 0xf3b   :  { %8131 = vmatprep.subr.mxu1 %v7925_v24 }
 0xf3c   :  { %8132 = vmatpush1.msra.mxu1 %v7924_v9 }
 0xf3d   :  { %8133 = vmatprep.subr.mxu1 %v7923_v42 }
 0xf3e   :  { %8134 = vmatpush1.msra.mxu1 %v7922_v25 }
 0xf3f   :  { %8135 = vmatprep.subr.mxu1 %v7921_v1 }
 0xf40   :  { %8136 = vmatpush1.msra.mxu1 %v7920_v40 }
 0xf41   :  { %8137 = vmatprep.subr.mxu1 %v7919_v8 }
 0xf42   :  { %8138 = vmatpush1.msra.mxu1 %v7918_v22 }
 0xf43   :  { %8139 = vmatprep.subr.mxu1 %v7917_v51 }
 0xf44   :  { %8140 = vmatpush1.msra.mxu1 %v7916_v59 }
 0xf45   :  { %8260 = vmatprep.subr.msk.mxu1 %vm6754_vm8, %v7957_v14 }
 0xf46   :  { %8261 = vmatpush2.msk.msra.mxu1 %vm6754_vm8, %v7956_v48 }
 0xf47   :  { %8165 = vmatprep.subr.mxu1 %v7955_v11 }
 0xf48   :  { %8166 = vmatpush2.msra.mxu1 %v7954_v33 }
 0xf49   :  { %8167 = vmatprep.subr.mxu1 %v7953_v56 }
 0xf4a   :  { %8168 = vmatpush2.msra.mxu1 %v7952_v13 }
 0xf4b   :  { %8169 = vmatprep.subr.mxu1 %v7951_v2 }
 0xf4c   :  { %8170 = vmatpush2.msra.mxu1 %v7950_v52 }
 0xf4d   :  { %8171 = vmatprep.subr.mxu1 %v7949_v53 }
 0xf4e   :  { %8172 = vmatpush2.msra.mxu1 %v7948_v54 }
 0xf4f   :  { %8174 = vmatmul.mubr.f32.vlgmr.msra.gmra.mxu1 %v7786_v36 }
 0xfe5   :  { %v8033_v60 = vpop.f32.mrf.mxu1 }
 0xfe7   :  { %v8035_v7 = vpop.f32.mrf.mxu1 }
 0xfe9   :  { %v8104_v38 = vpop.f32.mrf.mxu0 }
 0xfea   :  { %v8105_v43 = vadd.f32 %v8104_v38, %v8033_v60 }
 0xfeb   :  { %v8106_v15 = vpop.f32.mrf.mxu0 }
 0xfec   :  { %v8107_v23 = vadd.f32 %v8106_v15, %v8035_v7 }
0x100f   :  { %v8175_v3 = vpop.f32.mrf.mxu1 }
0x1010   :  { %v8176_v30 = vadd.f32 %v8175_v3, %v8105_v43 }
0x1011   :  { %v8177_v29 = vpop.f32.mrf.mxu1 }
0x1012   :  { %v8180_v31 = vmax.f32 %v8176_v30, 0.0  ;;  %v8178_v19 = vadd.f32 %v8177_v29, %v8107_v23 }
0x1014   :  { %v8181_v46 = vmax.f32 %v8178_v19, 0.0  ;;  %9046 = vtanh.f32 %v8180_v31 }
0x1016   :  { %9048 = vtanh.f32 %v8181_v46 }
0x1021   :  { %v9047_v61 = vpop.eup %9046 }
0x1023   :  { %v9049_v21 = vpop.eup %9048 }
0x1024   :  { %v8186_v41 = vcombine.low %v9047_v61, %v9049_v21 }
0x1026   :  { %8263 = vst.sshfl [vmem:[%s16360_s17] sm:$0x33 pattern:$0x76325410] %v8186_v41 }

</bundles_post_ra>
